<compile_context>
chip_gen: v7x
topology: tpu7x:2x2x1
jax: 0.10.0
libtpu: 0.0.40
codegen_flags: <defaults>
</compile_context>

<pallas_src>
import functools

import jax
import jax.numpy as jnp
from jax.experimental import pallas as pl
from jax.experimental.pallas import tpu as pltpu

EPS = 1e-5
_VMEM_LIMIT = 48 * 1024 * 1024   # < v7x 64 MiB physical; fine on v5e/v6e (128 MiB)


def _round_up(v, m):
    return ((v + m - 1) // m) * m


def _pad2(a, rows, cols):
    return jnp.pad(a, ((0, rows - a.shape[0]), (0, cols - a.shape[1])))


# Packed per-channel parameter rows (one (16, Cp) f32 array, resident in VMEM):
#  0:b1  1:b2  2:g1  3:be1  4:g2  5:be2  6:bm2  7:g3  8:be3  (rest zero pad)


# ---------------------------------------------------------------------------
# Fused fast path (nI == 1): whole forward in one kernel, grid over k only.
# ---------------------------------------------------------------------------
def _fused_kernel(a1_ref, a2_ref, xk_ref, xi_ref, w1_ref, w2_ref, p_ref,
                  wm1_ref, bm1_ref, wm2_ref, out_ref, acc1_ref, acc2_ref,
                  *, n_valid):
    # program_id / num_programs hoisted OUT of pl.when bodies (lowering fix).
    k = pl.program_id(0)
    nk = pl.num_programs(0)

    @pl.when(k == 0)
    def _():
        acc1_ref[...] = jnp.zeros_like(acc1_ref)
        acc2_ref[...] = jnp.zeros_like(acc2_ref)

    # Shared resident x RHS tile: one DMA feeds both conv branches' MXU pushes.
    xk = xk_ref[...]
    acc1_ref[...] += jnp.dot(a1_ref[...].astype(xk.dtype), xk,
                             preferred_element_type=jnp.float32)
    acc2_ref[...] += jnp.dot(a2_ref[...], xk,
                             preferred_element_type=jnp.float32)

    @pl.when(k == nk - 1)
    def _():
        xi = xi_ref[...]                                  # f32 residual tile
        b1, b2 = p_ref[0:1, :], p_ref[1:2, :]
        g1, be1 = p_ref[2:3, :], p_ref[3:4, :]
        g2, be2 = p_ref[4:5, :], p_ref[5:6, :]
        bm2 = p_ref[6:7, :]
        g3, be3 = p_ref[7:8, :], p_ref[8:9, :]

        h1p = jnp.dot(acc1_ref[...].astype(w1_ref.dtype), w1_ref[...],
                      preferred_element_type=jnp.float32) + b1 + xi
        h2p = jnp.dot(acc2_ref[...].astype(w2_ref.dtype), w2_ref[...],
                      preferred_element_type=jnp.float32) + b2 + xi

        tm = xi.shape[0]
        row = jax.lax.broadcasted_iota(jnp.int32, (tm, 1), 0)
        mask = (row < n_valid).astype(jnp.float32)
        inv_n = 1.0 / n_valid

        # BN stats over valid rows, centered form (no sumsq cancellation).
        mean1 = jnp.sum(h1p * mask, axis=0, keepdims=True) * inv_n
        c1 = (h1p - mean1) * mask
        var1 = jnp.sum(c1 * c1, axis=0, keepdims=True) * inv_n
        mean2 = jnp.sum(h2p * mask, axis=0, keepdims=True) * inv_n
        c2 = (h2p - mean2) * mask
        var2 = jnp.sum(c2 * c2, axis=0, keepdims=True) * inv_n

        inv1 = jax.lax.rsqrt(var1 + EPS)
        inv2 = jax.lax.rsqrt(var2 + EPS)
        h1 = (h1p - mean1) * inv1 * g1 + be1              # norm1 (conv1 branch)
        h2 = (h2p - mean2) * inv2 * g1 + be1              # norm1 reused (as in ref)
        # norm2(h2) analytically: after norm1, stats of h2 over valid rows are
        # exactly mean = be1, var = g1^2 * var2 / (var2 + eps).
        var_h2 = g1 * g1 * var2 * (inv2 * inv2)
        h3 = (h2 - be1) * jax.lax.rsqrt(var_h2 + EPS) * g2 + be2
        out0 = h1 + h2 + h3                               # sum(hs)

        # MLP: Linear(C,2C) -> ReLU -> Dropout(id) -> Linear(2C,C) -> Dropout(id)
        z = jnp.dot(out0.astype(wm1_ref.dtype), wm1_ref[...],
                    preferred_element_type=jnp.float32) + bm1_ref[...]
        z = jnp.maximum(z, 0.0)
        z = jnp.dot(z.astype(wm2_ref.dtype), wm2_ref[...],
                    preferred_element_type=jnp.float32) + bm2
        pre3 = out0 + z

        mean3 = jnp.sum(pre3 * mask, axis=0, keepdims=True) * inv_n
        c3 = (pre3 - mean3) * mask
        var3 = jnp.sum(c3 * c3, axis=0, keepdims=True) * inv_n
        out_ref[...] = (pre3 - mean3) * jax.lax.rsqrt(var3 + EPS) * g3 + be3


# ---------------------------------------------------------------------------
# Multi-tile path, pass 1: both conv branches' aggregation + Linear + residual,
# plus per-row-tile partial BatchNorm statistics (masked to valid rows).
# grid = (node-row tiles [parallel], adjacency-column tiles [arbitrary])
# ---------------------------------------------------------------------------
def _pass1_kernel(a1_ref, a2_ref, xk_ref, xi_ref, w1_ref, w2_ref, p_ref,
                  h1_ref, h2_ref, st_ref, acc1_ref, acc2_ref, *, n_valid, tm):
    i = pl.program_id(0)         # hoisted out of pl.when (lowering fix)
    k = pl.program_id(1)
    nk = pl.num_programs(1)
    row0 = i * tm

    @pl.when(k == 0)
    def _():
        acc1_ref[...] = jnp.zeros_like(acc1_ref)
        acc2_ref[...] = jnp.zeros_like(acc2_ref)

    xk = xk_ref[...]
    acc1_ref[...] += jnp.dot(a1_ref[...].astype(xk.dtype), xk,
                             preferred_element_type=jnp.float32)
    acc2_ref[...] += jnp.dot(a2_ref[...], xk,
                             preferred_element_type=jnp.float32)

    @pl.when(k == nk - 1)
    def _():
        xi = xi_ref[...]
        b1, b2 = p_ref[0:1, :], p_ref[1:2, :]
        h1 = jnp.dot(acc1_ref[...].astype(w1_ref.dtype), w1_ref[...],
                     preferred_element_type=jnp.float32) + b1 + xi
        h2 = jnp.dot(acc2_ref[...].astype(w2_ref.dtype), w2_ref[...],
                     preferred_element_type=jnp.float32) + b2 + xi
        h1_ref[...] = h1.astype(h1_ref.dtype)             # bf16 writeback
        h2_ref[...] = h2.astype(h2_ref.dtype)
        # Masked partial BN statistics (padded rows excluded); direct row stores.
        row = row0 + jax.lax.broadcasted_iota(jnp.int32, (tm, 1), 0)
        mask = (row < n_valid).astype(jnp.float32)
        h1m = h1 * mask
        h2m = h2 * mask
        # TODO(synk): sum/sumsq partials can cancel for large channel means;
        # a shifted-sumsq combine would be safer for very large graphs.
        st_ref[0, 0:1, :] = jnp.sum(h1m, axis=0, keepdims=True)
        st_ref[0, 1:2, :] = jnp.sum(h1m * h1, axis=0, keepdims=True)
        st_ref[0, 2:3, :] = jnp.sum(h2m, axis=0, keepdims=True)
        st_ref[0, 3:4, :] = jnp.sum(h2m * h2, axis=0, keepdims=True)


# ---------------------------------------------------------------------------
# Multi-tile path, pass 2: norm1 on both branches, analytic norm2(h2), sum,
# MLP, residual, plus per-row-tile partial stats for norm3.
# ---------------------------------------------------------------------------
def _pass2_kernel(h1_ref, h2_ref, stats_ref, p_ref, wm1_ref, bm1_ref, wm2_ref,
                  out_ref, st_ref, *, n_valid, tm):
    i = pl.program_id(0)
    mean1, var1 = stats_ref[0:1, :], stats_ref[1:2, :]
    mean2, var2 = stats_ref[2:3, :], stats_ref[3:4, :]
    g1, be1 = p_ref[2:3, :], p_ref[3:4, :]
    g2, be2 = p_ref[4:5, :], p_ref[5:6, :]
    bm2 = p_ref[6:7, :]

    inv1 = jax.lax.rsqrt(var1 + EPS)
    inv2 = jax.lax.rsqrt(var2 + EPS)
    h1 = (h1_ref[...].astype(jnp.float32) - mean1) * inv1 * g1 + be1
    h2 = (h2_ref[...].astype(jnp.float32) - mean2) * inv2 * g1 + be1
    var_h2 = g1 * g1 * var2 * (inv2 * inv2)
    h3 = (h2 - be1) * jax.lax.rsqrt(var_h2 + EPS) * g2 + be2
    out0 = h1 + h2 + h3

    z = jnp.dot(out0.astype(wm1_ref.dtype), wm1_ref[...],
                preferred_element_type=jnp.float32) + bm1_ref[...]
    z = jnp.maximum(z, 0.0)
    z = jnp.dot(z.astype(wm2_ref.dtype), wm2_ref[...],
                preferred_element_type=jnp.float32) + bm2
    pre3 = out0 + z
    out_ref[...] = pre3.astype(out_ref.dtype)             # bf16 writeback

    row = i * tm + jax.lax.broadcasted_iota(jnp.int32, (tm, 1), 0)
    mask = (row < n_valid).astype(jnp.float32)
    pm = pre3 * mask
    st_ref[0, 0:1, :] = jnp.sum(pm, axis=0, keepdims=True)
    st_ref[0, 1:2, :] = jnp.sum(pm * pre3, axis=0, keepdims=True)


def _gps_conv_impl(x, a1, a2, params, *, tm=512, tk=512):
    N, C = x.shape
    Cp = _round_up(C, 128)           # lane-dense channel padding
    Hp = _round_up(2 * C, 128)       # lane-dense MLP hidden padding
    Np = _round_up(N, 256)           # node-row padding
    if Np % tm:
        tm = 256                     # 256 always divides Np
    if Np % tk:
        tk = 256
    tm = min(tm, Np)
    tk = min(tk, Np)
    assert Np % tm == 0 and Np % tk == 0 and tm % 8 == 0 and tk % 128 == 0
    nI, nK = Np // tm, Np // tk

    f32, bf16 = jnp.float32, jnp.bfloat16

    # bf16/int8 for MXU-facing operands, f32 residual / biases / BN math.
    # TODO(synk): bf16 on the weighted adjacency a2 loses ~3 decimal digits;
    # validate against an f32 reference if edge weights need full precision.
    xi = _pad2(x, Np, Cp).astype(f32)          # residual (f32)
    xk = xi.astype(bf16)                       # aggregation RHS (bf16)
    # A1 is an integer count matrix (0/1 edges + self loops) -> int8 HBM stream,
    # upcast to bf16 in-kernel right before the MXU dot.
    a1p = _pad2(a1, Np, Np).astype(jnp.int8)
    a2p = _pad2(a2, Np, Np).astype(bf16)
    w1p = _pad2(params["w1"], Cp, Cp).astype(bf16)
    w2p = _pad2(params["w2"], Cp, Cp).astype(bf16)
    wm1p = _pad2(params["wm1"], Cp, Hp).astype(bf16)
    bm1p = _pad2(params["bm1"], 1, Hp).astype(f32)
    wm2p = _pad2(params["wm2"], Hp, Cp).astype(bf16)

    gam = _pad2(params["gamma"], 3, Cp)
    bet = _pad2(params["beta"], 3, Cp)
    pack = jnp.zeros((16, Cp), f32)
    pack = pack.at[0:1].set(_pad2(params["b1"], 1, Cp))
    pack = pack.at[1:2].set(_pad2(params["b2"], 1, Cp))
    pack = pack.at[2:3].set(gam[0:1])
    pack = pack.at[3:4].set(bet[0:1])
    pack = pack.at[4:5].set(gam[1:2])
    pack = pack.at[5:6].set(bet[1:2])
    pack = pack.at[6:7].set(_pad2(params["bm2"], 1, Cp))
    pack = pack.at[7:8].set(gam[2:3])
    pack = pack.at[8:9].set(bet[2:3])

    # ---------------- fused fast path: all rows in one tile ----------------
    if nI == 1:
        out_full = pl.pallas_call(
            functools.partial(_fused_kernel, n_valid=N),
            grid=(nK,),
            in_specs=[
                pl.BlockSpec((Np, tk), lambda k: (0, k)),      # A1 (int8)
                pl.BlockSpec((Np, tk), lambda k: (0, k)),      # A2 (bf16)
                pl.BlockSpec((tk, Cp), lambda k: (k, 0)),      # x (bf16 RHS)
                pl.BlockSpec((Np, Cp), lambda k: (0, 0)),      # x (f32 residual)
                pl.BlockSpec((Cp, Cp), lambda k: (0, 0)),      # W1
                pl.BlockSpec((Cp, Cp), lambda k: (0, 0)),      # W2
                pl.BlockSpec((16, Cp), lambda k: (0, 0)),      # packed params
                pl.BlockSpec((Cp, Hp), lambda k: (0, 0)),      # Wm1
                pl.BlockSpec((1, Hp), lambda k: (0, 0)),       # bm1
                pl.BlockSpec((Hp, Cp), lambda k: (0, 0)),      # Wm2
            ],
            out_specs=pl.BlockSpec((Np, Cp), lambda k: (0, 0)),
            out_shape=jax.ShapeDtypeStruct((Np, Cp), f32),
            scratch_shapes=[pltpu.VMEM((Np, Cp), f32),
                            pltpu.VMEM((Np, Cp), f32)],
            compiler_params=pltpu.CompilerParams(
                dimension_semantics=("arbitrary",),
                vmem_limit_bytes=_VMEM_LIMIT),
        )(a1p, a2p, xk, xi, w1p, w2p, pack, wm1p, bm1p, wm2p)
        return out_full[:N, :C]

    # ---------------- multi-tile path ----------------
    row2 = pl.BlockSpec((tm, Cp), lambda i, k: (i, 0))     # row tile, const in k
    const2 = lambda shape: pl.BlockSpec(shape, lambda i, k: (0, 0))

    h1_pre, h2_pre, part1 = pl.pallas_call(
        functools.partial(_pass1_kernel, n_valid=N, tm=tm),
        grid=(nI, nK),
        in_specs=[
            pl.BlockSpec((tm, tk), lambda i, k: (i, k)),       # A1 tile (int8)
            pl.BlockSpec((tm, tk), lambda i, k: (i, k)),       # A2 tile (bf16)
            pl.BlockSpec((tk, Cp), lambda i, k: (k, 0)),       # x (bf16 RHS)
            row2,                                              # x (f32 residual)
            const2((Cp, Cp)),                                  # W1 (resident)
            const2((Cp, Cp)),                                  # W2 (resident)
            const2((16, Cp)),                                  # packed params
        ],
        out_specs=[
            row2,                                              # h1_pre (bf16)
            row2,                                              # h2_pre (bf16)
            pl.BlockSpec((1, 4, Cp), lambda i, k: (i, 0, 0)),  # partial stats
        ],
        out_shape=[
            jax.ShapeDtypeStruct((Np, Cp), bf16),
            jax.ShapeDtypeStruct((Np, Cp), bf16),
            jax.ShapeDtypeStruct((nI, 4, Cp), f32),
        ],
        scratch_shapes=[pltpu.VMEM((tm, Cp), f32), pltpu.VMEM((tm, Cp), f32)],
        compiler_params=pltpu.CompilerParams(
            dimension_semantics=("parallel", "arbitrary"),
            vmem_limit_bytes=_VMEM_LIMIT),
    )(a1p, a2p, xk, xi, w1p, w2p, pack)

    # tiny cross-tile reduction of BN stats (kept in JAX so the row axis can
    # stay "parallel" inside the kernel)
    s = jnp.sum(part1, axis=0)
    mean1 = s[0] / N
    var1 = jnp.maximum(s[1] / N - mean1 * mean1, 0.0)
    mean2 = s[2] / N
    var2 = jnp.maximum(s[3] / N - mean2 * mean2, 0.0)
    stats12 = jnp.stack([mean1, var1, mean2, var2], axis=0)    # (4, Cp)

    row1 = pl.BlockSpec((tm, Cp), lambda i: (i, 0))
    const1 = lambda shape: pl.BlockSpec(shape, lambda i: (0, 0))

    pre3, part2 = pl.pallas_call(
        functools.partial(_pass2_kernel, n_valid=N, tm=tm),
        grid=(nI,),
        in_specs=[row1, row1,
                  const1((4, Cp)), const1((16, Cp)),
                  const1((Cp, Hp)), const1((1, Hp)), const1((Hp, Cp))],
        out_specs=[row1, pl.BlockSpec((1, 2, Cp), lambda i: (i, 0, 0))],
        out_shape=[jax.ShapeDtypeStruct((Np, Cp), bf16),
                   jax.ShapeDtypeStruct((nI, 2, Cp), f32)],
        compiler_params=pltpu.CompilerParams(
            dimension_semantics=("parallel",),
            vmem_limit_bytes=_VMEM_LIMIT),
    )(h1_pre, h2_pre, stats12, pack, wm1p, bm1p, wm2p)

    # Final norm3 is a trivial broadcast-normalize: let XLA fuse it with the
    # stats divide (removes one kernel launch; identical HBM traffic).
    s2 = jnp.sum(part2, axis=0)
    mean3 = s2[0] / N
    var3 = jnp.maximum(s2[1] / N - mean3 * mean3, 0.0)
    g3 = params["gamma"][2][None, :]
    be3 = params["beta"][2][None, :]
    pre = pre3[:N, :C].astype(f32)
    return (pre - mean3[None, :C]) * jax.lax.rsqrt(var3[None, :C] + EPS) * g3 + be3


gps_conv = jax.jit(_gps_conv_impl, static_argnames=("tm", "tk"))


def _make_inputs(key, N, C, E):
    ks = jax.random.split(key, 10)
    x = jax.random.normal(ks[0], (N, C), jnp.float32)

    # edge_index -> dense adjacency A1 (with self loops), integer counts
    src = jax.random.randint(ks[1], (E,), 0, N)
    dst = jax.random.randint(ks[2], (E,), 0, N)
    a1 = jnp.zeros((N, N), jnp.float32).at[dst, src].set(1.0)
    a1 = a1 + jnp.eye(N, dtype=jnp.float32)

    # vae_edge_index + vae_edge_weight -> dense weighted adjacency A2
    src2 = jax.random.randint(ks[3], (E,), 0, N)
    dst2 = jax.random.randint(ks[4], (E,), 0, N)
    ew = jax.random.uniform(ks[5], (E,), jnp.float32)
    a2 = jnp.zeros((N, N), jnp.float32).at[dst2, src2].add(ew)

    scale = 1.0 / jnp.sqrt(jnp.float32(C))
    params = dict(
        w1=jax.random.normal(ks[6], (C, C), jnp.float32) * scale,
        b1=jnp.zeros((1, C), jnp.float32),
        w2=jax.random.normal(ks[7], (C, C), jnp.float32) * scale,
        b2=jnp.zeros((1, C), jnp.float32),
        wm1=jax.random.normal(ks[8], (C, 2 * C), jnp.float32) * scale,
        bm1=jnp.zeros((1, 2 * C), jnp.float32),
        wm2=jax.random.normal(ks[9], (2 * C, C), jnp.float32)
            / jnp.sqrt(jnp.float32(2 * C)),
        bm2=jnp.zeros((1, C), jnp.float32),
        gamma=jnp.ones((3, C), jnp.float32),   # norm1/norm2/norm3 scales
        beta=jnp.zeros((3, C), jnp.float32),   # norm1/norm2/norm3 shifts
    )
    return x, a1, a2, params


if __name__ == "__main__":
    key = jax.random.PRNGKey(0)
    k1, k2 = jax.random.split(key)

    # Case 1: small graph -> fused single-kernel fast path (nI == 1).
    C = 96
    x, a1, a2, params = _make_inputs(k1, 300, C, 1200)
    out = gps_conv(x, a1, a2, params)
    jax.block_until_ready(out)
    assert out.shape == (300, C) and out.dtype == jnp.float32
    assert bool(jnp.all(jnp.isfinite(out)))

    # Case 2: larger graph -> tiled/pipelined multi-pass path (nI > 1).
    x2, a1b, a2b, params2 = _make_inputs(k2, 520, C, 2000)
    out2 = gps_conv(x2, a1b, a2b, params2)
    jax.block_until_ready(out2)
    assert out2.shape == (520, C) and out2.dtype == jnp.float32
    assert bool(jnp.all(jnp.isfinite(out2)))

    print("KERNEL_OK")
</pallas_src>

<mosaic_0001>
module attributes {stable_mosaic.version = 11 : i64} {
  func.func @_fused_kernel(%arg0: i32, %arg1: memref<512x512xi8, #tpu.memory_space<vmem>>, %arg2: memref<512x512xbf16, #tpu.memory_space<vmem>>, %arg3: memref<512x128xbf16, #tpu.memory_space<vmem>>, %arg4: memref<512x128xf32, #tpu.memory_space<vmem>>, %arg5: memref<128x128xbf16, #tpu.memory_space<vmem>>, %arg6: memref<128x128xbf16, #tpu.memory_space<vmem>>, %arg7: memref<16x128xf32, #tpu.memory_space<vmem>>, %arg8: memref<128x256xbf16, #tpu.memory_space<vmem>>, %arg9: memref<1x256xf32, #tpu.memory_space<vmem>>, %arg10: memref<256x128xbf16, #tpu.memory_space<vmem>>, %arg11: memref<512x128xf32, #tpu.memory_space<vmem>>, %arg12: memref<512x128xf32, #tpu.memory_space<vmem>>, %arg13: memref<512x128xf32, #tpu.memory_space<vmem>>) attributes {dimension_semantics = [#tpu.dimension_semantics<arbitrary>], iteration_bounds = array<i64: 1>, scalar_prefetch = 0 : i64, scratch_operands = 2 : i64, tpu.core_type = #tpu.core_type<tc>, window_params = [{transform_indices = @transform_0, window_bounds = array<i64: 512, 512>}, {transform_indices = @transform_1, window_bounds = array<i64: 512, 512>}, {transform_indices = @transform_2, window_bounds = array<i64: 512, 128>}, {pipeline_mode = #tpu.pipeline_mode<synchronous>, transform_indices = @transform_3, window_bounds = array<i64: 512, 128>}, {pipeline_mode = #tpu.pipeline_mode<synchronous>, transform_indices = @transform_4, window_bounds = array<i64: 128, 128>}, {pipeline_mode = #tpu.pipeline_mode<synchronous>, transform_indices = @transform_5, window_bounds = array<i64: 128, 128>}, {pipeline_mode = #tpu.pipeline_mode<synchronous>, transform_indices = @transform_6, window_bounds = array<i64: 16, 128>}, {pipeline_mode = #tpu.pipeline_mode<synchronous>, transform_indices = @transform_7, window_bounds = array<i64: 128, 256>}, {pipeline_mode = #tpu.pipeline_mode<synchronous>, transform_indices = @transform_8, window_bounds = array<i64: 1, 256>}, {pipeline_mode = #tpu.pipeline_mode<synchronous>, transform_indices = @transform_9, window_bounds = array<i64: 256, 128>}, {pipeline_mode = #tpu.pipeline_mode<synchronous>, transform_indices = @transform_10, window_bounds = array<i64: 512, 128>}]} {
    %c0_i32 = arith.constant 0 : i32
    %0 = arith.cmpi eq, %arg0, %c0_i32 : i32
    %1 = arith.extui %0 : i1 to i32
    %c0_i32_0 = arith.constant 0 : i32
    %2 = arith.cmpi ne, %1, %c0_i32_0 : i32
    scf.if %2 {
      %cst_17 = arith.constant 0.000000e+00 : f32
      %18 = vector.broadcast %cst_17 : f32 to vector<512x128xf32>
      %c0_18 = arith.constant 0 : index
      %c0_19 = arith.constant 0 : index
      %19 = vector.load %arg12[%c0_18, %c0_19] : memref<512x128xf32, #tpu.memory_space<vmem>>, vector<512x128xf32>
      tpu.vector_store %arg12[%c0_18, %c0_19], %18 {strides = array<i32>} : memref<512x128xf32, #tpu.memory_space<vmem>>, vector<512x128xf32>,
      %cst_20 = arith.constant 0.000000e+00 : f32
      %20 = vector.broadcast %cst_20 : f32 to vector<512x128xf32>
      %c0_21 = arith.constant 0 : index
      %c0_22 = arith.constant 0 : index
      %21 = vector.load %arg13[%c0_21, %c0_22] : memref<512x128xf32, #tpu.memory_space<vmem>>, vector<512x128xf32>
      tpu.vector_store %arg13[%c0_21, %c0_22], %20 {strides = array<i32>} : memref<512x128xf32, #tpu.memory_space<vmem>>, vector<512x128xf32>,
    } else {
    }
    %c0 = arith.constant 0 : index
    %c0_1 = arith.constant 0 : index
    %3 = vector.load %arg3[%c0, %c0_1] : memref<512x128xbf16, #tpu.memory_space<vmem>>, vector<512x128xbf16>
    %c0_2 = arith.constant 0 : index
    %c0_3 = arith.constant 0 : index
    %4 = vector.load %arg12[%c0_2, %c0_3] : memref<512x128xf32, #tpu.memory_space<vmem>>, vector<512x128xf32>
    %c0_4 = arith.constant 0 : index
    %c0_5 = arith.constant 0 : index
    %5 = vector.load %arg1[%c0_4, %c0_5] : memref<512x512xi8, #tpu.memory_space<vmem>>, vector<512x512xi8>
    %6 = arith.sitofp %5 : vector<512x512xi8> to vector<512x512xbf16>
    %cst = arith.constant dense<0.000000e+00> : vector<512x128xf32>
    %7 = tpu.matmul %6, %3, %cst {dimension_numbers = #tpu.dot_dimension_numbers<[1], [0], [0], [1], [0, 0, 1, 1], [], []>} : vector<512x512xbf16>, vector<512x128xbf16>, vector<512x128xf32> -> vector<512x128xf32>
    %8 = arith.addf %4, %7 : vector<512x128xf32>
    %c0_6 = arith.constant 0 : index
    %c0_7 = arith.constant 0 : index
    %9 = vector.load %arg12[%c0_6, %c0_7] : memref<512x128xf32, #tpu.memory_space<vmem>>, vector<512x128xf32>
    tpu.vector_store %arg12[%c0_6, %c0_7], %8 {strides = array<i32>} : memref<512x128xf32, #tpu.memory_space<vmem>>, vector<512x128xf32>,
    %c0_8 = arith.constant 0 : index
    %c0_9 = arith.constant 0 : index
    %10 = vector.load %arg13[%c0_8, %c0_9] : memref<512x128xf32, #tpu.memory_space<vmem>>, vector<512x128xf32>
    %c0_10 = arith.constant 0 : index
    %c0_11 = arith.constant 0 : index
    %11 = vector.load %arg2[%c0_10, %c0_11] : memref<512x512xbf16, #tpu.memory_space<vmem>>, vector<512x512xbf16>
    %cst_12 = arith.constant dense<0.000000e+00> : vector<512x128xf32>
    %12 = tpu.matmul %11, %3, %cst_12 {dimension_numbers = #tpu.dot_dimension_numbers<[1], [0], [0], [1], [0, 0, 1, 1], [], []>} : vector<512x512xbf16>, vector<512x128xbf16>, vector<512x128xf32> -> vector<512x128xf32>
    %13 = arith.addf %10, %12 : vector<512x128xf32>
    %c0_13 = arith.constant 0 : index
    %c0_14 = arith.constant 0 : index
    %14 = vector.load %arg13[%c0_13, %c0_14] : memref<512x128xf32, #tpu.memory_space<vmem>>, vector<512x128xf32>
    tpu.vector_store %arg13[%c0_13, %c0_14], %13 {strides = array<i32>} : memref<512x128xf32, #tpu.memory_space<vmem>>, vector<512x128xf32>,
    %c0_i32_15 = arith.constant 0 : i32
    %15 = arith.cmpi eq, %arg0, %c0_i32_15 : i32
    %16 = arith.extui %15 : i1 to i32
    %c0_i32_16 = arith.constant 0 : i32
    %17 = arith.cmpi ne, %16, %c0_i32_16 : i32
    scf.if %17 {
      %c0_17 = arith.constant 0 : index
      %c0_18 = arith.constant 0 : index
      %18 = vector.load %arg4[%c0_17, %c0_18] : memref<512x128xf32, #tpu.memory_space<vmem>>, vector<512x128xf32>
      %c0_19 = arith.constant 0 : index
      %c0_20 = arith.constant 0 : index
      %19 = vector.load %arg7[%c0_19, %c0_20] : memref<16x128xf32, #tpu.memory_space<vmem>>, vector<1x128xf32>
      %c1 = arith.constant 1 : index
      %c0_21 = arith.constant 0 : index
      %20 = vector.load %arg7[%c1, %c0_21] : memref<16x128xf32, #tpu.memory_space<vmem>>, vector<1x128xf32>
      %c2 = arith.constant 2 : index
      %c0_22 = arith.constant 0 : index
      %21 = vector.load %arg7[%c2, %c0_22] : memref<16x128xf32, #tpu.memory_space<vmem>>, vector<1x128xf32>
      %c3 = arith.constant 3 : index
      %c0_23 = arith.constant 0 : index
      %22 = vector.load %arg7[%c3, %c0_23] : memref<16x128xf32, #tpu.memory_space<vmem>>, vector<1x128xf32>
      %c4 = arith.constant 4 : index
      %c0_24 = arith.constant 0 : index
      %23 = vector.load %arg7[%c4, %c0_24] : memref<16x128xf32, #tpu.memory_space<vmem>>, vector<1x128xf32>
      %c5 = arith.constant 5 : index
      %c0_25 = arith.constant 0 : index
      %24 = vector.load %arg7[%c5, %c0_25] : memref<16x128xf32, #tpu.memory_space<vmem>>, vector<1x128xf32>
      %c6 = arith.constant 6 : index
      %c0_26 = arith.constant 0 : index
      %25 = vector.load %arg7[%c6, %c0_26] : memref<16x128xf32, #tpu.memory_space<vmem>>, vector<1x128xf32>
      %c7 = arith.constant 7 : index
      %c0_27 = arith.constant 0 : index
      %26 = vector.load %arg7[%c7, %c0_27] : memref<16x128xf32, #tpu.memory_space<vmem>>, vector<1x128xf32>
      %c8 = arith.constant 8 : index
      %c0_28 = arith.constant 0 : index
      %27 = vector.load %arg7[%c8, %c0_28] : memref<16x128xf32, #tpu.memory_space<vmem>>, vector<1x128xf32>
      %c0_29 = arith.constant 0 : index
      %c0_30 = arith.constant 0 : index
      %28 = vector.load %arg12[%c0_29, %c0_30] : memref<512x128xf32, #tpu.memory_space<vmem>>, vector<512x128xf32>
      %29 = arith.truncf %28 : vector<512x128xf32> to vector<512x128xbf16>
      %c0_31 = arith.constant 0 : index
      %c0_32 = arith.constant 0 : index
      %30 = vector.load %arg5[%c0_31, %c0_32] : memref<128x128xbf16, #tpu.memory_space<vmem>>, vector<128x128xbf16>
      %cst_33 = arith.constant dense<0.000000e+00> : vector<512x128xf32>
      %31 = tpu.matmul %29, %30, %cst_33 {dimension_numbers = #tpu.dot_dimension_numbers<[1], [0], [0], [1], [0, 0, 1, 1], [], []>} : vector<512x128xbf16>, vector<128x128xbf16>, vector<512x128xf32> -> vector<512x128xf32>
      %32 = vector.broadcast %19 : vector<1x128xf32> to vector<512x128xf32>
      %33 = arith.addf %31, %32 : vector<512x128xf32>
      %34 = arith.addf %33, %18 : vector<512x128xf32>
      %c0_34 = arith.constant 0 : index
      %c0_35 = arith.constant 0 : index
      %35 = vector.load %arg13[%c0_34, %c0_35] : memref<512x128xf32, #tpu.memory_space<vmem>>, vector<512x128xf32>
      %36 = arith.truncf %35 : vector<512x128xf32> to vector<512x128xbf16>
      %c0_36 = arith.constant 0 : index
      %c0_37 = arith.constant 0 : index
      %37 = vector.load %arg6[%c0_36, %c0_37] : memref<128x128xbf16, #tpu.memory_space<vmem>>, vector<128x128xbf16>
      %cst_38 = arith.constant dense<0.000000e+00> : vector<512x128xf32>
      %38 = tpu.matmul %36, %37, %cst_38 {dimension_numbers = #tpu.dot_dimension_numbers<[1], [0], [0], [1], [0, 0, 1, 1], [], []>} : vector<512x128xbf16>, vector<128x128xbf16>, vector<512x128xf32> -> vector<512x128xf32>
      %39 = vector.broadcast %20 : vector<1x128xf32> to vector<512x128xf32>
      %40 = arith.addf %38, %39 : vector<512x128xf32>
      %41 = arith.addf %40, %18 : vector<512x128xf32>
      %42 = tpu.iota {dimensions = array<i32: 0>} : vector<512x1xi32>
      %c300_i32 = arith.constant 300 : i32
      %43 = vector.broadcast %c300_i32 : i32 to vector<512x1xi32>
      %44 = arith.cmpi slt, %42, %43 : vector<512x1xi32>
      %45 = arith.extui %44 : vector<512x1xi1> to vector<512x1xi32>
      %46 = arith.sitofp %45 : vector<512x1xi32> to vector<512x1xf32>
      %47 = vector.broadcast %46 : vector<512x1xf32> to vector<512x128xf32>
      %48 = arith.mulf %34, %47 : vector<512x128xf32>
      %cst_39 = arith.constant dense<0.000000e+00> : vector<128xf32>
      %49 = vector.multi_reduction <add>, %48, %cst_39 [0] : vector<512x128xf32> to vector<128xf32>
      %50 = vector.shape_cast %49 : vector<128xf32> to vector<1x128xf32>
      %cst_40 = arith.constant 0.00333333341 : f32
      %51 = vector.broadcast %cst_40 : f32 to vector<1x128xf32>
      %52 = arith.mulf %50, %51 : vector<1x128xf32>
      %53 = vector.broadcast %52 : vector<1x128xf32> to vector<512x128xf32>
      %54 = arith.subf %34, %53 : vector<512x128xf32>
      %55 = vector.broadcast %46 : vector<512x1xf32> to vector<512x128xf32>
      %56 = arith.mulf %54, %55 : vector<512x128xf32>
      %57 = arith.mulf %56, %56 : vector<512x128xf32>
      %cst_41 = arith.constant dense<0.000000e+00> : vector<128xf32>
      %58 = vector.multi_reduction <add>, %57, %cst_41 [0] : vector<512x128xf32> to vector<128xf32>
      %59 = vector.shape_cast %58 : vector<128xf32> to vector<1x128xf32>
      %cst_42 = arith.constant 0.00333333341 : f32
      %60 = vector.broadcast %cst_42 : f32 to vector<1x128xf32>
      %61 = arith.mulf %59, %60 : vector<1x128xf32>
      %62 = vector.broadcast %46 : vector<512x1xf32> to vector<512x128xf32>
      %63 = arith.mulf %41, %62 : vector<512x128xf32>
      %cst_43 = arith.constant dense<0.000000e+00> : vector<128xf32>
      %64 = vector.multi_reduction <add>, %63, %cst_43 [0] : vector<512x128xf32> to vector<128xf32>
      %65 = vector.shape_cast %64 : vector<128xf32> to vector<1x128xf32>
      %cst_44 = arith.constant 0.00333333341 : f32
      %66 = vector.broadcast %cst_44 : f32 to vector<1x128xf32>
      %67 = arith.mulf %65, %66 : vector<1x128xf32>
      %68 = vector.broadcast %67 : vector<1x128xf32> to vector<512x128xf32>
      %69 = arith.subf %41, %68 : vector<512x128xf32>
      %70 = vector.broadcast %46 : vector<512x1xf32> to vector<512x128xf32>
      %71 = arith.mulf %69, %70 : vector<512x128xf32>
      %72 = arith.mulf %71, %71 : vector<512x128xf32>
      %cst_45 = arith.constant dense<0.000000e+00> : vector<128xf32>
      %73 = vector.multi_reduction <add>, %72, %cst_45 [0] : vector<512x128xf32> to vector<128xf32>
      %74 = vector.shape_cast %73 : vector<128xf32> to vector<1x128xf32>
      %cst_46 = arith.constant 0.00333333341 : f32
      %75 = vector.broadcast %cst_46 : f32 to vector<1x128xf32>
      %76 = arith.mulf %74, %75 : vector<1x128xf32>
      %cst_47 = arith.constant 9.99999974E-6 : f32
      %77 = vector.broadcast %cst_47 : f32 to vector<1x128xf32>
      %78 = arith.addf %61, %77 : vector<1x128xf32>
      %79 = math.rsqrt %78 : vector<1x128xf32>
      %cst_48 = arith.constant 9.99999974E-6 : f32
      %80 = vector.broadcast %cst_48 : f32 to vector<1x128xf32>
      %81 = arith.addf %76, %80 : vector<1x128xf32>
      %82 = math.rsqrt %81 : vector<1x128xf32>
      %83 = vector.broadcast %52 : vector<1x128xf32> to vector<512x128xf32>
      %84 = arith.subf %34, %83 : vector<512x128xf32>
      %85 = vector.broadcast %79 : vector<1x128xf32> to vector<512x128xf32>
      %86 = arith.mulf %84, %85 : vector<512x128xf32>
      %87 = vector.broadcast %21 : vector<1x128xf32> to vector<512x128xf32>
      %88 = arith.mulf %86, %87 : vector<512x128xf32>
      %89 = vector.broadcast %22 : vector<1x128xf32> to vector<512x128xf32>
      %90 = arith.addf %88, %89 : vector<512x128xf32>
      %91 = vector.broadcast %67 : vector<1x128xf32> to vector<512x128xf32>
      %92 = arith.subf %41, %91 : vector<512x128xf32>
      %93 = vector.broadcast %82 : vector<1x128xf32> to vector<512x128xf32>
      %94 = arith.mulf %92, %93 : vector<512x128xf32>
      %95 = vector.broadcast %21 : vector<1x128xf32> to vector<512x128xf32>
      %96 = arith.mulf %94, %95 : vector<512x128xf32>
      %97 = vector.broadcast %22 : vector<1x128xf32> to vector<512x128xf32>
      %98 = arith.addf %96, %97 : vector<512x128xf32>
      %99 = arith.mulf %21, %21 : vector<1x128xf32>
      %100 = arith.mulf %99, %76 : vector<1x128xf32>
      %101 = arith.mulf %82, %82 : vector<1x128xf32>
      %102 = arith.mulf %100, %101 : vector<1x128xf32>
      %103 = vector.broadcast %22 : vector<1x128xf32> to vector<512x128xf32>
      %104 = arith.subf %98, %103 : vector<512x128xf32>
      %cst_49 = arith.constant 9.99999974E-6 : f32
      %105 = vector.broadcast %cst_49 : f32 to vector<1x128xf32>
      %106 = arith.addf %102, %105 : vector<1x128xf32>
      %107 = math.rsqrt %106 : vector<1x128xf32>
      %108 = vector.broadcast %107 : vector<1x128xf32> to vector<512x128xf32>
      %109 = arith.mulf %104, %108 : vector<512x128xf32>
      %110 = vector.broadcast %23 : vector<1x128xf32> to vector<512x128xf32>
      %111 = arith.mulf %109, %110 : vector<512x128xf32>
      %112 = vector.broadcast %24 : vector<1x128xf32> to vector<512x128xf32>
      %113 = arith.addf %111, %112 : vector<512x128xf32>
      %114 = arith.addf %90, %98 : vector<512x128xf32>
      %115 = arith.addf %114, %113 : vector<512x128xf32>
      %116 = arith.truncf %115 : vector<512x128xf32> to vector<512x128xbf16>
      %c0_50 = arith.constant 0 : index
      %c0_51 = arith.constant 0 : index
      %117 = vector.load %arg8[%c0_50, %c0_51] : memref<128x256xbf16, #tpu.memory_space<vmem>>, vector<128x256xbf16>
      %cst_52 = arith.constant dense<0.000000e+00> : vector<512x256xf32>
      %118 = tpu.matmul %116, %117, %cst_52 {dimension_numbers = #tpu.dot_dimension_numbers<[1], [0], [0], [1], [0, 0, 1, 1], [], []>} : vector<512x128xbf16>, vector<128x256xbf16>, vector<512x256xf32> -> vector<512x256xf32>
      %c0_53 = arith.constant 0 : index
      %c0_54 = arith.constant 0 : index
      %119 = vector.load %arg9[%c0_53, %c0_54] : memref<1x256xf32, #tpu.memory_space<vmem>>, vector<1x256xf32>
      %120 = vector.broadcast %119 : vector<1x256xf32> to vector<512x256xf32>
      %121 = arith.addf %118, %120 : vector<512x256xf32>
      %cst_55 = arith.constant 0.000000e+00 : f32
      %122 = vector.broadcast %cst_55 : f32 to vector<512x256xf32>
      %123 = arith.maximumf %121, %122 : vector<512x256xf32>
      %124 = arith.truncf %123 : vector<512x256xf32> to vector<512x256xbf16>
      %c0_56 = arith.constant 0 : index
      %c0_57 = arith.constant 0 : index
      %125 = vector.load %arg10[%c0_56, %c0_57] : memref<256x128xbf16, #tpu.memory_space<vmem>>, vector<256x128xbf16>
      %cst_58 = arith.constant dense<0.000000e+00> : vector<512x128xf32>
      %126 = tpu.matmul %124, %125, %cst_58 {dimension_numbers = #tpu.dot_dimension_numbers<[1], [0], [0], [1], [0, 0, 1, 1], [], []>} : vector<512x256xbf16>, vector<256x128xbf16>, vector<512x128xf32> -> vector<512x128xf32>
      %127 = vector.broadcast %25 : vector<1x128xf32> to vector<512x128xf32>
      %128 = arith.addf %126, %127 : vector<512x128xf32>
      %129 = arith.addf %115, %128 : vector<512x128xf32>
      %130 = vector.broadcast %46 : vector<512x1xf32> to vector<512x128xf32>
      %131 = arith.mulf %129, %130 : vector<512x128xf32>
      %cst_59 = arith.constant dense<0.000000e+00> : vector<128xf32>
      %132 = vector.multi_reduction <add>, %131, %cst_59 [0] : vector<512x128xf32> to vector<128xf32>
      %133 = vector.shape_cast %132 : vector<128xf32> to vector<1x128xf32>
      %cst_60 = arith.constant 0.00333333341 : f32
      %134 = vector.broadcast %cst_60 : f32 to vector<1x128xf32>
      %135 = arith.mulf %133, %134 : vector<1x128xf32>
      %136 = vector.broadcast %135 : vector<1x128xf32> to vector<512x128xf32>
      %137 = arith.subf %129, %136 : vector<512x128xf32>
      %138 = vector.broadcast %46 : vector<512x1xf32> to vector<512x128xf32>
      %139 = arith.mulf %137, %138 : vector<512x128xf32>
      %140 = arith.mulf %139, %139 : vector<512x128xf32>
      %cst_61 = arith.constant dense<0.000000e+00> : vector<128xf32>
      %141 = vector.multi_reduction <add>, %140, %cst_61 [0] : vector<512x128xf32> to vector<128xf32>
      %142 = vector.shape_cast %141 : vector<128xf32> to vector<1x128xf32>
      %cst_62 = arith.constant 0.00333333341 : f32
      %143 = vector.broadcast %cst_62 : f32 to vector<1x128xf32>
      %144 = arith.mulf %142, %143 : vector<1x128xf32>
      %145 = vector.broadcast %135 : vector<1x128xf32> to vector<512x128xf32>
      %146 = arith.subf %129, %145 : vector<512x128xf32>
      %cst_63 = arith.constant 9.99999974E-6 : f32
      %147 = vector.broadcast %cst_63 : f32 to vector<1x128xf32>
      %148 = arith.addf %144, %147 : vector<1x128xf32>
      %149 = math.rsqrt %148 : vector<1x128xf32>
      %150 = vector.broadcast %149 : vector<1x128xf32> to vector<512x128xf32>
      %151 = arith.mulf %146, %150 : vector<512x128xf32>
      %152 = vector.broadcast %26 : vector<1x128xf32> to vector<512x128xf32>
      %153 = arith.mulf %151, %152 : vector<512x128xf32>
      %154 = vector.broadcast %27 : vector<1x128xf32> to vector<512x128xf32>
      %155 = arith.addf %153, %154 : vector<512x128xf32>
      %c0_64 = arith.constant 0 : index
      %c0_65 = arith.constant 0 : index
      %156 = vector.load %arg11[%c0_64, %c0_65] : memref<512x128xf32, #tpu.memory_space<vmem>>, vector<512x128xf32>
      tpu.vector_store %arg11[%c0_64, %c0_65], %155 {strides = array<i32>} : memref<512x128xf32, #tpu.memory_space<vmem>>, vector<512x128xf32>,
    } else {
    }
    return
  }
  func.func @transform_0(%arg0: i32) -> (i32, i32) {
    %c0_i32 = arith.constant 0 : i32
    %c0_i32_0 = arith.constant 0 : i32
    return %c0_i32, %arg0 : i32, i32
  }
  func.func @transform_1(%arg0: i32) -> (i32, i32) {
    %c0_i32 = arith.constant 0 : i32
    %c0_i32_0 = arith.constant 0 : i32
    return %c0_i32, %arg0 : i32, i32
  }
  func.func @transform_2(%arg0: i32) -> (i32, i32) {
    %c0_i32 = arith.constant 0 : i32
    %c0_i32_0 = arith.constant 0 : i32
    return %arg0, %c0_i32 : i32, i32
  }
  func.func @transform_3(%arg0: i32) -> (i32, i32) {
    %c0_i32 = arith.constant 0 : i32
    %c0_i32_0 = arith.constant 0 : i32
    %c0_i32_1 = arith.constant 0 : i32
    return %c0_i32, %c0_i32_0 : i32, i32
  }
  func.func @transform_4(%arg0: i32) -> (i32, i32) {
    %c0_i32 = arith.constant 0 : i32
    %c0_i32_0 = arith.constant 0 : i32
    %c0_i32_1 = arith.constant 0 : i32
    return %c0_i32, %c0_i32_0 : i32, i32
  }
  func.func @transform_5(%arg0: i32) -> (i32, i32) {
    %c0_i32 = arith.constant 0 : i32
    %c0_i32_0 = arith.constant 0 : i32
    %c0_i32_1 = arith.constant 0 : i32
    return %c0_i32, %c0_i32_0 : i32, i32
  }
  func.func @transform_6(%arg0: i32) -> (i32, i32) {
    %c0_i32 = arith.constant 0 : i32
    %c0_i32_0 = arith.constant 0 : i32
    %c0_i32_1 = arith.constant 0 : i32
    return %c0_i32, %c0_i32_0 : i32, i32
  }
  func.func @transform_7(%arg0: i32) -> (i32, i32) {
    %c0_i32 = arith.constant 0 : i32
    %c0_i32_0 = arith.constant 0 : i32
    %c0_i32_1 = arith.constant 0 : i32
    return %c0_i32, %c0_i32_0 : i32, i32
  }
  func.func @transform_8(%arg0: i32) -> (i32, i32) {
    %c0_i32 = arith.constant 0 : i32
    %c0_i32_0 = arith.constant 0 : i32
    %c0_i32_1 = arith.constant 0 : i32
    return %c0_i32, %c0_i32_0 : i32, i32
  }
  func.func @transform_9(%arg0: i32) -> (i32, i32) {
    %c0_i32 = arith.constant 0 : i32
    %c0_i32_0 = arith.constant 0 : i32
    %c0_i32_1 = arith.constant 0 : i32
    return %c0_i32, %c0_i32_0 : i32, i32
  }
  func.func @transform_10(%arg0: i32) -> (i32, i32) {
    %c0_i32 = arith.constant 0 : i32
    %c0_i32_0 = arith.constant 0 : i32
    %c0_i32_1 = arith.constant 0 : i32
    return %c0_i32, %c0_i32_0 : i32, i32
  }
}

</mosaic_0001>

<bundles_post_ra>
// kernel: _gps_conv_impl.1
= control target key start
LH: loop header
LB: loop body
LE: loop exit
PB: predicated region body
PF: predicated region fallthrough
CT: control target
= control target key end

     0   :  { %v15231_v0 = vmov 0   ;;  %s15220_s2 = inlined_call_operand.vmem [shape: bf16[512,128], index: 2, kind: input, shape index: {}]   ;;  %s15221_s0 = inlined_call_operand.vmem [shape: s8[512,512], index: 0, kind: input, shape index: {}]   ;;  %s15222_s1 = inlined_call_operand.vmem [shape: bf16[512,512], index: 1, kind: input, shape index: {}]   ;;  %s15223_s5 = inlined_call_operand.vmem [shape: bf16[128,128], index: 5, kind: input, shape index: {}]   ;;  %s15224_s4 = inlined_call_operand.vmem [shape: bf16[128,128], index: 4, kind: input, shape index: {}]   ;;  %s15225_s6 = inlined_call_operand.vmem [shape: f32[16,128], index: 6, kind: input, shape index: {}]   ;;  %s15226_s3 = inlined_call_operand.vmem [shape: f32[512,128], index: 3, kind: input, shape index: {}]   ;;  %s15227_s7 = inlined_call_operand.vmem [shape: bf16[128,256], index: 7, kind: input, shape index: {}]   ;;  %s15228_s9 = inlined_call_operand.vmem [shape: bf16[256,128], index: 9, kind: input, shape index: {}]   ;;  %s15229_s8 = inlined_call_operand.vmem [shape: f32[1,256], index: 8, kind: input, shape index: {}]   ;;  %s15230_s10 = inlined_call_operand.vmem [shape: f32[512,128], index: 10, kind: output, shape index: {}]  }
   0x1   :  { %680 = vmatprep.subr.bf16.mxu0 %v15231_v0  ;;  %2218 = vmatprep.subr.bf16.mxu1 %v15231_v0  ;;  %v8432_v1 = vld [vmem:[%s15220_s2] sm:$0xff]   ;;  %v8433_v2 = vld [vmem:[%s15220_s2 + $0x8] sm:$0xff]   ;;  %v8434_v3 = vld [vmem:[%s15220_s2 + $0x10] sm:$0xff]  }
   0x2   :  { %681 = vmatpush1.bf16.msra.mxu0 %v8432_v1  ;;  %2219 = vmatpush1.bf16.msra.mxu1 %v8432_v1  ;;  %v8435_v4 = vld [vmem:[%s15220_s2 + $0x18] sm:$0xff]   ;;  %v8436_v5 = vld [vmem:[%s15220_s2 + $0x20] sm:$0xff]   ;;  %v8810_v6 = vld [vmem:[%s15221_s0 + $0x8] sm:$0xff] }
   0x3   :  { %682 = vmatprep.subr.bf16.mxu0 %v15231_v0  ;;  %2220 = vmatprep.subr.bf16.mxu1 %v15231_v0  ;;  %v361_v7 = vunpack.c.l.s8.bf16 %v8810_v6  ;;  %v8450_v8 = vld [vmem:[%s15222_s1 + $0x4] ss:$16 sps:$4 sm:$0xff]   ;;  %v8437_v9 = vld [vmem:[%s15220_s2 + $0x28] sm:$0xff]   ;;  %v8439_v11 = vld [vmem:[%s15220_s2 + $0x38] sm:$0xff]   ;;  %v365_v24 = vunpack.c.h.s8.bf16 %v8810_v6 }
   0x4   :  { %2250 = vmatprep.mubr.bf16.mxu1 %v8450_v8  ;;  %v8438_v10 = vld [vmem:[%s15220_s2 + $0x30] sm:$0xff]   ;;  %v8440_v12 = vld [vmem:[%s15220_s2 + $0x40] sm:$0xff]   ;;  %v8441_v13 = vld [vmem:[%s15220_s2 + $0x48] sm:$0xff]  }
   0x5   :  { %712 = vmatprep.mubr.bf16.mxu0 %v361_v7  ;;  %v8442_v14 = vld [vmem:[%s15220_s2 + $0x50] sm:$0xff]   ;;  %v8443_v15 = vld [vmem:[%s15220_s2 + $0x58] sm:$0xff]   ;;  %v8444_v16 = vld [vmem:[%s15220_s2 + $0x60] sm:$0xff]  }
   0x6   :  { %683 = vmatpush1.bf16.msra.mxu0 %v8433_v2  ;;  %2221 = vmatpush1.bf16.msra.mxu1 %v8433_v2  ;;  %v8445_v17 = vld [vmem:[%s15220_s2 + $0x68] sm:$0xff]   ;;  %v8446_v18 = vld [vmem:[%s15220_s2 + $0x70] sm:$0xff]   ;;  %v8447_v19 = vld [vmem:[%s15220_s2 + $0x78] sm:$0xff]  }
   0x7   :  { %684 = vmatprep.subr.bf16.mxu0 %v15231_v0  ;;  %2222 = vmatprep.subr.bf16.mxu1 %v15231_v0  ;;  %v296_v20 = vld [vmem:[%s15221_s0] sm:$0xff]  ;;  %v301_v26 = vld [vmem:[%s15221_s0 + $0x28] sm:$0xff]  ;;  %v8465_v32 = vld [vmem:[%s15220_s2 + $0x90] sm:$0xff]  }
   0x8   :  { %v8448_v21 = vld [vmem:[%s15222_s1] ss:$16 sps:$4 sm:$0xff]   ;;  %v360_v23 = vunpack.c.l.s8.bf16 %v296_v20  ;;  %v8452_v25 = vld [vmem:[%s15222_s1 + $0x24] ss:$16 sps:$4 sm:$0xff]   ;;  %v8458_v27 = vld [vmem:[%s15220_s2 + $0x88] sm:$0xff]   ;;  %v364_v30 = vunpack.c.h.s8.bf16 %v296_v20  ;;  %v369_v31 = vunpack.c.l.s8.bf16 %v301_v26  ;;  %v373_v38 = vunpack.c.h.s8.bf16 %v301_v26 }
   0x9   :  { %v8451_v22 = vld [vmem:[%s15220_s2 + $0x80] sm:$0xff]   ;;  %v8472_v34 = vld [vmem:[%s15220_s2 + $0x98] sm:$0xff]   ;;  %v305_v40 = vld [vmem:[%s15221_s0 + $0x48] sm:$0xff] }
   0xa   :  { %685 = vmatpush1.bf16.msra.mxu0 %v8434_v3  ;;  %2223 = vmatpush1.bf16.msra.mxu1 %v8434_v3  ;;  %v8454_v28 = vld [vmem:[%s15222_s1 + $0x20] ss:$16 sps:$4 sm:$0xff]   ;;  %v8455_v29 = vld [vmem:[%s15222_s1 + $0x44] ss:$16 sps:$4 sm:$0xff]   ;;  %v8486_v41 = vld [vmem:[%s15220_s2 + $0xa8] sm:$0xff]   ;;  %v377_v45 = vunpack.c.l.s8.bf16 %v305_v40  ;;  %v381_v51 = vunpack.c.h.s8.bf16 %v305_v40 }
   0xb   :  { %686 = vmatprep.subr.bf16.mxu0 %v15231_v0  ;;  %2224 = vmatprep.subr.bf16.mxu1 %v15231_v0  ;;  %v300_v33 = vld [vmem:[%s15221_s0 + $0x20] sm:$0xff]  ;;  %v8493_v46 = vld [vmem:[%s15220_s2 + $0xb0] sm:$0xff]   ;;  %v8500_v48 = vld [vmem:[%s15220_s2 + $0xb8] sm:$0xff]  }
   0xc   :  { %v8457_v35 = vld [vmem:[%s15222_s1 + $0x40] ss:$16 sps:$4 sm:$0xff]   ;;  %v8459_v36 = vld [vmem:[%s15222_s1 + $0x64] ss:$16 sps:$4 sm:$0xff]   ;;  %v368_v37 = vunpack.c.l.s8.bf16 %v300_v33  ;;  %v372_v44 = vunpack.c.h.s8.bf16 %v300_v33  ;;  %v309_v54 = vld [vmem:[%s15221_s0 + $0x68] sm:$0xff] }
   0xd   :  { %v8479_v39 = vld [vmem:[%s15220_s2 + $0xa0] sm:$0xff]   ;;  %v8514_v55 = vld [vmem:[%s15220_s2 + $0xc8] sm:$0xff]   ;;  %v385_v58 = vunpack.c.l.s8.bf16 %v309_v54  ;;  %v8521_v60 = vld [vmem:[%s15220_s2 + $0xd0] sm:$0xff]   ;;  %v389_v1 = vunpack.c.h.s8.bf16 %v309_v54 }
   0xe   :  { %687 = vmatpush1.bf16.msra.mxu0 %v8435_v4  ;;  %2225 = vmatpush1.bf16.msra.mxu1 %v8435_v4  ;;  %v8461_v42 = vld [vmem:[%s15222_s1 + $0x60] ss:$16 sps:$4 sm:$0xff]   ;;  %v8462_v43 = vld [vmem:[%s15222_s1 + $0x84] ss:$16 sps:$4 sm:$0xff]   ;;  %v8528_v3 = vld [vmem:[%s15220_s2 + $0xd8] sm:$0xff]  }
   0xf   :  { %688 = vmatprep.subr.bf16.mxu0 %v15231_v0  ;;  %2226 = vmatprep.subr.bf16.mxu1 %v15231_v0  ;;  %v304_v47 = vld [vmem:[%s15221_s0 + $0x40] sm:$0xff]  ;;  %v313_v4 = vld [vmem:[%s15221_s0 + $0x88] sm:$0xff] }
  0x10   :  { %v376_v49 = vunpack.c.l.s8.bf16 %v304_v47  ;;  %v8464_v50 = vld [vmem:[%s15222_s1 + $0x80] ss:$16 sps:$4 sm:$0xff]   ;;  %v8466_v52 = vld [vmem:[%s15222_s1 + $0xa4] ss:$16 sps:$4 sm:$0xff]   ;;  %v380_v56 = vunpack.c.h.s8.bf16 %v304_v47  ;;  %v393_v7 = vunpack.c.l.s8.bf16 %v313_v4  ;;  %v321_v26 = vld [vmem:[%s15221_s0 + $0xc8] sm:$0xff] }
  0x11   :  { %v8507_v53 = vld [vmem:[%s15220_s2 + $0xc0] sm:$0xff]   ;;  %v8556_v47 = vld [vmem:[%s15220_s2 + $0xf8] sm:$0xff]  }
  0x12   :  { %689 = vmatpush1.bf16.msra.mxu0 %v8436_v5  ;;  %2227 = vmatpush1.bf16.msra.mxu1 %v8436_v5  ;;  %v8468_v57 = vld [vmem:[%s15222_s1 + $0xa0] ss:$16 sps:$4 sm:$0xff]   ;;  %v8469_v59 = vld [vmem:[%s15222_s1 + $0xc4] ss:$16 sps:$4 sm:$0xff]  }
  0x13   :  { %690 = vmatprep.subr.bf16.mxu0 %v15231_v0  ;;  %2228 = vmatprep.subr.bf16.mxu1 %v15231_v0  ;;  %v308_v61 = vld [vmem:[%s15221_s0 + $0x60] sm:$0xff] }
  0x14   :  { %v384_v62 = vunpack.c.l.s8.bf16 %v308_v61  ;;  %v8471_v63 = vld [vmem:[%s15222_s1 + $0xc0] ss:$16 sps:$4 sm:$0xff]   ;;  %v8473_v2 = vld [vmem:[%s15222_s1 + $0xe4] ss:$16 sps:$4 sm:$0xff]   ;;  %v388_v5 = vunpack.c.h.s8.bf16 %v308_v61 }
  0x15   :  { %v8475_v6 = vld [vmem:[%s15222_s1 + $0xe0] ss:$16 sps:$4 sm:$0xff]   ;;  %v8476_v8 = vld [vmem:[%s15222_s1 + $0x104] ss:$16 sps:$4 sm:$0xff]  }
  0x16   :  { %691 = vmatpush1.bf16.msra.mxu0 %v8437_v9  ;;  %2229 = vmatpush1.bf16.msra.mxu1 %v8437_v9  ;;  %v312_v9 = vld [vmem:[%s15221_s0 + $0x80] sm:$0xff] }
  0x17   :  { %692 = vmatprep.subr.bf16.mxu0 %v15231_v0  ;;  %2230 = vmatprep.subr.bf16.mxu1 %v15231_v0  ;;  %v316_v20 = vld [vmem:[%s15221_s0 + $0xa0] sm:$0xff] }
  0x18   :  { %v8492_v33 = vld [vmem:[%s15222_s1 + $0x180] ss:$16 sps:$4 sm:$0xff]  }
  0x1a   :  { %693 = vmatpush1.bf16.msra.mxu0 %v8438_v10  ;;  %2231 = vmatpush1.bf16.msra.mxu1 %v8438_v10  ;;  %v392_v10 = vunpack.c.l.s8.bf16 %v312_v9 }
  0x1b   :  { %694 = vmatprep.subr.bf16.mxu0 %v15231_v0  ;;  %2232 = vmatprep.subr.bf16.mxu1 %v15231_v0 }
  0x1e   :  { %695 = vmatpush1.bf16.msra.mxu0 %v8439_v11  ;;  %2233 = vmatpush1.bf16.msra.mxu1 %v8439_v11  ;;  %v8478_v11 = vld [vmem:[%s15222_s1 + $0x100] ss:$16 sps:$4 sm:$0xff]  }
  0x1f   :  { %696 = vmatprep.subr.bf16.mxu0 %v15231_v0  ;;  %2234 = vmatprep.subr.bf16.mxu1 %v15231_v0 }
  0x22   :  { %697 = vmatpush1.bf16.msra.mxu0 %v8440_v12  ;;  %2235 = vmatpush1.bf16.msra.mxu1 %v8440_v12  ;;  %v397_v12 = vunpack.c.h.s8.bf16 %v313_v4  ;;  %v8515_v4 = vld [vmem:[%s15222_s1 + $0x264] ss:$16 sps:$4 sm:$0xff]  }
  0x23   :  { %698 = vmatprep.subr.bf16.mxu0 %v15231_v0  ;;  %2236 = vmatprep.subr.bf16.mxu1 %v15231_v0 }
  0x26   :  { %699 = vmatpush1.bf16.msra.mxu0 %v8441_v13  ;;  %2237 = vmatpush1.bf16.msra.mxu1 %v8441_v13  ;;  %v8480_v13 = vld [vmem:[%s15222_s1 + $0x124] ss:$16 sps:$4 sm:$0xff]  }
  0x27   :  { %700 = vmatprep.subr.bf16.mxu0 %v15231_v0  ;;  %2238 = vmatprep.subr.bf16.mxu1 %v15231_v0 }
  0x2a   :  { %701 = vmatpush1.bf16.msra.mxu0 %v8442_v14  ;;  %2239 = vmatpush1.bf16.msra.mxu1 %v8442_v14  ;;  %v8535_v14 = vld [vmem:[%s15220_s2 + $0xe0] sm:$0xff]  }
  0x2b   :  { %702 = vmatprep.subr.bf16.mxu0 %v15231_v0  ;;  %2240 = vmatprep.subr.bf16.mxu1 %v15231_v0 }
  0x2e   :  { %703 = vmatpush1.bf16.msra.mxu0 %v8443_v15  ;;  %2241 = vmatpush1.bf16.msra.mxu1 %v8443_v15  ;;  %v317_v15 = vld [vmem:[%s15221_s0 + $0xa8] sm:$0xff] }
  0x2f   :  { %704 = vmatprep.subr.bf16.mxu0 %v15231_v0  ;;  %2242 = vmatprep.subr.bf16.mxu1 %v15231_v0 }
  0x32   :  { %705 = vmatpush1.bf16.msra.mxu0 %v8444_v16  ;;  %2243 = vmatpush1.bf16.msra.mxu1 %v8444_v16  ;;  %v396_v16 = vunpack.c.h.s8.bf16 %v312_v9  ;;  %v8518_v9 = vld [vmem:[%s15222_s1 + $0x284] ss:$16 sps:$4 sm:$0xff]  }
  0x33   :  { %706 = vmatprep.subr.bf16.mxu0 %v15231_v0  ;;  %2244 = vmatprep.subr.bf16.mxu1 %v15231_v0 }
  0x36   :  { %707 = vmatpush1.bf16.msra.mxu0 %v8445_v17  ;;  %2245 = vmatpush1.bf16.msra.mxu1 %v8445_v17  ;;  %v8482_v17 = vld [vmem:[%s15222_s1 + $0x120] ss:$16 sps:$4 sm:$0xff]  }
  0x37   :  { %708 = vmatprep.subr.bf16.mxu0 %v15231_v0  ;;  %2246 = vmatprep.subr.bf16.mxu1 %v15231_v0 }
  0x3a   :  { %709 = vmatpush1.bf16.msra.mxu0 %v8446_v18  ;;  %2247 = vmatpush1.bf16.msra.mxu1 %v8446_v18  ;;  %v401_v18 = vunpack.c.l.s8.bf16 %v317_v15 }
  0x3b   :  { %710 = vmatprep.subr.bf16.mxu0 %v15231_v0  ;;  %2248 = vmatprep.subr.bf16.mxu1 %v15231_v0 }
  0x3e   :  { %711 = vmatpush1.bf16.msra.mxu0 %v8447_v19  ;;  %2249 = vmatpush1.bf16.msra.mxu1 %v8447_v19  ;;  %v8483_v19 = vld [vmem:[%s15222_s1 + $0x144] ss:$16 sps:$4 sm:$0xff]  }
  0x3f   :  { %2507 = vmatprep.subr.bf16.mxu1 %v15231_v0  ;;  %969 = vmatprep.subr.bf16.mxu0 %v15231_v0 }
  0x41   :  { %713 = vmatmul.mubr.bf16.vlgmr.msra.gmra.mrb[0].mxu0 %v360_v23  ;;  %2251 = vmatmul.mubr.bf16.vlgmr.msra.gmra.mrb[0].mxu1 %v8448_v21  ;;  %v400_v21 = vunpack.c.l.s8.bf16 %v316_v20  ;;  %v405_v23 = vunpack.c.h.s8.bf16 %v317_v15  ;;  %v341_v15 = vld [vmem:[%s15221_s0 + $0x168] sm:$0xff] }
  0x42   :  { %2508 = vmatpush1.bf16.msra.mxu1 %v8451_v22  ;;  %720 = vmatprep.mubr.bf16.mxu0 %v365_v24  ;;  %v8487_v24 = vld [vmem:[%s15222_s1 + $0x164] ss:$16 sps:$4 sm:$0xff]  }
  0x43   :  { %2258 = vmatprep.mubr.bf16.mxu1 %v8452_v25  ;;  %2509 = vmatprep.subr.bf16.mxu1 %v15231_v0  ;;  %v8542_v25 = vld [vmem:[%s15220_s2 + $0xe8] sm:$0xff]  }
  0x44   :  { %970 = vmatpush1.bf16.msra.mxu0 %v8451_v22  ;;  %v8485_v22 = vld [vmem:[%s15222_s1 + $0x140] ss:$16 sps:$4 sm:$0xff]  }
  0x45   :  { %971 = vmatprep.subr.bf16.mxu0 %v15231_v0 }
  0x46   :  { %2510 = vmatpush1.bf16.msra.mxu1 %v8458_v27 }
  0x47   :  { %2511 = vmatprep.subr.bf16.mxu1 %v15231_v0 }
  0x48   :  { %972 = vmatpush1.bf16.msra.mxu0 %v8458_v27  ;;  %v404_v27 = vunpack.c.h.s8.bf16 %v316_v20  ;;  %v340_v20 = vld [vmem:[%s15221_s0 + $0x160] sm:$0xff] }
  0x49   :  { %721 = vmatmul.mubr.bf16.gmra.mrb[4].mxu0 %v364_v30  ;;  %2259 = vmatmul.mubr.bf16.gmra.mrb[4].mxu1 %v8454_v28  ;;  %v8489_v28 = vld [vmem:[%s15222_s1 + $0x160] ss:$16 sps:$4 sm:$0xff]   ;;  %v8490_v30 = vld [vmem:[%s15222_s1 + $0x184] ss:$16 sps:$4 sm:$0xff]  }
  0x4a   :  { %728 = vmatprep.mubr.bf16.mxu0 %v369_v31  ;;  %2266 = vmatprep.mubr.bf16.mxu1 %v8455_v29  ;;  %v409_v29 = vunpack.c.l.s8.bf16 %v321_v26  ;;  %v320_v31 = vld [vmem:[%s15221_s0 + $0xc0] sm:$0xff] }
  0x4b   :  { %2512 = vmatpush1.bf16.msra.mxu1 %v8465_v32  ;;  %973 = vmatprep.subr.bf16.mxu0 %v15231_v0 }
  0x4c   :  { %2513 = vmatprep.subr.bf16.mxu1 %v15231_v0  ;;  %974 = vmatpush1.bf16.msra.mxu0 %v8465_v32  ;;  %v408_v32 = vunpack.c.l.s8.bf16 %v320_v31 }
  0x4d   :  { %975 = vmatprep.subr.bf16.mxu0 %v15231_v0 }
  0x4f   :  { %2514 = vmatpush1.bf16.msra.mxu1 %v8472_v34 }
  0x50   :  { %2515 = vmatprep.subr.bf16.mxu1 %v15231_v0  ;;  %976 = vmatpush1.bf16.msra.mxu0 %v8472_v34  ;;  %v413_v34 = vunpack.c.h.s8.bf16 %v321_v26  ;;  %v452_v26 = vunpack.c.h.s8.bf16 %v340_v20 }
  0x51   :  { %729 = vmatmul.mubr.bf16.gmra.mrb[8].mxu0 %v368_v37  ;;  %2267 = vmatmul.mubr.bf16.gmra.mrb[8].mxu1 %v8457_v35  ;;  %v8494_v35 = vld [vmem:[%s15222_s1 + $0x1a4] ss:$16 sps:$4 sm:$0xff]   ;;  %v325_v37 = vld [vmem:[%s15221_s0 + $0xe8] sm:$0xff] }
  0x52   :  { %736 = vmatprep.mubr.bf16.mxu0 %v373_v38  ;;  %2274 = vmatprep.mubr.bf16.mxu1 %v8459_v36  ;;  %v8549_v36 = vld [vmem:[%s15220_s2 + $0xf0] sm:$0xff]   ;;  %v412_v38 = vunpack.c.h.s8.bf16 %v320_v31  ;;  %v417_v40 = vunpack.c.l.s8.bf16 %v325_v37 }
  0x53   :  { %2516 = vmatpush1.bf16.msra.mxu1 %v8479_v39  ;;  %977 = vmatprep.subr.bf16.mxu0 %v15231_v0 }
  0x54   :  { %2517 = vmatprep.subr.bf16.mxu1 %v15231_v0  ;;  %978 = vmatpush1.bf16.msra.mxu0 %v8479_v39  ;;  %v8496_v39 = vld [vmem:[%s15222_s1 + $0x1a0] ss:$16 sps:$4 sm:$0xff]  }
  0x55   :  { %979 = vmatprep.subr.bf16.mxu0 %v15231_v0 }
  0x57   :  { %2518 = vmatpush1.bf16.msra.mxu1 %v8486_v41 }
  0x58   :  { %2519 = vmatprep.subr.bf16.mxu1 %v15231_v0  ;;  %980 = vmatpush1.bf16.msra.mxu0 %v8486_v41  ;;  %v8497_v41 = vld [vmem:[%s15222_s1 + $0x1c4] ss:$16 sps:$4 sm:$0xff]  }
  0x59   :  { %737 = vmatmul.mubr.bf16.gmra.mrb[12].mxu0 %v372_v44  ;;  %2275 = vmatmul.mubr.bf16.gmra.mrb[12].mxu1 %v8461_v42  ;;  %v324_v42 = vld [vmem:[%s15221_s0 + $0xe0] sm:$0xff] }
  0x5a   :  { %744 = vmatprep.mubr.bf16.mxu0 %v377_v45  ;;  %2282 = vmatprep.mubr.bf16.mxu1 %v8462_v43  ;;  %v416_v43 = vunpack.c.l.s8.bf16 %v324_v42  ;;  %v8499_v44 = vld [vmem:[%s15222_s1 + $0x1c0] ss:$16 sps:$4 sm:$0xff]   ;;  %v421_v45 = vunpack.c.h.s8.bf16 %v325_v37 }
  0x5b   :  { %2520 = vmatpush1.bf16.msra.mxu1 %v8493_v46  ;;  %981 = vmatprep.subr.bf16.mxu0 %v15231_v0  ;;  %v8538_v37 = vld [vmem:[%s15222_s1 + $0x320] ss:$16 sps:$4 sm:$0xff]  }
  0x5c   :  { %2521 = vmatprep.subr.bf16.mxu1 %v15231_v0  ;;  %982 = vmatpush1.bf16.msra.mxu0 %v8493_v46  ;;  %v8501_v46 = vld [vmem:[%s15222_s1 + $0x1e4] ss:$16 sps:$4 sm:$0xff]  }
  0x5d   :  { %983 = vmatprep.subr.bf16.mxu0 %v15231_v0 }
  0x5f   :  { %2522 = vmatpush1.bf16.msra.mxu1 %v8500_v48 }
  0x60   :  { %2523 = vmatprep.subr.bf16.mxu1 %v15231_v0  ;;  %984 = vmatpush1.bf16.msra.mxu0 %v8500_v48  ;;  %v329_v48 = vld [vmem:[%s15221_s0 + $0x108] sm:$0xff] }
  0x61   :  { %745 = vmatmul.mubr.bf16.gmra.mrb[16].mxu0 %v376_v49  ;;  %2283 = vmatmul.mubr.bf16.gmra.mrb[16].mxu1 %v8464_v50  ;;  %v420_v49 = vunpack.c.h.s8.bf16 %v324_v42  ;;  %v8503_v50 = vld [vmem:[%s15222_s1 + $0x1e0] ss:$16 sps:$4 sm:$0xff]  }
  0x62   :  { %752 = vmatprep.mubr.bf16.mxu0 %v381_v51  ;;  %2290 = vmatprep.mubr.bf16.mxu1 %v8466_v52  ;;  %v425_v51 = vunpack.c.l.s8.bf16 %v329_v48  ;;  %v8504_v52 = vld [vmem:[%s15222_s1 + $0x204] ss:$16 sps:$4 sm:$0xff]   ;;  %v8541_v42 = vld [vmem:[%s15222_s1 + $0x340] ss:$16 sps:$4 sm:$0xff]  }
  0x63   :  { %2524 = vmatpush1.bf16.msra.mxu1 %v8507_v53  ;;  %985 = vmatprep.subr.bf16.mxu0 %v15231_v0 }
  0x64   :  { %2525 = vmatprep.subr.bf16.mxu1 %v15231_v0  ;;  %986 = vmatpush1.bf16.msra.mxu0 %v8507_v53  ;;  %v328_v53 = vld [vmem:[%s15221_s0 + $0x100] sm:$0xff] }
  0x65   :  { %987 = vmatprep.subr.bf16.mxu0 %v15231_v0  ;;  %v424_v54 = vunpack.c.l.s8.bf16 %v328_v53 }
  0x67   :  { %2526 = vmatpush1.bf16.msra.mxu1 %v8514_v55 }
  0x68   :  { %2527 = vmatprep.subr.bf16.mxu1 %v15231_v0  ;;  %988 = vmatpush1.bf16.msra.mxu0 %v8514_v55  ;;  %v8506_v55 = vld [vmem:[%s15222_s1 + $0x200] ss:$16 sps:$4 sm:$0xff]  }
  0x69   :  { %753 = vmatmul.mubr.bf16.gmra.mrb[20].mxu0 %v380_v56  ;;  %2291 = vmatmul.mubr.bf16.gmra.mrb[20].mxu1 %v8468_v57  ;;  %v429_v56 = vunpack.c.h.s8.bf16 %v329_v48  ;;  %v8508_v57 = vld [vmem:[%s15222_s1 + $0x224] ss:$16 sps:$4 sm:$0xff]  }
  0x6a   :  { %760 = vmatprep.mubr.bf16.mxu0 %v385_v58  ;;  %2298 = vmatprep.mubr.bf16.mxu1 %v8469_v59  ;;  %v333_v58 = vld [vmem:[%s15221_s0 + $0x128] sm:$0xff]  ;;  %v428_v59 = vunpack.c.h.s8.bf16 %v328_v53  ;;  %v8550_v53 = vld [vmem:[%s15222_s1 + $0x3a4] ss:$16 sps:$4 sm:$0xff]  }
  0x6b   :  { %2528 = vmatpush1.bf16.msra.mxu1 %v8521_v60  ;;  %989 = vmatprep.subr.bf16.mxu0 %v15231_v0  ;;  %v433_v61 = vunpack.c.l.s8.bf16 %v333_v58 }
  0x6c   :  { %2529 = vmatprep.subr.bf16.mxu1 %v15231_v0  ;;  %990 = vmatpush1.bf16.msra.mxu0 %v8521_v60  ;;  %v8510_v60 = vld [vmem:[%s15222_s1 + $0x220] ss:$16 sps:$4 sm:$0xff]  }
  0x6d   :  { %991 = vmatprep.subr.bf16.mxu0 %v15231_v0 }
  0x6f   :  { %2530 = vmatpush1.bf16.msra.mxu1 %v8528_v3 }
  0x70   :  { %992 = vmatpush1.bf16.msra.mxu0 %v8528_v3  ;;  %2531 = vmatprep.subr.bf16.mxu1 %v15231_v0  ;;  %v437_v3 = vunpack.c.h.s8.bf16 %v333_v58  ;;  %v8552_v58 = vld [vmem:[%s15222_s1 + $0x3a0] ss:$16 sps:$4 sm:$0xff]  }
  0x71   :  { %761 = vmatmul.mubr.bf16.gmra.mrb[24].mxu0 %v384_v62  ;;  %2299 = vmatmul.mubr.bf16.gmra.mrb[24].mxu1 %v8471_v63  ;;  %v8511_v62 = vld [vmem:[%s15222_s1 + $0x244] ss:$16 sps:$4 sm:$0xff]  }
  0x72   :  { %768 = vmatprep.mubr.bf16.mxu0 %v389_v1  ;;  %2306 = vmatprep.mubr.bf16.mxu1 %v8473_v2  ;;  %v332_v63 = vld [vmem:[%s15221_s0 + $0x120] sm:$0xff] }
  0x73   :  { %993 = vmatprep.subr.bf16.mxu0 %v15231_v0  ;;  %2532 = vmatpush1.bf16.msra.mxu1 %v8535_v14  ;;  %v432_v1 = vunpack.c.l.s8.bf16 %v332_v63  ;;  %v8513_v2 = vld [vmem:[%s15222_s1 + $0x240] ss:$16 sps:$4 sm:$0xff]  }
  0x74   :  { %994 = vmatpush1.bf16.msra.mxu0 %v8535_v14  ;;  %2533 = vmatprep.subr.bf16.mxu1 %v15231_v0  ;;  %v8522_v14 = vld [vmem:[%s15222_s1 + $0x2a4] ss:$16 sps:$4 sm:$0xff]  }
  0x75   :  { %995 = vmatprep.subr.bf16.mxu0 %v15231_v0 }
  0x77   :  { %2534 = vmatpush1.bf16.msra.mxu1 %v8542_v25 }
  0x78   :  { %996 = vmatpush1.bf16.msra.mxu0 %v8542_v25  ;;  %2535 = vmatprep.subr.bf16.mxu1 %v15231_v0  ;;  %v345_v25 = vld [vmem:[%s15221_s0 + $0x188] sm:$0xff] }
  0x79   :  { %769 = vmatmul.mubr.bf16.gmra.mrb[28].mxu0 %v388_v5  ;;  %2307 = vmatmul.mubr.bf16.gmra.mrb[28].mxu1 %v8475_v6  ;;  %v337_v5 = vld [vmem:[%s15221_s0 + $0x148] sm:$0xff]  ;;  %v436_v6 = vunpack.c.h.s8.bf16 %v332_v63  ;;  %v8555_v63 = vld [vmem:[%s15222_s1 + $0x3c0] ss:$16 sps:$4 sm:$0xff]  }
  0x7a   :  { %776 = vmatprep.mubr.bf16.mxu0 %v393_v7  ;;  %2314 = vmatprep.mubr.bf16.mxu1 %v8476_v8  ;;  %v8517_v7 = vld [vmem:[%s15222_s1 + $0x260] ss:$16 sps:$4 sm:$0xff]   ;;  %v441_v8 = vunpack.c.l.s8.bf16 %v337_v5 }
  0x7b   :  { %997 = vmatprep.subr.bf16.mxu0 %v15231_v0  ;;  %2536 = vmatpush1.bf16.msra.mxu1 %v8549_v36 }
  0x7c   :  { %998 = vmatpush1.bf16.msra.mxu0 %v8549_v36  ;;  %2537 = vmatprep.subr.bf16.mxu1 %v15231_v0 }
  0x7d   :  { %999 = vmatprep.subr.bf16.mxu0 %v15231_v0 }
  0x7f   :  { %2538 = vmatpush1.bf16.msra.mxu1 %v8556_v47 }
  0x80   :  { %1000 = vmatpush1.bf16.msra.mxu0 %v8556_v47  ;;  %v8545_v47 = vld [vmem:[%s15222_s1 + $0x360] ss:$16 sps:$4 sm:$0xff]  }
  0x81   :  { %777 = vmatmul.mubr.bf16.gmra.mrb[32].mxu0 %v392_v10  ;;  %2315 = vmatmul.mubr.bf16.gmra.mrb[32].mxu1 %v8478_v11  ;;  %v336_v10 = vld [vmem:[%s15221_s0 + $0x140] sm:$0xff] }
  0x82   :  { %784 = vmatprep.mubr.bf16.mxu0 %v397_v12  ;;  %2322 = vmatprep.mubr.bf16.mxu1 %v8480_v13  ;;  %v440_v11 = vunpack.c.l.s8.bf16 %v336_v10  ;;  %v8520_v12 = vld [vmem:[%s15222_s1 + $0x280] ss:$16 sps:$4 sm:$0xff]   ;;  %v445_v13 = vunpack.c.h.s8.bf16 %v337_v5 }
  0x89   :  { %785 = vmatmul.mubr.bf16.gmra.mrb[36].mxu0 %v396_v16  ;;  %2323 = vmatmul.mubr.bf16.gmra.mrb[36].mxu1 %v8482_v17  ;;  %v444_v16 = vunpack.c.h.s8.bf16 %v336_v10  ;;  %v8524_v17 = vld [vmem:[%s15222_s1 + $0x2a0] ss:$16 sps:$4 sm:$0xff]   ;;  %v8560_v10 = vld [vmem:[%s15222_s1 + $0x8] ss:$16 sps:$4 sm:$0xff]  }
  0x8a   :  { %792 = vmatprep.mubr.bf16.mxu0 %v401_v18  ;;  %2330 = vmatprep.mubr.bf16.mxu1 %v8483_v19  ;;  %v449_v18 = vunpack.c.l.s8.bf16 %v341_v15  ;;  %v8525_v19 = vld [vmem:[%s15222_s1 + $0x2c4] ss:$16 sps:$4 sm:$0xff]  }
  0x91   :  { %793 = vmatmul.mubr.bf16.gmra.mrb[40].mxu0 %v400_v21  ;;  %2331 = vmatmul.mubr.bf16.gmra.mrb[40].mxu1 %v8485_v22  ;;  %v448_v21 = vunpack.c.l.s8.bf16 %v340_v20  ;;  %v8527_v22 = vld [vmem:[%s15222_s1 + $0x2c0] ss:$16 sps:$4 sm:$0xff]   ;;  %v8617_v20 = vld [vmem:[%s15224_s4 + $0x8] sm:$0xff]  }
  0x92   :  { %800 = vmatprep.mubr.bf16.mxu0 %v405_v23  ;;  %2338 = vmatprep.mubr.bf16.mxu1 %v8487_v24  ;;  %v453_v23 = vunpack.c.h.s8.bf16 %v341_v15  ;;  %v8529_v24 = vld [vmem:[%s15222_s1 + $0x2e4] ss:$16 sps:$4 sm:$0xff]   ;;  %v303_v15 = vld [vmem:[%s15221_s0 + $0x38] sm:$0xff] }
  0x99   :  { %801 = vmatmul.mubr.bf16.gmra.mrb[44].mxu0 %v404_v27  ;;  %2339 = vmatmul.mubr.bf16.gmra.mrb[44].mxu1 %v8489_v28  ;;  %v8531_v27 = vld [vmem:[%s15222_s1 + $0x2e0] ss:$16 sps:$4 sm:$0xff]   ;;  %v457_v28 = vunpack.c.l.s8.bf16 %v345_v25 }
  0x9a   :  { %808 = vmatprep.mubr.bf16.mxu0 %v409_v29  ;;  %2346 = vmatprep.mubr.bf16.mxu1 %v8490_v30  ;;  %v8532_v29 = vld [vmem:[%s15222_s1 + $0x304] ss:$16 sps:$4 sm:$0xff]  }
  0x9b   :  { %v344_v30 = vld [vmem:[%s15221_s0 + $0x180] sm:$0xff] }
  0x9c   :  { %v456_v31 = vunpack.c.l.s8.bf16 %v344_v30  ;;  %v460_v36 = vunpack.c.h.s8.bf16 %v344_v30  ;;  %v8572_v30 = vld [vmem:[%s15222_s1 + $0x8c] ss:$16 sps:$4 sm:$0xff]  }
  0xa1   :  { %809 = vmatmul.mubr.bf16.gmra.mrb[48].mxu0 %v408_v32  ;;  %2347 = vmatmul.mubr.bf16.gmra.mrb[48].mxu1 %v8492_v33  ;;  %v8534_v32 = vld [vmem:[%s15222_s1 + $0x300] ss:$16 sps:$4 sm:$0xff]   ;;  %v461_v33 = vunpack.c.h.s8.bf16 %v345_v25  ;;  %v8569_v25 = vld [vmem:[%s15222_s1 + $0x6c] ss:$16 sps:$4 sm:$0xff]  }
  0xa2   :  { %816 = vmatprep.mubr.bf16.mxu0 %v413_v34  ;;  %2354 = vmatprep.mubr.bf16.mxu1 %v8494_v35  ;;  %v8536_v34 = vld [vmem:[%s15222_s1 + $0x324] ss:$16 sps:$4 sm:$0xff]   ;;  %v349_v35 = vld [vmem:[%s15221_s0 + $0x1a8] sm:$0xff] }
  0xa9   :  { %817 = vmatmul.mubr.bf16.gmra.mrb[52].mxu0 %v412_v38  ;;  %2355 = vmatmul.mubr.bf16.gmra.mrb[52].mxu1 %v8496_v39  ;;  %v465_v38 = vunpack.c.l.s8.bf16 %v349_v35  ;;  %v8539_v39 = vld [vmem:[%s15222_s1 + $0x344] ss:$16 sps:$4 sm:$0xff]  }
  0xaa   :  { %824 = vmatprep.mubr.bf16.mxu0 %v417_v40  ;;  %2362 = vmatprep.mubr.bf16.mxu1 %v8497_v41  ;;  %v348_v40 = vld [vmem:[%s15221_s0 + $0x1a0] sm:$0xff] }
  0xab   :  { %v464_v41 = vunpack.c.l.s8.bf16 %v348_v40 }
  0xb1   :  { %825 = vmatmul.mubr.bf16.gmra.mrb[56].mxu0 %v416_v43  ;;  %2363 = vmatmul.mubr.bf16.gmra.mrb[56].mxu1 %v8499_v44  ;;  %v469_v43 = vunpack.c.h.s8.bf16 %v349_v35  ;;  %v8543_v44 = vld [vmem:[%s15222_s1 + $0x364] ss:$16 sps:$4 sm:$0xff]  }
  0xb2   :  { %832 = vmatprep.mubr.bf16.mxu0 %v421_v45  ;;  %2370 = vmatprep.mubr.bf16.mxu1 %v8501_v46  ;;  %v353_v45 = vld [vmem:[%s15221_s0 + $0x1c8] sm:$0xff]  ;;  %v468_v46 = vunpack.c.h.s8.bf16 %v348_v40 }
  0xb3   :  { %v473_v48 = vunpack.c.l.s8.bf16 %v353_v45 }
  0xb9   :  { %833 = vmatmul.mubr.bf16.gmra.mrb[60].mxu0 %v420_v49  ;;  %2371 = vmatmul.mubr.bf16.gmra.mrb[60].mxu1 %v8503_v50  ;;  %v8546_v49 = vld [vmem:[%s15222_s1 + $0x384] ss:$16 sps:$4 sm:$0xff]  }
  0xba   :  { %840 = vmatprep.mubr.bf16.mxu0 %v425_v51  ;;  %2378 = vmatprep.mubr.bf16.mxu1 %v8504_v52  ;;  %v352_v50 = vld [vmem:[%s15221_s0 + $0x1c0] sm:$0xff] }
  0xbb   :  { %v8596_v51 = vld [vmem:[%s15223_s5] sm:$0xff]  }
  0xbc   :  { %v8548_v52 = vld [vmem:[%s15222_s1 + $0x380] ss:$16 sps:$4 sm:$0xff]   ;;  %8094 = vmatprep.subr.bf16.mxu1 %v8596_v51 }
  0xc1   :  { %841 = vmatmul.mubr.bf16.gmra.mrb[64].mxu0 %v424_v54  ;;  %2379 = vmatmul.mubr.bf16.gmra.mrb[64].mxu1 %v8506_v55  ;;  %v472_v54 = vunpack.c.l.s8.bf16 %v352_v50  ;;  %v477_v55 = vunpack.c.h.s8.bf16 %v353_v45  ;;  %v8580_v45 = vld [vmem:[%s15222_s1 + $0xc8] ss:$16 sps:$4 sm:$0xff]  }
  0xc2   :  { %848 = vmatprep.mubr.bf16.mxu0 %v429_v56  ;;  %2386 = vmatprep.mubr.bf16.mxu1 %v8508_v57  ;;  %v357_v56 = vld [vmem:[%s15221_s0 + $0x1e8] sm:$0xff]  ;;  %v476_v57 = vunpack.c.h.s8.bf16 %v352_v50 }
  0xc3   :  { %v8583_v50 = vld [vmem:[%s15222_s1 + $0xe8] ss:$16 sps:$4 sm:$0xff]  }
  0xc9   :  { %849 = vmatmul.mubr.bf16.gmra.mrb[68].mxu0 %v428_v59  ;;  %2387 = vmatmul.mubr.bf16.gmra.mrb[68].mxu1 %v8510_v60  ;;  %v481_v59 = vunpack.c.l.s8.bf16 %v357_v56  ;;  %v8553_v60 = vld [vmem:[%s15222_s1 + $0x3c4] ss:$16 sps:$4 sm:$0xff]  }
  0xca   :  { %856 = vmatprep.mubr.bf16.mxu0 %v433_v61  ;;  %2394 = vmatprep.mubr.bf16.mxu1 %v8511_v62  ;;  %v356_v61 = vld [vmem:[%s15221_s0 + $0x1e0] sm:$0xff] }
  0xcb   :  { %v8603_v62 = vld [vmem:[%s15224_s4] sm:$0xff]   ;;  %v484_v5 = vunpack.c.h.s8.bf16 %v356_v61 }
  0xcc   :  { %8014 = vmatprep.subr.bf16.mxu0 %v8603_v62 }
  0xd1   :  { %857 = vmatmul.mubr.bf16.gmra.mrb[72].mxu0 %v432_v1  ;;  %2395 = vmatmul.mubr.bf16.gmra.mrb[72].mxu1 %v8513_v2  ;;  %v8557_v1 = vld [vmem:[%s15222_s1 + $0x3e4] ss:$16 sps:$4 sm:$0xff]   ;;  %v480_v2 = vunpack.c.l.s8.bf16 %v356_v61  ;;  %v8589_v61 = vld [vmem:[%s15222_s1 + $0x128] ss:$16 sps:$4 sm:$0xff]  }
  0xd2   :  { %864 = vmatprep.mubr.bf16.mxu0 %v437_v3  ;;  %2402 = vmatprep.mubr.bf16.mxu1 %v8515_v4  ;;  %v485_v3 = vunpack.c.h.s8.bf16 %v357_v56  ;;  %v299_v4 = vld [vmem:[%s15221_s0 + $0x18] sm:$0xff] }
  0xd3   :  { %v8586_v56 = vld [vmem:[%s15222_s1 + $0x108] ss:$16 sps:$4 sm:$0xff]  }
  0xd9   :  { %865 = vmatmul.mubr.bf16.gmra.mrb[76].mxu0 %v436_v6  ;;  %2403 = vmatmul.mubr.bf16.gmra.mrb[76].mxu1 %v8517_v7  ;;  %v8559_v6 = vld [vmem:[%s15222_s1 + $0x3e0] ss:$16 sps:$4 sm:$0xff]   ;;  %v363_v7 = vunpack.c.l.s8.bf16 %v299_v4 }
  0xda   :  { %872 = vmatprep.mubr.bf16.mxu0 %v441_v8  ;;  %2410 = vmatprep.mubr.bf16.mxu1 %v8518_v9  ;;  %v8562_v8 = vld [vmem:[%s15222_s1 + $0xc] ss:$16 sps:$4 sm:$0xff]   ;;  %v298_v9 = vld [vmem:[%s15221_s0 + $0x10] sm:$0xff] }
  0xe1   :  { %873 = vmatmul.mubr.bf16.gmra.mrb[80].mxu0 %v440_v11  ;;  %2411 = vmatmul.mubr.bf16.gmra.mrb[80].mxu1 %v8520_v12  ;;  %v362_v11 = vunpack.c.l.s8.bf16 %v298_v9  ;;  %v367_v12 = vunpack.c.h.s8.bf16 %v299_v4  ;;  %v8592_v4 = vld [vmem:[%s15222_s1 + $0x148] ss:$16 sps:$4 sm:$0xff]  }
  0xe2   :  { %880 = vmatprep.mubr.bf16.mxu0 %v445_v13  ;;  %2418 = vmatprep.mubr.bf16.mxu1 %v8522_v14  ;;  %v8563_v13 = vld [vmem:[%s15222_s1 + $0x2c] ss:$16 sps:$4 sm:$0xff]  }
  0xe3   :  { %v8610_v14 = vld [vmem:[%s15223_s5 + $0x8] sm:$0xff]  }
  0xe9   :  { %881 = vmatmul.mubr.bf16.gmra.mrb[84].mxu0 %v444_v16  ;;  %2419 = vmatmul.mubr.bf16.gmra.mrb[84].mxu1 %v8524_v17  ;;  %v366_v16 = vunpack.c.h.s8.bf16 %v298_v9  ;;  %v8565_v17 = vld [vmem:[%s15222_s1 + $0x28] ss:$16 sps:$4 sm:$0xff]  }
  0xea   :  { %888 = vmatprep.mubr.bf16.mxu0 %v449_v18  ;;  %2426 = vmatprep.mubr.bf16.mxu1 %v8525_v19  ;;  %v371_v18 = vunpack.c.l.s8.bf16 %v303_v15  ;;  %v8566_v19 = vld [vmem:[%s15222_s1 + $0x4c] ss:$16 sps:$4 sm:$0xff]   ;;  %v8595_v9 = vld [vmem:[%s15222_s1 + $0x168] ss:$16 sps:$4 sm:$0xff]  }
  0xf1   :  { %889 = vmatmul.mubr.bf16.gmra.mrb[88].mxu0 %v448_v21  ;;  %2427 = vmatmul.mubr.bf16.gmra.mrb[88].mxu1 %v8527_v22  ;;  %v302_v21 = vld [vmem:[%s15221_s0 + $0x30] sm:$0xff] }
  0xf2   :  { %896 = vmatprep.mubr.bf16.mxu0 %v453_v23  ;;  %2434 = vmatprep.mubr.bf16.mxu1 %v8529_v24  ;;  %v370_v22 = vunpack.c.l.s8.bf16 %v302_v21  ;;  %v8568_v23 = vld [vmem:[%s15222_s1 + $0x48] ss:$16 sps:$4 sm:$0xff]   ;;  %v375_v24 = vunpack.c.h.s8.bf16 %v303_v15 }
  0xf3   :  { %v8599_v15 = vld [vmem:[%s15222_s1 + $0x188] ss:$16 sps:$4 sm:$0xff]  }
  0xf9   :  { %897 = vmatmul.mubr.bf16.gmra.mrb[92].mxu0 %v452_v26  ;;  %2435 = vmatmul.mubr.bf16.gmra.mrb[92].mxu1 %v8531_v27  ;;  %v307_v26 = vld [vmem:[%s15221_s0 + $0x58] sm:$0xff]  ;;  %v374_v27 = vunpack.c.h.s8.bf16 %v302_v21 }
  0xfa   :  { %904 = vmatprep.mubr.bf16.mxu0 %v457_v28  ;;  %2442 = vmatprep.mubr.bf16.mxu1 %v8532_v29  ;;  %v8571_v28 = vld [vmem:[%s15222_s1 + $0x68] ss:$16 sps:$4 sm:$0xff]   ;;  %v379_v29 = vunpack.c.l.s8.bf16 %v307_v26  ;;  %v383_v35 = vunpack.c.h.s8.bf16 %v307_v26 }
  0xfb   :  { %v8606_v26 = vld [vmem:[%s15222_s1 + $0x1c8] ss:$16 sps:$4 sm:$0xff]  }
 0x101   :  { %905 = vmatmul.mubr.bf16.gmra.mrb[96].mxu0 %v456_v31  ;;  %2443 = vmatmul.mubr.bf16.gmra.mrb[96].mxu1 %v8534_v32  ;;  %v8624_v31 = vld [vmem:[%s15223_s5 + $0x10] sm:$0xff]  }
 0x102   :  { %912 = vmatprep.mubr.bf16.mxu0 %v461_v33  ;;  %2450 = vmatprep.mubr.bf16.mxu1 %v8536_v34  ;;  %v306_v32 = vld [vmem:[%s15221_s0 + $0x50] sm:$0xff]  ;;  %v8574_v34 = vld [vmem:[%s15222_s1 + $0x88] ss:$16 sps:$4 sm:$0xff]  }
 0x103   :  { %v378_v33 = vunpack.c.l.s8.bf16 %v306_v32 }
 0x109   :  { %913 = vmatmul.mubr.bf16.gmra.mrb[100].mxu0 %v460_v36  ;;  %2451 = vmatmul.mubr.bf16.gmra.mrb[100].mxu1 %v8538_v37  ;;  %v8575_v36 = vld [vmem:[%s15222_s1 + $0xac] ss:$16 sps:$4 sm:$0xff]  }
 0x10a   :  { %920 = vmatprep.mubr.bf16.mxu0 %v465_v38  ;;  %2458 = vmatprep.mubr.bf16.mxu1 %v8539_v39  ;;  %v311_v37 = vld [vmem:[%s15221_s0 + $0x78] sm:$0xff]  ;;  %v382_v38 = vunpack.c.h.s8.bf16 %v306_v32 }
 0x10b   :  { %v8577_v39 = vld [vmem:[%s15222_s1 + $0xa8] ss:$16 sps:$4 sm:$0xff]   ;;  %v387_v40 = vunpack.c.l.s8.bf16 %v311_v37 }
 0x111   :  { %921 = vmatmul.mubr.bf16.gmra.mrb[104].mxu0 %v464_v41  ;;  %2459 = vmatmul.mubr.bf16.gmra.mrb[104].mxu1 %v8541_v42  ;;  %v8578_v41 = vld [vmem:[%s15222_s1 + $0xcc] ss:$16 sps:$4 sm:$0xff]   ;;  %v8631_v42 = vld [vmem:[%s15224_s4 + $0x10] sm:$0xff]  }
 0x112   :  { %928 = vmatprep.mubr.bf16.mxu0 %v469_v43  ;;  %2466 = vmatprep.mubr.bf16.mxu1 %v8543_v44  ;;  %v310_v43 = vld [vmem:[%s15221_s0 + $0x70] sm:$0xff] }
 0x113   :  { %v386_v44 = vunpack.c.l.s8.bf16 %v310_v43 }
 0x119   :  { %929 = vmatmul.mubr.bf16.gmra.mrb[108].mxu0 %v468_v46  ;;  %2467 = vmatmul.mubr.bf16.gmra.mrb[108].mxu1 %v8545_v47  ;;  %v391_v46 = vunpack.c.h.s8.bf16 %v311_v37  ;;  %v8581_v47 = vld [vmem:[%s15222_s1 + $0xec] ss:$16 sps:$4 sm:$0xff]   ;;  %v8669_v37 = vld [vmem:[%s15223_s5 + $0x30] sm:$0xff]  }
 0x11a   :  { %936 = vmatprep.mubr.bf16.mxu0 %v473_v48  ;;  %2474 = vmatprep.mubr.bf16.mxu1 %v8546_v49  ;;  %v315_v48 = vld [vmem:[%s15221_s0 + $0x98] sm:$0xff]  ;;  %v390_v49 = vunpack.c.h.s8.bf16 %v310_v43 }
 0x121   :  { %937 = vmatmul.mubr.bf16.gmra.mrb[112].mxu0 %v472_v54  ;;  %2475 = vmatmul.mubr.bf16.gmra.mrb[112].mxu1 %v8548_v52  ;;  %v8584_v52 = vld [vmem:[%s15222_s1 + $0x10c] ss:$16 sps:$4 sm:$0xff]   ;;  %v314_v54 = vld [vmem:[%s15221_s0 + $0x90] sm:$0xff] }
 0x122   :  { %944 = vmatprep.mubr.bf16.mxu0 %v477_v55  ;;  %2482 = vmatprep.mubr.bf16.mxu1 %v8550_v53  ;;  %v8638_v53 = vld [vmem:[%s15223_s5 + $0x18] sm:$0xff]   ;;  %v394_v55 = vunpack.c.l.s8.bf16 %v314_v54 }
 0x129   :  { %945 = vmatmul.mubr.bf16.gmra.mrb[116].mxu0 %v476_v57  ;;  %2483 = vmatmul.mubr.bf16.gmra.mrb[116].mxu1 %v8552_v58  ;;  %v399_v57 = vunpack.c.h.s8.bf16 %v315_v48  ;;  %v8587_v58 = vld [vmem:[%s15222_s1 + $0x12c] ss:$16 sps:$4 sm:$0xff]  }
 0x12a   :  { %952 = vmatprep.mubr.bf16.mxu0 %v481_v59  ;;  %2490 = vmatprep.mubr.bf16.mxu1 %v8553_v60  ;;  %v319_v59 = vld [vmem:[%s15221_s0 + $0xb8] sm:$0xff]  ;;  %v398_v60 = vunpack.c.h.s8.bf16 %v314_v54 }
 0x12b   :  { %v8621_v54 = vld [vmem:[%s15222_s1 + $0x26c] ss:$16 sps:$4 sm:$0xff]  }
 0x131   :  { %953 = vmatmul.mubr.bf16.gmra.mrb[120].mxu0 %v480_v2  ;;  %2491 = vmatmul.mubr.bf16.gmra.mrb[120].mxu1 %v8555_v63  ;;  %v8590_v63 = vld [vmem:[%s15222_s1 + $0x14c] ss:$16 sps:$4 sm:$0xff]   ;;  %v318_v2 = vld [vmem:[%s15221_s0 + $0xb0] sm:$0xff] }
 0x132   :  { %960 = vmatprep.mubr.bf16.mxu0 %v485_v3  ;;  %2498 = vmatprep.mubr.bf16.mxu1 %v8557_v1  ;;  %v8645_v1 = vld [vmem:[%s15224_s4 + $0x18] sm:$0xff]   ;;  %v402_v3 = vunpack.c.l.s8.bf16 %v318_v2 }
 0x139   :  { %961 = vmatmul.mubr.bf16.gmra.mrb[124].mxu0 %v484_v5  ;;  %2499 = vmatmul.mubr.bf16.gmra.mrb[124].mxu1 %v8559_v6  ;;  %v407_v5 = vunpack.c.h.s8.bf16 %v319_v59  ;;  %v8593_v6 = vld [vmem:[%s15222_s1 + $0x16c] ss:$16 sps:$4 sm:$0xff]  }
 0x13a   :  { %1001 = vmatprep.mubr.bf16.mxu0 %v363_v7  ;;  %2539 = vmatprep.mubr.bf16.mxu1 %v8562_v8  ;;  %v323_v7 = vld [vmem:[%s15221_s0 + $0xd8] sm:$0xff]  ;;  %v406_v8 = vunpack.c.h.s8.bf16 %v318_v2 }
 0x13b   :  { %v343_v2 = vld [vmem:[%s15221_s0 + $0x178] sm:$0xff] }
 0x141   :  { %1002 = vmatmul.mubr.bf16.vlgmr.msra.gmra.mrb[0].mxu0 %v362_v11  ;;  %2540 = vmatmul.mubr.bf16.vlgmr.msra.gmra.mrb[0].mxu1 %v8560_v10  ;;  %v411_v10 = vunpack.c.l.s8.bf16 %v323_v7  ;;  %v8597_v11 = vld [vmem:[%s15222_s1 + $0x18c] ss:$16 sps:$4 sm:$0xff]  }
 0x142   :  { %1009 = vmatprep.mubr.bf16.mxu0 %v367_v12  ;;  %2547 = vmatprep.mubr.bf16.mxu1 %v8563_v13  ;;  %v8652_v12 = vld [vmem:[%s15223_s5 + $0x20] sm:$0xff]   ;;  %v322_v13 = vld [vmem:[%s15221_s0 + $0xd0] sm:$0xff] }
 0x143   :  { %8095 = vmatpush3.bf16.msra.mxu1 %v8596_v51  ;;  %8015 = vmatpush3.bf16.msra.mxu0 %v8603_v62  ;;  %v395_v51 = vunpack.c.l.s8.bf16 %v315_v48  ;;  %v403_v62 = vunpack.c.l.s8.bf16 %v319_v59  ;;  %v8625_v59 = vld [vmem:[%s15222_s1 + $0x28c] ss:$16 sps:$4 sm:$0xff]  }
 0x144   :  { %8096 = vmatprep.subr.bf16.mxu1 %v8610_v14  ;;  %8016 = vmatprep.subr.bf16.mxu0 %v8617_v20 }
 0x147   :  { %8097 = vmatpush3.bf16.msra.mxu1 %v8610_v14  ;;  %8017 = vmatpush3.bf16.msra.mxu0 %v8617_v20  ;;  %v410_v14 = vunpack.c.l.s8.bf16 %v322_v13  ;;  %v8602_v20 = vld [vmem:[%s15222_s1 + $0x1a8] ss:$16 sps:$4 sm:$0xff]  }
 0x148   :  { %8098 = vmatprep.subr.bf16.mxu1 %v8624_v31  ;;  %8018 = vmatprep.subr.bf16.mxu0 %v8631_v42 }
 0x149   :  { %1010 = vmatmul.mubr.bf16.gmra.mrb[4].mxu0 %v366_v16  ;;  %2548 = vmatmul.mubr.bf16.gmra.mrb[4].mxu1 %v8565_v17  ;;  %v415_v16 = vunpack.c.h.s8.bf16 %v323_v7  ;;  %v8600_v17 = vld [vmem:[%s15222_s1 + $0x1ac] ss:$16 sps:$4 sm:$0xff]   ;;  %v342_v7 = vld [vmem:[%s15221_s0 + $0x170] sm:$0xff] }
 0x14a   :  { %1017 = vmatprep.mubr.bf16.mxu0 %v371_v18  ;;  %2555 = vmatprep.mubr.bf16.mxu1 %v8566_v19  ;;  %v327_v18 = vld [vmem:[%s15221_s0 + $0xf8] sm:$0xff]  ;;  %v414_v19 = vunpack.c.h.s8.bf16 %v322_v13  ;;  %v454_v13 = vunpack.c.h.s8.bf16 %v342_v7 }
 0x14b   :  { %8099 = vmatpush3.bf16.msra.mxu1 %v8624_v31  ;;  %8019 = vmatpush3.bf16.msra.mxu0 %v8631_v42  ;;  %v419_v21 = vunpack.c.l.s8.bf16 %v327_v18  ;;  %v8664_v31 = vld [vmem:[%s15223_s5 + $0x28] sm:$0xff]  }
 0x14c   :  { %8100 = vmatprep.subr.bf16.mxu1 %v8638_v53  ;;  %8020 = vmatprep.subr.bf16.mxu0 %v8645_v1  ;;  %v8613_v42 = vld [vmem:[%s15222_s1 + $0x208] ss:$16 sps:$4 sm:$0xff]  }
 0x14f   :  { %8101 = vmatpush3.bf16.msra.mxu1 %v8638_v53  ;;  %8021 = vmatpush3.bf16.msra.mxu0 %v8645_v1  ;;  %v8628_v1 = vld [vmem:[%s15222_s1 + $0x2ac] ss:$16 sps:$4 sm:$0xff]  }
 0x150   :  { %8102 = vmatprep.subr.bf16.mxu1 %v8652_v12 }
 0x151   :  { %1018 = vmatmul.mubr.bf16.gmra.mrb[8].mxu0 %v370_v22  ;;  %2556 = vmatmul.mubr.bf16.gmra.mrb[8].mxu1 %v8568_v23  ;;  %v8604_v22 = vld [vmem:[%s15222_s1 + $0x1cc] ss:$16 sps:$4 sm:$0xff]   ;;  %v8659_v23 = vld [vmem:[%s15224_s4 + $0x20] sm:$0xff]  }
 0x152   :  { %1025 = vmatprep.mubr.bf16.mxu0 %v375_v24  ;;  %2563 = vmatprep.mubr.bf16.mxu1 %v8569_v25  ;;  %v326_v24 = vld [vmem:[%s15221_s0 + $0xf0] sm:$0xff] }
 0x153   :  { %8103 = vmatpush3.bf16.msra.mxu1 %v8652_v12  ;;  %8022 = vmatprep.subr.bf16.mxu0 %v8659_v23  ;;  %v418_v25 = vunpack.c.l.s8.bf16 %v326_v24  ;;  %v422_v32 = vunpack.c.h.s8.bf16 %v326_v24  ;;  %v347_v12 = vld [vmem:[%s15221_s0 + $0x198] sm:$0xff] }
 0x154   :  { %8023 = vmatpush3.bf16.msra.mxu0 %v8659_v23  ;;  %8104 = vmatprep.subr.bf16.mxu1 %v8664_v31  ;;  %v8644_v24 = vld [vmem:[%s15222_s1 + $0x328] ss:$16 sps:$4 sm:$0xff]  }
 0x157   :  { %8105 = vmatpush3.bf16.msra.mxu1 %v8664_v31  ;;  %v8649_v31 = vld [vmem:[%s15222_s1 + $0x36c] ss:$16 sps:$4 sm:$0xff]  }
 0x158   :  { %8106 = vmatprep.subr.bf16.mxu1 %v8669_v37 }
 0x159   :  { %1026 = vmatmul.mubr.bf16.gmra.mrb[12].mxu0 %v374_v27  ;;  %2564 = vmatmul.mubr.bf16.gmra.mrb[12].mxu1 %v8571_v28  ;;  %v423_v27 = vunpack.c.h.s8.bf16 %v327_v18  ;;  %v8607_v28 = vld [vmem:[%s15222_s1 + $0x1ec] ss:$16 sps:$4 sm:$0xff]  }
 0x15a   :  { %1033 = vmatprep.mubr.bf16.mxu0 %v379_v29  ;;  %2571 = vmatprep.mubr.bf16.mxu1 %v8572_v30  ;;  %v331_v29 = vld [vmem:[%s15221_s0 + $0x118] sm:$0xff]  ;;  %v8663_v30 = vld [vmem:[%s15224_s4 + $0x28] sm:$0xff]  }
 0x15b   :  { %8024 = vmatprep.subr.bf16.mxu0 %v8663_v30  ;;  %8107 = vmatpush3.bf16.msra.mxu1 %v8669_v37  ;;  %v431_v43 = vunpack.c.h.s8.bf16 %v331_v29 }
 0x15c   :  { %8025 = vmatpush3.bf16.msra.mxu0 %v8663_v30 }
 0x161   :  { %1034 = vmatmul.mubr.bf16.gmra.mrb[16].mxu0 %v378_v33  ;;  %2572 = vmatmul.mubr.bf16.gmra.mrb[16].mxu1 %v8574_v34  ;;  %v8609_v33 = vld [vmem:[%s15222_s1 + $0x1e8] ss:$16 sps:$4 sm:$0xff]   ;;  %v427_v34 = vunpack.c.l.s8.bf16 %v331_v29 }
 0x162   :  { %1041 = vmatprep.mubr.bf16.mxu0 %v383_v35  ;;  %2579 = vmatprep.mubr.bf16.mxu1 %v8575_v36  ;;  %v8611_v35 = vld [vmem:[%s15222_s1 + $0x20c] ss:$16 sps:$4 sm:$0xff]   ;;  %v8668_v36 = vld [vmem:[%s15224_s4 + $0x30] sm:$0xff]   ;;  %v8648_v29 = vld [vmem:[%s15222_s1 + $0x348] ss:$16 sps:$4 sm:$0xff]  }
 0x163   :  { %8026 = vmatprep.subr.bf16.mxu0 %v8668_v36 }
 0x164   :  { %8027 = vmatpush3.bf16.msra.mxu0 %v8668_v36 }
 0x169   :  { %1042 = vmatmul.mubr.bf16.gmra.mrb[20].mxu0 %v382_v38  ;;  %2580 = vmatmul.mubr.bf16.gmra.mrb[20].mxu1 %v8577_v39  ;;  %v330_v38 = vld [vmem:[%s15221_s0 + $0x110] sm:$0xff]  ;;  %v8670_v39 = vld [vmem:[%s15224_s4 + $0x38] sm:$0xff]  }
 0x16a   :  { %1049 = vmatprep.mubr.bf16.mxu0 %v387_v40  ;;  %2587 = vmatprep.mubr.bf16.mxu1 %v8578_v41  ;;  %v8671_v40 = vld [vmem:[%s15223_s5 + $0x38] sm:$0xff]   ;;  %v426_v41 = vunpack.c.l.s8.bf16 %v330_v38 }
 0x16b   :  { %8028 = vmatprep.subr.bf16.mxu0 %v8670_v39  ;;  %8108 = vmatprep.subr.bf16.mxu1 %v8671_v40 }
 0x16c   :  { %8029 = vmatpush3.bf16.msra.mxu0 %v8670_v39  ;;  %8109 = vmatpush3.bf16.msra.mxu1 %v8671_v40 }
 0x16d   :  { %6698 = vmatprep.subr.bf16.mxu1 %v15231_v0 }
 0x171   :  { %1050 = vmatmul.mubr.bf16.gmra.mrb[24].mxu0 %v386_v44  ;;  %2588 = vmatmul.mubr.bf16.gmra.mrb[24].mxu1 %v8580_v45  ;;  %v8614_v44 = vld [vmem:[%s15222_s1 + $0x22c] ss:$16 sps:$4 sm:$0xff]  }
 0x172   :  { %1057 = vmatprep.mubr.bf16.mxu0 %v391_v46  ;;  %2595 = vmatprep.mubr.bf16.mxu1 %v8581_v47  ;;  %v335_v45 = vld [vmem:[%s15221_s0 + $0x138] sm:$0xff]  ;;  %v430_v46 = vunpack.c.h.s8.bf16 %v330_v38 }
 0x173   :  { %v8616_v47 = vld [vmem:[%s15222_s1 + $0x228] ss:$16 sps:$4 sm:$0xff]   ;;  %v435_v48 = vunpack.c.l.s8.bf16 %v335_v45  ;;  %v439_v53 = vunpack.c.h.s8.bf16 %v335_v45 }
 0x174   :  { %v8651_v38 = vld [vmem:[%s15222_s1 + $0x368] ss:$16 sps:$4 sm:$0xff]  }
 0x179   :  { %1058 = vmatmul.mubr.bf16.gmra.mrb[28].mxu0 %v390_v49  ;;  %2596 = vmatmul.mubr.bf16.gmra.mrb[28].mxu1 %v8583_v50  ;;  %v8618_v49 = vld [vmem:[%s15222_s1 + $0x24c] ss:$16 sps:$4 sm:$0xff]   ;;  %v334_v50 = vld [vmem:[%s15221_s0 + $0x130] sm:$0xff] }
 0x17a   :  { %1065 = vmatprep.mubr.bf16.mxu0 %v395_v51  ;;  %2603 = vmatprep.mubr.bf16.mxu1 %v8584_v52  ;;  %v434_v51 = vunpack.c.l.s8.bf16 %v334_v50  ;;  %v8620_v52 = vld [vmem:[%s15222_s1 + $0x248] ss:$16 sps:$4 sm:$0xff]  }
 0x181   :  { %1066 = vmatmul.mubr.bf16.gmra.mrb[32].mxu0 %v394_v55  ;;  %2604 = vmatmul.mubr.bf16.gmra.mrb[32].mxu1 %v8586_v56  ;;  %v339_v55 = vld [vmem:[%s15221_s0 + $0x158] sm:$0xff]  ;;  %v438_v56 = vunpack.c.h.s8.bf16 %v334_v50 }
 0x182   :  { %1073 = vmatprep.mubr.bf16.mxu0 %v399_v57  ;;  %2611 = vmatprep.mubr.bf16.mxu1 %v8587_v58  ;;  %v8623_v57 = vld [vmem:[%s15222_s1 + $0x268] ss:$16 sps:$4 sm:$0xff]   ;;  %v443_v58 = vunpack.c.l.s8.bf16 %v339_v55 }
 0x189   :  { %1074 = vmatmul.mubr.bf16.gmra.mrb[36].mxu0 %v398_v60  ;;  %2612 = vmatmul.mubr.bf16.gmra.mrb[36].mxu1 %v8589_v61  ;;  %v338_v60 = vld [vmem:[%s15221_s0 + $0x150] sm:$0xff] }
 0x18a   :  { %1081 = vmatprep.mubr.bf16.mxu0 %v403_v62  ;;  %2619 = vmatprep.mubr.bf16.mxu1 %v8590_v63  ;;  %v442_v61 = vunpack.c.l.s8.bf16 %v338_v60  ;;  %v8627_v62 = vld [vmem:[%s15222_s1 + $0x288] ss:$16 sps:$4 sm:$0xff]   ;;  %v447_v63 = vunpack.c.h.s8.bf16 %v339_v55 }
 0x191   :  { %1082 = vmatmul.mubr.bf16.gmra.mrb[40].mxu0 %v402_v3  ;;  %2620 = vmatmul.mubr.bf16.gmra.mrb[40].mxu1 %v8592_v4  ;;  %v446_v3 = vunpack.c.h.s8.bf16 %v338_v60  ;;  %v8630_v4 = vld [vmem:[%s15222_s1 + $0x2a8] ss:$16 sps:$4 sm:$0xff]  }
 0x192   :  { %1089 = vmatprep.mubr.bf16.mxu0 %v407_v5  ;;  %2627 = vmatprep.mubr.bf16.mxu1 %v8593_v6  ;;  %v451_v5 = vunpack.c.l.s8.bf16 %v343_v2  ;;  %v8632_v6 = vld [vmem:[%s15222_s1 + $0x2cc] ss:$16 sps:$4 sm:$0xff]  }
 0x199   :  { %1090 = vmatmul.mubr.bf16.gmra.mrb[44].mxu0 %v406_v8  ;;  %2628 = vmatmul.mubr.bf16.gmra.mrb[44].mxu1 %v8595_v9  ;;  %v450_v8 = vunpack.c.l.s8.bf16 %v342_v7  ;;  %v8634_v9 = vld [vmem:[%s15222_s1 + $0x2c8] ss:$16 sps:$4 sm:$0xff]  }
 0x19a   :  { %1097 = vmatprep.mubr.bf16.mxu0 %v411_v10  ;;  %2635 = vmatprep.mubr.bf16.mxu1 %v8597_v11  ;;  %v455_v10 = vunpack.c.h.s8.bf16 %v343_v2  ;;  %v8635_v11 = vld [vmem:[%s15222_s1 + $0x2ec] ss:$16 sps:$4 sm:$0xff]  }
 0x1a1   :  { %1098 = vmatmul.mubr.bf16.gmra.mrb[48].mxu0 %v410_v14  ;;  %2636 = vmatmul.mubr.bf16.gmra.mrb[48].mxu1 %v8599_v15  ;;  %v8637_v14 = vld [vmem:[%s15222_s1 + $0x2e8] ss:$16 sps:$4 sm:$0xff]   ;;  %v459_v15 = vunpack.c.l.s8.bf16 %v347_v12 }
 0x1a2   :  { %1105 = vmatprep.mubr.bf16.mxu0 %v415_v16  ;;  %2643 = vmatprep.mubr.bf16.mxu1 %v8600_v17  ;;  %v8639_v16 = vld [vmem:[%s15222_s1 + $0x30c] ss:$16 sps:$4 sm:$0xff]   ;;  %v346_v17 = vld [vmem:[%s15221_s0 + $0x190] sm:$0xff] }
 0x1a3   :  { %v458_v18 = vunpack.c.l.s8.bf16 %v346_v17  ;;  %v462_v23 = vunpack.c.h.s8.bf16 %v346_v17 }
 0x1a9   :  { %1106 = vmatmul.mubr.bf16.gmra.mrb[52].mxu0 %v414_v19  ;;  %2644 = vmatmul.mubr.bf16.gmra.mrb[52].mxu1 %v8602_v20  ;;  %v8641_v19 = vld [vmem:[%s15222_s1 + $0x308] ss:$16 sps:$4 sm:$0xff]   ;;  %v463_v20 = vunpack.c.h.s8.bf16 %v347_v12 }
 0x1aa   :  { %1113 = vmatprep.mubr.bf16.mxu0 %v419_v21  ;;  %2651 = vmatprep.mubr.bf16.mxu1 %v8604_v22  ;;  %v8642_v21 = vld [vmem:[%s15222_s1 + $0x32c] ss:$16 sps:$4 sm:$0xff]  }
 0x1ab   :  { %v351_v22 = vld [vmem:[%s15221_s0 + $0x1b8] sm:$0xff] }
 0x1ac   :  { %v471_v30 = vunpack.c.h.s8.bf16 %v351_v22 }
 0x1b1   :  { %1114 = vmatmul.mubr.bf16.gmra.mrb[56].mxu0 %v418_v25  ;;  %2652 = vmatmul.mubr.bf16.gmra.mrb[56].mxu1 %v8606_v26  ;;  %v467_v25 = vunpack.c.l.s8.bf16 %v351_v22  ;;  %v8646_v26 = vld [vmem:[%s15222_s1 + $0x34c] ss:$16 sps:$4 sm:$0xff]  }
 0x1b2   :  { %1121 = vmatprep.mubr.bf16.mxu0 %v423_v27  ;;  %2659 = vmatprep.mubr.bf16.mxu1 %v8607_v28  ;;  %v350_v27 = vld [vmem:[%s15221_s0 + $0x1b0] sm:$0xff] }
 0x1b3   :  { %v466_v28 = vunpack.c.l.s8.bf16 %v350_v27  ;;  %v470_v37 = vunpack.c.h.s8.bf16 %v350_v27 }
 0x1b9   :  { %1122 = vmatmul.mubr.bf16.gmra.mrb[60].mxu0 %v422_v32  ;;  %2660 = vmatmul.mubr.bf16.gmra.mrb[60].mxu1 %v8609_v33  ;;  %v355_v32 = vld [vmem:[%s15221_s0 + $0x1d8] sm:$0xff] }
 0x1ba   :  { %1129 = vmatprep.mubr.bf16.mxu0 %v427_v34  ;;  %2667 = vmatprep.mubr.bf16.mxu1 %v8611_v35 }
 0x1c1   :  { %1130 = vmatmul.mubr.bf16.gmra.mrb[64].mxu0 %v426_v41  ;;  %2668 = vmatmul.mubr.bf16.gmra.mrb[64].mxu1 %v8613_v42  ;;  %v475_v41 = vunpack.c.l.s8.bf16 %v355_v32  ;;  %v8653_v42 = vld [vmem:[%s15222_s1 + $0x38c] ss:$16 sps:$4 sm:$0xff]  }
 0x1c2   :  { %1137 = vmatprep.mubr.bf16.mxu0 %v431_v43  ;;  %2675 = vmatprep.mubr.bf16.mxu1 %v8614_v44 }
 0x1c9   :  { %1138 = vmatmul.mubr.bf16.gmra.mrb[68].mxu0 %v430_v46  ;;  %2676 = vmatmul.mubr.bf16.gmra.mrb[68].mxu1 %v8616_v47  ;;  %v354_v47 = vld [vmem:[%s15221_s0 + $0x1d0] sm:$0xff] }
 0x1ca   :  { %1145 = vmatprep.mubr.bf16.mxu0 %v435_v48  ;;  %2683 = vmatprep.mubr.bf16.mxu1 %v8618_v49 }
 0x1d1   :  { %1146 = vmatmul.mubr.bf16.gmra.mrb[72].mxu0 %v434_v51  ;;  %2684 = vmatmul.mubr.bf16.gmra.mrb[72].mxu1 %v8620_v52  ;;  %v474_v52 = vunpack.c.l.s8.bf16 %v354_v47 }
 0x1d2   :  { %1153 = vmatprep.mubr.bf16.mxu0 %v439_v53  ;;  %2691 = vmatprep.mubr.bf16.mxu1 %v8621_v54  ;;  %v8655_v53 = vld [vmem:[%s15222_s1 + $0x388] ss:$16 sps:$4 sm:$0xff]  }
 0x1d9   :  { %1154 = vmatmul.mubr.bf16.gmra.mrb[76].mxu0 %v438_v56  ;;  %2692 = vmatmul.mubr.bf16.gmra.mrb[76].mxu1 %v8623_v57  ;;  %v479_v56 = vunpack.c.h.s8.bf16 %v355_v32  ;;  %v8656_v57 = vld [vmem:[%s15222_s1 + $0x3ac] ss:$16 sps:$4 sm:$0xff]  }
 0x1da   :  { %1161 = vmatprep.mubr.bf16.mxu0 %v443_v58  ;;  %2699 = vmatprep.mubr.bf16.mxu1 %v8625_v59 }
 0x1e1   :  { %1162 = vmatmul.mubr.bf16.gmra.mrb[80].mxu0 %v442_v61  ;;  %2700 = vmatmul.mubr.bf16.gmra.mrb[80].mxu1 %v8627_v62  ;;  %v359_v62 = vld [vmem:[%s15221_s0 + $0x1f8] sm:$0xff] }
 0x1e2   :  { %1169 = vmatprep.mubr.bf16.mxu0 %v447_v63  ;;  %2707 = vmatprep.mubr.bf16.mxu1 %v8628_v1 }
 0x1e9   :  { %1170 = vmatmul.mubr.bf16.gmra.mrb[84].mxu0 %v446_v3  ;;  %2708 = vmatmul.mubr.bf16.gmra.mrb[84].mxu1 %v8630_v4  ;;  %v478_v4 = vunpack.c.h.s8.bf16 %v354_v47 }
 0x1ea   :  { %1177 = vmatprep.mubr.bf16.mxu0 %v451_v5  ;;  %2715 = vmatprep.mubr.bf16.mxu1 %v8632_v6  ;;  %v8658_v5 = vld [vmem:[%s15222_s1 + $0x3a8] ss:$16 sps:$4 sm:$0xff]  }
 0x1f1   :  { %1178 = vmatmul.mubr.bf16.gmra.mrb[88].mxu0 %v450_v8  ;;  %2716 = vmatmul.mubr.bf16.gmra.mrb[88].mxu1 %v8634_v9  ;;  %v483_v8 = vunpack.c.l.s8.bf16 %v359_v62  ;;  %v8660_v9 = vld [vmem:[%s15222_s1 + $0x3cc] ss:$16 sps:$4 sm:$0xff]  }
 0x1f2   :  { %1185 = vmatprep.mubr.bf16.mxu0 %v455_v10  ;;  %2723 = vmatprep.mubr.bf16.mxu1 %v8635_v11 }
 0x1f9   :  { %1186 = vmatmul.mubr.bf16.gmra.mrb[92].mxu0 %v454_v13  ;;  %2724 = vmatmul.mubr.bf16.gmra.mrb[92].mxu1 %v8637_v14  ;;  %v358_v14 = vld [vmem:[%s15221_s0 + $0x1f0] sm:$0xff] }
 0x1fa   :  { %1193 = vmatprep.mubr.bf16.mxu0 %v459_v15  ;;  %2731 = vmatprep.mubr.bf16.mxu1 %v8639_v16 }
 0x201   :  { %1194 = vmatmul.mubr.bf16.gmra.mrb[96].mxu0 %v458_v18  ;;  %2732 = vmatmul.mubr.bf16.gmra.mrb[96].mxu1 %v8641_v19  ;;  %v482_v19 = vunpack.c.l.s8.bf16 %v358_v14 }
 0x202   :  { %1201 = vmatprep.mubr.bf16.mxu0 %v463_v20  ;;  %2739 = vmatprep.mubr.bf16.mxu1 %v8642_v21  ;;  %v8662_v20 = vld [vmem:[%s15222_s1 + $0x3c8] ss:$16 sps:$4 sm:$0xff]  }
 0x209   :  { %1202 = vmatmul.mubr.bf16.gmra.mrb[100].mxu0 %v462_v23  ;;  %2740 = vmatmul.mubr.bf16.gmra.mrb[100].mxu1 %v8644_v24  ;;  %v487_v23 = vunpack.c.h.s8.bf16 %v359_v62  ;;  %v8665_v24 = vld [vmem:[%s15222_s1 + $0x3ec] ss:$16 sps:$4 sm:$0xff]  }
 0x20a   :  { %1209 = vmatprep.mubr.bf16.mxu0 %v467_v25  ;;  %2747 = vmatprep.mubr.bf16.mxu1 %v8646_v26 }
 0x211   :  { %1210 = vmatmul.mubr.bf16.gmra.mrb[104].mxu0 %v466_v28  ;;  %2748 = vmatmul.mubr.bf16.gmra.mrb[104].mxu1 %v8648_v29 }
 0x212   :  { %1217 = vmatprep.mubr.bf16.mxu0 %v471_v30  ;;  %2755 = vmatprep.mubr.bf16.mxu1 %v8649_v31 }
 0x214   :  { %v9535_v33 = vpop.f32.mrb[0].mxu0  ;;  %v9537_v34 = vpop.f32.mrb[0].mxu1 }
 0x215   :  { %v1005_v35 = vpop.f32.mrb[1].mxu0  ;;  %v2543_v36 = vpop.f32.mrb[1].mxu1 }
 0x216   :  { %v9542_v39 = vpop.f32.mrb[2].mxu0  ;;  %v9544_v40 = vpop.f32.mrb[2].mxu1  ;;  %v486_v35 = vunpack.c.h.s8.bf16 %v358_v14  ;;  %v8667_v36 = vld [vmem:[%s15222_s1 + $0x3e8] ss:$16 sps:$4 sm:$0xff]  }
 0x217   :  { %v3064_v43 = vpack.c.bf16 %v9542_v39, %v9535_v33  ;;  %v3581_v44 = vpack.c.bf16 %v9544_v40, %v9537_v34  ;;  %v1008_v45 = vpop.f32.mrb[3].mxu0  ;;  %v2546_v46 = vpop.f32.mrb[3].mxu1 }
 0x219   :  { %1218 = vmatmul.mubr.bf16.gmra.mrb[108].mxu0 %v470_v37  ;;  %2756 = vmatmul.mubr.bf16.gmra.mrb[108].mxu1 %v8651_v38 }
 0x21a   :  { %1225 = vmatprep.mubr.bf16.mxu0 %v475_v41  ;;  %2763 = vmatprep.mubr.bf16.mxu1 %v8653_v42 }
 0x21c   :  { %v9556_v48 = vpop.f32.mrb[4].mxu0  ;;  %v9558_v49 = vpop.f32.mrb[4].mxu1 }
 0x21d   :  { %v1013_v50 = vpop.f32.mrb[5].mxu0  ;;  %v2551_v51 = vpop.f32.mrb[5].mxu1 }
 0x21e   :  { %v9563_v54 = vpop.f32.mrb[6].mxu0  ;;  %v9565_v55 = vpop.f32.mrb[6].mxu1 }
 0x21f   :  { %v3065_v58 = vpack.c.bf16 %v9563_v54, %v9556_v48  ;;  %v3582_v59 = vpack.c.bf16 %v9565_v55, %v9558_v49  ;;  %v1016_v60 = vpop.f32.mrb[7].mxu0  ;;  %v2554_v61 = vpop.f32.mrb[7].mxu1 }
 0x221   :  { %1226 = vmatmul.mubr.bf16.gmra.mrb[112].mxu0 %v474_v52  ;;  %2764 = vmatmul.mubr.bf16.gmra.mrb[112].mxu1 %v8655_v53 }
 0x222   :  { %1233 = vmatprep.mubr.bf16.mxu0 %v479_v56  ;;  %2771 = vmatprep.mubr.bf16.mxu1 %v8656_v57 }
 0x224   :  { %v9577_v63 = vpop.f32.mrb[8].mxu0  ;;  %v9579_v1 = vpop.f32.mrb[8].mxu1 }
 0x225   :  { %v1021_v2 = vpop.f32.mrb[9].mxu0  ;;  %v2559_v3 = vpop.f32.mrb[9].mxu1 }
 0x226   :  { %v1022_v6 = vpop.f32.mrb[10].mxu0  ;;  %v2560_v7 = vpop.f32.mrb[10].mxu1 }
 0x227   :  { %v3066_v10 = vpack.c.bf16 %v1022_v6, %v9577_v63  ;;  %v3583_v11 = vpack.c.bf16 %v2560_v7, %v9579_v1  ;;  %v1024_v12 = vpop.f32.mrb[11].mxu0  ;;  %v2562_v13 = vpop.f32.mrb[11].mxu1 }
 0x229   :  { %1234 = vmatmul.mubr.bf16.gmra.mrb[116].mxu0 %v478_v4  ;;  %2772 = vmatmul.mubr.bf16.gmra.mrb[116].mxu1 %v8658_v5 }
 0x22a   :  { %1241 = vmatprep.mubr.bf16.mxu0 %v483_v8  ;;  %2779 = vmatprep.mubr.bf16.mxu1 %v8660_v9 }
 0x22c   :  { %v1027_v15 = vpop.f32.mrb[12].mxu0  ;;  %v2565_v16 = vpop.f32.mrb[12].mxu1 }
 0x22d   :  { %v1029_v17 = vpop.f32.mrb[13].mxu0  ;;  %v2567_v18 = vpop.f32.mrb[13].mxu1 }
 0x22e   :  { %v1030_v21 = vpop.f32.mrb[14].mxu0  ;;  %v2568_v22 = vpop.f32.mrb[14].mxu1 }
 0x22f   :  { %v3067_v25 = vpack.c.bf16 %v1030_v21, %v1027_v15  ;;  %v3584_v26 = vpack.c.bf16 %v2568_v22, %v2565_v16  ;;  %v1032_v27 = vpop.f32.mrb[15].mxu0  ;;  %v2570_v28 = vpop.f32.mrb[15].mxu1 }
 0x231   :  { %1242 = vmatmul.mubr.bf16.gmra.mrb[120].mxu0 %v482_v19  ;;  %2780 = vmatmul.mubr.bf16.gmra.mrb[120].mxu1 %v8662_v20 }
 0x232   :  { %1249 = vmatprep.mubr.bf16.mxu0 %v487_v23  ;;  %2787 = vmatprep.mubr.bf16.mxu1 %v8665_v24 }
 0x234   :  { %v1035_v29 = vpop.f32.mrb[16].mxu0  ;;  %v2573_v30 = vpop.f32.mrb[16].mxu1 }
 0x235   :  { %v1037_v31 = vpop.f32.mrb[17].mxu0  ;;  %v2575_v32 = vpop.f32.mrb[17].mxu1 }
 0x236   :  { %v1038_v37 = vpop.f32.mrb[18].mxu0  ;;  %v2576_v38 = vpop.f32.mrb[18].mxu1 }
 0x237   :  { %v3068_v41 = vpack.c.bf16 %v1038_v37, %v1035_v29  ;;  %v3585_v42 = vpack.c.bf16 %v2576_v38, %v2573_v30  ;;  %v1040_v45 = vpop.f32.mrb[19].mxu0  ;;  %v2578_v46 = vpop.f32.mrb[19].mxu1 }
 0x239   :  { %1250 = vmatmul.mubr.bf16.gmra.mrb[124].mxu0 %v486_v35  ;;  %2788 = vmatmul.mubr.bf16.gmra.mrb[124].mxu1 %v8667_v36 }
 0x23a   :  { %8030 = vmatprep.mubr.bf16.mxu0 %v3064_v43  ;;  %8110 = vmatprep.mubr.bf16.mxu1 %v3581_v44 }
 0x23c   :  { %v1043_v47 = vpop.f32.mrb[20].mxu0  ;;  %v2581_v50 = vpop.f32.mrb[20].mxu1 }
 0x23d   :  { %v1045_v51 = vpop.f32.mrb[21].mxu0  ;;  %v2583_v52 = vpop.f32.mrb[21].mxu1 }
 0x23e   :  { %v1046_v53 = vpop.f32.mrb[22].mxu0  ;;  %v2584_v56 = vpop.f32.mrb[22].mxu1 }
 0x23f   :  { %v3069_v57 = vpack.c.bf16 %v1046_v53, %v1043_v47  ;;  %v3586_v60 = vpack.c.bf16 %v2584_v56, %v2581_v50  ;;  %v1048_v61 = vpop.f32.mrb[23].mxu0  ;;  %v2586_v62 = vpop.f32.mrb[23].mxu1 }
 0x241   :  { %8031 = vmatmul.mubr.bf16.vlgmr.msra.gmra.mrb[128].mxu0 %v3065_v58  ;;  %8111 = vmatmul.mubr.bf16.vlgmr.msra.gmra.mrb[128].mxu1 %v3582_v59 }
 0x242   :  { %8034 = vmatprep.mubr.bf16.mxu0 %v3066_v10  ;;  %8114 = vmatprep.mubr.bf16.mxu1 %v3583_v11 }
 0x244   :  { %v1051_v33 = vpop.f32.mrb[24].mxu0  ;;  %v2589_v34 = vpop.f32.mrb[24].mxu1 }
 0x245   :  { %v1053_v39 = vpop.f32.mrb[25].mxu0  ;;  %v2591_v40 = vpop.f32.mrb[25].mxu1 }
 0x246   :  { %v1054_v43 = vpop.f32.mrb[26].mxu0  ;;  %v2592_v44 = vpop.f32.mrb[26].mxu1 }
 0x247   :  { %v3070_v63 = vpack.c.bf16 %v1054_v43, %v1051_v33  ;;  %v3587_v1 = vpack.c.bf16 %v2592_v44, %v2589_v34  ;;  %v1056_v2 = vpop.f32.mrb[27].mxu0  ;;  %v2594_v3 = vpop.f32.mrb[27].mxu1 }
 0x249   :  { %8035 = vmatmul.mubr.bf16.gmra.mrb[132].mxu0 %v3067_v25  ;;  %8115 = vmatmul.mubr.bf16.gmra.mrb[132].mxu1 %v3584_v26 }
 0x24a   :  { %8038 = vmatprep.mubr.bf16.mxu0 %v3068_v41  ;;  %8118 = vmatprep.mubr.bf16.mxu1 %v3585_v42 }
 0x24c   :  { %v1059_v48 = vpop.f32.mrb[28].mxu0  ;;  %v2597_v54 = vpop.f32.mrb[28].mxu1 }
 0x24d   :  { %v1061_v49 = vpop.f32.mrb[29].mxu0  ;;  %v2599_v55 = vpop.f32.mrb[29].mxu1 }
 0x24e   :  { %v1062_v58 = vpop.f32.mrb[30].mxu0  ;;  %v2600_v59 = vpop.f32.mrb[30].mxu1 }
 0x24f   :  { %v3071_v4 = vpack.c.bf16 %v1062_v58, %v1059_v48  ;;  %v3588_v5 = vpack.c.bf16 %v2600_v59, %v2597_v54  ;;  %v1064_v6 = vpop.f32.mrb[31].mxu0  ;;  %v2602_v7 = vpop.f32.mrb[31].mxu1 }
 0x251   :  { %8039 = vmatmul.mubr.bf16.gmra.mrb[136].mxu0 %v3069_v57  ;;  %8119 = vmatmul.mubr.bf16.gmra.mrb[136].mxu1 %v3586_v60 }
 0x252   :  { %8042 = vmatprep.mubr.bf16.mxu0 %v3070_v63  ;;  %8122 = vmatprep.mubr.bf16.mxu1 %v3587_v1 }
 0x254   :  { %v1067_v8 = vpop.f32.mrb[32].mxu0  ;;  %v2605_v9 = vpop.f32.mrb[32].mxu1 }
 0x255   :  { %v1069_v10 = vpop.f32.mrb[33].mxu0  ;;  %v2607_v11 = vpop.f32.mrb[33].mxu1 }
 0x256   :  { %v1070_v12 = vpop.f32.mrb[34].mxu0  ;;  %v2608_v13 = vpop.f32.mrb[34].mxu1 }
 0x257   :  { %v3072_v14 = vpack.c.bf16 %v1070_v12, %v1067_v8  ;;  %v3589_v15 = vpack.c.bf16 %v2608_v13, %v2605_v9  ;;  %v1072_v16 = vpop.f32.mrb[35].mxu0  ;;  %v2610_v17 = vpop.f32.mrb[35].mxu1 }
 0x259   :  { %8043 = vmatmul.mubr.bf16.gmra.mrb[140].mxu0 %v3071_v4  ;;  %8123 = vmatmul.mubr.bf16.gmra.mrb[140].mxu1 %v3588_v5 }
 0x25a   :  { %8046 = vmatprep.mubr.bf16.mxu0 %v3072_v14  ;;  %8126 = vmatprep.mubr.bf16.mxu1 %v3589_v15 }
 0x25c   :  { %v1075_v18 = vpop.f32.mrb[36].mxu0  ;;  %v2613_v19 = vpop.f32.mrb[36].mxu1 }
 0x25d   :  { %v1077_v20 = vpop.f32.mrb[37].mxu0  ;;  %v2615_v21 = vpop.f32.mrb[37].mxu1 }
 0x25e   :  { %v1078_v22 = vpop.f32.mrb[38].mxu0  ;;  %v2616_v23 = vpop.f32.mrb[38].mxu1 }
 0x25f   :  { %v3073_v24 = vpack.c.bf16 %v1078_v22, %v1075_v18  ;;  %v3590_v25 = vpack.c.bf16 %v2616_v23, %v2613_v19  ;;  %v1080_v26 = vpop.f32.mrb[39].mxu0  ;;  %v2618_v27 = vpop.f32.mrb[39].mxu1 }
 0x261   :  { %8047 = vmatmul.mubr.bf16.gmra.mrb[144].mxu0 %v3073_v24  ;;  %8127 = vmatmul.mubr.bf16.gmra.mrb[144].mxu1 %v3590_v25 }
 0x264   :  { %v1083_v28 = vpop.f32.mrb[40].mxu0  ;;  %v2621_v29 = vpop.f32.mrb[40].mxu1 }
 0x265   :  { %v1085_v30 = vpop.f32.mrb[41].mxu0  ;;  %v2623_v31 = vpop.f32.mrb[41].mxu1 }
 0x266   :  { %v1086_v32 = vpop.f32.mrb[42].mxu0  ;;  %v2624_v35 = vpop.f32.mrb[42].mxu1 }
 0x267   :  { %v3074_v36 = vpack.c.bf16 %v1086_v32, %v1083_v28  ;;  %v3591_v37 = vpack.c.bf16 %v2624_v35, %v2621_v29  ;;  %v1088_v38 = vpop.f32.mrb[43].mxu0  ;;  %v2626_v41 = vpop.f32.mrb[43].mxu1 }
 0x269   :  { %8050 = vmatprep.mubr.bf16.mxu0 %v3074_v36  ;;  %8130 = vmatprep.mubr.bf16.mxu1 %v3591_v37 }
 0x26c   :  { %v1091_v42 = vpop.f32.mrb[44].mxu0  ;;  %v2629_v45 = vpop.f32.mrb[44].mxu1 }
 0x26d   :  { %v1093_v46 = vpop.f32.mrb[45].mxu0  ;;  %v2631_v47 = vpop.f32.mrb[45].mxu1 }
 0x26e   :  { %v1094_v50 = vpop.f32.mrb[46].mxu0  ;;  %v2632_v51 = vpop.f32.mrb[46].mxu1 }
 0x26f   :  { %v3075_v52 = vpack.c.bf16 %v1094_v50, %v1091_v42  ;;  %v3592_v53 = vpack.c.bf16 %v2632_v51, %v2629_v45  ;;  %v1096_v56 = vpop.f32.mrb[47].mxu0  ;;  %v2634_v57 = vpop.f32.mrb[47].mxu1 }
 0x271   :  { %8051 = vmatmul.mubr.bf16.gmra.mrb[148].mxu0 %v3075_v52  ;;  %8131 = vmatmul.mubr.bf16.gmra.mrb[148].mxu1 %v3592_v53 }
 0x274   :  { %v1099_v60 = vpop.f32.mrb[48].mxu0  ;;  %v2637_v61 = vpop.f32.mrb[48].mxu1 }
 0x275   :  { %v1101_v62 = vpop.f32.mrb[49].mxu0  ;;  %v2639_v33 = vpop.f32.mrb[49].mxu1 }
 0x276   :  { %v1102_v34 = vpop.f32.mrb[50].mxu0  ;;  %v2640_v39 = vpop.f32.mrb[50].mxu1 }
 0x277   :  { %v3076_v40 = vpack.c.bf16 %v1102_v34, %v1099_v60  ;;  %v3593_v43 = vpack.c.bf16 %v2640_v39, %v2637_v61  ;;  %v1104_v44 = vpop.f32.mrb[51].mxu0  ;;  %v2642_v63 = vpop.f32.mrb[51].mxu1 }
 0x279   :  { %8054 = vmatprep.mubr.bf16.mxu0 %v3076_v40  ;;  %8134 = vmatprep.mubr.bf16.mxu1 %v3593_v43 }
 0x27c   :  { %v1107_v1 = vpop.f32.mrb[52].mxu0  ;;  %v2645_v2 = vpop.f32.mrb[52].mxu1 }
 0x27d   :  { %v1109_v3 = vpop.f32.mrb[53].mxu0  ;;  %v2647_v48 = vpop.f32.mrb[53].mxu1 }
 0x27e   :  { %v1110_v54 = vpop.f32.mrb[54].mxu0  ;;  %v2648_v49 = vpop.f32.mrb[54].mxu1 }
 0x27f   :  { %v3077_v55 = vpack.c.bf16 %v1110_v54, %v1107_v1  ;;  %v3594_v58 = vpack.c.bf16 %v2648_v49, %v2645_v2  ;;  %v1112_v59 = vpop.f32.mrb[55].mxu0  ;;  %v2650_v4 = vpop.f32.mrb[55].mxu1 }
 0x281   :  { %8055 = vmatmul.mubr.bf16.gmra.mrb[152].mxu0 %v3077_v55  ;;  %8135 = vmatmul.mubr.bf16.gmra.mrb[152].mxu1 %v3594_v58 }
 0x284   :  { %v1115_v5 = vpop.f32.mrb[56].mxu0  ;;  %v2653_v6 = vpop.f32.mrb[56].mxu1 }
 0x285   :  { %v1117_v7 = vpop.f32.mrb[57].mxu0  ;;  %v2655_v8 = vpop.f32.mrb[57].mxu1 }
 0x286   :  { %v1118_v9 = vpop.f32.mrb[58].mxu0  ;;  %v2656_v10 = vpop.f32.mrb[58].mxu1 }
 0x287   :  { %v3078_v11 = vpack.c.bf16 %v1118_v9, %v1115_v5  ;;  %v3595_v12 = vpack.c.bf16 %v2656_v10, %v2653_v6  ;;  %v1120_v13 = vpop.f32.mrb[59].mxu0  ;;  %v2658_v14 = vpop.f32.mrb[59].mxu1 }
 0x289   :  { %8058 = vmatprep.mubr.bf16.mxu0 %v3078_v11  ;;  %8138 = vmatprep.mubr.bf16.mxu1 %v3595_v12 }
 0x28c   :  { %v1123_v15 = vpop.f32.mrb[60].mxu0  ;;  %v2661_v16 = vpop.f32.mrb[60].mxu1 }
 0x28d   :  { %v1125_v17 = vpop.f32.mrb[61].mxu0  ;;  %v2663_v18 = vpop.f32.mrb[61].mxu1 }
 0x28e   :  { %v1126_v19 = vpop.f32.mrb[62].mxu0  ;;  %v2664_v20 = vpop.f32.mrb[62].mxu1 }
 0x28f   :  { %v3079_v21 = vpack.c.bf16 %v1126_v19, %v1123_v15  ;;  %v3596_v22 = vpack.c.bf16 %v2664_v20, %v2661_v16  ;;  %v1128_v23 = vpop.f32.mrb[63].mxu0  ;;  %v2666_v24 = vpop.f32.mrb[63].mxu1 }
 0x291   :  { %8059 = vmatmul.mubr.bf16.gmra.mrb[156].mxu0 %v3079_v21  ;;  %8139 = vmatmul.mubr.bf16.gmra.mrb[156].mxu1 %v3596_v22 }
 0x294   :  { %v1131_v25 = vpop.f32.mrb[64].mxu0  ;;  %v2669_v26 = vpop.f32.mrb[64].mxu1 }
 0x295   :  { %v1133_v27 = vpop.f32.mrb[65].mxu0  ;;  %v2671_v28 = vpop.f32.mrb[65].mxu1 }
 0x296   :  { %v1134_v29 = vpop.f32.mrb[66].mxu0  ;;  %v2672_v30 = vpop.f32.mrb[66].mxu1 }
 0x297   :  { %v3080_v31 = vpack.c.bf16 %v1134_v29, %v1131_v25  ;;  %v3597_v32 = vpack.c.bf16 %v2672_v30, %v2669_v26  ;;  %v1136_v35 = vpop.f32.mrb[67].mxu0  ;;  %v2674_v36 = vpop.f32.mrb[67].mxu1 }
 0x299   :  { %8062 = vmatprep.mubr.bf16.mxu0 %v3080_v31  ;;  %8142 = vmatprep.mubr.bf16.mxu1 %v3597_v32 }
 0x29c   :  { %v1139_v37 = vpop.f32.mrb[68].mxu0  ;;  %v2677_v38 = vpop.f32.mrb[68].mxu1 }
 0x29d   :  { %v1141_v41 = vpop.f32.mrb[69].mxu0  ;;  %v2679_v42 = vpop.f32.mrb[69].mxu1 }
 0x29e   :  { %v1142_v45 = vpop.f32.mrb[70].mxu0  ;;  %v2680_v46 = vpop.f32.mrb[70].mxu1 }
 0x29f   :  { %v3081_v47 = vpack.c.bf16 %v1142_v45, %v1139_v37  ;;  %v3598_v50 = vpack.c.bf16 %v2680_v46, %v2677_v38  ;;  %v1144_v51 = vpop.f32.mrb[71].mxu0  ;;  %v2682_v52 = vpop.f32.mrb[71].mxu1 }
 0x2a1   :  { %8063 = vmatmul.mubr.bf16.gmra.mrb[160].mxu0 %v3081_v47  ;;  %8143 = vmatmul.mubr.bf16.gmra.mrb[160].mxu1 %v3598_v50 }
 0x2a4   :  { %v1147_v53 = vpop.f32.mrb[72].mxu0  ;;  %v2685_v56 = vpop.f32.mrb[72].mxu1 }
 0x2a5   :  { %v1149_v57 = vpop.f32.mrb[73].mxu0  ;;  %v2687_v60 = vpop.f32.mrb[73].mxu1 }
 0x2a6   :  { %v1150_v61 = vpop.f32.mrb[74].mxu0  ;;  %v2688_v62 = vpop.f32.mrb[74].mxu1 }
 0x2a7   :  { %v3082_v33 = vpack.c.bf16 %v1150_v61, %v1147_v53  ;;  %v3599_v34 = vpack.c.bf16 %v2688_v62, %v2685_v56  ;;  %v1152_v39 = vpop.f32.mrb[75].mxu0  ;;  %v2690_v40 = vpop.f32.mrb[75].mxu1 }
 0x2a9   :  { %8066 = vmatprep.mubr.bf16.mxu0 %v3082_v33  ;;  %8146 = vmatprep.mubr.bf16.mxu1 %v3599_v34 }
 0x2ac   :  { %v1155_v43 = vpop.f32.mrb[76].mxu0  ;;  %v2693_v44 = vpop.f32.mrb[76].mxu1 }
 0x2ad   :  { %v1157_v63 = vpop.f32.mrb[77].mxu0  ;;  %v2695_v1 = vpop.f32.mrb[77].mxu1 }
 0x2ae   :  { %v1158_v2 = vpop.f32.mrb[78].mxu0  ;;  %v2696_v3 = vpop.f32.mrb[78].mxu1 }
 0x2af   :  { %v3083_v48 = vpack.c.bf16 %v1158_v2, %v1155_v43  ;;  %v3600_v54 = vpack.c.bf16 %v2696_v3, %v2693_v44  ;;  %v1160_v49 = vpop.f32.mrb[79].mxu0  ;;  %v2698_v55 = vpop.f32.mrb[79].mxu1 }
 0x2b1   :  { %8067 = vmatmul.mubr.bf16.gmra.mrb[164].mxu0 %v3083_v48  ;;  %8147 = vmatmul.mubr.bf16.gmra.mrb[164].mxu1 %v3600_v54 }
 0x2b4   :  { %v1163_v58 = vpop.f32.mrb[80].mxu0  ;;  %v2701_v59 = vpop.f32.mrb[80].mxu1 }
 0x2b5   :  { %v1165_v4 = vpop.f32.mrb[81].mxu0  ;;  %v2703_v5 = vpop.f32.mrb[81].mxu1 }
 0x2b6   :  { %v1166_v6 = vpop.f32.mrb[82].mxu0  ;;  %v2704_v7 = vpop.f32.mrb[82].mxu1 }
 0x2b7   :  { %v3084_v8 = vpack.c.bf16 %v1166_v6, %v1163_v58  ;;  %v3601_v9 = vpack.c.bf16 %v2704_v7, %v2701_v59  ;;  %v1168_v10 = vpop.f32.mrb[83].mxu0  ;;  %v2706_v11 = vpop.f32.mrb[83].mxu1 }
 0x2b9   :  { %8070 = vmatprep.mubr.bf16.mxu0 %v3084_v8  ;;  %8150 = vmatprep.mubr.bf16.mxu1 %v3601_v9 }
 0x2bc   :  { %v1171_v12 = vpop.f32.mrb[84].mxu0  ;;  %v2709_v13 = vpop.f32.mrb[84].mxu1 }
 0x2bd   :  { %v1173_v14 = vpop.f32.mrb[85].mxu0  ;;  %v2711_v15 = vpop.f32.mrb[85].mxu1 }
 0x2be   :  { %v1174_v16 = vpop.f32.mrb[86].mxu0  ;;  %v2712_v17 = vpop.f32.mrb[86].mxu1 }
 0x2bf   :  { %v3085_v18 = vpack.c.bf16 %v1174_v16, %v1171_v12  ;;  %v3602_v19 = vpack.c.bf16 %v2712_v17, %v2709_v13  ;;  %v1176_v20 = vpop.f32.mrb[87].mxu0  ;;  %v2714_v21 = vpop.f32.mrb[87].mxu1 }
 0x2c1   :  { %8071 = vmatmul.mubr.bf16.gmra.mrb[168].mxu0 %v3085_v18  ;;  %8151 = vmatmul.mubr.bf16.gmra.mrb[168].mxu1 %v3602_v19 }
 0x2c4   :  { %v1179_v22 = vpop.f32.mrb[88].mxu0  ;;  %v2717_v23 = vpop.f32.mrb[88].mxu1 }
 0x2c5   :  { %v1181_v24 = vpop.f32.mrb[89].mxu0  ;;  %v2719_v25 = vpop.f32.mrb[89].mxu1 }
 0x2c6   :  { %v1182_v26 = vpop.f32.mrb[90].mxu0  ;;  %v2720_v27 = vpop.f32.mrb[90].mxu1 }
 0x2c7   :  { %v3086_v28 = vpack.c.bf16 %v1182_v26, %v1179_v22  ;;  %v3603_v29 = vpack.c.bf16 %v2720_v27, %v2717_v23  ;;  %v1184_v30 = vpop.f32.mrb[91].mxu0  ;;  %v2722_v31 = vpop.f32.mrb[91].mxu1 }
 0x2c9   :  { %8074 = vmatprep.mubr.bf16.mxu0 %v3086_v28  ;;  %8154 = vmatprep.mubr.bf16.mxu1 %v3603_v29 }
 0x2cc   :  { %v1187_v32 = vpop.f32.mrb[92].mxu0  ;;  %v2725_v35 = vpop.f32.mrb[92].mxu1 }
 0x2cd   :  { %v1189_v36 = vpop.f32.mrb[93].mxu0  ;;  %v2727_v37 = vpop.f32.mrb[93].mxu1 }
 0x2ce   :  { %v1190_v38 = vpop.f32.mrb[94].mxu0  ;;  %v2728_v41 = vpop.f32.mrb[94].mxu1 }
 0x2cf   :  { %v3087_v42 = vpack.c.bf16 %v1190_v38, %v1187_v32  ;;  %v3604_v45 = vpack.c.bf16 %v2728_v41, %v2725_v35  ;;  %v1192_v46 = vpop.f32.mrb[95].mxu0  ;;  %v2730_v47 = vpop.f32.mrb[95].mxu1 }
 0x2d1   :  { %8075 = vmatmul.mubr.bf16.gmra.mrb[172].mxu0 %v3087_v42  ;;  %8155 = vmatmul.mubr.bf16.gmra.mrb[172].mxu1 %v3604_v45 }
 0x2d4   :  { %v1195_v50 = vpop.f32.mrb[96].mxu0  ;;  %v2733_v51 = vpop.f32.mrb[96].mxu1 }
 0x2d5   :  { %v1197_v52 = vpop.f32.mrb[97].mxu0  ;;  %v2735_v53 = vpop.f32.mrb[97].mxu1 }
 0x2d6   :  { %v1198_v56 = vpop.f32.mrb[98].mxu0  ;;  %v2736_v57 = vpop.f32.mrb[98].mxu1 }
 0x2d7   :  { %v3088_v60 = vpack.c.bf16 %v1198_v56, %v1195_v50  ;;  %v3605_v61 = vpack.c.bf16 %v2736_v57, %v2733_v51  ;;  %v1200_v62 = vpop.f32.mrb[99].mxu0  ;;  %v2738_v33 = vpop.f32.mrb[99].mxu1 }
 0x2d9   :  { %8078 = vmatprep.mubr.bf16.mxu0 %v3088_v60  ;;  %8158 = vmatprep.mubr.bf16.mxu1 %v3605_v61 }
 0x2dc   :  { %v1203_v34 = vpop.f32.mrb[100].mxu0  ;;  %v2741_v39 = vpop.f32.mrb[100].mxu1 }
 0x2dd   :  { %v1205_v40 = vpop.f32.mrb[101].mxu0  ;;  %v2743_v43 = vpop.f32.mrb[101].mxu1 }
 0x2de   :  { %v1206_v44 = vpop.f32.mrb[102].mxu0  ;;  %v2744_v63 = vpop.f32.mrb[102].mxu1 }
 0x2df   :  { %v3089_v1 = vpack.c.bf16 %v1206_v44, %v1203_v34  ;;  %v3606_v2 = vpack.c.bf16 %v2744_v63, %v2741_v39  ;;  %v1208_v3 = vpop.f32.mrb[103].mxu0  ;;  %v2746_v48 = vpop.f32.mrb[103].mxu1 }
 0x2e1   :  { %8079 = vmatmul.mubr.bf16.gmra.mrb[176].mxu0 %v3089_v1  ;;  %8159 = vmatmul.mubr.bf16.gmra.mrb[176].mxu1 %v3606_v2  ;;  %v9617_v2 = vld [vmem:[%s15225_s6] ss:$0 sm:$0xff] }
 0x2e4   :  { %v1211_v54 = vpop.f32.mrb[104].mxu0  ;;  %v2749_v49 = vpop.f32.mrb[104].mxu1 }
 0x2e5   :  { %v1213_v55 = vpop.f32.mrb[105].mxu0  ;;  %v2751_v58 = vpop.f32.mrb[105].mxu1 }
 0x2e6   :  { %v1214_v59 = vpop.f32.mrb[106].mxu0  ;;  %v2752_v4 = vpop.f32.mrb[106].mxu1 }
 0x2e7   :  { %v3090_v5 = vpack.c.bf16 %v1214_v59, %v1211_v54  ;;  %v3607_v6 = vpack.c.bf16 %v2752_v4, %v2749_v49  ;;  %v1216_v7 = vpop.f32.mrb[107].mxu0  ;;  %v2754_v8 = vpop.f32.mrb[107].mxu1  ;;  %v9629_v4 = vld [vmem:[%s15226_s3] sm:$0xff] }
 0x2e9   :  { %8082 = vmatprep.mubr.bf16.mxu0 %v3090_v5  ;;  %8162 = vmatprep.mubr.bf16.mxu1 %v3607_v6  ;;  %v9634_v5 = vld [vmem:[%s15226_s3 + $0x8] sm:$0xff] }
 0x2ec   :  { %v1219_v9 = vpop.f32.mrb[108].mxu0  ;;  %v2757_v10 = vpop.f32.mrb[108].mxu1 }
 0x2ed   :  { %v1221_v11 = vpop.f32.mrb[109].mxu0  ;;  %v2759_v12 = vpop.f32.mrb[109].mxu1 }
 0x2ee   :  { %v1222_v13 = vpop.f32.mrb[110].mxu0  ;;  %v2760_v14 = vpop.f32.mrb[110].mxu1 }
 0x2ef   :  { %v3091_v15 = vpack.c.bf16 %v1222_v13, %v1219_v9  ;;  %v3608_v16 = vpack.c.bf16 %v2760_v14, %v2757_v10  ;;  %v1224_v17 = vpop.f32.mrb[111].mxu0  ;;  %v2762_v18 = vpop.f32.mrb[111].mxu1  ;;  %v9643_v10 = vld [vmem:[%s15226_s3 + $0x10] sm:$0xff]  ;;  %v9655_v14 = vld [vmem:[%s15226_s3 + $0x18] sm:$0xff] }
 0x2f1   :  { %8083 = vmatmul.mubr.bf16.gmra.mrb[180].mxu0 %v3091_v15  ;;  %8163 = vmatmul.mubr.bf16.gmra.mrb[180].mxu1 %v3608_v16 }
 0x2f4   :  { %v1227_v19 = vpop.f32.mrb[112].mxu0  ;;  %v2765_v20 = vpop.f32.mrb[112].mxu1 }
 0x2f5   :  { %v1229_v21 = vpop.f32.mrb[113].mxu0  ;;  %v2767_v22 = vpop.f32.mrb[113].mxu1 }
 0x2f6   :  { %v1230_v23 = vpop.f32.mrb[114].mxu0  ;;  %v2768_v24 = vpop.f32.mrb[114].mxu1 }
 0x2f7   :  { %v3092_v25 = vpack.c.bf16 %v1230_v23, %v1227_v19  ;;  %v3609_v26 = vpack.c.bf16 %v2768_v24, %v2765_v20  ;;  %v1232_v27 = vpop.f32.mrb[115].mxu0  ;;  %v2770_v28 = vpop.f32.mrb[115].mxu1  ;;  %v9667_v19 = vld [vmem:[%s15226_s3 + $0x20] sm:$0xff] }
 0x2f9   :  { %8086 = vmatprep.mubr.bf16.mxu0 %v3092_v25  ;;  %8166 = vmatprep.mubr.bf16.mxu1 %v3609_v26 }
 0x2fc   :  { %v1235_v29 = vpop.f32.mrb[116].mxu0  ;;  %v2773_v30 = vpop.f32.mrb[116].mxu1 }
 0x2fd   :  { %v1237_v31 = vpop.f32.mrb[117].mxu0  ;;  %v2775_v32 = vpop.f32.mrb[117].mxu1 }
 0x2fe   :  { %v1238_v35 = vpop.f32.mrb[118].mxu0  ;;  %v2776_v36 = vpop.f32.mrb[118].mxu1  ;;  %v9687_v31 = vld [vmem:[%s15226_s3 + $0x28] sm:$0xff] }
 0x2ff   :  { %v3093_v37 = vpack.c.bf16 %v1238_v35, %v1235_v29  ;;  %v3610_v38 = vpack.c.bf16 %v2776_v36, %v2773_v30  ;;  %v1240_v41 = vpop.f32.mrb[119].mxu0  ;;  %v2778_v42 = vpop.f32.mrb[119].mxu1 }
 0x300   :  { %v9700_v42 = vld [vmem:[%s15226_s3 + $0x30] sm:$0xff] }
 0x301   :  { %8087 = vmatmul.mubr.bf16.gmra.mrb[184].mxu0 %v3093_v37  ;;  %8167 = vmatmul.mubr.bf16.gmra.mrb[184].mxu1 %v3610_v38 }
 0x304   :  { %v1243_v45 = vpop.f32.mrb[120].mxu0  ;;  %v2781_v46 = vpop.f32.mrb[120].mxu1 }
 0x305   :  { %v1245_v47 = vpop.f32.mrb[121].mxu0  ;;  %v2783_v50 = vpop.f32.mrb[121].mxu1 }
 0x306   :  { %v1246_v51 = vpop.f32.mrb[122].mxu0  ;;  %v2784_v52 = vpop.f32.mrb[122].mxu1 }
 0x307   :  { %v3094_v53 = vpack.c.bf16 %v1246_v51, %v1243_v45  ;;  %v3611_v56 = vpack.c.bf16 %v2784_v52, %v2781_v46  ;;  %v1248_v57 = vpop.f32.mrb[123].mxu0  ;;  %v2786_v60 = vpop.f32.mrb[123].mxu1 }
 0x308   :  { %v9716_v60 = vld [vmem:[%s15226_s3 + $0x38] sm:$0xff] }
 0x309   :  { %8090 = vmatprep.mubr.bf16.mxu0 %v3094_v53  ;;  %8170 = vmatprep.mubr.bf16.mxu1 %v3611_v56 }
 0x30c   :  { %v1251_v61 = vpop.f32.mrb[124].mxu0  ;;  %v2789_v62 = vpop.f32.mrb[124].mxu1 }
 0x30d   :  { %v1253_v33 = vpop.f32.mrb[125].mxu0  ;;  %v2791_v34 = vpop.f32.mrb[125].mxu1 }
 0x30e   :  { %v1254_v39 = vpop.f32.mrb[126].mxu0  ;;  %v2792_v40 = vpop.f32.mrb[126].mxu1  ;;  %v9723_v33 = vld [vmem:[%s15226_s3 + $0x40] sm:$0xff] }
 0x30f   :  { %v3095_v43 = vpack.c.bf16 %v1254_v39, %v1251_v61  ;;  %v3612_v44 = vpack.c.bf16 %v2792_v40, %v2789_v62  ;;  %v1256_v63 = vpop.f32.mrb[127].mxu0  ;;  %v2794_v1 = vpop.f32.mrb[127].mxu1 }
 0x311   :  { %8091 = vmatmul.mubr.bf16.gmra.mrb[188].mxu0 %v3095_v43  ;;  %8171 = vmatmul.mubr.bf16.gmra.mrb[188].mxu1 %v3612_v44 }
 0x312   :  { %6053 = vmatprep.mubr.bf16.mxu0 %v15231_v0 }
 0x314   :  { %v8032_v3 = vpop.f32.mrb[128].mxu0  ;;  %v9619_v48 = vpop.f32.mrb[128].mxu1 }
 0x315   :  { %v3198_v54 = vpop.f32.mrb[129].mxu0  ;;  %v9621_v49 = vpop.f32.mrb[129].mxu1  ;;  %v3207_v8 = vadd.f32 %v8032_v3, %v9617_v2 }
 0x316   :  { %v3199_v55 = vadd.f32 %v9617_v2, %v3198_v54  ;;  %v8033_v58 = vpop.f32.mrb[130].mxu0  ;;  %v9624_v59 = vpop.f32.mrb[130].mxu1 }
 0x317   :  { %v3201_v6 = vpop.f32.mrb[131].mxu0  ;;  %v9636_v7 = vpop.f32.mrb[131].mxu1  ;;  %v3210_v12 = vadd.f32 %v8033_v58, %v9617_v2  ;;  %v9658_v15 = vadd.f32 %v3207_v8, %v9643_v10  ;;  %v9742_v58 = vld [vmem:[%s15226_s3 + $0x48] sm:$0xff] }
 0x318   :  { %v3202_v9 = vadd.f32 %v9617_v2, %v3201_v6  ;;  %v9646_v11 = vadd.f32 %v3199_v55, %v9629_v4 }
 0x319   :  { %v9672_v22 = vadd.f32 %v3210_v12, %v9655_v14 }
 0x31a   :  { %v9650_v13 = vadd.f32 %v3202_v9, %v9634_v5 }
 0x31b   :  { %15542 = vst [vmem:[#allocation4_spill] sm:$0xff] %v9672_v22 }
 0x31c   :  { %v4355_v16 = vadd.f32 %v9650_v13, %v9646_v11  ;;  %v8036_v17 = vpop.f32.mrb[132].mxu0  ;;  %v9662_v18 = vpop.f32.mrb[132].mxu1 }
 0x31d   :  { %v3214_v20 = vpop.f32.mrb[133].mxu0  ;;  %v9669_v21 = vpop.f32.mrb[133].mxu1  ;;  %v3223_v37 = vadd.f32 %v8036_v17, %v9617_v2 }
 0x31e   :  { %v4356_v23 = vadd.f32 %v4355_v16, %v9658_v15  ;;  %v3215_v24 = vadd.f32 %v9617_v2, %v3214_v20  ;;  %v8037_v25 = vpop.f32.mrb[134].mxu0  ;;  %v9676_v26 = vpop.f32.mrb[134].mxu1 }
 0x31f   :  { %v3217_v27 = vpop.f32.mrb[135].mxu0  ;;  %v9678_v28 = vpop.f32.mrb[135].mxu1  ;;  %v9710_v56 = vadd.f32 %v3223_v37, %v9700_v42  ;;  %v3226_v57 = vadd.f32 %v8037_v25, %v9617_v2 }
 0x320   :  { %v9681_v29 = vadd.f32 %v3215_v24, %v9667_v19  ;;  %v4357_v30 = vadd.f32 %v4356_v23, %v9672_v22  ;;  %v3218_v32 = vadd.f32 %v9617_v2, %v3217_v27  ;;  %v9756_v23 = vld [vmem:[%s15226_s3 + $0x50] sm:$0xff] }
 0x321   :  { %15545 = vst [vmem:[#allocation7_spill] sm:$0xff] %v9710_v56  ;;  %v9726_v34 = vadd.f32 %v3226_v57, %v9716_v60 }
 0x322   :  { %15543 = vst [vmem:[#allocation5_spill] sm:$0xff] %v9681_v29  ;;  %v4358_v35 = vadd.f32 %v4357_v30, %v9681_v29  ;;  %v9692_v36 = vadd.f32 %v3218_v32, %v9687_v31 }
 0x323   :  { %15546 = vst [vmem:[#allocation8_spill] sm:$0xff] %v9726_v34 }
 0x324   :  { %15544 = vst [vmem:[#allocation6_spill] sm:$0xff] %v9692_v36  ;;  %v8040_v38 = vpop.f32.mrb[136].mxu0  ;;  %v9695_v41 = vpop.f32.mrb[136].mxu1  ;;  %v4359_v47 = vadd.f32 %v4358_v35, %v9692_v36 }
 0x325   :  { %v3230_v45 = vpop.f32.mrb[137].mxu0  ;;  %v9702_v46 = vpop.f32.mrb[137].mxu1  ;;  %v3239_v16 = vadd.f32 %v8040_v38, %v9617_v2 }
 0x326   :  { %v8041_v50 = vpop.f32.mrb[138].mxu0  ;;  %v9705_v51 = vpop.f32.mrb[138].mxu1  ;;  %v4360_v61 = vadd.f32 %v4359_v47, %v9710_v56  ;;  %v3231_v62 = vadd.f32 %v9617_v2, %v3230_v45  ;;  %v9774_v47 = vld [vmem:[%s15226_s3 + $0x58] sm:$0xff] }
 0x327   :  { %v3233_v52 = vpop.f32.mrb[139].mxu0  ;;  %v9707_v53 = vpop.f32.mrb[139].mxu1  ;;  %v9768_v38 = vadd.f32 %v3239_v16, %v9756_v23  ;;  %v3242_v45 = vadd.f32 %v8041_v50, %v9617_v2 }
 0x328   :  { %v9733_v63 = vadd.f32 %v3231_v62, %v9723_v33  ;;  %v4361_v1 = vadd.f32 %v4360_v61, %v9726_v34  ;;  %v3234_v3 = vadd.f32 %v9617_v2, %v3233_v52  ;;  %v9781_v61 = vld [vmem:[%s15226_s3 + $0x60] sm:$0xff] }
 0x329   :  { %15549 = vst [vmem:[#allocation11_spill] sm:$0xff] %v9768_v38  ;;  %v9784_v62 = vadd.f32 %v3242_v45, %v9774_v47 }
 0x32a   :  { %15547 = vst [vmem:[#allocation9_spill] sm:$0xff] %v9733_v63  ;;  %v4362_v9 = vadd.f32 %v4361_v1, %v9733_v63  ;;  %v9748_v12 = vadd.f32 %v3234_v3, %v9742_v58 }
 0x32b   :  { %15550 = vst [vmem:[#allocation12_spill] sm:$0xff] %v9784_v62 }
 0x32c   :  { %v8044_v39 = vpop.f32.mrb[140].mxu0  ;;  %v9728_v40 = vpop.f32.mrb[140].mxu1  ;;  %15548 = vst [vmem:[#allocation10_spill] sm:$0xff] %v9748_v12  ;;  %v4363_v27 = vadd.f32 %v4362_v9, %v9748_v12  ;;  %v9794_v9 = vld [vmem:[%s15226_s3 + $0x68] sm:$0xff] }
 0x32d   :  { %v3246_v43 = vpop.f32.mrb[141].mxu0  ;;  %v9730_v44 = vpop.f32.mrb[141].mxu1 }
 0x32e   :  { %v8045_v54 = vpop.f32.mrb[142].mxu0  ;;  %v9737_v55 = vpop.f32.mrb[142].mxu1  ;;  %v4364_v52 = vadd.f32 %v4363_v27, %v9768_v38  ;;  %v3247_v57 = vadd.f32 %v9617_v2, %v3246_v43  ;;  %v9799_v43 = vld [vmem:[%s15225_s6 + $0x1] ss:$0 sm:$0xff] }
 0x32f   :  { %v3249_v6 = vpop.f32.mrb[143].mxu0  ;;  %v9744_v8 = vpop.f32.mrb[143].mxu1  ;;  %v3719_v45 = vadd.f32 %v9799_v43, %v9636_v7  ;;  %v3716_v0 = vadd.f32 %v9799_v43, %v9621_v49  ;;  %v3258_v34 = vadd.f32 %v8045_v54, %v9617_v2  ;;  %v3724_v56 = vadd.f32 %v9619_v48, %v9799_v43  ;;  %v9852_v54 = vld [vmem:[%s15226_s3 + $0x80] sm:$0xff] }
 0x330   :  { %v9787_v1 = vadd.f32 %v3247_v57, %v9781_v61  ;;  %v4365_v50 = vadd.f32 %v4364_v52, %v9784_v62  ;;  %v3250_v3 = vadd.f32 %v9617_v2, %v3249_v6  ;;  %v3255_v6 = vadd.f32 %v8044_v39, %v9617_v2  ;;  %v9817_v62 = vld [vmem:[%s15226_s3 + $0x70] sm:$0xff] }
 0x331   :  { %v9827_v38 = vadd.f32 %v3719_v45, %v9634_v5  ;;  %v9858_v48 = vadd.f32 %v3724_v56, %v9643_v10  ;;  %v9873_v10 = vld [vmem:[%s15226_s3 + $0x88] sm:$0xff]  ;;  %v3743_v36 = vadd.f32 %v9676_v26, %v9799_v43 }
 0x332   :  { %15551 = vst [vmem:[#allocation13_spill] sm:$0xff] %v9787_v1  ;;  %v4366_v16 = vadd.f32 %v4365_v50, %v9787_v1  ;;  %v9803_v27 = vadd.f32 %v3250_v3, %v9794_v9  ;;  %v9832_v49 = vadd.f32 %v3255_v6, %v9817_v62 }
 0x333   :  { %15553 = vst [vmem:[#allocation15_spill] sm:$0xff] %v9827_v38  ;;  %15557 = vst [vmem:[#allocation19_spill] sm:$0xff] %v9858_v48 }
 0x334   :  { %v8048_v17 = vpop.f32.mrb[144].mxu0  ;;  %v9751_v20 = vpop.f32.mrb[144].mxu1  ;;  %15552 = vst [vmem:[#allocation14_spill] sm:$0xff] %v9803_v27  ;;  %v4367_v1 = vadd.f32 %v4366_v16, %v9803_v27  ;;  %15554 = vst [vmem:[#allocation16_spill] sm:$0xff] %v9832_v49  ;;  %v9838_v16 = vadd.f32 %v3716_v0, %v9629_v4  ;;  %v9843_v27 = vld [vmem:[%s15226_s3 + $0x78] sm:$0xff]  ;;  %v3727_v4 = vadd.f32 %v9624_v59, %v9799_v43 }
 0x335   :  { %v3262_v24 = vpop.f32.mrb[145].mxu0  ;;  %v9758_v25 = vpop.f32.mrb[145].mxu1  ;;  %v9855_v0 = vadd.f32 %v3258_v34, %v9843_v27 }
 0x336   :  { %v9761_v30 = vpop.f32.mrb[146].mxu0  ;;  %v9763_v32 = vpop.f32.mrb[146].mxu1  ;;  %15555 = vst [vmem:[#allocation17_spill] sm:$0xff] %v9838_v16  ;;  %v4368_v5 = vadd.f32 %v4367_v1, %v9832_v49  ;;  %v3263_v45 = vadd.f32 %v9617_v2, %v3262_v24  ;;  %v4751_v6 = vadd.f32 %v9827_v38, %v9838_v16  ;;  %v3732_v49 = vadd.f32 %v9799_v43, %v9669_v21 }
 0x337   :  { %v3265_v35 = vpop.f32.mrb[147].mxu0  ;;  %v9765_v37 = vpop.f32.mrb[147].mxu1  ;;  %15556 = vst [vmem:[#allocation18_spill] sm:$0xff] %v9855_v0  ;;  %v9876_v56 = vadd.f32 %v3727_v4, %v9655_v14  ;;  %v3735_v21 = vadd.f32 %v9799_v43, %v9678_v28  ;;  %v9896_v14 = vld [vmem:[%s15226_s3 + $0x90] sm:$0xff] }
 0x338   :  { %v9863_v1 = vadd.f32 %v3263_v45, %v9852_v54  ;;  %v4369_v24 = vadd.f32 %v4368_v5, %v9855_v0  ;;  %v3266_v38 = vadd.f32 %v9617_v2, %v3265_v35  ;;  %v4752_v16 = vadd.f32 %v4751_v6, %v9858_v48 }
 0x339   :  { %15559 = vst [vmem:[#allocation21_spill] sm:$0xff] %v9876_v56  ;;  %v9883_v35 = vadd.f32 %v3732_v49, %v9667_v19  ;;  %v3271_v45 = vadd.f32 %v8048_v17, %v9617_v2  ;;  %v9907_v17 = vadd.f32 %v3735_v21, %v9687_v31  ;;  %v3274_v0 = vadd.f32 %v9761_v30, %v9617_v2  ;;  %v9927_v31 = vld [vmem:[%s15226_s3 + $0xa0] sm:$0xff] }
 0x33a   :  { %15558 = vst [vmem:[#allocation20_spill] sm:$0xff] %v9863_v1  ;;  %v4370_v59 = vadd.f32 %v4369_v24, %v9863_v1  ;;  %v9880_v34 = vadd.f32 %v3266_v38, %v9873_v10  ;;  %v4753_v5 = vadd.f32 %v4752_v16, %v9876_v56 }
 0x33b   :  { %15561 = vst [vmem:[#allocation23_spill] sm:$0xff] %v9883_v35  ;;  %15562 = vst [vmem:[#allocation24_spill] sm:$0xff] %v9907_v17  ;;  %v9912_v1 = vadd.f32 %v3271_v45, %v9896_v14 }
 0x33c   :  { %15560 = vst [vmem:[#allocation22_spill] sm:$0xff] %v9880_v34  ;;  %v4371_v19 = vadd.f32 %v4370_v59, %v9880_v34  ;;  %v4754_v28 = vadd.f32 %v4753_v5, %v9883_v35  ;;  %v3740_v34 = vadd.f32 %v9662_v18, %v9799_v43  ;;  %v9922_v5 = vld [vmem:[%s15226_s3 + $0x98] sm:$0xff] }
 0x33d   :  { %15563 = vst [vmem:[#allocation25_spill] sm:$0xff] %v9912_v1  ;;  %v9932_v30 = vadd.f32 %v3274_v0, %v9922_v5 }
 0x33e   :  { %v4372_v21 = vadd.f32 %v4371_v19, %v9912_v1  ;;  %v4755_v45 = vadd.f32 %v4754_v28, %v9907_v17  ;;  %v9939_v35 = vadd.f32 %v3740_v34, %v9700_v42  ;;  %v9946_v19 = vld [vmem:[%s15226_s3 + $0xa8] sm:$0xff]  ;;  %v9957_v34 = vadd.f32 %v3743_v36, %v9716_v60 }
 0x33f   :  { %15564 = vst [vmem:[#allocation26_spill] sm:$0xff] %v9932_v30  ;;  %v10019_v1 = vld [vmem:[%s15226_s3 + $0xc8] sm:$0xff] }
 0x340   :  { %15566 = vst [vmem:[#allocation28_spill] sm:$0xff] %v9939_v35  ;;  %v4373_v28 = vadd.f32 %v4372_v21, %v9932_v30  ;;  %v4756_v0 = vadd.f32 %v4755_v45, %v9939_v35  ;;  %15568 = vst [vmem:[#allocation30_spill] sm:$0xff] %v9957_v34  ;;  %v3751_v45 = vadd.f32 %v9799_v43, %v9707_v53 }
 0x342   :  { %v4757_v21 = vadd.f32 %v4756_v0, %v9957_v34  ;;  %v9991_v35 = vadd.f32 %v3751_v45, %v9742_v58 }
 0x344   :  { %v9808_v52 = vpop.f32.mrb[148].mxu0  ;;  %v9810_v57 = vpop.f32.mrb[148].mxu1  ;;  %15571 = vst [vmem:[#allocation33_spill] sm:$0xff] %v9991_v35 }
 0x345   :  { %v3278_v50 = vpop.f32.mrb[149].mxu0  ;;  %v9819_v3 = vpop.f32.mrb[149].mxu1  ;;  %v3287_v26 = vadd.f32 %v9808_v52, %v9617_v2 }
 0x346   :  { %v9822_v7 = vpop.f32.mrb[150].mxu0  ;;  %v9824_v39 = vpop.f32.mrb[150].mxu1  ;;  %v3279_v59 = vadd.f32 %v9617_v2, %v3278_v50 }
 0x347   :  { %v3281_v12 = vpop.f32.mrb[151].mxu0  ;;  %v9829_v63 = vpop.f32.mrb[151].mxu1  ;;  %v3290_v53 = vadd.f32 %v9822_v7, %v9617_v2  ;;  %v10001_v7 = vld [vmem:[%s15226_s3 + $0xc0] sm:$0xff] }
 0x348   :  { %v9935_v50 = vadd.f32 %v3279_v59, %v9927_v31  ;;  %v3282_v18 = vadd.f32 %v9617_v2, %v3281_v12  ;;  %v3748_v59 = vadd.f32 %v9799_v43, %v9702_v46  ;;  %v9970_v46 = vld [vmem:[%s15226_s3 + $0xb0] sm:$0xff] }
 0x34a   :  { %15565 = vst [vmem:[#allocation27_spill] sm:$0xff] %v9935_v50  ;;  %v4374_v12 = vadd.f32 %v4373_v28, %v9935_v50  ;;  %v9954_v42 = vadd.f32 %v3282_v18, %v9946_v19  ;;  %v9962_v17 = vadd.f32 %v3748_v59, %v9723_v33  ;;  %v9980_v33 = vadd.f32 %v3287_v26, %v9970_v46 }
 0x34c   :  { %15567 = vst [vmem:[#allocation29_spill] sm:$0xff] %v9954_v42  ;;  %15569 = vst [vmem:[#allocation31_spill] sm:$0xff] %v9962_v17  ;;  %v4375_v18 = vadd.f32 %v4374_v12, %v9954_v42  ;;  %v4758_v12 = vadd.f32 %v4757_v21, %v9962_v17  ;;  %v9996_v42 = vld [vmem:[%s15226_s3 + $0xb8] sm:$0xff]  ;;  %v3756_v21 = vadd.f32 %v9695_v41, %v9799_v43 }
 0x34d   :  { %15570 = vst [vmem:[#allocation32_spill] sm:$0xff] %v9980_v33  ;;  %v10009_v58 = vadd.f32 %v3290_v53, %v9996_v42  ;;  %v3759_v41 = vadd.f32 %v9705_v51, %v9799_v43  ;;  %v10042_v51 = vld [vmem:[%s15226_s3 + $0xd0] sm:$0xff] }
 0x34e   :  { %v4376_v50 = vadd.f32 %v4375_v18, %v9980_v33  ;;  %v4759_v30 = vadd.f32 %v4758_v12, %v9991_v35  ;;  %v10023_v33 = vadd.f32 %v3756_v21, %v9756_v23  ;;  %v3764_v12 = vadd.f32 %v9799_v43, %v9730_v44 }
 0x34f   :  { %15572 = vst [vmem:[#allocation34_spill] sm:$0xff] %v10009_v58  ;;  %v3767_v44 = vadd.f32 %v9799_v43, %v9744_v8  ;;  %v10067_v8 = vld [vmem:[%s15226_s3 + $0xe0] sm:$0xff] }
 0x350   :  { %v4377_v18 = vadd.f32 %v4376_v50, %v10009_v58  ;;  %15574 = vst [vmem:[#allocation36_spill] sm:$0xff] %v10023_v33  ;;  %v10037_v50 = vadd.f32 %v3759_v41, %v9774_v47 }
 0x352   :  { %15576 = vst [vmem:[#allocation38_spill] sm:$0xff] %v10037_v50 }
 0x354   :  { %v9889_v6 = vpop.f32.mrb[152].mxu0  ;;  %v9891_v48 = vpop.f32.mrb[152].mxu1 }
 0x355   :  { %v3294_v38 = vpop.f32.mrb[153].mxu0  ;;  %v9898_v4 = vpop.f32.mrb[153].mxu1  ;;  %v3303_v35 = vadd.f32 %v9889_v6, %v9617_v2 }
 0x356   :  { %v9901_v49 = vpop.f32.mrb[154].mxu0  ;;  %v9903_v16 = vpop.f32.mrb[154].mxu1  ;;  %v3295_v0 = vadd.f32 %v9617_v2, %v3294_v38 }
 0x357   :  { %v3297_v24 = vpop.f32.mrb[155].mxu0  ;;  %v9909_v56 = vpop.f32.mrb[155].mxu1  ;;  %v10052_v6 = vadd.f32 %v3303_v35, %v10042_v51  ;;  %v3306_v47 = vadd.f32 %v9901_v49, %v9617_v2 }
 0x358   :  { %v10012_v45 = vadd.f32 %v3295_v0, %v10001_v7  ;;  %v3298_v17 = vadd.f32 %v9617_v2, %v3297_v24  ;;  %v4760_v24 = vadd.f32 %v4759_v30, %v10023_v33 }
 0x359   :  { %15578 = vst [vmem:[#allocation40_spill] sm:$0xff] %v10052_v6 }
 0x35a   :  { %15573 = vst [vmem:[#allocation35_spill] sm:$0xff] %v10012_v45  ;;  %v4378_v53 = vadd.f32 %v4377_v18, %v10012_v45  ;;  %v10029_v0 = vadd.f32 %v3298_v17, %v10019_v1  ;;  %v10046_v17 = vadd.f32 %v3764_v12, %v9781_v61  ;;  %v4761_v30 = vadd.f32 %v4760_v24, %v10037_v50  ;;  %v10062_v61 = vld [vmem:[%s15226_s3 + $0xd8] sm:$0xff] }
 0x35b   :  { %v10078_v50 = vadd.f32 %v3767_v44, %v9794_v9  ;;  %v10083_v45 = vadd.f32 %v3306_v47, %v10062_v61 }
 0x35c   :  { %15575 = vst [vmem:[#allocation37_spill] sm:$0xff] %v10029_v0  ;;  %v4379_v23 = vadd.f32 %v4378_v53, %v10029_v0  ;;  %15577 = vst [vmem:[#allocation39_spill] sm:$0xff] %v10046_v17  ;;  %v4762_v12 = vadd.f32 %v4761_v30, %v10046_v17  ;;  %v10094_v30 = vld [vmem:[%s15226_s3 + $0xe8] sm:$0xff] }
 0x35d   :  { %15579 = vst [vmem:[#allocation41_spill] sm:$0xff] %v10078_v50  ;;  %15580 = vst [vmem:[#allocation42_spill] sm:$0xff] %v10083_v45 }
 0x35e   :  { %v4380_v49 = vadd.f32 %v4379_v23, %v10052_v6  ;;  %v3772_v6 = vadd.f32 %v9728_v40, %v9799_v43  ;;  %v4763_v44 = vadd.f32 %v4762_v12, %v10078_v50  ;;  %v3775_v40 = vadd.f32 %v9737_v55, %v9799_v43  ;;  %v10115_v12 = vld [vmem:[%s15226_s3 + $0xf0] sm:$0xff] }
 0x360   :  { %v4381_v9 = vadd.f32 %v4380_v49, %v10083_v45  ;;  %v3780_v49 = vadd.f32 %v9799_v43, %v9758_v25  ;;  %v3788_v45 = vadd.f32 %v9751_v20, %v9799_v43  ;;  %v3796_v20 = vadd.f32 %v9799_v43, %v9819_v3 }
 0x362   :  { %v10128_v25 = vadd.f32 %v3780_v49, %v9852_v54 }
 0x364   :  { %v9973_v36 = vpop.f32.mrb[156].mxu0  ;;  %v9975_v60 = vpop.f32.mrb[156].mxu1  ;;  %15586 = vst [vmem:[#allocation48_spill] sm:$0xff] %v10128_v25 }
 0x365   :  { %v3310_v52 = vpop.f32.mrb[157].mxu0  ;;  %v9977_v28 = vpop.f32.mrb[157].mxu1 }
 0x366   :  { %v9985_v59 = vpop.f32.mrb[158].mxu0  ;;  %v9987_v34 = vpop.f32.mrb[158].mxu1  ;;  %v3311_v21 = vadd.f32 %v9617_v2, %v3310_v52 }
 0x367   :  { %v3313_v38 = vpop.f32.mrb[159].mxu0  ;;  %v10003_v26 = vpop.f32.mrb[159].mxu1 }
 0x368   :  { %v10086_v58 = vadd.f32 %v3311_v21, %v10067_v8  ;;  %v3314_v23 = vadd.f32 %v9617_v2, %v3313_v38  ;;  %v10103_v21 = vadd.f32 %v3772_v6, %v9817_v62  ;;  %v3319_v38 = vadd.f32 %v9973_v36, %v9617_v2 }
 0x369   :  { %v10119_v62 = vadd.f32 %v3775_v40, %v9843_v27  ;;  %v3322_v36 = vadd.f32 %v9985_v59, %v9617_v2  ;;  %v10136_v27 = vld [vmem:[%s15226_s3 + $0xf8] sm:$0xff]  ;;  %v4034_v59 = vlaneseq }
 0x36a   :  { %15581 = vst [vmem:[#allocation43_spill] sm:$0xff] %v10086_v58  ;;  %v4382_v47 = vadd.f32 %v4381_v9, %v10086_v58  ;;  %v10100_v17 = vadd.f32 %v3314_v23, %v10094_v30  ;;  %15583 = vst [vmem:[#allocation45_spill] sm:$0xff] %v10103_v21  ;;  %v4764_v29 = vadd.f32 %v4763_v44, %v10103_v21 }
 0x36b   :  { %15584 = vst [vmem:[#allocation46_spill] sm:$0xff] %v10119_v62  ;;  %v10122_v55 = vadd.f32 %v3319_v38, %v10115_v12  ;;  %v3783_v44 = vadd.f32 %v9799_v43, %v9765_v37  ;;  %v10149_v37 = vadd.f32 %v3322_v36, %v10136_v27  ;;  %v10166_v58 = vshrl.u32 %v4034_v59, 7 }
 0x36c   :  { %15582 = vst [vmem:[#allocation44_spill] sm:$0xff] %v10100_v17  ;;  %v4383_v23 = vadd.f32 %v4382_v47, %v10100_v17  ;;  %v4765_v9 = vadd.f32 %v4764_v29, %v10119_v62  ;;  %v10141_v47 = vld [vmem:[%s15226_s3 + $0x100] sm:$0xff]  ;;  %v10181_v59 = vadd.f32 %v3788_v45, %v9896_v14  ;;  %v10198_v14 = vld [vmem:[%s15226_s3 + $0x128] sm:$0xff] }
 0x36d   :  { %15585 = vst [vmem:[#allocation47_spill] sm:$0xff] %v10122_v55  ;;  %15587 = vst [vmem:[#allocation49_spill] sm:$0xff] %v10149_v37 }
 0x36e   :  { %v4766_v17 = vadd.f32 %v4765_v9, %v10128_v25  ;;  %15590 = vst [vmem:[#allocation52_spill] sm:$0xff] %v10166_v58  ;;  %v4072_v25 = vadd.s32 296, %v10166_v58  ;;  %15592 = vst [vmem:[#allocation54_spill] sm:$0xff] %v10181_v59 }
 0x370   :  { %vm4136_vm0 = vcmp.lt.s32.totalorder %v4072_v25, 300  ;;  %v10217_v25 = vld [vmem:[%s15226_s3 + $0x118] sm:$0xff] }
 0x374   :  { %v8064_v18 = vpop.f32.mrb[160].mxu0  ;;  %v10057_v41 = vpop.f32.mrb[160].mxu1 }
 0x375   :  { %v3326_v35 = vpop.f32.mrb[161].mxu0  ;;  %v10069_v53 = vpop.f32.mrb[161].mxu1  ;;  %v3335_v22 = vadd.f32 %v8064_v18, %v9617_v2 }
 0x376   :  { %v10072_v24 = vpop.f32.mrb[162].mxu0  ;;  %v10074_v52 = vpop.f32.mrb[162].mxu1  ;;  %v3327_v6 = vadd.f32 %v9617_v2, %v3326_v35  ;;  %v4384_v35 = vadd.f32 %v4383_v23, %v10122_v55  ;;  %v10159_v23 = vadd.f32 %v3783_v44, %v9873_v10  ;;  %v10164_v55 = vld [vmem:[%s15226_s3 + $0x108] sm:$0xff] }
 0x377   :  { %v3329_v33 = vpop.f32.mrb[163].mxu0  ;;  %v10080_v0 = vpop.f32.mrb[163].mxu1  ;;  %v3338_v3 = vadd.f32 %v10072_v24, %v9617_v2 }
 0x378   :  { %v10152_v49 = vadd.f32 %v3327_v6, %v10141_v47  ;;  %v3330_v62 = vadd.f32 %v9617_v2, %v3329_v33  ;;  %15589 = vst [vmem:[#allocation51_spill] sm:$0xff] %v10159_v23  ;;  %v4385_v33 = vadd.f32 %v4384_v35, %v10149_v37  ;;  %v4767_v44 = vadd.f32 %v4766_v17, %v10159_v23 }
 0x379   :  { %v3791_v35 = vadd.f32 %v9763_v32, %v9799_v43 }
 0x37a   :  { %15588 = vst [vmem:[#allocation50_spill] sm:$0xff] %v10152_v49  ;;  %v4386_v9 = vadd.f32 %v4385_v33, %v10152_v49  ;;  %v10175_v10 = vadd.f32 %v3330_v62, %v10164_v55  ;;  %v10190_v62 = vld [vmem:[%s15226_s3 + $0x110] sm:$0xff]  ;;  %v4768_v18 = vadd.f32 %v4767_v44, %v10181_v59  ;;  %v3799_v44 = vadd.f32 %v9799_v43, %v9829_v63 }
 0x37b   :  { %v10201_v32 = vadd.f32 %v3335_v22, %v10190_v62  ;;  %v10222_v22 = vld [vmem:[%s15226_s3 + $0x120] sm:$0xff]  ;;  %v10232_v63 = vadd.f32 %v3338_v3, %v10217_v25 }
 0x37c   :  { %15591 = vst [vmem:[#allocation53_spill] sm:$0xff] %v10175_v10  ;;  %v4387_v17 = vadd.f32 %v4386_v9, %v10175_v10  ;;  %v10207_v9 = vadd.f32 %v3791_v35, %v9922_v5 }
 0x37d   :  { %15593 = vst [vmem:[#allocation55_spill] sm:$0xff] %v10201_v32  ;;  %15598 = vst [vmem:[#allocation60_spill] sm:$0xff] %v10232_v63 }
 0x37e   :  { %15594 = vst [vmem:[#allocation56_spill] sm:$0xff] %v10207_v9  ;;  %v4388_v24 = vadd.f32 %v4387_v17, %v10201_v32 }
 0x384   :  { %v8068_v54 = vpop.f32.mrb[164].mxu0  ;;  %v10144_v40 = vpop.f32.mrb[164].mxu1 }
 0x385   :  { %v3342_v29 = vpop.f32.mrb[165].mxu0  ;;  %v10146_v38 = vpop.f32.mrb[165].mxu1 }
 0x386   :  { %v8069_v21 = vpop.f32.mrb[166].mxu0  ;;  %v10155_v50 = vpop.f32.mrb[166].mxu1  ;;  %v3343_v45 = vadd.f32 %v9617_v2, %v3342_v29  ;;  %v8726_v29 = vmov 0.0  }
 0x387   :  { %v3345_v36 = vpop.f32.mrb[167].mxu0  ;;  %v10168_v6 = vpop.f32.mrb[167].mxu1  ;;  %v10229_v35 = vsel %vm4136_vm0, 1.0, %v8726_v29  ;;  %v3354_v49 = vadd.f32 %v8069_v21, %v9617_v2  ;;  %v3807_v21 = vadd.f32 %v9824_v39, %v9799_v43 }
 0x388   :  { %v3346_v33 = vadd.f32 %v9617_v2, %v3345_v36  ;;  %v10210_v36 = vadd.f32 %v3796_v20, %v9927_v31  ;;  %v4769_v31 = vadd.f32 %v4768_v18, %v10207_v9  ;;  %15597 = vst [vmem:[#allocation59_spill] sm:$0xff] %v10229_v35  ;;  %v3351_v20 = vadd.f32 %v8068_v54, %v9617_v2  ;;  %v10247_v18 = vld [vmem:[%s15226_s3 + $0x130] sm:$0xff] }
 0x389   :  { %v10236_v58 = vadd.f32 %v3343_v45, %v10222_v22  ;;  %v4389_v54 = vadd.f32 %v4388_v24, %v10232_v63  ;;  %v10270_v63 = vld [vmem:[%s15226_s3 + $0x138] sm:$0xff] }
 0x38a   :  { %15595 = vst [vmem:[#allocation57_spill] sm:$0xff] %v10210_v36  ;;  %v10226_v5 = vadd.f32 %v3346_v33, %v10198_v14  ;;  %v4770_v17 = vadd.f32 %v4769_v31, %v10210_v36  ;;  %v10242_v33 = vadd.f32 %v3799_v44, %v9946_v19  ;;  %v3804_v19 = vadd.f32 %v9810_v57, %v9799_v43  ;;  %v10275_v57 = vld [vmem:[%s15226_s3 + $0x140] sm:$0xff] }
 0x38b   :  { %15599 = vst [vmem:[#allocation61_spill] sm:$0xff] %v10236_v58  ;;  %v10261_v36 = vadd.f32 %v3351_v20, %v10247_v18  ;;  %v4390_v10 = vadd.f32 %v4389_v54, %v10236_v58  ;;  %v10286_v54 = vadd.f32 %v3354_v49, %v10270_v63  ;;  %v3815_v49 = vadd.f32 %v9799_v43, %v9909_v56  ;;  %v10320_v56 = vld [vmem:[%s15226_s3 + $0x150] sm:$0xff] }
 0x38c   :  { %15596 = vst [vmem:[#allocation58_spill] sm:$0xff] %v10226_v5  ;;  %15600 = vst [vmem:[#allocation62_spill] sm:$0xff] %v10242_v33  ;;  %v4328_v45 = vmul.f32 %v10229_v35, %v10226_v5  ;;  %v4771_v5 = vadd.f32 %v4770_v17, %v10242_v33  ;;  %v10278_v37 = vadd.f32 %v3804_v19, %v9970_v46  ;;  %v10296_v46 = vld [vmem:[%s15226_s3 + $0x148] sm:$0xff] }
 0x38d   :  { %15601 = vst [vmem:[#allocation63_spill] sm:$0xff] %v10261_v36  ;;  %v3812_v17 = vadd.f32 %v9799_v43, %v9898_v4  ;;  %15603 = vst [vmem:[#allocation65_spill] sm:$0xff] %v10286_v54  ;;  %v10299_v4 = vadd.f32 %v3807_v21, %v9996_v42  ;;  %v4330_v19 = vmul.f32 0.0, %v10286_v54 }
 0x38e   :  { %v4391_v20 = vadd.f32 %v4390_v10, %v4328_v45  ;;  %15602 = vst [vmem:[#allocation64_spill] sm:$0xff] %v10278_v37  ;;  %v4772_v10 = vadd.f32 %v4771_v5, %v10278_v37 }
 0x38f   :  { %15605 = vst [vmem:[#allocation67_spill] sm:$0xff] %v10299_v4  ;;  %v10302_v45 = vadd.f32 %v3812_v17, %v10001_v7  ;;  %v10315_v7 = vadd.f32 %v3815_v49, %v10019_v1 }
 0x391   :  { %15606 = vst [vmem:[#allocation68_spill] sm:$0xff] %v10302_v45  ;;  %15608 = vst [vmem:[#allocation70_spill] sm:$0xff] %v10315_v7 }
 0x394   :  { %v8072_v59 = vpop.f32.mrb[168].mxu0  ;;  %v10238_v23 = vpop.f32.mrb[168].mxu1 }
 0x395   :  { %v3358_v3 = vpop.f32.mrb[169].mxu0  ;;  %v10249_v29 = vpop.f32.mrb[169].mxu1 }
 0x396   :  { %v8073_v9 = vpop.f32.mrb[170].mxu0  ;;  %v10254_v32 = vpop.f32.mrb[170].mxu1  ;;  %v3359_v24 = vadd.f32 %v9617_v2, %v3358_v3  ;;  %v4329_v3 = vmul.f32 0.0, %v10261_v36 }
 0x397   :  { %v3361_v44 = vpop.f32.mrb[171].mxu0  ;;  %v10258_v31 = vpop.f32.mrb[171].mxu1  ;;  %v3370_v49 = vadd.f32 %v8073_v9, %v9617_v2 }
 0x398   :  { %v10289_v33 = vadd.f32 %v3359_v24, %v10275_v57  ;;  %v3362_v58 = vadd.f32 %v9617_v2, %v3361_v44  ;;  %v4392_v39 = vadd.f32 %v4391_v20, %v4329_v3  ;;  %v4773_v24 = vadd.f32 %v4772_v10, %v10299_v4 }
 0x399   :  { %v3367_v20 = vadd.f32 %v8072_v59, %v9617_v2  ;;  %v3820_v59 = vadd.f32 %v9891_v48, %v9799_v43  ;;  %v10345_v48 = vld [vmem:[%s15226_s3 + $0x160] sm:$0xff] }
 0x39a   :  { %15604 = vst [vmem:[#allocation66_spill] sm:$0xff] %v10289_v33  ;;  %v4331_v44 = vmul.f32 0.0, %v10289_v33  ;;  %v10309_v5 = vadd.f32 %v3362_v58, %v10296_v46  ;;  %v4393_v3 = vadd.f32 %v4392_v39, %v4330_v19  ;;  %v4774_v42 = vadd.f32 %v4773_v24, %v10302_v45  ;;  %v10340_v45 = vld [vmem:[%s15226_s3 + $0x158] sm:$0xff] }
 0x39b   :  { %v10330_v1 = vadd.f32 %v3367_v20, %v10320_v56  ;;  %v10358_v33 = vadd.f32 %v3370_v49, %v10340_v45 }
 0x39c   :  { %15607 = vst [vmem:[#allocation69_spill] sm:$0xff] %v10309_v5  ;;  %v4394_v21 = vadd.f32 %v4393_v3, %v4331_v44  ;;  %v4332_v17 = vmul.f32 0.0, %v10309_v5  ;;  %v4775_v3 = vadd.f32 %v4774_v42, %v10315_v7  ;;  %v3823_v42 = vadd.f32 %v9903_v16, %v9799_v43 }
 0x39d   :  { %v3828_v7 = vadd.f32 %v9799_v43, %v9977_v28  ;;  %v4333_v5 = vmul.f32 0.0, %v10330_v1  ;;  %v4334_v49 = vmul.f32 0.0, %v10358_v33 }
 0x39e   :  { %v4395_v9 = vadd.f32 %v4394_v21, %v4332_v17  ;;  %v10371_v28 = vadd.f32 %v3823_v42, %v10062_v61 }
 0x39f   :  { %v10374_v17 = vadd.f32 %v3828_v7, %v10067_v8 }
 0x3a0   :  { %v4396_v16 = vadd.f32 %v4395_v9, %v4333_v5  ;;  %15611 = vst [vmem:[#allocation73_spill] sm:$0xff] %v10371_v28 }
 0x3a1   :  { %15612 = vst [vmem:[#allocation74_spill] sm:$0xff] %v10374_v17 }
 0x3a2   :  { %v4397_v9 = vadd.f32 %v4396_v16, %v4334_v49 }
 0x3a4   :  { %v8076_v58 = vpop.f32.mrb[172].mxu0  ;;  %v10323_v37 = vpop.f32.mrb[172].mxu1 }
 0x3a5   :  { %v3374_v10 = vpop.f32.mrb[173].mxu0  ;;  %v10327_v39 = vpop.f32.mrb[173].mxu1  ;;  %v3383_v5 = vadd.f32 %v8076_v58, %v9617_v2 }
 0x3a6   :  { %v3375_v19 = vadd.f32 %v9617_v2, %v3374_v10  ;;  %v8077_v24 = vpop.f32.mrb[174].mxu0  ;;  %v10334_v44 = vpop.f32.mrb[174].mxu1  ;;  %v10350_v10 = vadd.f32 %v3820_v59, %v10042_v51  ;;  %v10368_v51 = vld [vmem:[%s15226_s3 + $0x168] sm:$0xff]  ;;  %v3831_v59 = vadd.f32 %v9799_v43, %v10003_v26  ;;  %v10392_v26 = vld [vmem:[%s15226_s3 + $0x170] sm:$0xff] }
 0x3a7   :  { %v3377_v20 = vpop.f32.mrb[175].mxu0  ;;  %v10347_v4 = vpop.f32.mrb[175].mxu1  ;;  %v3386_v58 = vadd.f32 %v8077_v24, %v9617_v2 }
 0x3a8   :  { %15609 = vst [vmem:[#allocation71_spill] sm:$0xff] %v10350_v10  ;;  %v10361_v54 = vadd.f32 %v3375_v19, %v10345_v48  ;;  %v3378_v36 = vadd.f32 %v9617_v2, %v3377_v20  ;;  %v4776_v21 = vadd.f32 %v4775_v3, %v10350_v10  ;;  %v10387_v8 = vadd.f32 %v3831_v59, %v10094_v30  ;;  %v10407_v59 = vld [vmem:[%s15226_s3 + $0x178] sm:$0xff] }
 0x3aa   :  { %15610 = vst [vmem:[#allocation72_spill] sm:$0xff] %v10361_v54  ;;  %v4335_v19 = vmul.f32 0.0, %v10361_v54  ;;  %v10381_v3 = vadd.f32 %v3378_v36, %v10368_v51  ;;  %v4777_v20 = vadd.f32 %v4776_v21, %v10371_v28  ;;  %15614 = vst [vmem:[#allocation76_spill] sm:$0xff] %v10387_v8  ;;  %v3836_v36 = vadd.f32 %v9975_v60, %v9799_v43 }
 0x3ab   :  { %v10398_v21 = vadd.f32 %v3383_v5, %v10392_v26  ;;  %v3844_v28 = vadd.f32 %v9799_v43, %v10069_v53 }
 0x3ac   :  { %15613 = vst [vmem:[#allocation75_spill] sm:$0xff] %v10381_v3  ;;  %v4778_v61 = vadd.f32 %v4777_v20, %v10374_v17  ;;  %v4398_v7 = vadd.f32 %v4397_v9, %v4335_v19  ;;  %v4336_v42 = vmul.f32 0.0, %v10381_v3  ;;  %v10412_v19 = vld [vmem:[%s15226_s3 + $0x180] sm:$0xff] }
 0x3ad   :  { %15615 = vst [vmem:[#allocation77_spill] sm:$0xff] %v10398_v21  ;;  %v4337_v54 = vmul.f32 0.0, %v10398_v21  ;;  %v10446_v21 = vadd.f32 %v3844_v28, %v10141_v47 }
 0x3ae   :  { %v4779_v30 = vadd.f32 %v4778_v61, %v10387_v8  ;;  %v4399_v5 = vadd.f32 %v4398_v7, %v4336_v42  ;;  %v10420_v61 = vadd.f32 %v3836_v36, %v10115_v12  ;;  %v3839_v8 = vadd.f32 %v9987_v34, %v9799_v43  ;;  %v10440_v34 = vld [vmem:[%s15226_s3 + $0x188] sm:$0xff] }
 0x3af   :  { %v10430_v7 = vadd.f32 %v3386_v58, %v10407_v59  ;;  %15620 = vst [vmem:[#allocation82_spill] sm:$0xff] %v10446_v21  ;;  %v3847_v58 = vadd.f32 %v9799_v43, %v10080_v0  ;;  %v10464_v0 = vld [vmem:[%s15226_s3 + $0x190] sm:$0xff] }
 0x3b0   :  { %15616 = vst [vmem:[#allocation78_spill] sm:$0xff] %v10420_v61  ;;  %v4780_v36 = vadd.f32 %v4779_v30, %v10420_v61  ;;  %v4400_v53 = vadd.f32 %v4399_v5, %v4337_v54 }
 0x3b1   :  { %15617 = vst [vmem:[#allocation79_spill] sm:$0xff] %v10430_v7  ;;  %v10459_v47 = vadd.f32 %v3847_v58, %v10164_v55  ;;  %v3863_v55 = vadd.f32 %v9799_v43, %v10168_v6  ;;  %v10493_v6 = vld [vmem:[%s15226_s3 + $0x1a0] sm:$0xff] }
 0x3b3   :  { %15622 = vst [vmem:[#allocation84_spill] sm:$0xff] %v10459_v47 }
 0x3b4   :  { %v8080_v16 = vpop.f32.mrb[176].mxu0  ;;  %v10401_v49 = vpop.f32.mrb[176].mxu1 }
 0x3b5   :  { %v3390_v60 = vpop.f32.mrb[177].mxu0  ;;  %v10414_v20 = vpop.f32.mrb[177].mxu1  ;;  %v3399_v54 = vadd.f32 %v8080_v16, %v9617_v2 }
 0x3b6   :  { %v3391_v24 = vadd.f32 %v9617_v2, %v3390_v60  ;;  %v8081_v9 = vpop.f32.mrb[178].mxu0  ;;  %v10417_v17 = vpop.f32.mrb[178].mxu1  ;;  %v10443_v60 = vadd.f32 %v3839_v8, %v10136_v27 }
 0x3b7   :  { %v3393_v10 = vpop.f32.mrb[179].mxu0  ;;  %v10426_v3 = vpop.f32.mrb[179].mxu1  ;;  %v3402_v16 = vadd.f32 %v8081_v9, %v9617_v2  ;;  %v3855_v9 = vadd.f32 %v10074_v52, %v9799_v43 }
 0x3b8   :  { %v10433_v42 = vadd.f32 %v3391_v24, %v10412_v19  ;;  %v3394_v12 = vadd.f32 %v9617_v2, %v3393_v10  ;;  %15619 = vst [vmem:[#allocation81_spill] sm:$0xff] %v10443_v60  ;;  %v4338_v24 = vmul.f32 0.0, %v10430_v7  ;;  %v4781_v61 = vadd.f32 %v4780_v36, %v10443_v60 }
 0x3b9   :  { %v10470_v36 = vadd.f32 %v3399_v54, %v10464_v0  ;;  %v3860_v54 = vadd.f32 %v9799_v43, %v10146_v38 }
 0x3ba   :  { %15618 = vst [vmem:[#allocation80_spill] sm:$0xff] %v10433_v42  ;;  %v4339_v10 = vmul.f32 0.0, %v10433_v42  ;;  %v10453_v30 = vadd.f32 %v3394_v12, %v10440_v34  ;;  %v4401_v5 = vadd.f32 %v4400_v53, %v4338_v24  ;;  %v4782_v27 = vadd.f32 %v4781_v61, %v10446_v21  ;;  %v10479_v53 = vld [vmem:[%s15226_s3 + $0x198] sm:$0xff]  ;;  %v10511_v21 = vld [vmem:[%s15226_s3 + $0x1a8] sm:$0xff] }
 0x3bb   :  { %v3852_v12 = vadd.f32 %v10057_v41, %v9799_v43  ;;  %15623 = vst [vmem:[#allocation85_spill] sm:$0xff] %v10470_v36  ;;  %v10520_v42 = vadd.f32 %v3855_v9, %v10217_v25 }
 0x3bc   :  { %15621 = vst [vmem:[#allocation83_spill] sm:$0xff] %v10453_v30  ;;  %v4402_v28 = vadd.f32 %v4401_v5, %v4339_v10  ;;  %v4340_v8 = vmul.f32 0.0, %v10453_v30  ;;  %v4783_v61 = vadd.f32 %v4782_v27, %v10459_v47  ;;  %v10506_v47 = vadd.f32 %v3863_v55, %v10198_v14 }
 0x3bd   :  { %v10484_v41 = vadd.f32 %v3852_v12, %v10190_v62  ;;  %15628 = vst [vmem:[#allocation90_spill] sm:$0xff] %v10520_v42  ;;  %v3868_v14 = vadd.f32 %v10144_v40, %v9799_v43 }
 0x3be   :  { %v4403_v58 = vadd.f32 %v4402_v28, %v4340_v8  ;;  %v4341_v28 = vmul.f32 0.0, %v10470_v36  ;;  %v10499_v8 = vadd.f32 %v3402_v16, %v10479_v53  ;;  %15626 = vst [vmem:[#allocation88_spill] sm:$0xff] %v10506_v47 }
 0x3bf   :  { %15624 = vst [vmem:[#allocation86_spill] sm:$0xff] %v10484_v41  ;;  %v4784_v38 = vadd.f32 %v4783_v61, %v10484_v41  ;;  %v10525_v61 = vadd.f32 %v3860_v54, %v10222_v22  ;;  %v10537_v40 = vadd.f32 %v3868_v14, %v10247_v18  ;;  %v3871_v54 = vadd.f32 %v10155_v50, %v9799_v43 }
 0x3c0   :  { %15625 = vst [vmem:[#allocation87_spill] sm:$0xff] %v10499_v8  ;;  %v4404_v16 = vadd.f32 %v4403_v58, %v4341_v28  ;;  %v4342_v55 = vmul.f32 0.0, %v10499_v8  ;;  %v3911_v8 = vadd.f32 %v9799_v43, %v10426_v3 }
 0x3c1   :  { %15629 = vst [vmem:[#allocation91_spill] sm:$0xff] %v10525_v61  ;;  %v4785_v28 = vadd.f32 %v4784_v38, %v10520_v42  ;;  %15631 = vst [vmem:[#allocation93_spill] sm:$0xff] %v10537_v40  ;;  %v10547_v38 = vld [vmem:[%s15226_s3 + $0x1b0] sm:$0xff]  ;;  %v10556_v50 = vadd.f32 %v3871_v54, %v10270_v63  ;;  %v10614_v42 = vld [vmem:[%s15226_s3 + $0x1d8] sm:$0xff] }
 0x3c2   :  { %v4405_v9 = vadd.f32 %v4404_v16, %v4342_v55  ;;  %v4725_v55 = vmul.f32 0.0, %v10537_v40 }
 0x3c3   :  { %v4786_v22 = vadd.f32 %v4785_v28, %v10525_v61  ;;  %15633 = vst [vmem:[#allocation95_spill] sm:$0xff] %v10556_v50  ;;  %v3879_v28 = vadd.f32 %v9799_v43, %v10258_v31 }
 0x3c4   :  { %v8084_v24 = vpop.f32.mrb[180].mxu0  ;;  %v10481_v10 = vpop.f32.mrb[180].mxu1 }
 0x3c5   :  { %v3406_v5 = vpop.f32.mrb[181].mxu0  ;;  %v10495_v27 = vpop.f32.mrb[181].mxu1  ;;  %v3415_v25 = vadd.f32 %v8084_v24, %v9617_v2  ;;  %v10577_v31 = vadd.f32 %v3879_v28, %v10296_v46  ;;  %v3884_v46 = vadd.f32 %v10238_v23, %v9799_v43 }
 0x3c6   :  { %v3407_v62 = vadd.f32 %v9617_v2, %v3406_v5  ;;  %v8085_v12 = vpop.f32.mrb[182].mxu0  ;;  %v10502_v52 = vpop.f32.mrb[182].mxu1 }
 0x3c7   :  { %v3409_v60 = vpop.f32.mrb[183].mxu0  ;;  %v10513_v36 = vpop.f32.mrb[183].mxu1  ;;  %v10551_v18 = vadd.f32 %v3415_v25, %v10547_v38  ;;  %v3418_v14 = vadd.f32 %v8085_v12, %v9617_v2  ;;  %15636 = vst [vmem:[#allocation98_spill] sm:$0xff] %v10577_v31 }
 0x3c8   :  { %v10516_v30 = vadd.f32 %v3407_v62, %v10493_v6  ;;  %v3410_v5 = vadd.f32 %v9617_v2, %v3409_v60  ;;  %v4724_v60 = vmul.f32 %v10229_v35, %v10506_v47  ;;  %v3876_v62 = vadd.f32 %v9799_v43, %v10249_v29 }
 0x3c9   :  { %15632 = vst [vmem:[#allocation94_spill] sm:$0xff] %v10551_v18  ;;  %v4345_v12 = vmul.f32 0.0, %v10551_v18  ;;  %v4728_v47 = vmul.f32 0.0, %v10577_v31 }
 0x3ca   :  { %15627 = vst [vmem:[#allocation89_spill] sm:$0xff] %v10516_v30  ;;  %v4343_v41 = vmul.f32 0.0, %v10516_v30  ;;  %v10530_v58 = vadd.f32 %v3410_v5, %v10511_v21  ;;  %v4787_v16 = vadd.f32 %v4786_v22, %v4724_v60  ;;  %v10559_v29 = vadd.f32 %v3876_v62, %v10275_v57  ;;  %v10582_v62 = vld [vmem:[%s15226_s3 + $0x1c0] sm:$0xff] }
 0x3cb   :  { %v4726_v57 = vmul.f32 0.0, %v10556_v50 }
 0x3cc   :  { %15630 = vst [vmem:[#allocation92_spill] sm:$0xff] %v10530_v58  ;;  %v4406_v5 = vadd.f32 %v4405_v9, %v4343_v41  ;;  %v4344_v24 = vmul.f32 0.0, %v10530_v58  ;;  %15634 = vst [vmem:[#allocation96_spill] sm:$0xff] %v10559_v29  ;;  %v10566_v41 = vld [vmem:[%s15226_s3 + $0x1b8] sm:$0xff]  ;;  %v4788_v25 = vadd.f32 %v4787_v16, %v4725_v55  ;;  %v4727_v54 = vmul.f32 0.0, %v10559_v29  ;;  %v10595_v29 = vld [vmem:[%s15226_s3 + $0x1d0] sm:$0xff] }
 0x3cd   :  { %v10570_v9 = vadd.f32 %v3418_v14, %v10566_v41 }
 0x3ce   :  { %v4407_v60 = vadd.f32 %v4406_v5, %v4344_v24  ;;  %v4789_v28 = vadd.f32 %v4788_v25, %v4726_v57 }
 0x3cf   :  { %15635 = vst [vmem:[#allocation97_spill] sm:$0xff] %v10570_v9 }
 0x3d0   :  { %v4408_v16 = vadd.f32 %v4407_v60, %v4345_v12  ;;  %v10600_v60 = vld [vmem:[%s15226_s3 + $0x1c8] sm:$0xff]  ;;  %v4790_v57 = vadd.f32 %v4789_v28, %v4727_v54  ;;  %v3892_v54 = vadd.f32 %v9799_v43, %v10327_v39  ;;  %v3895_v39 = vadd.f32 %v9799_v43, %v10347_v4  ;;  %v10657_v4 = vld [vmem:[%s15226_s3 + $0x1e0] sm:$0xff] }
 0x3d2   :  { %v4791_v31 = vadd.f32 %v4790_v57, %v4728_v47 }
 0x3d4   :  { %v8088_v63 = vpop.f32.mrb[184].mxu0  ;;  %v10572_v22 = vpop.f32.mrb[184].mxu1 }
 0x3d5   :  { %v3422_v5 = vpop.f32.mrb[185].mxu0  ;;  %v10584_v24 = vpop.f32.mrb[185].mxu1  ;;  %v3431_v14 = vadd.f32 %v8088_v63, %v9617_v2 }
 0x3d6   :  { %v3423_v55 = vadd.f32 %v9617_v2, %v3422_v5  ;;  %v8089_v40 = vpop.f32.mrb[186].mxu0  ;;  %v10588_v50 = vpop.f32.mrb[186].mxu1  ;;  %v4346_v5 = vmul.f32 0.0, %v10570_v9 }
 0x3d7   :  { %v3425_v12 = vpop.f32.mrb[187].mxu0  ;;  %v10602_v63 = vpop.f32.mrb[187].mxu1  ;;  %v3434_v23 = vadd.f32 %v8089_v40, %v9617_v2  ;;  %v10617_v18 = vadd.f32 %v3431_v14, %v10595_v29  ;;  %v10624_v40 = vadd.f32 %v3884_v46, %v10320_v56 }
 0x3d8   :  { %v10606_v61 = vadd.f32 %v3423_v55, %v10582_v62  ;;  %v3426_v25 = vadd.f32 %v9617_v2, %v3425_v12  ;;  %v4409_v58 = vadd.f32 %v4408_v16, %v4346_v5  ;;  %v3887_v2 = vadd.f32 %v10254_v32, %v9799_v43 }
 0x3d9   :  { %15637 = vst [vmem:[#allocation99_spill] sm:$0xff] %v10624_v40  ;;  %v10631_v12 = vadd.f32 %v3434_v23, %v10614_v42  ;;  %v4349_v16 = vmul.f32 0.0, %v10617_v18  ;;  %v10640_v32 = vadd.f32 %v3892_v54, %v10345_v48  ;;  %v3900_v48 = vadd.f32 %v10323_v37, %v9799_v43 }
 0x3da   :  { %v4347_v9 = vmul.f32 0.0, %v10606_v61  ;;  %v10621_v55 = vadd.f32 %v3426_v25, %v10600_v60  ;;  %v4729_v25 = vmul.f32 0.0, %v10624_v40  ;;  %v10637_v56 = vadd.f32 %v3887_v2, %v10340_v45  ;;  %v10692_v40 = vld [vmem:[%s15226_s3 + $0x1f8] sm:$0xff] }
 0x3db   :  { %15639 = vst [vmem:[#allocation101_spill] sm:$0xff] %v10640_v32  ;;  %v4731_v57 = vmul.f32 0.0, %v10640_v32 }
 0x3dc   :  { %v4410_v28 = vadd.f32 %v4409_v58, %v4347_v9  ;;  %v4348_v14 = vmul.f32 0.0, %v10621_v55  ;;  %15638 = vst [vmem:[#allocation100_spill] sm:$0xff] %v10637_v56  ;;  %v4350_v58 = vmul.f32 0.0, %v10631_v12  ;;  %v4792_v46 = vadd.f32 %v4791_v31, %v4729_v25 }
 0x3dd   :  { %v4730_v47 = vmul.f32 0.0, %v10637_v56  ;;  %v3908_v56 = vadd.f32 %v9799_v43, %v10414_v20 }
 0x3de   :  { %v4411_v5 = vadd.f32 %v4410_v28, %v4348_v14  ;;  %v10648_v28 = vadd.f32 %v3895_v39, %v10368_v51  ;;  %v8720_v51 = vld [vmem:[%s15225_s6] ss:$0 sm:$0xff] }
 0x3df   :  { %v4793_v54 = vadd.f32 %v4792_v46, %v4730_v47  ;;  %v10675_v46 = vld [vmem:[%s15226_s3 + $0x1e8] sm:$0xff] }
 0x3e0   :  { %v4412_v9 = vadd.f32 %v4411_v5, %v4349_v16  ;;  %15640 = vst [vmem:[#allocation102_spill] sm:$0xff] %v10648_v28  ;;  %v4732_v37 = vmul.f32 0.0, %v10648_v28  ;;  %v3903_v28 = vadd.f32 %v10334_v44, %v9799_v43 }
 0x3e2   :  { %v4413_v23 = vadd.f32 %v4412_v9, %v4350_v58  ;;  %v4794_v58 = vadd.f32 %v4793_v54, %v4731_v57  ;;  %v10670_v9 = vld [vmem:[%s15226_s3 + $0x1f0] sm:$0xff]  ;;  %v10683_v54 = vadd.f32 %v3900_v48, %v10392_v26 }
 0x3e4   :  { %v8092_v45 = vpop.f32.mrb[188].mxu0  ;;  %v10650_v2 = vpop.f32.mrb[188].mxu1  ;;  %15641 = vst [vmem:[#allocation103_spill] sm:$0xff] %v10683_v54  ;;  %v4795_v26 = vadd.f32 %v4794_v58, %v4732_v37 }
 0x3e5   :  { %v3438_v31 = vpop.f32.mrb[189].mxu0  ;;  %v10659_v14 = vpop.f32.mrb[189].mxu1  ;;  %v3447_v16 = vadd.f32 %v8720_v51, %v8092_v45 }
 0x3e6   :  { %v3439_v5 = vadd.f32 %v8720_v51, %v3438_v31  ;;  %v8093_v25 = vpop.f32.mrb[190].mxu0  ;;  %v10664_v39 = vpop.f32.mrb[190].mxu1 }
 0x3e7   :  { %v3441_v47 = vpop.f32.mrb[191].mxu0  ;;  %v10677_v32 = vpop.f32.mrb[191].mxu1  ;;  %v3450_v31 = vadd.f32 %v8720_v51, %v8093_v25  ;;  %v10695_v30 = vadd.f32 %v3447_v16, %v10670_v9  ;;  %v4733_v25 = vmul.f32 0.0, %v10683_v54  ;;  %v10710_v16 = vadd.f32 %v3908_v56, %v10412_v19 }
 0x3e8   :  { %v10680_v45 = vadd.f32 %v3439_v5, %v10657_v4  ;;  %v3442_v57 = vadd.f32 %v8720_v51, %v3441_v47  ;;  %v10707_v47 = vadd.f32 %v3903_v28, %v10407_v59  ;;  %v10719_v59 = vadd.f32 %v3911_v8, %v10440_v34 }
 0x3e9   :  { %v10702_v44 = vadd.f32 %v3450_v31, %v10692_v40  ;;  %v4735_v54 = vmul.f32 0.0, %v10710_v16  ;;  %v3916_v19 = vadd.f32 %v10401_v49, %v9799_v43 }
 0x3ea   :  { %v4351_v5 = vmul.f32 0.0, %v10680_v45  ;;  %v10699_v51 = vadd.f32 %v3442_v57, %v10675_v46  ;;  %v4353_v57 = vmul.f32 0.0, %v10695_v30 }
 0x3eb   :  { %v4354_v37 = vmul.f32 0.0, %v10702_v44 }
 0x3ec   :  { %v4414_v48 = vadd.f32 %v4413_v23, %v4351_v5  ;;  %v4352_v20 = vmul.f32 0.0, %v10699_v51  ;;  %v4796_v23 = vadd.f32 %v4795_v26, %v4733_v25  ;;  %v4734_v5 = vmul.f32 0.0, %v10707_v47 }
 0x3ed   :  { %v10725_v26 = vadd.f32 %v3916_v19, %v10464_v0  ;;  %v3924_v25 = vadd.f32 %v9799_v43, %v10495_v27  ;;  %v3927_v0 = vadd.f32 %v9799_v43, %v10513_v36  ;;  %v3935_v19 = vadd.f32 %v10502_v52, %v9799_v43 }
 0x3ee   :  { %v4415_v58 = vadd.f32 %v4414_v48, %v4352_v20  ;;  %v4797_v56 = vadd.f32 %v4796_v23, %v4734_v5  ;;  %v4736_v48 = vmul.f32 0.0, %v10719_v59  ;;  %v3919_v20 = vadd.f32 %v10417_v17, %v9799_v43 }
 0x3ef   :  { %v10743_v27 = vadd.f32 %v3927_v0, %v10511_v21  ;;  %v3940_v21 = vadd.f32 %v9799_v43, %v10584_v24 }
 0x3f0   :  { %v4416_v31 = vadd.f32 %v4415_v58, %v4353_v57  ;;  %v4798_v7 = vadd.f32 %v4797_v56, %v4735_v54  ;;  %v4737_v57 = vmul.f32 0.0, %v10725_v26  ;;  %v10733_v49 = vadd.f32 %v3919_v20, %v10479_v53 }
 0x3f1   :  { %v10736_v54 = vadd.f32 %v3924_v25, %v10493_v6  ;;  %v3932_v53 = vadd.f32 %v10481_v10, %v9799_v43  ;;  %v4740_v6 = vmul.f32 0.0, %v10743_v27  ;;  %v10757_v10 = vadd.f32 %v3935_v19, %v10566_v41 }
 0x3f2   :  { %v4417_v28 = vadd.f32 %v4416_v31, %v4354_v37  ;;  %v4799_v8 = vadd.f32 %v4798_v7, %v4736_v48  ;;  %v4738_v17 = vmul.f32 0.0, %v10733_v49  ;;  %v10760_v25 = vadd.f32 %v3940_v21, %v10582_v62 }
 0x3f3   :  { %v4739_v37 = vmul.f32 0.0, %v10736_v54  ;;  %v10749_v36 = vadd.f32 %v3932_v53, %v10547_v38  ;;  %v8721_v38 = vld [vmem:[%s15225_s6 + $0x1] ss:$0 sm:$0xff]  ;;  %v4742_v43 = vmul.f32 0.0, %v10757_v10 }
 0x3f4   :  { %v4418_v3 = vrot.slane %v4417_v28, 4  ;;  %v4800_v23 = vadd.f32 %v4799_v8, %v4737_v57  ;;  %v3943_v52 = vadd.f32 %v8721_v38, %v10602_v63  ;;  %v3948_v24 = vadd.f32 %v8721_v38, %v10572_v22 }
 0x3f5   :  { %v4741_v48 = vmul.f32 0.0, %v10749_v36  ;;  %v4743_v8 = vmul.f32 0.0, %v10760_v25 }
 0x3f6   :  { %v4419_v34 = vadd.f32 %v4418_v3, %v4417_v28  ;;  %v4801_v31 = vadd.f32 %v4800_v23, %v4738_v17  ;;  %v10772_v57 = vadd.f32 %v3943_v52, %v10600_v60  ;;  %v10808_v23 = vadd.f32 %v3948_v24, %v10595_v29  ;;  %v15647_v52 = vld [vmem:[#allocation6_spill] sm:$0xff] }
 0x3f7   :  { %v3956_v17 = vadd.f32 %v8721_v38, %v10659_v14  ;;  %v3964_v14 = vadd.f32 %v8721_v38, %v10650_v2 }
 0x3f8   :  { %v4420_v58 = vrot.slane %v4419_v34, 2  ;;  %v4802_v5 = vadd.f32 %v4801_v31, %v4739_v37  ;;  %v4745_v37 = vmul.f32 0.0, %v10808_v23 }
 0x3fa   :  { %v4421_v7 = vadd.f32 %v4420_v58, %v4419_v34  ;;  %v4803_v56 = vadd.f32 %v4802_v5, %v4740_v6 }
 0x3fc   :  { %v4422_v28 = vrot.slane %v4421_v7, 1  ;;  %v4804_v20 = vadd.f32 %v4803_v56, %v4741_v48  ;;  %v15645_v56 = vld [vmem:[#allocation4_spill] sm:$0xff] }
 0x3fe   :  { %v4423_v3 = vadd.f32 %v4422_v28, %v4421_v7  ;;  %v4805_v41 = vadd.f32 %v4804_v20, %v4742_v43  ;;  %v10817_v7 = vadd.f32 %v3956_v17, %v10657_v4  ;;  %v10836_v28 = vadd.f32 %v3964_v14, %v10670_v9 }
 0x400   :  { %v10766_v34 = vmul.f32 0.0033333334, %v4423_v3  ;;  %v4806_v58 = vadd.f32 %v4805_v41, %v4743_v8  ;;  %v4747_v29 = vmul.f32 0.0, %v10817_v7  ;;  %v4749_v9 = vmul.f32 0.0, %v10836_v28  ;;  %v15648_v41 = vld [vmem:[#allocation7_spill] sm:$0xff] }
 0x402   :  { %v10776_v62 = vsub.f32 %v10606_v61, %v10766_v34  ;;  %v10780_v0 = vsub.f32 %v10621_v55, %v10766_v34  ;;  %v10784_v63 = vsub.f32 %v10617_v18, %v10766_v34  ;;  %v10788_v22 = vsub.f32 %v10631_v12, %v10766_v34 }
 0x403   :  { %v10792_v60 = vsub.f32 %v10680_v45, %v10766_v34  ;;  %v10796_v61 = vsub.f32 %v10699_v51, %v10766_v34  ;;  %v10800_v55 = vsub.f32 %v10695_v30, %v10766_v34  ;;  %v10804_v18 = vsub.f32 %v10702_v44, %v10766_v34 }
 0x404   :  { %15642 = vst [vmem:[#allocation104_spill] sm:$0xff] %v10784_v63  ;;  %15643 = vst [vmem:[#allocation105_spill] sm:$0xff] %v10788_v22  ;;  %v4744_v12 = vmul.f32 0.0, %v10772_v57  ;;  %v3951_v45 = vadd.f32 %v8721_v38, %v10588_v50  ;;  %v3959_v44 = vadd.f32 %v8721_v38, %v10677_v32  ;;  %v10832_v4 = vsub.f32 %v9650_v13, %v10766_v34 }
 0x405   :  { %15644 = vst [vmem:[#allocation106_spill] sm:$0xff] %v10800_v55  ;;  %v10841_v2 = vsub.f32 %v9658_v15, %v10766_v34  ;;  %v10849_v21 = vsub.f32 %v15645_v56, %v10766_v34  ;;  %v10863_v43 = vsub.f32 %v15647_v52, %v10766_v34 }
 0x406   :  { %v4807_v51 = vadd.f32 %v4806_v58, %v4744_v12  ;;  %v10814_v30 = vadd.f32 %v3951_v45, %v10614_v42  ;;  %v10823_v50 = vadd.f32 %v3959_v44, %v10675_v46  ;;  %v10828_v42 = vsub.f32 %v9646_v11, %v10766_v34 }
 0x407   :  { %v3967_v46 = vadd.f32 %v8721_v38, %v10664_v39  ;;  %v4554_v19 = vmul.f32 %v10832_v4, %v10832_v4  ;;  %v15646_v39 = vld [vmem:[#allocation5_spill] sm:$0xff]  ;;  %v4555_v48 = vmul.f32 %v10841_v2, %v10841_v2  ;;  %v4556_v24 = vmul.f32 %v10849_v21, %v10849_v21 }
 0x408   :  { %v4808_v53 = vadd.f32 %v4807_v51, %v4745_v37  ;;  %v4746_v31 = vmul.f32 0.0, %v10814_v30  ;;  %v4748_v6 = vmul.f32 0.0, %v10823_v50  ;;  %v4553_v11 = vmul.f32 %v10828_v42, %v10828_v42  ;;  %v15649_v51 = vld [vmem:[#allocation8_spill] sm:$0xff] }
 0x409   :  { %v10853_v3 = vadd.f32 %v3967_v46, %v10692_v40  ;;  %v10857_v15 = vsub.f32 %v15646_v39, %v10766_v34  ;;  %v10870_v58 = vsub.f32 %v15648_v41, %v10766_v34  ;;  %v10876_v37 = vsub.f32 %v15649_v51, %v10766_v34  ;;  %v15657_v51 = vld [vmem:[#allocation14_spill] sm:$0xff] }
 0x40a   :  { %v4809_v5 = vadd.f32 %v4808_v53, %v4746_v31  ;;  %v4617_v20 = vadd.f32 %v4554_v19, %v4553_v11  ;;  %v4558_v44 = vmul.f32 %v10863_v43, %v10863_v43  ;;  %v15650_v31 = vld [vmem:[#allocation9_spill] sm:$0xff] }
 0x40b   :  { %v4750_v40 = vmul.f32 0.0, %v10853_v3  ;;  %v4557_v12 = vmul.f32 %v10857_v15, %v10857_v15  ;;  %v4559_v14 = vmul.f32 %v10870_v58, %v10870_v58  ;;  %v4560_v11 = vmul.f32 %v10876_v37, %v10876_v37 }
 0x40c   :  { %v4810_v32 = vadd.f32 %v4809_v5, %v4747_v29  ;;  %v4618_v8 = vadd.f32 %v4617_v20, %v4555_v48  ;;  %v10882_v29 = vsub.f32 %v15650_v31, %v10766_v34  ;;  %v15653_v20 = vld [vmem:[#allocation12_spill] sm:$0xff] }
 0x40d   :  { %v15659_v31 = vld [vmem:[#allocation16_spill] sm:$0xff] }
 0x40e   :  { %v4811_v13 = vadd.f32 %v4810_v32, %v4748_v6  ;;  %v4619_v45 = vadd.f32 %v4618_v8, %v4556_v24  ;;  %v15651_v6 = vld [vmem:[#allocation10_spill] sm:$0xff]  ;;  %v15655_v8 = vld [vmem:[#allocation13_spill] sm:$0xff] }
 0x40f   :  { %v10888_v46 = vsub.f32 %v15651_v6, %v10766_v34 }
 0x410   :  { %v4812_v38 = vadd.f32 %v4811_v13, %v4749_v9  ;;  %v4620_v53 = vadd.f32 %v4619_v45, %v4557_v12  ;;  %v15652_v13 = vld [vmem:[#allocation11_spill] sm:$0xff]  ;;  %v4561_v9 = vmul.f32 %v10882_v29, %v10882_v29 }
 0x411   :  { %v10894_v56 = vsub.f32 %v15652_v13, %v10766_v34  ;;  %v4562_v52 = vmul.f32 %v10888_v46, %v10888_v46 }
 0x412   :  { %v4813_v17 = vadd.f32 %v4812_v38, %v4750_v40  ;;  %v4621_v5 = vadd.f32 %v4620_v53, %v4558_v44  ;;  %v10900_v38 = vsub.f32 %v15653_v20, %v10766_v34  ;;  %v10906_v40 = vsub.f32 %v15655_v8, %v10766_v34 }
 0x413   :  { %v4563_v41 = vmul.f32 %v10894_v56, %v10894_v56 }
 0x414   :  { %v4814_v32 = vrot.slane %v4813_v17, 4  ;;  %v4622_v19 = vadd.f32 %v4621_v5, %v4559_v14  ;;  %15654 = vst [vmem:[#allocation4_spill] sm:$0xff] %v10900_v38  ;;  %15656 = vst [vmem:[#allocation5_spill] sm:$0xff] %v10906_v40  ;;  %v4564_v44 = vmul.f32 %v10900_v38, %v10900_v38  ;;  %v10918_v14 = vsub.f32 %v15659_v31, %v10766_v34  ;;  %v15747_v38 = vld [vmem:[#allocation51_spill] sm:$0xff] }
 0x415   :  { %v4565_v5 = vmul.f32 %v10906_v40, %v10906_v40 }
 0x416   :  { %v4623_v39 = vadd.f32 %v4622_v19, %v4560_v11  ;;  %v4815_v48 = vadd.f32 %v4814_v32, %v4813_v17  ;;  %v10912_v17 = vsub.f32 %v15657_v51, %v10766_v34  ;;  %15660 = vst [vmem:[#allocation7_spill] sm:$0xff] %v10918_v14  ;;  %v15661_v11 = vld [vmem:[#allocation18_spill] sm:$0xff]  ;;  %v15667_v51 = vld [vmem:[#allocation25_spill] sm:$0xff] }
 0x417   :  { %v10924_v19 = vsub.f32 %v15661_v11, %v10766_v34 }
 0x418   :  { %v4624_v24 = vadd.f32 %v4623_v39, %v4561_v9  ;;  %v4816_v45 = vrot.slane %v4815_v48, 2  ;;  %15658 = vst [vmem:[#allocation6_spill] sm:$0xff] %v10912_v17  ;;  %v4566_v13 = vmul.f32 %v10912_v17, %v10912_v17  ;;  %v15663_v39 = vld [vmem:[#allocation20_spill] sm:$0xff] }
 0x419   :  { %15662 = vst [vmem:[#allocation8_spill] sm:$0xff] %v10924_v19  ;;  %v10930_v20 = vsub.f32 %v15663_v39, %v10766_v34  ;;  %v15671_v39 = vld [vmem:[#allocation27_spill] sm:$0xff] }
 0x41a   :  { %v4625_v12 = vadd.f32 %v4624_v24, %v4562_v52  ;;  %v4817_v6 = vadd.f32 %v4816_v45, %v4815_v48  ;;  %v4567_v52 = vmul.f32 %v10918_v14, %v10918_v14  ;;  %v15697_v14 = vld [vmem:[#allocation24_spill] sm:$0xff] }
 0x41b   :  { %15664 = vst [vmem:[#allocation9_spill] sm:$0xff] %v10930_v20 }
 0x41c   :  { %v4626_v53 = vadd.f32 %v4625_v12, %v4563_v41  ;;  %v4818_v8 = vrot.slane %v4817_v6, 1  ;;  %v15665_v41 = vld [vmem:[#allocation22_spill] sm:$0xff]  ;;  %v4568_v12 = vmul.f32 %v10924_v19, %v10924_v19 }
 0x41d   :  { %v10936_v48 = vsub.f32 %v15665_v41, %v10766_v34 }
 0x41e   :  { %v4627_v32 = vadd.f32 %v4626_v53, %v4564_v44  ;;  %v10942_v44 = vsub.f32 %v15667_v51, %v10766_v34  ;;  %v4569_v53 = vmul.f32 %v10930_v20, %v10930_v20  ;;  %v15693_v20 = vld [vmem:[#allocation23_spill] sm:$0xff] }
 0x41f   :  { %15666 = vst [vmem:[#allocation10_spill] sm:$0xff] %v10936_v48 }
 0x420   :  { %v4628_v9 = vadd.f32 %v4627_v32, %v4565_v5  ;;  %15668 = vst [vmem:[#allocation11_spill] sm:$0xff] %v10942_v44  ;;  %v4819_v5 = vadd.f32 %v4818_v8, %v4817_v6  ;;  %v15669_v32 = vld [vmem:[#allocation26_spill] sm:$0xff]  ;;  %v15673_v6 = vld [vmem:[#allocation29_spill] sm:$0xff] }
 0x421   :  { %v10948_v11 = vsub.f32 %v15669_v32, %v10766_v34  ;;  %v10962_v8 = vsub.f32 %v15673_v6, %v10766_v34 }
 0x422   :  { %v4629_v24 = vadd.f32 %v4628_v9, %v4566_v13  ;;  %v4570_v13 = vmul.f32 %v10936_v48, %v10936_v48  ;;  %v10958_v51 = vmul.f32 0.0033333334, %v4819_v5 }
 0x423   :  { %15670 = vst [vmem:[#allocation12_spill] sm:$0xff] %v10948_v11  ;;  %15674 = vst [vmem:[#allocation14_spill] sm:$0xff] %v10962_v8 }
 0x424   :  { %v4630_v45 = vadd.f32 %v4629_v24, %v4567_v52  ;;  %v10954_v52 = vsub.f32 %v15671_v39, %v10766_v34  ;;  %v4571_v24 = vmul.f32 %v10942_v44, %v10942_v44  ;;  %v15681_v44 = vld [vmem:[#allocation34_spill] sm:$0xff] }
 0x426   :  { %v4631_v31 = vadd.f32 %v4630_v45, %v4568_v12  ;;  %15672 = vst [vmem:[#allocation13_spill] sm:$0xff] %v10954_v52  ;;  %v4572_v12 = vmul.f32 %v10948_v11, %v10948_v11  ;;  %v4573_v32 = vmul.f32 %v10954_v52, %v10954_v52  ;;  %v10982_v11 = vsub.f32 %v15681_v44, %v10766_v34 }
 0x428   :  { %v4632_v9 = vadd.f32 %v4631_v31, %v4569_v53  ;;  %v15675_v53 = vld [vmem:[#allocation32_spill] sm:$0xff]  ;;  %15682 = vst [vmem:[#allocation22_spill] sm:$0xff] %v10982_v11 }
 0x429   :  { %v10968_v31 = vsub.f32 %v15675_v53, %v10766_v34  ;;  %v15683_v53 = vld [vmem:[#allocation35_spill] sm:$0xff] }
 0x42a   :  { %v4633_v41 = vadd.f32 %v4632_v9, %v4570_v13  ;;  %v15677_v13 = vld [vmem:[#allocation17_spill] sm:$0xff]  ;;  %v15679_v9 = vld [vmem:[#allocation15_spill] sm:$0xff]  ;;  %v10988_v52 = vsub.f32 %v15683_v53, %v10766_v34  ;;  %v4576_v53 = vmul.f32 %v10982_v11, %v10982_v11 }
 0x42b   :  { %15676 = vst [vmem:[#allocation16_spill] sm:$0xff] %v10968_v31  ;;  %v10974_v5 = vsub.f32 %v15677_v13, %v10958_v51  ;;  %v10978_v6 = vsub.f32 %v15679_v9, %v10958_v51  ;;  %v15685_v13 = vld [vmem:[#allocation19_spill] sm:$0xff] }
 0x42c   :  { %v4634_v45 = vadd.f32 %v4633_v41, %v4571_v24  ;;  %v4574_v24 = vmul.f32 %v10962_v8, %v10962_v8  ;;  %15684 = vst [vmem:[#allocation25_spill] sm:$0xff] %v10988_v52  ;;  %v10994_v9 = vsub.f32 %v15685_v13, %v10958_v51  ;;  %v15691_v13 = vld [vmem:[#allocation40_spill] sm:$0xff] }
 0x42d   :  { %15678 = vst [vmem:[#allocation18_spill] sm:$0xff] %v10974_v5  ;;  %15680 = vst [vmem:[#allocation20_spill] sm:$0xff] %v10978_v6  ;;  %v4949_v44 = vmul.f32 %v10974_v5, %v10974_v5  ;;  %v4950_v48 = vmul.f32 %v10978_v6, %v10978_v6  ;;  %v4577_v5 = vmul.f32 %v10988_v52, %v10988_v52 }
 0x42e   :  { %v4635_v39 = vadd.f32 %v4634_v45, %v4572_v12  ;;  %v4575_v12 = vmul.f32 %v10968_v31, %v10968_v31  ;;  %15686 = vst [vmem:[#allocation26_spill] sm:$0xff] %v10994_v9  ;;  %v11012_v31 = vsub.f32 %v15691_v13, %v10766_v34  ;;  %v4951_v11 = vmul.f32 %v10994_v9, %v10994_v9 }
 0x42f   :  { %v11030_v52 = vsub.f32 %v15697_v14, %v10958_v51 }
 0x430   :  { %v4636_v41 = vadd.f32 %v4635_v39, %v4573_v32  ;;  %v15687_v32 = vld [vmem:[#allocation37_spill] sm:$0xff]  ;;  %15692 = vst [vmem:[#allocation32_spill] sm:$0xff] %v11012_v31 }
 0x431   :  { %v11002_v39 = vsub.f32 %v15687_v32, %v10766_v34  ;;  %v11018_v32 = vsub.f32 %v15693_v20, %v10958_v51  ;;  %15698 = vst [vmem:[#allocation34_spill] sm:$0xff] %v11030_v52 }
 0x432   :  { %v4637_v45 = vadd.f32 %v4636_v41, %v4574_v24  ;;  %v15689_v24 = vld [vmem:[#allocation21_spill] sm:$0xff] }
 0x433   :  { %15688 = vst [vmem:[#allocation27_spill] sm:$0xff] %v11002_v39  ;;  %v11008_v41 = vsub.f32 %v15689_v24, %v10958_v51  ;;  %15694 = vst [vmem:[#allocation17_spill] sm:$0xff] %v11018_v32  ;;  %v4578_v13 = vmul.f32 %v11002_v39, %v11002_v39  ;;  %v4953_v14 = vmul.f32 %v11018_v32, %v11018_v32 }
 0x434   :  { %v4638_v8 = vadd.f32 %v4637_v45, %v4575_v12  ;;  %v5013_v12 = vadd.f32 %v4950_v48, %v4949_v44  ;;  %v15695_v45 = vld [vmem:[#allocation42_spill] sm:$0xff]  ;;  %v4579_v48 = vmul.f32 %v11012_v31, %v11012_v31 }
 0x435   :  { %15690 = vst [vmem:[#allocation29_spill] sm:$0xff] %v11008_v41  ;;  %v11024_v24 = vsub.f32 %v15695_v45, %v10766_v34  ;;  %v4952_v20 = vmul.f32 %v11008_v41, %v11008_v41  ;;  %v15701_v45 = vld [vmem:[#allocation28_spill] sm:$0xff] }
 0x436   :  { %v4639_v6 = vadd.f32 %v4638_v8, %v4576_v53  ;;  %v5014_v8 = vadd.f32 %v5013_v12, %v4951_v11  ;;  %v15699_v53 = vld [vmem:[#allocation43_spill] sm:$0xff]  ;;  %v11042_v39 = vsub.f32 %v15701_v45, %v10958_v51 }
 0x437   :  { %15696 = vst [vmem:[#allocation15_spill] sm:$0xff] %v11024_v24  ;;  %v11036_v9 = vsub.f32 %v15699_v53, %v10766_v34  ;;  %v4580_v11 = vmul.f32 %v11024_v24, %v11024_v24  ;;  %v15705_v53 = vld [vmem:[#allocation30_spill] sm:$0xff]  ;;  %v15707_v45 = vld [vmem:[#allocation47_spill] sm:$0xff] }
 0x438   :  { %v4640_v19 = vadd.f32 %v4639_v6, %v4577_v5  ;;  %15702 = vst [vmem:[#allocation19_spill] sm:$0xff] %v11042_v39  ;;  %v5015_v5 = vadd.f32 %v5014_v8, %v4952_v20  ;;  %v15703_v6 = vld [vmem:[#allocation44_spill] sm:$0xff]  ;;  %v11054_v31 = vsub.f32 %v15705_v53, %v10958_v51  ;;  %v11060_v32 = vsub.f32 %v15707_v45, %v10766_v34  ;;  %v15711_v53 = vld [vmem:[#allocation49_spill] sm:$0xff] }
 0x439   :  { %15700 = vst [vmem:[#allocation35_spill] sm:$0xff] %v11036_v9  ;;  %v11048_v41 = vsub.f32 %v15703_v6, %v10766_v34  ;;  %v4581_v20 = vmul.f32 %v11036_v9, %v11036_v9  ;;  %v15709_v6 = vld [vmem:[#allocation31_spill] sm:$0xff]  ;;  %v15713_v45 = vld [vmem:[#allocation33_spill] sm:$0xff] }
 0x43a   :  { %v4641_v44 = vadd.f32 %v4640_v19, %v4578_v13  ;;  %15706 = vst [vmem:[#allocation21_spill] sm:$0xff] %v11054_v31  ;;  %v4954_v19 = vmul.f32 %v11030_v52, %v11030_v52  ;;  %v5016_v13 = vadd.f32 %v5015_v5, %v4953_v14  ;;  %15708 = vst [vmem:[#allocation40_spill] sm:$0xff] %v11060_v32 }
 0x43b   :  { %15704 = vst [vmem:[#allocation37_spill] sm:$0xff] %v11048_v41  ;;  %v11066_v24 = vsub.f32 %v15709_v6, %v10958_v51  ;;  %v11072_v52 = vsub.f32 %v15711_v53, %v10766_v34  ;;  %v4582_v14 = vmul.f32 %v11048_v41, %v11048_v41  ;;  %v11078_v9 = vsub.f32 %v15713_v45, %v10958_v51  ;;  %v15715_v6 = vld [vmem:[#allocation50_spill] sm:$0xff]  ;;  %v15717_v53 = vld [vmem:[#allocation36_spill] sm:$0xff]  ;;  %v15719_v45 = vld [vmem:[#allocation53_spill] sm:$0xff] }
 0x43c   :  { %v4642_v12 = vadd.f32 %v4641_v44, %v4579_v48  ;;  %v4955_v48 = vmul.f32 %v11042_v39, %v11042_v39  ;;  %v5017_v44 = vadd.f32 %v5016_v13, %v4954_v19  ;;  %v11084_v39 = vsub.f32 %v15715_v6, %v10766_v34  ;;  %v15721_v6 = vld [vmem:[#allocation38_spill] sm:$0xff] }
 0x43d   :  { %15710 = vst [vmem:[#allocation23_spill] sm:$0xff] %v11066_v24  ;;  %15712 = vst [vmem:[#allocation42_spill] sm:$0xff] %v11072_v52  ;;  %v4583_v19 = vmul.f32 %v11060_v32, %v11060_v32  ;;  %v11090_v41 = vsub.f32 %v15717_v53, %v10958_v51  ;;  %v11102_v32 = vsub.f32 %v15721_v6, %v10958_v51  ;;  %v15723_v53 = vld [vmem:[#allocation55_spill] sm:$0xff]  ;;  %v15727_v6 = vld [vmem:[#allocation60_spill] sm:$0xff] }
 0x43e   :  { %v4643_v8 = vadd.f32 %v4642_v12, %v4580_v11  ;;  %15714 = vst [vmem:[#allocation24_spill] sm:$0xff] %v11078_v9  ;;  %v4956_v11 = vmul.f32 %v11054_v31, %v11054_v31  ;;  %v5018_v12 = vadd.f32 %v5017_v44, %v4955_v48  ;;  %15716 = vst [vmem:[#allocation43_spill] sm:$0xff] %v11084_v39 }
 0x43f   :  { %15718 = vst [vmem:[#allocation28_spill] sm:$0xff] %v11090_v41  ;;  %v11096_v31 = vsub.f32 %v15719_v45, %v10766_v34  ;;  %v4584_v48 = vmul.f32 %v11072_v52, %v11072_v52  ;;  %15722 = vst [vmem:[#allocation30_spill] sm:$0xff] %v11102_v32  ;;  %v15725_v45 = vld [vmem:[#allocation39_spill] sm:$0xff] }
 0x440   :  { %v4644_v5 = vadd.f32 %v4643_v8, %v4581_v20  ;;  %v4957_v20 = vmul.f32 %v11066_v24, %v11066_v24  ;;  %v5019_v8 = vadd.f32 %v5018_v12, %v4956_v11  ;;  %v11108_v24 = vsub.f32 %v15723_v53, %v10766_v34 }
 0x441   :  { %15720 = vst [vmem:[#allocation44_spill] sm:$0xff] %v11096_v31  ;;  %v4585_v11 = vmul.f32 %v11084_v39, %v11084_v39  ;;  %v11114_v52 = vsub.f32 %v15725_v45, %v10958_v51  ;;  %v4586_v53 = vmul.f32 %v11096_v31, %v11096_v31  ;;  %v15735_v39 = vld [vmem:[#allocation63_spill] sm:$0xff] }
 0x442   :  { %v4645_v13 = vadd.f32 %v4644_v5, %v4582_v14  ;;  %v4958_v14 = vmul.f32 %v11078_v9, %v11078_v9  ;;  %v5020_v5 = vadd.f32 %v5019_v8, %v4957_v20  ;;  %15724 = vst [vmem:[#allocation47_spill] sm:$0xff] %v11108_v24  ;;  %v11120_v9 = vsub.f32 %v15727_v6, %v10766_v34  ;;  %v15729_v20 = vld [vmem:[#allocation58_spill] sm:$0xff] }
 0x443   :  { %15726 = vst [vmem:[#allocation31_spill] sm:$0xff] %v11114_v52  ;;  %v11124_v8 = vsub.f32 %v15729_v20, %v10766_v34  ;;  %v11140_v20 = vsub.f32 %v15735_v39, %v10766_v34  ;;  %v4587_v31 = vmul.f32 %v11108_v24, %v11108_v24 }
 0x444   :  { %v4646_v44 = vadd.f32 %v4645_v13, %v4583_v19  ;;  %v4959_v19 = vmul.f32 %v11090_v41, %v11090_v41  ;;  %v5021_v13 = vadd.f32 %v5020_v5, %v4958_v14  ;;  %15728 = vst [vmem:[#allocation49_spill] sm:$0xff] %v11120_v9  ;;  %v4960_v41 = vmul.f32 %v11102_v32, %v11102_v32  ;;  %v15733_v5 = vld [vmem:[#allocation61_spill] sm:$0xff] }
 0x445   :  { %15730 = vst [vmem:[#allocation33_spill] sm:$0xff] %v11124_v8  ;;  %v11136_v6 = vsub.f32 %v15733_v5, %v10766_v34  ;;  %15736 = vst [vmem:[#allocation53_spill] sm:$0xff] %v11140_v20  ;;  %v4961_v32 = vmul.f32 %v11114_v52, %v11114_v52  ;;  %v4526_v39 = vmul.f32 %v10229_v35, %v11124_v8 }
 0x446   :  { %v4647_v12 = vadd.f32 %v4646_v44, %v4584_v48  ;;  %v15731_v44 = vld [vmem:[#allocation41_spill] sm:$0xff]  ;;  %v5022_v14 = vadd.f32 %v5021_v13, %v4959_v19  ;;  %v4588_v17 = vmul.f32 %v11120_v9, %v11120_v9 }
 0x447   :  { %v11130_v45 = vsub.f32 %v15731_v44, %v10958_v51  ;;  %15734 = vst [vmem:[#allocation36_spill] sm:$0xff] %v11136_v6  ;;  %v15739_v13 = vld [vmem:[#allocation65_spill] sm:$0xff]  ;;  %v4589_v8 = vmul.f32 %v11136_v6, %v11136_v6  ;;  %v11184_v6 = vsub.f32 %v15747_v38, %v10958_v51 }
 0x448   :  { %v4648_v48 = vadd.f32 %v4647_v12, %v4585_v11  ;;  %v15737_v12 = vld [vmem:[#allocation45_spill] sm:$0xff]  ;;  %v5023_v19 = vadd.f32 %v5022_v14, %v4960_v41  ;;  %v11152_v5 = vsub.f32 %v15739_v13, %v10766_v34  ;;  %v15742_v41 = vld [vmem:[#allocation66_spill] sm:$0xff]  ;;  %v4527_v13 = vmul.f32 0.0, %v11140_v20 }
 0x449   :  { %15732 = vst [vmem:[#allocation50_spill] sm:$0xff] %v11130_v45  ;;  %v11146_v44 = vsub.f32 %v15737_v12, %v10958_v51  ;;  %v4962_v12 = vmul.f32 %v11130_v45, %v11130_v45  ;;  %v11166_v14 = vsub.f32 %v15742_v41, %v10766_v34  ;;  %v4590_v45 = vmul.f32 %v4526_v39, %v4526_v39 }
 0x44a   :  { %v4649_v11 = vadd.f32 %v4648_v48, %v4586_v53  ;;  %v15740_v53 = vld [vmem:[#allocation46_spill] sm:$0xff]  ;;  %v5024_v52 = vadd.f32 %v5023_v19, %v4961_v32  ;;  %v15745_v32 = vld [vmem:[#allocation69_spill] sm:$0xff]  ;;  %v4528_v41 = vmul.f32 0.0, %v11152_v5  ;;  %15748 = vst [vmem:[#allocation58_spill] sm:$0xff] %v11184_v6 }
 0x44b   :  { %15738 = vst [vmem:[#allocation38_spill] sm:$0xff] %v11146_v44  ;;  %v11160_v48 = vsub.f32 %v15740_v53, %v10958_v51  ;;  %v4963_v53 = vmul.f32 %v11146_v44, %v11146_v44  ;;  %v11179_v19 = vsub.f32 %v15745_v32, %v10766_v34  ;;  %v15750_v44 = vld [vmem:[#allocation54_spill] sm:$0xff] }
 0x44c   :  { %v4650_v24 = vadd.f32 %v4649_v11, %v4587_v31  ;;  %v15743_v31 = vld [vmem:[#allocation48_spill] sm:$0xff]  ;;  %v5025_v9 = vadd.f32 %v5024_v52, %v4962_v12  ;;  %v4529_v52 = vmul.f32 0.0, %v11166_v14  ;;  %v4591_v12 = vmul.f32 %v4527_v13, %v4527_v13 }
 0x44d   :  { %15741 = vst [vmem:[#allocation55_spill] sm:$0xff] %v11160_v48  ;;  %v11173_v11 = vsub.f32 %v15743_v31, %v10958_v51  ;;  %15746 = vst [vmem:[#allocation60_spill] sm:$0xff] %v11179_v19  ;;  %v11190_v31 = vsub.f32 %v10330_v1, %v10766_v34  ;;  %v11195_v39 = vsub.f32 %v15750_v44, %v10958_v51  ;;  %v15755_v44 = vld [vmem:[#allocation72_spill] sm:$0xff] }
 0x44e   :  { %v4651_v40 = vadd.f32 %v4650_v24, %v4588_v17  ;;  %v4964_v17 = vmul.f32 %v11160_v48, %v11160_v48  ;;  %v5026_v24 = vadd.f32 %v5025_v9, %v4963_v53  ;;  %v4530_v9 = vmul.f32 0.0, %v11179_v19  ;;  %v15753_v48 = vld [vmem:[#allocation56_spill] sm:$0xff]  ;;  %v15757_v19 = vld [vmem:[#allocation57_spill] sm:$0xff] }
 0x44f   :  { %15744 = vst [vmem:[#allocation39_spill] sm:$0xff] %v11173_v11  ;;  %15749 = vst [vmem:[#allocation41_spill] sm:$0xff] %v11190_v31  ;;  %v4965_v38 = vmul.f32 %v11173_v11, %v11173_v11  ;;  %v4592_v1 = vmul.f32 %v4528_v41, %v4528_v41  ;;  %v11206_v13 = vsub.f32 %v15753_v48, %v10958_v51 }
 0x450   :  { %v4652_v20 = vadd.f32 %v4651_v40, %v4589_v8  ;;  %15751 = vst [vmem:[#allocation61_spill] sm:$0xff] %v11195_v39  ;;  %v5027_v40 = vadd.f32 %v5026_v24, %v4964_v17  ;;  %v11201_v8 = vsub.f32 %v10358_v33, %v10766_v34  ;;  %v11212_v11 = vsub.f32 %v15755_v44, %v10766_v34 }
 0x451   :  { %15754 = vst [vmem:[#allocation45_spill] sm:$0xff] %v11206_v13  ;;  %v4531_v17 = vmul.f32 0.0, %v11190_v31  ;;  %v4593_v33 = vmul.f32 %v4529_v52, %v4529_v52  ;;  %v11217_v41 = vsub.f32 %v15757_v19, %v10958_v51  ;;  %v4967_v48 = vmul.f32 %v11195_v39, %v11195_v39  ;;  %v15761_v31 = vld [vmem:[#allocation62_spill] sm:$0xff] }
 0x452   :  { %v4653_v32 = vadd.f32 %v4652_v20, %v4590_v45  ;;  %15752 = vst [vmem:[#allocation63_spill] sm:$0xff] %v11201_v8  ;;  %v4966_v45 = vmul.f32 %v11184_v6, %v11184_v6  ;;  %v5028_v20 = vadd.f32 %v5027_v40, %v4965_v38  ;;  %15756 = vst [vmem:[#allocation65_spill] sm:$0xff] %v11212_v11  ;;  %v4532_v38 = vmul.f32 0.0, %v11201_v8  ;;  %v15765_v8 = vld [vmem:[#allocation64_spill] sm:$0xff] }
 0x453   :  { %15758 = vst [vmem:[#allocation46_spill] sm:$0xff] %v11217_v41  ;;  %v4594_v40 = vmul.f32 %v4530_v9, %v4530_v9  ;;  %v11228_v52 = vsub.f32 %v15761_v31, %v10958_v51  ;;  %v4968_v19 = vmul.f32 %v11206_v13, %v11206_v13  ;;  %v11239_v9 = vsub.f32 %v15765_v8, %v10958_v51 }
 0x454   :  { %v4654_v53 = vadd.f32 %v4653_v32, %v4591_v12  ;;  %v5029_v12 = vadd.f32 %v5028_v20, %v4966_v45  ;;  %v15759_v32 = vld [vmem:[#allocation75_spill] sm:$0xff]  ;;  %v4533_v45 = vmul.f32 0.0, %v11212_v11  ;;  %v4595_v20 = vmul.f32 %v4531_v17, %v4531_v17 }
 0x455   :  { %v11223_v6 = vsub.f32 %v15759_v32, %v10766_v34  ;;  %15762 = vst [vmem:[#allocation48_spill] sm:$0xff] %v11228_v52  ;;  %15766 = vst [vmem:[#allocation51_spill] sm:$0xff] %v11239_v9  ;;  %v4969_v31 = vmul.f32 %v11217_v41, %v11217_v41  ;;  %v15769_v11 = vld [vmem:[#allocation67_spill] sm:$0xff]  ;;  %v4970_v8 = vmul.f32 %v11228_v52, %v11228_v52 }
 0x456   :  { %v4655_v24 = vadd.f32 %v4654_v53, %v4592_v1  ;;  %v5030_v1 = vadd.f32 %v5029_v12, %v4967_v48  ;;  %v15763_v53 = vld [vmem:[#allocation77_spill] sm:$0xff]  ;;  %v4596_v12 = vmul.f32 %v4532_v38, %v4532_v38  ;;  %v11250_v17 = vsub.f32 %v15769_v11, %v10958_v51 }
 0x457   :  { %15760 = vst [vmem:[#allocation66_spill] sm:$0xff] %v11223_v6  ;;  %v11234_v39 = vsub.f32 %v15763_v53, %v10766_v34  ;;  %v4534_v48 = vmul.f32 0.0, %v11223_v6  ;;  %v15773_v6 = vld [vmem:[#allocation68_spill] sm:$0xff]  ;;  %v4971_v11 = vmul.f32 %v11239_v9, %v11239_v9 }
 0x458   :  { %v4656_v44 = vadd.f32 %v4655_v24, %v4593_v33  ;;  %v5031_v33 = vadd.f32 %v5030_v1, %v4968_v19  ;;  %v15767_v24 = vld [vmem:[#allocation79_spill] sm:$0xff]  ;;  %15770 = vst [vmem:[#allocation56_spill] sm:$0xff] %v11250_v17  ;;  %v4597_v1 = vmul.f32 %v4533_v45, %v4533_v45  ;;  %v11261_v38 = vsub.f32 %v15773_v6, %v10958_v51 }
 0x459   :  { %15764 = vst [vmem:[#allocation69_spill] sm:$0xff] %v11234_v39  ;;  %v11245_v13 = vsub.f32 %v15767_v24, %v10766_v34  ;;  %v4535_v19 = vmul.f32 0.0, %v11234_v39  ;;  %v15777_v39 = vld [vmem:[#allocation70_spill] sm:$0xff]  ;;  %v4972_v6 = vmul.f32 %v11250_v17, %v11250_v17 }
 0x45a   :  { %v4657_v32 = vadd.f32 %v4656_v44, %v4594_v40  ;;  %v5032_v40 = vadd.f32 %v5031_v33, %v4969_v31  ;;  %v15771_v44 = vld [vmem:[#allocation80_spill] sm:$0xff]  ;;  %15774 = vst [vmem:[#allocation57_spill] sm:$0xff] %v11261_v38  ;;  %v4598_v33 = vmul.f32 %v4534_v48, %v4534_v48  ;;  %v11272_v45 = vsub.f32 %v15777_v39, %v10958_v51 }
 0x45b   :  { %15768 = vst [vmem:[#allocation54_spill] sm:$0xff] %v11245_v13  ;;  %v11256_v41 = vsub.f32 %v15771_v44, %v10766_v34  ;;  %v4536_v31 = vmul.f32 0.0, %v11245_v13  ;;  %v15781_v13 = vld [vmem:[#allocation71_spill] sm:$0xff]  ;;  %v4973_v39 = vmul.f32 %v11261_v38, %v11261_v38 }
 0x45c   :  { %v4658_v53 = vadd.f32 %v4657_v32, %v4595_v20  ;;  %v5033_v20 = vadd.f32 %v5032_v40, %v4970_v8  ;;  %v15775_v32 = vld [vmem:[#allocation83_spill] sm:$0xff]  ;;  %15778 = vst [vmem:[#allocation62_spill] sm:$0xff] %v11272_v45  ;;  %v4599_v40 = vmul.f32 %v4535_v19, %v4535_v19  ;;  %v11283_v48 = vsub.f32 %v15781_v13, %v10958_v51 }
 0x45d   :  { %15772 = vst [vmem:[#allocation72_spill] sm:$0xff] %v11256_v41  ;;  %v11267_v52 = vsub.f32 %v15775_v32, %v10766_v34  ;;  %v4537_v8 = vmul.f32 0.0, %v11256_v41  ;;  %v15785_v41 = vld [vmem:[#allocation73_spill] sm:$0xff]  ;;  %v4974_v13 = vmul.f32 %v11272_v45, %v11272_v45 }
 0x45e   :  { %v4659_v24 = vadd.f32 %v4658_v53, %v4596_v12  ;;  %v5034_v12 = vadd.f32 %v5033_v20, %v4971_v11  ;;  %v15779_v53 = vld [vmem:[#allocation85_spill] sm:$0xff]  ;;  %15782 = vst [vmem:[#allocation64_spill] sm:$0xff] %v11283_v48  ;;  %v4600_v20 = vmul.f32 %v4536_v31, %v4536_v31  ;;  %v11294_v19 = vsub.f32 %v15785_v41, %v10958_v51 }
 0x45f   :  { %15776 = vst [vmem:[#allocation75_spill] sm:$0xff] %v11267_v52  ;;  %v11278_v9 = vsub.f32 %v15779_v53, %v10766_v34  ;;  %v4538_v11 = vmul.f32 0.0, %v11267_v52  ;;  %v15789_v52 = vld [vmem:[#allocation74_spill] sm:$0xff]  ;;  %v4975_v41 = vmul.f32 %v11283_v48, %v11283_v48 }
 0x460   :  { %v4660_v44 = vadd.f32 %v4659_v24, %v4597_v1  ;;  %v5035_v1 = vadd.f32 %v5034_v12, %v4972_v6  ;;  %v15783_v24 = vld [vmem:[#allocation87_spill] sm:$0xff]  ;;  %15786 = vst [vmem:[#allocation67_spill] sm:$0xff] %v11294_v19  ;;  %v4601_v12 = vmul.f32 %v4537_v8, %v4537_v8  ;;  %v11305_v31 = vsub.f32 %v15789_v52, %v10958_v51 }
 0x461   :  { %15780 = vst [vmem:[#allocation77_spill] sm:$0xff] %v11278_v9  ;;  %v11289_v17 = vsub.f32 %v15783_v24, %v10766_v34  ;;  %v4539_v6 = vmul.f32 0.0, %v11278_v9  ;;  %v15793_v9 = vld [vmem:[#allocation76_spill] sm:$0xff]  ;;  %v4976_v52 = vmul.f32 %v11294_v19, %v11294_v19 }
 0x462   :  { %v4661_v32 = vadd.f32 %v4660_v44, %v4598_v33  ;;  %v5036_v33 = vadd.f32 %v5035_v1, %v4973_v39  ;;  %v15787_v44 = vld [vmem:[#allocation89_spill] sm:$0xff]  ;;  %15790 = vst [vmem:[#allocation68_spill] sm:$0xff] %v11305_v31  ;;  %v4602_v1 = vmul.f32 %v4538_v11, %v4538_v11  ;;  %v11316_v8 = vsub.f32 %v15793_v9, %v10958_v51 }
 0x463   :  { %15784 = vst [vmem:[#allocation79_spill] sm:$0xff] %v11289_v17  ;;  %v11300_v38 = vsub.f32 %v15787_v44, %v10766_v34  ;;  %v4540_v39 = vmul.f32 0.0, %v11289_v17  ;;  %v15796_v17 = vld [vmem:[#allocation78_spill] sm:$0xff]  ;;  %v4977_v9 = vmul.f32 %v11305_v31, %v11305_v31 }
 0x464   :  { %v4662_v53 = vadd.f32 %v4661_v32, %v4599_v40  ;;  %v5037_v40 = vadd.f32 %v5036_v33, %v4974_v13  ;;  %v15791_v32 = vld [vmem:[#allocation92_spill] sm:$0xff]  ;;  %15794 = vst [vmem:[#allocation70_spill] sm:$0xff] %v11316_v8  ;;  %v4603_v33 = vmul.f32 %v4539_v6, %v4539_v6  ;;  %v11327_v11 = vsub.f32 %v15796_v17, %v10958_v51 }
 0x465   :  { %15788 = vst [vmem:[#allocation80_spill] sm:$0xff] %v11300_v38  ;;  %v11311_v45 = vsub.f32 %v15791_v32, %v10766_v34  ;;  %v4541_v13 = vmul.f32 0.0, %v11300_v38  ;;  %v15799_v38 = vld [vmem:[#allocation81_spill] sm:$0xff]  ;;  %v4978_v17 = vmul.f32 %v11316_v8, %v11316_v8 }
 0x466   :  { %v4663_v24 = vadd.f32 %v4662_v53, %v4600_v20  ;;  %v5038_v20 = vadd.f32 %v5037_v40, %v4975_v41  ;;  %v15795_v53 = vld [vmem:[#allocation94_spill] sm:$0xff]  ;;  %15797 = vst [vmem:[#allocation85_spill] sm:$0xff] %v11327_v11  ;;  %v4604_v40 = vmul.f32 %v4540_v39, %v4540_v39  ;;  %v11338_v6 = vsub.f32 %v15799_v38, %v10958_v51 }
 0x467   :  { %15792 = vst [vmem:[#allocation83_spill] sm:$0xff] %v11311_v45  ;;  %v11322_v48 = vsub.f32 %v15795_v53, %v10766_v34  ;;  %v4542_v41 = vmul.f32 0.0, %v11311_v45  ;;  %v4605_v31 = vmul.f32 %v4541_v13, %v4541_v13  ;;  %v4979_v39 = vmul.f32 %v11327_v11, %v11327_v11  ;;  %v15803_v45 = vld [vmem:[#allocation84_spill] sm:$0xff] }
 0x468   :  { %v4664_v44 = vadd.f32 %v4663_v24, %v4601_v12  ;;  %v5039_v12 = vadd.f32 %v5038_v20, %v4976_v52  ;;  %v15798_v24 = vld [vmem:[#allocation97_spill] sm:$0xff]  ;;  %15800 = vst [vmem:[#allocation71_spill] sm:$0xff] %v11338_v6  ;;  %v15801_v20 = vld [vmem:[#allocation82_spill] sm:$0xff]  ;;  %v11352_v8 = vsub.f32 %v15803_v45, %v10958_v51  ;;  %v4980_v13 = vmul.f32 %v11338_v6, %v11338_v6 }
 0x469   :  { %v11333_v19 = vsub.f32 %v15798_v24, %v10766_v34  ;;  %v11345_v34 = vsub.f32 %v15801_v20, %v10958_v51  ;;  %v4606_v38 = vmul.f32 %v4542_v41, %v4542_v41  ;;  %v15805_v20 = vld [vmem:[#allocation86_spill] sm:$0xff] }
 0x46a   :  { %v4665_v32 = vadd.f32 %v4664_v44, %v4602_v1  ;;  %v5040_v1 = vadd.f32 %v5039_v12, %v4977_v9  ;;  %v4543_v44 = vmul.f32 0.0, %v11322_v48  ;;  %15804 = vst [vmem:[#allocation73_spill] sm:$0xff] %v11352_v8  ;;  %v4545_v12 = vmul.f32 0.0, %v10776_v62 }
 0x46b   :  { %15802 = vst [vmem:[#allocation87_spill] sm:$0xff] %v11345_v34  ;;  %v11359_v11 = vsub.f32 %v15805_v20, %v10958_v51  ;;  %v4981_v41 = vmul.f32 %v11345_v34, %v11345_v34  ;;  %v4548_v34 = vmul.f32 0.0, %v10788_v22  ;;  %v15821_v22 = vld [vmem:[#allocation99_spill] sm:$0xff] }
 0x46c   :  { %v4666_v53 = vadd.f32 %v4665_v32, %v4603_v33  ;;  %v5041_v33 = vadd.f32 %v5040_v1, %v4978_v17  ;;  %v4544_v32 = vmul.f32 0.0, %v11333_v19  ;;  %v4546_v17 = vmul.f32 0.0, %v10780_v0 }
 0x46d   :  { %15806 = vst [vmem:[#allocation89_spill] sm:$0xff] %v11359_v11  ;;  %v4609_v20 = vmul.f32 %v4545_v12, %v4545_v12 }
 0x46e   :  { %v4667_v52 = vadd.f32 %v4666_v53, %v4604_v40  ;;  %v5042_v9 = vadd.f32 %v5041_v33, %v4979_v39  ;;  %v4607_v40 = vmul.f32 %v4543_v44, %v4543_v44  ;;  %v4608_v45 = vmul.f32 %v4544_v32, %v4544_v32  ;;  %v15809_v39 = vld [vmem:[#allocation88_spill] sm:$0xff] }
 0x46f   :  { %v11370_v44 = vsub.f32 %v15809_v39, %v10958_v51  ;;  %v4982_v33 = vmul.f32 %v11352_v8, %v11352_v8  ;;  %v4610_v8 = vmul.f32 %v4546_v17, %v4546_v17 }
 0x470   :  { %v4668_v24 = vadd.f32 %v4667_v52, %v4605_v31  ;;  %v5043_v31 = vadd.f32 %v5042_v9, %v4980_v13  ;;  %v15807_v52 = vld [vmem:[#allocation90_spill] sm:$0xff]  ;;  %v15811_v9 = vld [vmem:[#allocation91_spill] sm:$0xff] }
 0x471   :  { %v11366_v6 = vsub.f32 %v15807_v52, %v10958_v51  ;;  %15810 = vst [vmem:[#allocation92_spill] sm:$0xff] %v11370_v44  ;;  %v11377_v32 = vsub.f32 %v15811_v9, %v10958_v51  ;;  %v4983_v52 = vmul.f32 %v11359_v11, %v11359_v11 }
 0x472   :  { %v4669_v53 = vadd.f32 %v4668_v24, %v4606_v38  ;;  %v5044_v38 = vadd.f32 %v5043_v31, %v4981_v41  ;;  %v4547_v24 = vmul.f32 0.0, %v10784_v63  ;;  %v15815_v31 = vld [vmem:[#allocation95_spill] sm:$0xff] }
 0x473   :  { %15808 = vst [vmem:[#allocation74_spill] sm:$0xff] %v11366_v6  ;;  %15812 = vst [vmem:[#allocation76_spill] sm:$0xff] %v11377_v32  ;;  %v11388_v12 = vsub.f32 %v15815_v31, %v10958_v51  ;;  %v4550_v31 = vmul.f32 0.0, %v10796_v61 }
 0x474   :  { %v4670_v1 = vadd.f32 %v4669_v53, %v4607_v40  ;;  %v15813_v40 = vld [vmem:[#allocation93_spill] sm:$0xff]  ;;  %v5045_v39 = vadd.f32 %v5044_v38, %v4982_v33  ;;  %v4611_v63 = vmul.f32 %v4547_v24, %v4547_v24  ;;  %v15817_v33 = vld [vmem:[#allocation96_spill] sm:$0xff] }
 0x475   :  { %v11381_v53 = vsub.f32 %v15813_v40, %v10958_v51  ;;  %15816 = vst [vmem:[#allocation78_spill] sm:$0xff] %v11388_v12  ;;  %v4549_v40 = vmul.f32 0.0, %v10792_v60  ;;  %v11397_v38 = vsub.f32 %v15817_v33, %v10958_v51  ;;  %v4551_v33 = vmul.f32 0.0, %v10800_v55 }
 0x476   :  { %v4671_v13 = vadd.f32 %v4670_v1, %v4608_v45  ;;  %v4922_v45 = vmul.f32 %v10229_v35, %v11370_v44  ;;  %v4984_v1 = vmul.f32 %v11366_v6, %v11366_v6  ;;  %v5046_v9 = vadd.f32 %v5045_v39, %v4983_v52  ;;  %v15819_v52 = vld [vmem:[#allocation98_spill] sm:$0xff] }
 0x477   :  { %15814 = vst [vmem:[#allocation94_spill] sm:$0xff] %v11381_v53  ;;  %15818 = vst [vmem:[#allocation97_spill] sm:$0xff] %v11397_v38  ;;  %v4923_v17 = vmul.f32 0.0, %v11381_v53  ;;  %v4612_v35 = vmul.f32 %v4548_v34, %v4548_v34  ;;  %v11405_v39 = vsub.f32 %v15819_v52, %v10958_v51  ;;  %v4613_v6 = vmul.f32 %v4549_v40, %v4549_v40 }
 0x478   :  { %v4672_v41 = vadd.f32 %v4671_v13, %v4609_v20  ;;  %v4985_v20 = vmul.f32 %v11377_v32, %v11377_v32  ;;  %v5047_v13 = vadd.f32 %v5046_v9, %v4984_v1  ;;  %v4986_v24 = vmul.f32 %v4922_v45, %v4922_v45 }
 0x479   :  { %15820 = vst [vmem:[#allocation81_spill] sm:$0xff] %v11405_v39  ;;  %v11411_v32 = vsub.f32 %v15821_v22, %v10958_v51  ;;  %v4925_v1 = vmul.f32 0.0, %v11397_v38  ;;  %v4987_v34 = vmul.f32 %v4923_v17, %v4923_v17  ;;  %v4614_v9 = vmul.f32 %v4550_v31, %v4550_v31  ;;  %v15825_v22 = vld [vmem:[#allocation101_spill] sm:$0xff]  ;;  %v15878_v38 = vld [vmem:[#allocation36_spill] sm:$0xff] }
 0x47a   :  { %v4673_v11 = vadd.f32 %v4672_v41, %v4610_v8  ;;  %v4924_v8 = vmul.f32 0.0, %v11388_v12  ;;  %v5048_v41 = vadd.f32 %v5047_v13, %v4985_v20  ;;  %v15823_v12 = vld [vmem:[#allocation100_spill] sm:$0xff]  ;;  %v4926_v20 = vmul.f32 0.0, %v11405_v39 }
 0x47b   :  { %15822 = vst [vmem:[#allocation82_spill] sm:$0xff] %v11411_v32  ;;  %v11417_v45 = vsub.f32 %v15823_v12, %v10958_v51  ;;  %v11422_v55 = vsub.f32 %v15825_v22, %v10958_v51  ;;  %v4927_v17 = vmul.f32 0.0, %v11411_v32 }
 0x47c   :  { %v4674_v44 = vadd.f32 %v4673_v11, %v4611_v63  ;;  %v5049_v63 = vadd.f32 %v5048_v41, %v4986_v24  ;;  %v4552_v11 = vmul.f32 0.0, %v10804_v18  ;;  %v4988_v40 = vmul.f32 %v4924_v8, %v4924_v8 }
 0x47d   :  { %15824 = vst [vmem:[#allocation84_spill] sm:$0xff] %v11417_v45  ;;  %15826 = vst [vmem:[#allocation86_spill] sm:$0xff] %v11422_v55  ;;  %v4989_v24 = vmul.f32 %v4925_v1, %v4925_v1  ;;  %v4928_v39 = vmul.f32 0.0, %v11417_v45  ;;  %v4990_v8 = vmul.f32 %v4926_v20, %v4926_v20  ;;  %v4991_v22 = vmul.f32 %v4927_v17, %v4927_v17 }
 0x47e   :  { %v4675_v53 = vadd.f32 %v4674_v44, %v4612_v35  ;;  %v5050_v35 = vadd.f32 %v5049_v63, %v4987_v34  ;;  %v4615_v44 = vmul.f32 %v4551_v33, %v4551_v33  ;;  %v4616_v31 = vmul.f32 %v4552_v11, %v4552_v11  ;;  %v15829_v63 = vld [vmem:[#allocation103_spill] sm:$0xff] }
 0x47f   :  { %v11437_v11 = vsub.f32 %v10707_v47, %v10958_v51 }
 0x480   :  { %v4676_v52 = vadd.f32 %v4675_v53, %v4613_v6  ;;  %v5051_v41 = vadd.f32 %v5050_v35, %v4988_v40  ;;  %v15827_v53 = vld [vmem:[#allocation102_spill] sm:$0xff] }
 0x481   :  { %v11427_v12 = vsub.f32 %v15827_v53, %v10958_v51  ;;  %15831 = vst [vmem:[#allocation91_spill] sm:$0xff] %v11437_v11  ;;  %v11443_v53 = vsub.f32 %v10710_v16, %v10958_v51  ;;  %v4932_v17 = vmul.f32 0.0, %v11437_v11  ;;  %v11453_v16 = vsub.f32 %v10725_v26, %v10958_v51  ;;  %v15871_v11 = vld [vmem:[#allocation37_spill] sm:$0xff] }
 0x482   :  { %v4677_v13 = vadd.f32 %v4676_v52, %v4614_v9  ;;  %v5052_v34 = vadd.f32 %v5051_v41, %v4989_v24  ;;  %v11432_v9 = vsub.f32 %v15829_v63, %v10958_v51  ;;  %v4929_v52 = vmul.f32 0.0, %v11422_v55 }
 0x483   :  { %15828 = vst [vmem:[#allocation90_spill] sm:$0xff] %v11427_v12  ;;  %v4930_v35 = vmul.f32 0.0, %v11427_v12  ;;  %15832 = vst [vmem:[#allocation93_spill] sm:$0xff] %v11443_v53 }
 0x484   :  { %v4678_v6 = vadd.f32 %v4677_v13, %v4615_v44  ;;  %15830 = vst [vmem:[#allocation88_spill] sm:$0xff] %v11432_v9  ;;  %v5053_v1 = vadd.f32 %v5052_v34, %v4990_v8  ;;  %v4992_v44 = vmul.f32 %v4928_v39, %v4928_v39  ;;  %v4931_v24 = vmul.f32 0.0, %v11432_v9  ;;  %15834 = vst [vmem:[#allocation96_spill] sm:$0xff] %v11453_v16 }
 0x485   :  { %v4993_v41 = vmul.f32 %v4929_v52, %v4929_v52  ;;  %v4994_v8 = vmul.f32 %v4930_v35, %v4930_v35  ;;  %v11448_v39 = vsub.f32 %v10719_v59, %v10958_v51  ;;  %v4996_v52 = vmul.f32 %v4932_v17, %v4932_v17 }
 0x486   :  { %v4679_v33 = vadd.f32 %v4678_v6, %v4616_v31  ;;  %v5054_v13 = vadd.f32 %v5053_v1, %v4991_v22  ;;  %v4995_v63 = vmul.f32 %v4931_v24, %v4931_v24  ;;  %v11458_v24 = vsub.f32 %v10733_v49, %v10958_v51 }
 0x487   :  { %15833 = vst [vmem:[#allocation95_spill] sm:$0xff] %v11448_v39  ;;  %v4934_v35 = vmul.f32 0.0, %v11448_v39  ;;  %v4935_v59 = vmul.f32 0.0, %v11453_v16  ;;  %v15869_v16 = vld [vmem:[#allocation15_spill] sm:$0xff] }
 0x488   :  { %v4680_v40 = vrot.slane %v4679_v33, 4  ;;  %v5055_v31 = vadd.f32 %v5054_v13, %v4992_v44  ;;  %15835 = vst [vmem:[#allocation98_spill] sm:$0xff] %v11458_v24  ;;  %v4936_v26 = vmul.f32 0.0, %v11458_v24  ;;  %v15868_v24 = vld [vmem:[#allocation32_spill] sm:$0xff] }
 0x489   :  { %v4999_v17 = vmul.f32 %v4935_v59, %v4935_v59  ;;  %v8672_v59 = vld [vmem:[%s15227_s7] ss:$8 sps:$4 sm:$0xff]  }
 0x48a   :  { %v4681_v20 = vadd.f32 %v4680_v40, %v4679_v33  ;;  %v5056_v34 = vadd.f32 %v5055_v31, %v4993_v41  ;;  %v4933_v33 = vmul.f32 0.0, %v11443_v53  ;;  %v4998_v41 = vmul.f32 %v4934_v35, %v4934_v35 }
 0x48b   :  { %v11486_v35 = vsub.f32 %v10772_v57, %v10958_v51  ;;  %v11506_v57 = vsub.f32 %v10823_v50, %v10958_v51  ;;  %v2993_v50 = vld [vmem:[%s15225_s6 + $0x2] sm:$0x1] }
 0x48c   :  { %v4682_v6 = vrot.slane %v4681_v20, 2  ;;  %v5057_v55 = vadd.f32 %v5056_v34, %v4994_v8  ;;  %v4997_v44 = vmul.f32 %v4933_v33, %v4933_v33 }
 0x48d   :  { %15841 = vst [vmem:[#allocation107_spill] sm:$0xff] %v11486_v35  ;;  %15845 = vst [vmem:[#allocation111_spill] sm:$0xff] %v11506_v57 }
 0x48e   :  { %v4683_v47 = vadd.f32 %v4682_v6, %v4681_v20  ;;  %v5058_v22 = vadd.f32 %v5057_v55, %v4995_v63  ;;  %v11463_v6 = vsub.f32 %v10736_v54, %v10958_v51  ;;  %v5000_v63 = vmul.f32 %v4936_v26, %v4936_v26 }
 0x490   :  { %v4684_v1 = vrot.slane %v4683_v47, 1  ;;  %v5059_v40 = vadd.f32 %v5058_v22, %v4996_v52  ;;  %15836 = vst [vmem:[#allocation99_spill] sm:$0xff] %v11463_v6  ;;  %v4937_v49 = vmul.f32 0.0, %v11463_v6  ;;  %v11473_v52 = vsub.f32 %v10749_v36, %v10958_v51  ;;  %v15866_v6 = vld [vmem:[#allocation25_spill] sm:$0xff] }
 0x491   :  { %v11490_v36 = vsub.f32 %v10808_v23, %v10958_v51  ;;  %v11510_v23 = vsub.f32 %v10836_v28, %v10958_v51 }
 0x492   :  { %v4685_v13 = vadd.f32 %v4684_v1, %v4683_v47  ;;  %v5060_v20 = vadd.f32 %v5059_v40, %v4997_v44  ;;  %v11468_v47 = vsub.f32 %v10743_v27, %v10958_v51  ;;  %15838 = vst [vmem:[#allocation101_spill] sm:$0xff] %v11473_v52  ;;  %v5001_v22 = vmul.f32 %v4937_v49, %v4937_v49 }
 0x493   :  { %v11478_v40 = vsub.f32 %v10757_v10, %v10958_v51  ;;  %v11482_v27 = vsub.f32 %v10760_v25, %v10958_v51  ;;  %15842 = vst [vmem:[#allocation108_spill] sm:$0xff] %v11490_v36  ;;  %v11494_v44 = vsub.f32 %v10814_v30, %v10958_v51  ;;  %v8674_v25 = vld [vmem:[%s15227_s7 + $0x4] ss:$8 sps:$4 sm:$0xff]   ;;  %15846 = vst [vmem:[#allocation112_spill] sm:$0xff] %v11510_v23  ;;  %v4943_v26 = vmul.f32 0.0, %v11490_v36 }
 0x494   :  { %v4686_v31 = vmul.f32 0.0033333334, %v4685_v13  ;;  %v5061_v55 = vadd.f32 %v5060_v20, %v4998_v41  ;;  %15837 = vst [vmem:[#allocation100_spill] sm:$0xff] %v11468_v47  ;;  %v4938_v54 = vmul.f32 0.0, %v11468_v47  ;;  %v4939_v13 = vmul.f32 0.0, %v11473_v52  ;;  %v15848_v41 = vld [vmem:[#allocation52_spill] sm:$0xff]  ;;  %6021 = vmatprep.subr.bf16.mxu0 %v8674_v25 }
 0x495   :  { %15839 = vst [vmem:[#allocation102_spill] sm:$0xff] %v11478_v40  ;;  %15840 = vst [vmem:[#allocation103_spill] sm:$0xff] %v11482_v27  ;;  %v11502_v20 = vsub.f32 %v10817_v7, %v10958_v51  ;;  %v11514_v30 = vsub.f32 %v10853_v3, %v10958_v51  ;;  %v4940_v28 = vmul.f32 0.0, %v11478_v40  ;;  %v4941_v3 = vmul.f32 0.0, %v11482_v27  ;;  %6022 = vmatpush1.bf16.msra.mxu0 %v8672_v59  ;;  %v15864_v52 = vld [vmem:[#allocation16_spill] sm:$0xff]  ;;  %v15865_v47 = vld [vmem:[#allocation22_spill] sm:$0xff] }
 0x496   :  { %v5083_v8 = vadd.f32 1e-05, %v4686_v31  ;;  %v5062_v34 = vadd.f32 %v5061_v55, %v4999_v17  ;;  %15843 = vst [vmem:[#allocation109_spill] sm:$0xff] %v11494_v44  ;;  %v5002_v10 = vmul.f32 %v4938_v54, %v4938_v54  ;;  %v11520_v31 = vsub.s32 0, %v15848_v41 }
 0x497   :  { %15844 = vst [vmem:[#allocation110_spill] sm:$0xff] %v11502_v20  ;;  %15847 = vst [vmem:[#allocation113_spill] sm:$0xff] %v11514_v30  ;;  %v4942_v51 = vmul.f32 0.0, %v11486_v35  ;;  %v4944_v17 = vmul.f32 0.0, %v11494_v44  ;;  %v4945_v49 = vmul.f32 0.0, %v11502_v20  ;;  %v4948_v54 = vmul.f32 0.0, %v11514_v30 }
 0x498   :  { %8712 = vrsqrt.f32 %v5083_v8  ;;  %v5063_v33 = vadd.f32 %v5062_v34, %v5000_v63  ;;  %15849 = vst [vmem:[#allocation114_spill] sm:$0xff] %v11520_v31  ;;  %v5003_v8 = vmul.f32 %v4939_v13, %v4939_v13  ;;  %v8677_v34 = vld [vmem:[%s15227_s7 + $0x14] ss:$8 sps:$4 sm:$0xff]   ;;  %v4946_v63 = vmul.f32 0.0, %v11506_v57  ;;  %v8680_v30 = vld [vmem:[%s15227_s7 + $0x24] ss:$8 sps:$4 sm:$0xff]  }
 0x499   :  { %v11545_v13 = vrot.slane %v2993_v50, %v11520_v31  ;;  %6023 = vmatprep.subr.bf16.mxu0 %v8677_v34  ;;  %v5004_v25 = vmul.f32 %v4940_v28, %v4940_v28  ;;  %v5005_v59 = vmul.f32 %v4941_v3, %v4941_v3  ;;  %v5006_v41 = vmul.f32 %v4942_v51, %v4942_v51  ;;  %v15879_v31 = vld [vmem:[#allocation33_spill] sm:$0xff] }
 0x49a   :  { %v5064_v1 = vadd.f32 %v5063_v33, %v5001_v22  ;;  %v4947_v33 = vmul.f32 0.0, %v11510_v23  ;;  %v8675_v22 = vld [vmem:[%s15227_s7 + $0x10] ss:$8 sps:$4 sm:$0xff]   ;;  %v5007_v44 = vmul.f32 %v4943_v26, %v4943_v26  ;;  %v5008_v23 = vmul.f32 %v4944_v17, %v4944_v17  ;;  %v11569_v17 = vld [vmem:[%s15225_s6 + $0x3] ss:$0 sm:$0xff]  ;;  %v15884_v57 = vld [vmem:[#allocation41_spill] sm:$0xff] }
 0x49b   :  { %15850 = vst [vmem:[#allocation115_spill] sm:$0xff] %v11545_v13  ;;  %6024 = vmatpush1.bf16.msra.mxu0 %v8675_v22  ;;  %v5009_v36 = vmul.f32 %v4945_v49, %v4945_v49  ;;  %v11550_v35 = vmul.f32 %v4946_v63, %v4946_v63  ;;  %v11564_v26 = vmul.f32 %v2993_v50, %v2993_v50  ;;  %v15852_v63 = vld [vmem:[#allocation4_spill] sm:$0xff] }
 0x49c   :  { %v5065_v7 = vadd.f32 %v5064_v1, %v5002_v10  ;;  %v11552_v27 = vmul.f32 %v4947_v33, %v4947_v33  ;;  %6025 = vmatprep.subr.bf16.mxu0 %v8680_v30  ;;  %v8681_v33 = vld [vmem:[%s15227_s7 + $0x30] ss:$8 sps:$4 sm:$0xff]  }
 0x49d   :  { %15851 = vst [vmem:[#allocation116_spill] sm:$0xff] %v11564_v26 }
 0x49e   :  { %v5066_v10 = vadd.f32 %v5065_v7, %v5003_v8  ;;  %v8678_v7 = vld [vmem:[%s15227_s7 + $0x20] ss:$8 sps:$4 sm:$0xff]  }
 0x49f   :  { %6026 = vmatpush1.bf16.msra.mxu0 %v8678_v7 }
 0x4a0   :  { %v5067_v51 = vadd.f32 %v5066_v10, %v5004_v25  ;;  %v15856_v10 = vld [vmem:[#allocation7_spill] sm:$0xff] }
 0x4a2   :  { %v11522_v55 = vpop.eup %8712  ;;  %v5068_v49 = vadd.f32 %v5067_v51, %v5005_v59  ;;  %v15857_v59 = vld [vmem:[#allocation8_spill] sm:$0xff] }
 0x4a3   :  { %v5148_v1 = vmul.f32 %v11522_v55, %v10796_v61  ;;  %v11554_v61 = vmul.f32 %v4948_v54, %v4948_v54  ;;  %v11562_v3 = vmul.f32 %v11522_v55, %v10828_v42  ;;  %v11573_v8 = vmul.f32 %v11522_v55, %v10832_v4 }
 0x4a4   :  { %v11577_v34 = vmul.f32 %v11522_v55, %v10841_v2  ;;  %v11581_v42 = vmul.f32 %v11522_v55, %v10849_v21  ;;  %v11585_v30 = vmul.f32 %v11522_v55, %v10857_v15  ;;  %v11589_v50 = vmul.f32 %v11522_v55, %v10863_v43  ;;  %v8683_v21 = vld [vmem:[%s15227_s7 + $0x34] ss:$8 sps:$4 sm:$0xff]  }
 0x4a5   :  { %v5216_v28 = vmul.f32 %v11545_v13, %v5148_v1  ;;  %v11593_v4 = vmul.f32 %v11522_v55, %v10870_v58  ;;  %v11597_v2 = vmul.f32 %v11522_v55, %v10876_v37  ;;  %v11604_v15 = vmul.f32 %v11522_v55, %v10882_v29  ;;  %v15854_v29 = vld [vmem:[#allocation5_spill] sm:$0xff]  ;;  %6027 = vmatprep.subr.bf16.mxu0 %v8683_v21 }
 0x4a6   :  { %v11608_v43 = vmul.f32 %v11522_v55, %v10888_v46  ;;  %v11612_v58 = vmul.f32 %v11522_v55, %v10894_v56  ;;  %v11616_v37 = vmul.f32 %v11522_v55, %v15852_v63  ;;  %v11626_v22 = vmul.f32 %v11522_v55, %v15854_v29  ;;  %v15855_v46 = vld [vmem:[#allocation6_spill] sm:$0xff]  ;;  %6028 = vmatpush1.bf16.msra.mxu0 %v8681_v33 }
 0x4a7   :  { %v11622_v54 = vadd.f32 %v11569_v17, %v5216_v28  ;;  %v11630_v1 = vmul.f32 %v11522_v55, %v15855_v46  ;;  %v5069_v56 = vadd.f32 %v5068_v49, %v5006_v41  ;;  %v11634_v25 = vmul.f32 %v11522_v55, %v15856_v10  ;;  %v15858_v28 = vld [vmem:[#allocation9_spill] sm:$0xff]  ;;  %v15859_v63 = vld [vmem:[#allocation10_spill] sm:$0xff]  ;;  %v15860_v46 = vld [vmem:[#allocation11_spill] sm:$0xff] }
 0x4a8   :  { %v11638_v7 = vmul.f32 %v11522_v55, %v15857_v59  ;;  %v11642_v51 = vmul.f32 %v11522_v55, %v15858_v28  ;;  %v11646_v29 = vmul.f32 %v11522_v55, %v15859_v63  ;;  %v11650_v41 = vmul.f32 %v11522_v55, %v15860_v46  ;;  %v15861_v49 = vld [vmem:[#allocation12_spill] sm:$0xff]  ;;  %v15862_v10 = vld [vmem:[#allocation13_spill] sm:$0xff]  ;;  %v15863_v63 = vld [vmem:[#allocation14_spill] sm:$0xff] }
 0x4a9   :  { %15853 = vst [vmem:[#allocation4_spill] sm:$0xff] %v11622_v54  ;;  %v11654_v21 = vmul.f32 %v11522_v55, %v15861_v49  ;;  %v11658_v59 = vmul.f32 %v11522_v55, %v15862_v10  ;;  %v5070_v40 = vadd.f32 %v5069_v56, %v5007_v44  ;;  %v8686_v28 = vld [vmem:[%s15227_s7 + $0x44] ss:$8 sps:$4 sm:$0xff]   ;;  %v11665_v33 = vmul.f32 %v11522_v55, %v15863_v63  ;;  %v8684_v44 = vld [vmem:[%s15227_s7 + $0x40] ss:$8 sps:$4 sm:$0xff]   ;;  %v15867_v56 = vld [vmem:[#allocation27_spill] sm:$0xff] }
 0x4aa   :  { %v11669_v46 = vmul.f32 %v11522_v55, %v15864_v52  ;;  %v11673_v49 = vmul.f32 %v11522_v55, %v15865_v47  ;;  %v11677_v10 = vmul.f32 %v11522_v55, %v15866_v6  ;;  %v11684_v63 = vmul.f32 %v11522_v55, %v15867_v56  ;;  %6029 = vmatprep.subr.bf16.mxu0 %v8686_v28  ;;  %v15870_v6 = vld [vmem:[#allocation35_spill] sm:$0xff]  ;;  %v15872_v56 = vld [vmem:[#allocation40_spill] sm:$0xff]  ;;  %v15880_v54 = vld [vmem:[#allocation53_spill] sm:$0xff] }
 0x4ab   :  { %v11688_v52 = vmul.f32 %v11522_v55, %v15868_v24  ;;  %v11692_v47 = vmul.f32 %v11522_v55, %v15869_v16  ;;  %v5071_v39 = vadd.f32 %v5070_v40, %v5008_v23  ;;  %v11696_v53 = vmul.f32 %v11522_v55, %v15870_v6  ;;  %v15873_v24 = vld [vmem:[#allocation42_spill] sm:$0xff]  ;;  %6030 = vmatpush1.bf16.msra.mxu0 %v8684_v44  ;;  %v15874_v16 = vld [vmem:[#allocation43_spill] sm:$0xff]  ;;  %v15875_v23 = vld [vmem:[#allocation44_spill] sm:$0xff] }
 0x4ac   :  { %v11700_v9 = vmul.f32 %v11522_v55, %v15871_v11  ;;  %v11704_v12 = vmul.f32 %v11522_v55, %v15872_v56  ;;  %v11708_v45 = vmul.f32 %v11522_v55, %v15873_v24  ;;  %v11712_v40 = vmul.f32 %v11522_v55, %v15874_v16  ;;  %v15876_v6 = vld [vmem:[#allocation47_spill] sm:$0xff]  ;;  %v15877_v24 = vld [vmem:[#allocation49_spill] sm:$0xff] }
 0x4ad   :  { %v11716_v28 = vmul.f32 %v11522_v55, %v15875_v23  ;;  %v11720_v11 = vmul.f32 %v11522_v55, %v15876_v6  ;;  %v5072_v32 = vadd.f32 %v5071_v39, %v5009_v36  ;;  %v8689_v56 = vld [vmem:[%s15227_s7 + $0x54] ss:$8 sps:$4 sm:$0xff]   ;;  %v11727_v44 = vmul.f32 %v11522_v55, %v15877_v24  ;;  %v8687_v39 = vld [vmem:[%s15227_s7 + $0x50] ss:$8 sps:$4 sm:$0xff]   ;;  %v15883_v24 = vld [vmem:[#allocation60_spill] sm:$0xff] }
 0x4ae   :  { %v11731_v16 = vmul.f32 %v11522_v55, %v15878_v38  ;;  %v11735_v23 = vmul.f32 %v11522_v55, %v15879_v31  ;;  %v11739_v6 = vmul.f32 %v11522_v55, %v15880_v54  ;;  %v11746_v36 = vmul.f32 %v11522_v55, %v11152_v5  ;;  %6031 = vmatprep.subr.bf16.mxu0 %v8689_v56  ;;  %v8692_v54 = vld [vmem:[%s15227_s7 + $0x64] ss:$8 sps:$4 sm:$0xff]   ;;  %v15886_v5 = vld [vmem:[#allocation63_spill] sm:$0xff]  ;;  %v15890_v56 = vld [vmem:[#allocation66_spill] sm:$0xff] }
 0x4af   :  { %v11750_v38 = vmul.f32 %v11522_v55, %v11166_v14  ;;  %v11754_v31 = vmul.f32 %v11522_v55, %v15883_v24  ;;  %v5073_v26 = vadd.f32 %v5072_v32, %v11550_v35  ;;  %v11762_v20 = vmul.f32 %v11522_v55, %v15884_v57  ;;  %v15888_v14 = vld [vmem:[#allocation65_spill] sm:$0xff]  ;;  %6032 = vmatpush1.bf16.msra.mxu0 %v8687_v39  ;;  %v15896_v39 = vld [vmem:[#allocation72_spill] sm:$0xff] }
 0x4b0   :  { %15881 = vst [vmem:[#allocation5_spill] sm:$0xff] %v11746_v36  ;;  %v11766_v36 = vmul.f32 %v11522_v55, %v15886_v5  ;;  %v5147_v32 = vmul.f32 %v11522_v55, %v10792_v60  ;;  %v8690_v35 = vld [vmem:[%s15227_s7 + $0x60] ss:$8 sps:$4 sm:$0xff]   ;;  %v11779_v57 = vmul.f32 %v11522_v55, %v15890_v56  ;;  %6033 = vmatprep.subr.bf16.mxu0 %v8692_v54  ;;  %v8695_v60 = vld [vmem:[%s15227_s7 + $0x74] ss:$8 sps:$4 sm:$0xff]  }
 0x4b1   :  { %15882 = vst [vmem:[#allocation6_spill] sm:$0xff] %v11750_v38  ;;  %15885 = vst [vmem:[#allocation7_spill] sm:$0xff] %v11762_v20  ;;  %v11770_v38 = vmul.f32 %v11522_v55, %v15888_v14  ;;  %v15892_v24 = vld [vmem:[#allocation69_spill] sm:$0xff]  ;;  %v11795_v20 = vmul.f32 %v11522_v55, %v15896_v39  ;;  %v15897_v56 = vld [vmem:[#allocation75_spill] sm:$0xff] }
 0x4b2   :  { %15887 = vst [vmem:[#allocation8_spill] sm:$0xff] %v11766_v36  ;;  %15891 = vst [vmem:[#allocation10_spill] sm:$0xff] %v11779_v57  ;;  %v11783_v5 = vmul.f32 %v11522_v55, %v15892_v24  ;;  %v15894_v36 = vld [vmem:[#allocation54_spill] sm:$0xff]  ;;  %v11799_v57 = vmul.f32 %v11522_v55, %v15897_v56  ;;  %v15899_v24 = vld [vmem:[#allocation77_spill] sm:$0xff]  ;;  %v11819_v56 = vmul.f32 %v11522_v55, %v11322_v48 }
 0x4b3   :  { %15889 = vst [vmem:[#allocation9_spill] sm:$0xff] %v11770_v38  ;;  %v11787_v14 = vmul.f32 %v11522_v55, %v15894_v36  ;;  %v5074_v38 = vadd.f32 %v5073_v26, %v11552_v27  ;;  %v15900_v36 = vld [vmem:[#allocation79_spill] sm:$0xff]  ;;  %v15901_v26 = vld [vmem:[#allocation80_spill] sm:$0xff]  ;;  %6034 = vmatpush1.bf16.msra.mxu0 %v8690_v35  ;;  %v11856_v35 = vmul.f32 %v11545_v13, %v11562_v3 }
 0x4b4   :  { %15893 = vst [vmem:[#allocation11_spill] sm:$0xff] %v11783_v5  ;;  %15898 = vst [vmem:[#allocation13_spill] sm:$0xff] %v11799_v57  ;;  %v11803_v5 = vmul.f32 %v11522_v55, %v15899_v24  ;;  %v11807_v27 = vmul.f32 %v11522_v55, %v15900_v36  ;;  %v11811_v54 = vmul.f32 %v11522_v55, %v15901_v26  ;;  %v8693_v48 = vld [vmem:[%s15227_s7 + $0x70] ss:$8 sps:$4 sm:$0xff]   ;;  %6035 = vmatprep.subr.bf16.mxu0 %v8695_v60 }
 0x4b5   :  { %15895 = vst [vmem:[#allocation12_spill] sm:$0xff] %v11787_v14  ;;  %v15902_v14 = vld [vmem:[#allocation83_spill] sm:$0xff]  ;;  %v5075_v57 = vadd.f32 %v5074_v38, %v11554_v61  ;;  %v11824_v24 = vmul.f32 %v11522_v55, %v11333_v19  ;;  %v11828_v36 = vmul.f32 %v11522_v55, %v10776_v62  ;;  %v11832_v26 = vmul.f32 %v11522_v55, %v10780_v0  ;;  %v15905_v61 = vld [vmem:[#allocation104_spill] sm:$0xff]  ;;  %v15906_v19 = vld [vmem:[#allocation105_spill] sm:$0xff] }
 0x4b6   :  { %v11815_v39 = vmul.f32 %v11522_v55, %v15902_v14  ;;  %v5215_v14 = vmul.f32 %v11545_v13, %v5147_v32  ;;  %v11840_v38 = vmul.f32 %v11522_v55, %v15905_v61  ;;  %v15907_v62 = vld [vmem:[#allocation106_spill] sm:$0xff]  ;;  %v11852_v32 = vmul.f32 %v11522_v55, %v10804_v18 }
 0x4b7   :  { %15903 = vst [vmem:[#allocation14_spill] sm:$0xff] %v11824_v24  ;;  %15904 = vst [vmem:[#allocation16_spill] sm:$0xff] %v11828_v36  ;;  %v11844_v24 = vmul.f32 %v11522_v55, %v15906_v19  ;;  %v11848_v36 = vmul.f32 %v11522_v55, %v15907_v62  ;;  %v5076_v0 = vrot.slane %v5075_v57, 4  ;;  %v11860_v61 = vmul.f32 %v11545_v13, %v11573_v8 }
 0x4b8   :  { %v11864_v19 = vmul.f32 %v11545_v13, %v11577_v34  ;;  %v11868_v60 = vmul.f32 %v11545_v13, %v11581_v42  ;;  %v11872_v18 = vmul.f32 %v11545_v13, %v11585_v30  ;;  %v11876_v55 = vmul.f32 %v11545_v13, %v11589_v50  ;;  %6036 = vmatpush1.bf16.msra.mxu0 %v8693_v48 }
 0x4b9   :  { %v5077_v62 = vadd.f32 %v5076_v0, %v5075_v57  ;;  %v11879_v3 = vadd.f32 %v11569_v17, %v5215_v14  ;;  %v11883_v8 = vmul.f32 %v11545_v13, %v11593_v4  ;;  %v11887_v34 = vmul.f32 %v11545_v13, %v11597_v2 }
 0x4ba   :  { %v11891_v42 = vmul.f32 %v11545_v13, %v11604_v15  ;;  %v11895_v50 = vmul.f32 %v11545_v13, %v11608_v43  ;;  %v11899_v57 = vmul.f32 %v11545_v13, %v11612_v58  ;;  %v11903_v4 = vmul.f32 %v11545_v13, %v11616_v37 }
 0x4bb   :  { %v5078_v30 = vrot.slane %v5077_v62, 2  ;;  %v11907_v2 = vmul.f32 %v11545_v13, %v11626_v22  ;;  %v11911_v15 = vmul.f32 %v11545_v13, %v11630_v1  ;;  %v11915_v43 = vmul.f32 %v11545_v13, %v11634_v25 }
 0x4bc   :  { %v11919_v58 = vmul.f32 %v11545_v13, %v11638_v7  ;;  %v11923_v37 = vmul.f32 %v11545_v13, %v11642_v51  ;;  %v11927_v22 = vmul.f32 %v11545_v13, %v11646_v29  ;;  %v11931_v1 = vmul.f32 %v11545_v13, %v11650_v41 }
 0x4bd   :  { %v5079_v14 = vadd.f32 %v5078_v30, %v5077_v62  ;;  %v11935_v25 = vmul.f32 %v11545_v13, %v11654_v21  ;;  %v11939_v7 = vmul.f32 %v11545_v13, %v11658_v59  ;;  %v11943_v51 = vmul.f32 %v11545_v13, %v11665_v33 }
 0x4be   :  { %v11947_v29 = vmul.f32 %v11545_v13, %v11669_v46  ;;  %v11951_v41 = vmul.f32 %v11545_v13, %v11673_v49  ;;  %v11955_v21 = vmul.f32 %v11545_v13, %v11677_v10  ;;  %v11959_v59 = vmul.f32 %v11545_v13, %v11684_v63 }
 0x4bf   :  { %v5080_v48 = vrot.slane %v5079_v14, 1  ;;  %v11963_v33 = vmul.f32 %v11545_v13, %v11688_v52  ;;  %v11967_v46 = vmul.f32 %v11545_v13, %v11692_v47  ;;  %v11971_v49 = vmul.f32 %v11545_v13, %v11696_v53 }
 0x4c0   :  { %15908 = vst [vmem:[#allocation22_spill] sm:$0xff] %v11947_v29  ;;  %15909 = vst [vmem:[#allocation25_spill] sm:$0xff] %v11951_v41  ;;  %v11975_v10 = vmul.f32 %v11545_v13, %v11700_v9  ;;  %v11979_v63 = vmul.f32 %v11545_v13, %v11704_v12  ;;  %v11983_v52 = vmul.f32 %v11545_v13, %v11708_v45 }
 0x4c1   :  { %15910 = vst [vmem:[#allocation27_spill] sm:$0xff] %v11955_v21  ;;  %15911 = vst [vmem:[#allocation32_spill] sm:$0xff] %v11959_v59  ;;  %v5081_v0 = vadd.f32 %v5080_v48, %v5079_v14  ;;  %v5187_v47 = vmul.f32 %v11545_v13, %v11712_v40  ;;  %v5188_v53 = vmul.f32 %v11545_v13, %v11716_v28  ;;  %v15918_v14 = vld [vmem:[#allocation5_spill] sm:$0xff]  ;;  %v15919_v48 = vld [vmem:[#allocation6_spill] sm:$0xff] }
 0x4c2   :  { %15912 = vst [vmem:[#allocation15_spill] sm:$0xff] %v11963_v33  ;;  %15913 = vst [vmem:[#allocation35_spill] sm:$0xff] %v11967_v46  ;;  %v5189_v62 = vmul.f32 %v11545_v13, %v11720_v11  ;;  %v5190_v9 = vmul.f32 %v11545_v13, %v11727_v44  ;;  %v5191_v12 = vmul.f32 %v11545_v13, %v11731_v16  ;;  %v15924_v46 = vld [vmem:[#allocation11_spill] sm:$0xff]  ;;  %v15925_v33 = vld [vmem:[#allocation12_spill] sm:$0xff] }
 0x4c3   :  { %15914 = vst [vmem:[#allocation37_spill] sm:$0xff] %v11971_v49  ;;  %15915 = vst [vmem:[#allocation40_spill] sm:$0xff] %v11975_v10  ;;  %v11995_v30 = vmul.f32 0.0033333334, %v5081_v0  ;;  %v5192_v45 = vmul.f32 %v11545_v13, %v11735_v23  ;;  %v5193_v40 = vmul.f32 %v11545_v13, %v11739_v6  ;;  %v5194_v28 = vmul.f32 %v11545_v13, %v15918_v14  ;;  %v15921_v0 = vld [vmem:[#allocation8_spill] sm:$0xff]  ;;  %v15922_v10 = vld [vmem:[#allocation9_spill] sm:$0xff] }
 0x4c4   :  { %15916 = vst [vmem:[#allocation42_spill] sm:$0xff] %v11979_v63  ;;  %15917 = vst [vmem:[#allocation43_spill] sm:$0xff] %v11983_v52  ;;  %v5195_v11 = vmul.f32 %v11545_v13, %v15919_v48  ;;  %v5196_v44 = vmul.f32 %v11545_v13, %v11754_v31  ;;  %v15920_v52 = vld [vmem:[#allocation7_spill] sm:$0xff]  ;;  %v5198_v63 = vmul.f32 %v11545_v13, %v15921_v0  ;;  %v15923_v49 = vld [vmem:[#allocation10_spill] sm:$0xff] }
 0x4c5   :  { %v5197_v16 = vmul.f32 %v11545_v13, %v15920_v52  ;;  %v5085_v23 = vadd.f32 1e-05, %v11995_v30  ;;  %v5199_v6 = vmul.f32 %v11545_v13, %v15922_v10  ;;  %v5200_v14 = vmul.f32 %v11545_v13, %v15923_v49  ;;  %v15926_v59 = vld [vmem:[#allocation13_spill] sm:$0xff] }
 0x4c6   :  { %v5201_v48 = vmul.f32 %v11545_v13, %v15924_v46  ;;  %v5202_v31 = vmul.f32 %v11545_v13, %v15925_v33  ;;  %v5203_v52 = vmul.f32 %v11545_v13, %v11795_v20  ;;  %v5204_v0 = vmul.f32 %v11545_v13, %v15926_v59  ;;  %v15927_v20 = vld [vmem:[#allocation14_spill] sm:$0xff]  ;;  %v15928_v59 = vld [vmem:[#allocation16_spill] sm:$0xff] }
 0x4c7   :  { %v5205_v21 = vmul.f32 %v11545_v13, %v11803_v5  ;;  %8714 = vrsqrt.f32 %v5085_v23  ;;  %v5206_v10 = vmul.f32 %v11545_v13, %v11807_v27  ;;  %v5207_v49 = vmul.f32 %v11545_v13, %v11811_v54 }
 0x4c8   :  { %v5208_v46 = vmul.f32 %v11545_v13, %v11815_v39  ;;  %v5209_v33 = vmul.f32 %v11545_v13, %v11819_v56  ;;  %v5210_v41 = vmul.f32 %v11545_v13, %v15927_v20  ;;  %v5211_v29 = vmul.f32 %v11545_v13, %v15928_v59  ;;  %v15959_v59 = vld [vmem:[#allocation110_spill] sm:$0xff] }
 0x4c9   :  { %v5212_v5 = vmul.f32 %v11545_v13, %v11832_v26  ;;  %v5213_v27 = vmul.f32 %v11545_v13, %v11840_v38  ;;  %v5214_v54 = vmul.f32 %v11545_v13, %v11844_v24  ;;  %v5217_v39 = vmul.f32 %v11545_v13, %v11848_v36 }
 0x4ca   :  { %v5218_v56 = vmul.f32 %v11545_v13, %v11852_v32  ;;  %v12050_v23 = vadd.f32 %v11569_v17, %v11856_v35  ;;  %v12054_v20 = vadd.f32 %v11569_v17, %v11860_v61  ;;  %v12057_v26 = vadd.f32 %v11569_v17, %v5187_v47 }
 0x4cb   :  { %v12060_v38 = vadd.f32 %v11569_v17, %v5188_v53  ;;  %v12063_v24 = vadd.f32 %v11569_v17, %v5189_v62  ;;  %v12066_v36 = vadd.f32 %v11569_v17, %v5190_v9  ;;  %v12069_v32 = vadd.f32 %v11569_v17, %v5191_v12 }
 0x4cc   :  { %15929 = vst [vmem:[#allocation44_spill] sm:$0xff] %v12050_v23  ;;  %15930 = vst [vmem:[#allocation47_spill] sm:$0xff] %v12054_v20  ;;  %v12072_v35 = vadd.f32 %v11569_v17, %v5192_v45  ;;  %v12075_v61 = vadd.f32 %v11569_v17, %v5193_v40  ;;  %v12078_v47 = vadd.f32 %v11569_v17, %v5194_v28  ;;  %v15960_v20 = vld [vmem:[#allocation111_spill] sm:$0xff]  ;;  %v15961_v23 = vld [vmem:[#allocation116_spill] sm:$0xff] }
 0x4cd   :  { %15931 = vst [vmem:[#allocation49_spill] sm:$0xff] %v12063_v24  ;;  %15932 = vst [vmem:[#allocation36_spill] sm:$0xff] %v12066_v36  ;;  %v12081_v53 = vadd.f32 %v11569_v17, %v5195_v11  ;;  %v12084_v62 = vadd.f32 %v11569_v17, %v5196_v44  ;;  %v12087_v9 = vadd.f32 %v11569_v17, %v5197_v16  ;;  %v16066_v36 = vld [vmem:[#allocation112_spill] sm:$0xff]  ;;  %v16067_v24 = vld [vmem:[#allocation113_spill] sm:$0xff] }
 0x4ce   :  { %15933 = vst [vmem:[#allocation33_spill] sm:$0xff] %v12069_v32  ;;  %15934 = vst [vmem:[#allocation53_spill] sm:$0xff] %v12072_v35  ;;  %v12090_v12 = vadd.f32 %v11569_v17, %v5198_v63  ;;  %v12093_v45 = vadd.f32 %v11569_v17, %v5199_v6  ;;  %v12096_v40 = vadd.f32 %v11569_v17, %v5200_v14  ;;  %v16064_v35 = vld [vmem:[#allocation108_spill] sm:$0xff]  ;;  %v16065_v32 = vld [vmem:[#allocation109_spill] sm:$0xff] }
 0x4cf   :  { %15935 = vst [vmem:[#allocation60_spill] sm:$0xff] %v12075_v61  ;;  %15936 = vst [vmem:[#allocation41_spill] sm:$0xff] %v12078_v47  ;;  %v12099_v28 = vadd.f32 %v11569_v17, %v5201_v48  ;;  %v12102_v11 = vadd.f32 %v11569_v17, %v5202_v31  ;;  %v12105_v44 = vadd.f32 %v11569_v17, %v5203_v52 }
 0x4d0   :  { %15937 = vst [vmem:[#allocation63_spill] sm:$0xff] %v12081_v53  ;;  %15938 = vst [vmem:[#allocation65_spill] sm:$0xff] %v12084_v62  ;;  %v12108_v16 = vadd.f32 %v11569_v17, %v5204_v0  ;;  %v12111_v63 = vadd.f32 %v11569_v17, %v5205_v21  ;;  %v12114_v6 = vadd.f32 %v11569_v17, %v5206_v10 }
 0x4d1   :  { %15939 = vst [vmem:[#allocation66_spill] sm:$0xff] %v12087_v9  ;;  %15940 = vst [vmem:[#allocation69_spill] sm:$0xff] %v12090_v12  ;;  %v12117_v14 = vadd.f32 %v11569_v17, %v5207_v49  ;;  %v12120_v48 = vadd.f32 %v11569_v17, %v5208_v46  ;;  %v12123_v31 = vadd.f32 %v11569_v17, %v5209_v33  ;;  %v12134_v10 = vpop.eup %8714 }
 0x4d2   :  { %15941 = vst [vmem:[#allocation54_spill] sm:$0xff] %v12093_v45  ;;  %15942 = vst [vmem:[#allocation72_spill] sm:$0xff] %v12096_v40  ;;  %v12126_v52 = vadd.f32 %v11569_v17, %v5210_v41  ;;  %v12129_v0 = vadd.f32 %v11569_v17, %v5211_v29  ;;  %v12132_v21 = vadd.f32 %v11569_v17, %v5212_v5 }
 0x4d3   :  { %15943 = vst [vmem:[#allocation75_spill] sm:$0xff] %v12099_v28  ;;  %15944 = vst [vmem:[#allocation77_spill] sm:$0xff] %v12102_v11  ;;  %v12137_v49 = vadd.f32 %v11569_v17, %v5213_v27  ;;  %v12140_v46 = vadd.f32 %v11569_v17, %v5214_v54  ;;  %v12143_v33 = vadd.f32 %v11569_v17, %v5217_v39 }
 0x4d4   :  { %15945 = vst [vmem:[#allocation79_spill] sm:$0xff] %v12105_v44  ;;  %15946 = vst [vmem:[#allocation80_spill] sm:$0xff] %v12108_v16  ;;  %v12146_v41 = vadd.f32 %v11569_v17, %v5218_v56  ;;  %v5347_v29 = vmul.f32 %v12134_v10, %v15959_v59  ;;  %v5348_v5 = vmul.f32 %v12134_v10, %v15960_v20  ;;  %v16051_v44 = vld [vmem:[#allocation91_spill] sm:$0xff] }
 0x4d5   :  { %15947 = vst [vmem:[#allocation83_spill] sm:$0xff] %v12111_v63  ;;  %15948 = vst [vmem:[#allocation104_spill] sm:$0xff] %v12114_v6  ;;  %v5481_v27 = vmul.f32 %v12134_v10, %v12134_v10  ;;  %v12158_v54 = vadd.f32 %v11569_v17, %v11864_v19  ;;  %v12162_v39 = vadd.f32 %v11569_v17, %v11868_v60  ;;  %v16050_v63 = vld [vmem:[#allocation88_spill] sm:$0xff] }
 0x4d6   :  { %15949 = vst [vmem:[#allocation105_spill] sm:$0xff] %v12117_v14  ;;  %15950 = vst [vmem:[#allocation106_spill] sm:$0xff] %v12120_v48  ;;  %v12166_v56 = vadd.f32 %v11569_v17, %v11872_v18  ;;  %v12170_v20 = vadd.f32 %v11569_v17, %v11876_v55  ;;  %v12176_v19 = vadd.f32 %v11569_v17, %v11883_v8  ;;  %v16047_v48 = vld [vmem:[#allocation84_spill] sm:$0xff]  ;;  %v16049_v14 = vld [vmem:[#allocation90_spill] sm:$0xff] }
 0x4d7   :  { %15951 = vst [vmem:[#allocation5_spill] sm:$0xff] %v12123_v31  ;;  %15952 = vst [vmem:[#allocation6_spill] sm:$0xff] %v12126_v52  ;;  %v12180_v60 = vadd.f32 %v11569_v17, %v11887_v34  ;;  %v12184_v18 = vadd.f32 %v11569_v17, %v11891_v42  ;;  %v12188_v55 = vadd.f32 %v11569_v17, %v11895_v50  ;;  %v16044_v52 = vld [vmem:[#allocation81_spill] sm:$0xff] }
 0x4d8   :  { %15953 = vst [vmem:[#allocation7_spill] sm:$0xff] %v12129_v0  ;;  %15954 = vst [vmem:[#allocation8_spill] sm:$0xff] %v12132_v21  ;;  %v5480_v21 = vmul.f32 %v15961_v23, %v11995_v30  ;;  %v5411_v30 = vmul.f32 %v5347_v29, %v11545_v13  ;;  %v5412_v23 = vmul.f32 %v5348_v5, %v11545_v13 }
 0x4d9   :  { %15955 = vst [vmem:[#allocation9_spill] sm:$0xff] %v12137_v49  ;;  %15956 = vst [vmem:[#allocation10_spill] sm:$0xff] %v12140_v46  ;;  %v12192_v29 = vadd.f32 %v11569_v17, %v11899_v57  ;;  %v12202_v5 = vadd.f32 %v11569_v17, %v11903_v4  ;;  %v12206_v42 = vadd.f32 %v11569_v17, %v11907_v2  ;;  %v16043_v49 = vld [vmem:[#allocation97_spill] sm:$0xff] }
 0x4da   :  { %15957 = vst [vmem:[#allocation11_spill] sm:$0xff] %v12143_v33  ;;  %15958 = vst [vmem:[#allocation12_spill] sm:$0xff] %v12146_v41  ;;  %v5482_v59 = vmul.f32 %v5481_v27, %v5480_v21  ;;  %v12195_v21 = vadd.f32 %v11569_v17, %v5411_v30  ;;  %v12198_v8 = vadd.f32 %v11569_v17, %v5412_v23  ;;  %v15978_v30 = vld [vmem:[#allocation4_spill] sm:$0xff]  ;;  %v15982_v23 = vld [vmem:[#allocation18_spill] sm:$0xff] }
 0x4db   :  { %15962 = vst [vmem:[#allocation13_spill] sm:$0xff] %v12158_v54  ;;  %15963 = vst [vmem:[#allocation14_spill] sm:$0xff] %v12162_v39  ;;  %v12210_v50 = vadd.f32 %v11569_v17, %v11911_v15  ;;  %v12214_v57 = vadd.f32 %v11569_v17, %v11915_v43  ;;  %v12218_v27 = vadd.f32 %v11569_v17, %v11919_v58  ;;  %v16010_v39 = vld [vmem:[#allocation48_spill] sm:$0xff]  ;;  %v16012_v54 = vld [vmem:[#allocation51_spill] sm:$0xff] }
 0x4dc   :  { %15964 = vst [vmem:[#allocation16_spill] sm:$0xff] %v12166_v56  ;;  %15965 = vst [vmem:[#allocation110_spill] sm:$0xff] %v12170_v20  ;;  %v5547_v34 = vadd.f32 1e-05, %v5482_v59  ;;  %v12222_v4 = vadd.f32 %v12195_v21, %v11879_v3  ;;  %v12226_v2 = vadd.f32 %v11569_v17, %v11923_v37  ;;  %v12230_v15 = vadd.f32 %v11569_v17, %v11927_v22  ;;  %v15983_v59 = vld [vmem:[#allocation20_spill] sm:$0xff]  ;;  %v16036_v41 = vld [vmem:[#allocation89_spill] sm:$0xff] }
 0x4dd   :  { %15966 = vst [vmem:[#allocation111_spill] sm:$0xff] %v12176_v19  ;;  %15967 = vst [vmem:[#allocation116_spill] sm:$0xff] %v12180_v60  ;;  %v12234_v43 = vadd.f32 %v12198_v8, %v15978_v30  ;;  %v12238_v58 = vadd.f32 %v11569_v17, %v11931_v1  ;;  %v12242_v3 = vadd.f32 %v11569_v17, %v11935_v25  ;;  %v15984_v30 = vld [vmem:[#allocation26_spill] sm:$0xff] }
 0x4de   :  { %15968 = vst [vmem:[#allocation117_spill] sm:$0xff] %v12184_v18  ;;  %15969 = vst [vmem:[#allocation118_spill] sm:$0xff] %v12188_v55  ;;  %8716 = vrsqrt.f32 %v5547_v34  ;;  %v12246_v37 = vadd.f32 %v11569_v17, %v11939_v7  ;;  %v12250_v22 = vmul.f32 %v12134_v10, %v15982_v23  ;;  %v12254_v34 = vmul.f32 %v12134_v10, %v15983_v59  ;;  %v16042_v33 = vld [vmem:[#allocation78_spill] sm:$0xff] }
 0x4df   :  { %15970 = vst [vmem:[#allocation119_spill] sm:$0xff] %v12192_v29  ;;  %15971 = vst [vmem:[#allocation120_spill] sm:$0xff] %v12202_v5  ;;  %v12258_v1 = vmul.f32 %v12134_v10, %v15984_v30  ;;  %v12262_v25 = vadd.f32 %v11569_v17, %v11943_v51  ;;  %v15995_v5 = vld [vmem:[#allocation31_spill] sm:$0xff]  ;;  %v15997_v29 = vld [vmem:[#allocation38_spill] sm:$0xff]  ;;  %v5544_v55 = vsub.f32 %v12198_v8, %v11569_v17 }
 0x4e0   :  { %15972 = vst [vmem:[#allocation121_spill] sm:$0xff] %v12206_v42  ;;  %15973 = vst [vmem:[#allocation122_spill] sm:$0xff] %v12210_v50  ;;  %v15992_v50 = vld [vmem:[#allocation24_spill] sm:$0xff]  ;;  %v16008_v8 = vld [vmem:[#allocation46_spill] sm:$0xff]  ;;  %v5327_v0 = vmul.f32 %v12134_v10, %v16043_v49  ;;  %v5328_v31 = vmul.f32 %v12134_v10, %v16044_v52  ;;  %v5332_v49 = vmul.f32 %v12134_v10, %v16049_v14 }
 0x4e1   :  { %15974 = vst [vmem:[#allocation123_spill] sm:$0xff] %v12214_v57  ;;  %15975 = vst [vmem:[#allocation124_spill] sm:$0xff] %v12218_v27  ;;  %v15993_v42 = vld [vmem:[#allocation28_spill] sm:$0xff]  ;;  %v15994_v27 = vld [vmem:[#allocation30_spill] sm:$0xff]  ;;  %v5333_v16 = vmul.f32 %v12134_v10, %v16050_v63  ;;  %v5334_v11 = vmul.f32 %v12134_v10, %v16051_v44 }
 0x4e2   :  { %15976 = vst [vmem:[#allocation125_spill] sm:$0xff] %v12226_v2  ;;  %15977 = vst [vmem:[#allocation126_spill] sm:$0xff] %v12230_v15  ;;  %v15989_v15 = vld [vmem:[#allocation19_spill] sm:$0xff]  ;;  %v15990_v2 = vld [vmem:[#allocation21_spill] sm:$0xff] }
 0x4e3   :  { %15979 = vst [vmem:[#allocation4_spill] sm:$0xff] %v12238_v58  ;;  %15980 = vst [vmem:[#allocation127_spill] sm:$0xff] %v12242_v3  ;;  %v15986_v3 = vld [vmem:[#allocation29_spill] sm:$0xff]  ;;  %v15988_v58 = vld [vmem:[#allocation34_spill] sm:$0xff]  ;;  %v12278_v30 = vmul.f32 %v12134_v10, %v15989_v15  ;;  %v12282_v51 = vmul.f32 %v12134_v10, %v15990_v2  ;;  %v12298_v15 = vmul.f32 %v12134_v10, %v15994_v27 }
 0x4e4   :  { %15981 = vst [vmem:[#allocation128_spill] sm:$0xff] %v12246_v37  ;;  %15985 = vst [vmem:[#allocation18_spill] sm:$0xff] %v12262_v25  ;;  %v12266_v7 = vmul.f32 %v12134_v10, %v15986_v3  ;;  %v15987_v37 = vld [vmem:[#allocation17_spill] sm:$0xff]  ;;  %v12274_v59 = vmul.f32 %v12134_v10, %v15988_v58  ;;  %v15991_v25 = vld [vmem:[#allocation23_spill] sm:$0xff]  ;;  %v12294_v58 = vmul.f32 %v12134_v10, %v15993_v42 }
 0x4e5   :  { %v12270_v23 = vmul.f32 %v12134_v10, %v15987_v37  ;;  %v12286_v3 = vmul.f32 %v12134_v10, %v15991_v25  ;;  %v12290_v37 = vmul.f32 %v12134_v10, %v15992_v50  ;;  %v12302_v2 = vmul.f32 %v12134_v10, %v15995_v5  ;;  %v15996_v57 = vld [vmem:[#allocation50_spill] sm:$0xff]  ;;  %v15998_v27 = vld [vmem:[#allocation55_spill] sm:$0xff]  ;;  %v16057_v44 = vld [vmem:[#allocation100_spill] sm:$0xff] }
 0x4e6   :  { %v12306_v25 = vmul.f32 %v12134_v10, %v15996_v57  ;;  %v12310_v50 = vmul.f32 %v12134_v10, %v15997_v29  ;;  %v5543_v42 = vsub.f32 %v12195_v21, %v11569_v17  ;;  %v12318_v18 = vmul.f32 %v12134_v10, %v15998_v27  ;;  %v16000_v5 = vld [vmem:[#allocation39_spill] sm:$0xff]  ;;  %v16002_v57 = vld [vmem:[#allocation58_spill] sm:$0xff]  ;;  %v16004_v29 = vld [vmem:[#allocation61_spill] sm:$0xff] }
 0x4e7   :  { %v12322_v60 = vmul.f32 %v12134_v10, %v16000_v5  ;;  %v12326_v19 = vmul.f32 %v12134_v10, %v16002_v57  ;;  %v12330_v20 = vmul.f32 %v12134_v10, %v16004_v29  ;;  %v16006_v21 = vld [vmem:[#allocation45_spill] sm:$0xff]  ;;  %v12338_v27 = vmul.f32 %v12134_v10, %v16008_v8  ;;  %v16055_v14 = vld [vmem:[#allocation98_spill] sm:$0xff]  ;;  %v16056_v63 = vld [vmem:[#allocation99_spill] sm:$0xff] }
 0x4e8   :  { %15999 = vst [vmem:[#allocation20_spill] sm:$0xff] %v12318_v18  ;;  %v12334_v56 = vmul.f32 %v12134_v10, %v16006_v21  ;;  %v12342_v5 = vmul.f32 %v12134_v10, %v16010_v39  ;;  %v12346_v57 = vmul.f32 %v12134_v10, %v16012_v54  ;;  %v5339_v9 = vmul.f32 %v12134_v10, %v16056_v63 }
 0x4e9   :  { %16001 = vst [vmem:[#allocation26_spill] sm:$0xff] %v12322_v60  ;;  %16003 = vst [vmem:[#allocation29_spill] sm:$0xff] %v12326_v19  ;;  %v16014_v19 = vld [vmem:[#allocation56_spill] sm:$0xff]  ;;  %v16026_v60 = vld [vmem:[#allocation70_spill] sm:$0xff]  ;;  %v5340_v62 = vmul.f32 %v12134_v10, %v16057_v44  ;;  %v5345_v44 = vmul.f32 %v12134_v10, %v16064_v35  ;;  %v12479_v35 = vmul.f32 %v12266_v7, %v11545_v13 }
 0x4ea   :  { %16005 = vst [vmem:[#allocation17_spill] sm:$0xff] %v12330_v20  ;;  %16007 = vst [vmem:[#allocation34_spill] sm:$0xff] %v12334_v56  ;;  %v12350_v29 = vmul.f32 %v12134_v10, %v16014_v19  ;;  %v16016_v20 = vld [vmem:[#allocation57_spill] sm:$0xff]  ;;  %v16018_v56 = vld [vmem:[#allocation62_spill] sm:$0xff]  ;;  %v12515_v7 = vmul.f32 %v12302_v2, %v11545_v13 }
 0x4eb   :  { %16009 = vst [vmem:[#allocation19_spill] sm:$0xff] %v12338_v27  ;;  %16011 = vst [vmem:[#allocation21_spill] sm:$0xff] %v12342_v5  ;;  %v12354_v21 = vmul.f32 %v12134_v10, %v16016_v20  ;;  %v12358_v8 = vmul.f32 %v12134_v10, %v16018_v56  ;;  %v16020_v27 = vld [vmem:[#allocation64_spill] sm:$0xff]  ;;  %v16022_v5 = vld [vmem:[#allocation67_spill] sm:$0xff]  ;;  %v12374_v20 = vmul.f32 %v12134_v10, %v16026_v60 }
 0x4ec   :  { %16013 = vst [vmem:[#allocation23_spill] sm:$0xff] %v12346_v57  ;;  %16015 = vst [vmem:[#allocation24_spill] sm:$0xff] %v12350_v29  ;;  %v12362_v39 = vmul.f32 %v12134_v10, %v16020_v27  ;;  %v12366_v54 = vmul.f32 %v12134_v10, %v16022_v5  ;;  %v16024_v57 = vld [vmem:[#allocation68_spill] sm:$0xff]  ;;  %v8717_v29 = vpop.eup %8716  ;;  %v5321_v60 = vmul.f32 %v12134_v10, %v16036_v41 }
 0x4ed   :  { %16017 = vst [vmem:[#allocation28_spill] sm:$0xff] %v12354_v21  ;;  %16019 = vst [vmem:[#allocation30_spill] sm:$0xff] %v12358_v8  ;;  %v12370_v19 = vmul.f32 %v12134_v10, %v16024_v57  ;;  %v16028_v21 = vld [vmem:[#allocation85_spill] sm:$0xff]  ;;  %v16030_v8 = vld [vmem:[#allocation71_spill] sm:$0xff]  ;;  %v5326_v41 = vmul.f32 %v12134_v10, %v16042_v33  ;;  %v5330_v33 = vmul.f32 %v12134_v10, %v16047_v48 }
 0x4ee   :  { %16021 = vst [vmem:[#allocation31_spill] sm:$0xff] %v12362_v39  ;;  %16023 = vst [vmem:[#allocation50_spill] sm:$0xff] %v12366_v54  ;;  %v12378_v56 = vmul.f32 %v12134_v10, %v16028_v21  ;;  %v12382_v27 = vmul.f32 %v12134_v10, %v16030_v8  ;;  %v16032_v39 = vld [vmem:[#allocation87_spill] sm:$0xff]  ;;  %v16033_v54 = vld [vmem:[#allocation114_spill] sm:$0xff] }
 0x4ef   :  { %16025 = vst [vmem:[#allocation38_spill] sm:$0xff] %v12370_v19  ;;  %16027 = vst [vmem:[#allocation55_spill] sm:$0xff] %v12374_v20  ;;  %v5319_v5 = vmul.f32 %v12134_v10, %v16032_v39  ;;  %v12387_v18 = vrot.slane %v8717_v29, %v16033_v54  ;;  %v16035_v57 = vld [vmem:[#allocation73_spill] sm:$0xff]  ;;  %v16037_v20 = vld [vmem:[#allocation74_spill] sm:$0xff] }
 0x4f0   :  { %16029 = vst [vmem:[#allocation39_spill] sm:$0xff] %v12378_v56  ;;  %16031 = vst [vmem:[#allocation58_spill] sm:$0xff] %v12382_v27  ;;  %v5320_v19 = vmul.f32 %v12134_v10, %v16035_v57  ;;  %v5322_v21 = vmul.f32 %v12134_v10, %v16037_v20  ;;  %v12398_v8 = vld [vmem:[%s15225_s6 + $0x4] ss:$0 sm:$0xff]  ;;  %v16041_v54 = vld [vmem:[#allocation94_spill] sm:$0xff] }
 0x4f1   :  { %16034 = vst [vmem:[#allocation61_spill] sm:$0xff] %v12387_v18  ;;  %16038 = vst [vmem:[#allocation45_spill] sm:$0xff] %v12398_v8  ;;  %v16039_v27 = vld [vmem:[#allocation76_spill] sm:$0xff]  ;;  %v5325_v57 = vmul.f32 %v12134_v10, %v16041_v54  ;;  %v5613_v46 = vmul.f32 %v12387_v18, %v5543_v42  ;;  %v5614_v20 = vmul.f32 %v12387_v18, %v5544_v55  ;;  %v16048_v42 = vld [vmem:[#allocation86_spill] sm:$0xff] }
 0x4f2   :  { %v5323_v39 = vmul.f32 %v12134_v10, %v16039_v27  ;;  %v16040_v56 = vld [vmem:[#allocation92_spill] sm:$0xff]  ;;  %v16046_v27 = vld [vmem:[#allocation82_spill] sm:$0xff]  ;;  %v5331_v55 = vmul.f32 %v12134_v10, %v16048_v42  ;;  %v16053_v48 = vld [vmem:[#allocation95_spill] sm:$0xff]  ;;  %16069 = vst [vmem:[#allocation57_spill] sm:$0xff] %v12479_v35 }
 0x4f3   :  { %v5324_v29 = vmul.f32 %v12134_v10, %v16040_v56  ;;  %v12417_v56 = vld [vmem:[%s15225_s6 + $0x5] ss:$0 sm:$0xff]  ;;  %v5329_v54 = vmul.f32 %v12134_v10, %v16046_v27  ;;  %v5681_v6 = vmul.f32 %v12398_v8, %v5613_v46  ;;  %v5682_v52 = vmul.f32 %v12398_v8, %v5614_v20  ;;  %v16052_v27 = vld [vmem:[#allocation93_spill] sm:$0xff]  ;;  %16078 = vst [vmem:[#allocation73_spill] sm:$0xff] %v12515_v7 }
 0x4f4   :  { %16045 = vst [vmem:[#allocation46_spill] sm:$0xff] %v12417_v56  ;;  %v5335_v28 = vmul.f32 %v12134_v10, %v16052_v27  ;;  %v5336_v40 = vmul.f32 %v12134_v10, %v16053_v48  ;;  %v16054_v42 = vld [vmem:[#allocation96_spill] sm:$0xff]  ;;  %v5338_v46 = vmul.f32 %v12134_v10, %v16055_v14  ;;  %v16058_v27 = vld [vmem:[#allocation101_spill] sm:$0xff]  ;;  %v16059_v48 = vld [vmem:[#allocation102_spill] sm:$0xff]  ;;  %v5389_v2 = vmul.f32 %v5325_v57, %v11545_v13 }
 0x4f5   :  { %v5337_v45 = vmul.f32 %v12134_v10, %v16054_v42  ;;  %v5749_v20 = vadd.f32 %v12417_v56, %v5681_v6  ;;  %v5750_v12 = vadd.f32 %v12417_v56, %v5682_v52  ;;  %v5341_v53 = vmul.f32 %v12134_v10, %v16058_v27  ;;  %v16060_v42 = vld [vmem:[#allocation103_spill] sm:$0xff] }
 0x4f6   :  { %v5342_v47 = vmul.f32 %v12134_v10, %v16059_v48  ;;  %v5343_v61 = vmul.f32 %v12134_v10, %v16060_v42  ;;  %v16061_v14 = vld [vmem:[#allocation107_spill] sm:$0xff]  ;;  %v5346_v27 = vmul.f32 %v12134_v10, %v16065_v32  ;;  %v5349_v48 = vmul.f32 %v12134_v10, %v16066_v36 }
 0x4f7   :  { %v5344_v6 = vmul.f32 %v12134_v10, %v16061_v14  ;;  %v12456_v52 = vadd.f32 %v12222_v4, %v5749_v20  ;;  %v12459_v63 = vadd.f32 %v12234_v43, %v5750_v12  ;;  %v5350_v42 = vmul.f32 %v12134_v10, %v16067_v24 }
 0x4f8   :  { %v5351_v14 = vmul.f32 %v12250_v22, %v11545_v13  ;;  %v5352_v4 = vmul.f32 %v12254_v34, %v11545_v13  ;;  %v12475_v12 = vmul.f32 %v12258_v1, %v11545_v13  ;;  %v12483_v36 = vmul.f32 %v12270_v23, %v11545_v13 }
 0x4f9   :  { %16062 = vst [vmem:[#allocation48_spill] sm:$0xff] %v12456_v52  ;;  %16063 = vst [vmem:[#allocation51_spill] sm:$0xff] %v12459_v63  ;;  %v12487_v24 = vmul.f32 %v12274_v59, %v11545_v13  ;;  %v12491_v32 = vmul.f32 %v12278_v30, %v11545_v13  ;;  %v12495_v10 = vmul.f32 %v12282_v51, %v11545_v13 }
 0x4fa   :  { %16068 = vst [vmem:[#allocation56_spill] sm:$0xff] %v12475_v12  ;;  %16070 = vst [vmem:[#allocation62_spill] sm:$0xff] %v12483_v36  ;;  %v12499_v43 = vmul.f32 %v12286_v3, %v11545_v13  ;;  %v12503_v22 = vmul.f32 %v12290_v37, %v11545_v13  ;;  %v12507_v34 = vmul.f32 %v12294_v58, %v11545_v13 }
 0x4fb   :  { %16071 = vst [vmem:[#allocation64_spill] sm:$0xff] %v12487_v24  ;;  %16072 = vst [vmem:[#allocation67_spill] sm:$0xff] %v12491_v32  ;;  %v12511_v1 = vmul.f32 %v12298_v15, %v11545_v13  ;;  %v12519_v23 = vmul.f32 %v12306_v25, %v11545_v13  ;;  %v12523_v59 = vmul.f32 %v12310_v50, %v11545_v13 }
 0x4fc   :  { %16073 = vst [vmem:[#allocation68_spill] sm:$0xff] %v12495_v10  ;;  %16074 = vst [vmem:[#allocation70_spill] sm:$0xff] %v12499_v43  ;;  %v5383_v30 = vmul.f32 %v5319_v5, %v11545_v13  ;;  %v5384_v51 = vmul.f32 %v5320_v19, %v11545_v13  ;;  %v5385_v3 = vmul.f32 %v5321_v60, %v11545_v13 }
 0x4fd   :  { %16075 = vst [vmem:[#allocation85_spill] sm:$0xff] %v12503_v22  ;;  %16076 = vst [vmem:[#allocation71_spill] sm:$0xff] %v12507_v34  ;;  %v5386_v37 = vmul.f32 %v5322_v21, %v11545_v13  ;;  %v5387_v58 = vmul.f32 %v5323_v39, %v11545_v13  ;;  %v5388_v15 = vmul.f32 %v5324_v29, %v11545_v13 }
 0x4fe   :  { %16077 = vst [vmem:[#allocation87_spill] sm:$0xff] %v12511_v1  ;;  %16079 = vst [vmem:[#allocation89_spill] sm:$0xff] %v12519_v23  ;;  %v5390_v25 = vmul.f32 %v5326_v41, %v11545_v13  ;;  %v5391_v20 = vmul.f32 %v5327_v0, %v11545_v13  ;;  %v5392_v50 = vmul.f32 %v5328_v31, %v11545_v13 }
 0x4ff   :  { %16080 = vst [vmem:[#allocation74_spill] sm:$0xff] %v12523_v59  ;;  %v5393_v5 = vmul.f32 %v5329_v54, %v11545_v13  ;;  %v5394_v19 = vmul.f32 %v5330_v33, %v11545_v13  ;;  %v5395_v60 = vmul.f32 %v5331_v55, %v11545_v13  ;;  %v5396_v21 = vmul.f32 %v5332_v49, %v11545_v13 }
 0x500   :  { %v5397_v39 = vmul.f32 %v5333_v16, %v11545_v13  ;;  %v5398_v29 = vmul.f32 %v5334_v11, %v11545_v13  ;;  %v5399_v57 = vmul.f32 %v5335_v28, %v11545_v13  ;;  %v5400_v41 = vmul.f32 %v5336_v40, %v11545_v13 }
 0x501   :  { %v5401_v0 = vmul.f32 %v5337_v45, %v11545_v13  ;;  %v5402_v31 = vmul.f32 %v5338_v46, %v11545_v13  ;;  %v5403_v54 = vmul.f32 %v5339_v9, %v11545_v13  ;;  %v5404_v33 = vmul.f32 %v5340_v62, %v11545_v13 }
 0x502   :  { %v5405_v55 = vmul.f32 %v5341_v53, %v11545_v13  ;;  %v5406_v49 = vmul.f32 %v5342_v47, %v11545_v13  ;;  %v5407_v16 = vmul.f32 %v5343_v61, %v11545_v13  ;;  %v5408_v11 = vmul.f32 %v5344_v6, %v11545_v13 }
 0x503   :  { %v5409_v28 = vmul.f32 %v5345_v44, %v11545_v13  ;;  %v5410_v40 = vmul.f32 %v5346_v27, %v11545_v13  ;;  %v5413_v45 = vmul.f32 %v5349_v48, %v11545_v13  ;;  %v5414_v46 = vmul.f32 %v5350_v42, %v11545_v13 }
 0x504   :  { %v12556_v9 = vadd.f32 %v11569_v17, %v5351_v14  ;;  %v12559_v62 = vadd.f32 %v11569_v17, %v5352_v4  ;;  %v12562_v47 = vadd.f32 %v11569_v17, %v5383_v30  ;;  %v12565_v61 = vadd.f32 %v11569_v17, %v5384_v51 }
 0x505   :  { %v12568_v53 = vadd.f32 %v11569_v17, %v5385_v3  ;;  %v12571_v6 = vadd.f32 %v11569_v17, %v5386_v37  ;;  %v12574_v44 = vadd.f32 %v11569_v17, %v5387_v58  ;;  %v12577_v27 = vadd.f32 %v11569_v17, %v5388_v15 }
 0x506   :  { %16081 = vst [vmem:[#allocation76_spill] sm:$0xff] %v12556_v9  ;;  %16082 = vst [vmem:[#allocation92_spill] sm:$0xff] %v12559_v62  ;;  %v12580_v48 = vadd.f32 %v11569_v17, %v5389_v2  ;;  %v12583_v42 = vadd.f32 %v11569_v17, %v5390_v25  ;;  %v12586_v14 = vadd.f32 %v11569_v17, %v5391_v20 }
 0x507   :  { %v12589_v4 = vadd.f32 %v11569_v17, %v5392_v50  ;;  %v12592_v30 = vadd.f32 %v11569_v17, %v5393_v5  ;;  %v12595_v51 = vadd.f32 %v11569_v17, %v5394_v19  ;;  %v12598_v3 = vadd.f32 %v11569_v17, %v5395_v60 }
 0x508   :  { %v12601_v37 = vadd.f32 %v11569_v17, %v5396_v21  ;;  %v12604_v58 = vadd.f32 %v11569_v17, %v5397_v39  ;;  %v12607_v15 = vadd.f32 %v11569_v17, %v5398_v29  ;;  %v12610_v2 = vadd.f32 %v11569_v17, %v5399_v57 }
 0x509   :  { %v12613_v25 = vadd.f32 %v11569_v17, %v5400_v41  ;;  %v12616_v20 = vadd.f32 %v11569_v17, %v5401_v0  ;;  %v12619_v50 = vadd.f32 %v11569_v17, %v5402_v31  ;;  %v12622_v5 = vadd.f32 %v11569_v17, %v5403_v54 }
 0x50a   :  { %16083 = vst [vmem:[#allocation94_spill] sm:$0xff] %v12610_v2  ;;  %v12625_v19 = vadd.f32 %v11569_v17, %v5404_v33  ;;  %v12628_v60 = vadd.f32 %v11569_v17, %v5405_v55  ;;  %v12631_v21 = vadd.f32 %v11569_v17, %v5406_v49  ;;  %v12634_v39 = vadd.f32 %v11569_v17, %v5407_v16 }
 0x50b   :  { %16084 = vst [vmem:[#allocation78_spill] sm:$0xff] %v12613_v25  ;;  %16085 = vst [vmem:[#allocation97_spill] sm:$0xff] %v12616_v20  ;;  %v12637_v29 = vadd.f32 %v11569_v17, %v5408_v11  ;;  %v12640_v57 = vadd.f32 %v11569_v17, %v5409_v28  ;;  %v12643_v41 = vadd.f32 %v11569_v17, %v5410_v40 }
 0x50c   :  { %16086 = vst [vmem:[#allocation81_spill] sm:$0xff] %v12619_v50  ;;  %16087 = vst [vmem:[#allocation82_spill] sm:$0xff] %v12622_v5  ;;  %v12646_v0 = vadd.f32 %v11569_v17, %v5413_v45  ;;  %v12649_v31 = vadd.f32 %v11569_v17, %v5414_v46  ;;  %v5483_v54 = vsub.f32 %v12556_v9, %v11569_v17 }
 0x50d   :  { %16088 = vst [vmem:[#allocation84_spill] sm:$0xff] %v12625_v19  ;;  %16089 = vst [vmem:[#allocation86_spill] sm:$0xff] %v12628_v60  ;;  %v5484_v33 = vsub.f32 %v12559_v62, %v11569_v17  ;;  %v5515_v55 = vsub.f32 %v12562_v47, %v11569_v17  ;;  %v5516_v49 = vsub.f32 %v12565_v61, %v11569_v17 }
 0x50e   :  { %16090 = vst [vmem:[#allocation90_spill] sm:$0xff] %v12631_v21  ;;  %16091 = vst [vmem:[#allocation88_spill] sm:$0xff] %v12634_v39  ;;  %v5517_v16 = vsub.f32 %v12568_v53, %v11569_v17  ;;  %v5518_v11 = vsub.f32 %v12571_v6, %v11569_v17  ;;  %v5519_v28 = vsub.f32 %v12574_v44, %v11569_v17 }
 0x50f   :  { %16092 = vst [vmem:[#allocation91_spill] sm:$0xff] %v12637_v29  ;;  %16093 = vst [vmem:[#allocation93_spill] sm:$0xff] %v12640_v57  ;;  %v5520_v40 = vsub.f32 %v12577_v27, %v11569_v17  ;;  %v5521_v45 = vsub.f32 %v12580_v48, %v11569_v17  ;;  %v5522_v46 = vsub.f32 %v12583_v42, %v11569_v17 }
 0x510   :  { %16094 = vst [vmem:[#allocation95_spill] sm:$0xff] %v12643_v41  ;;  %16095 = vst [vmem:[#allocation96_spill] sm:$0xff] %v12646_v0  ;;  %v5523_v63 = vsub.f32 %v12586_v14, %v11569_v17  ;;  %v5524_v52 = vsub.f32 %v12589_v4, %v11569_v17  ;;  %v5525_v59 = vsub.f32 %v12592_v30, %v11569_v17 }
 0x511   :  { %v5526_v23 = vsub.f32 %v12595_v51, %v11569_v17  ;;  %v5527_v7 = vsub.f32 %v12598_v3, %v11569_v17  ;;  %v5528_v1 = vsub.f32 %v12601_v37, %v11569_v17  ;;  %v5529_v34 = vsub.f32 %v12604_v58, %v11569_v17 }
 0x512   :  { %v5530_v22 = vsub.f32 %v12607_v15, %v11569_v17  ;;  %v5531_v43 = vsub.f32 %v12610_v2, %v11569_v17  ;;  %v5532_v10 = vsub.f32 %v12613_v25, %v11569_v17  ;;  %v5533_v32 = vsub.f32 %v12616_v20, %v11569_v17 }
 0x513   :  { %v5534_v24 = vsub.f32 %v12619_v50, %v11569_v17  ;;  %v5535_v36 = vsub.f32 %v12622_v5, %v11569_v17  ;;  %v5536_v35 = vsub.f32 %v12625_v19, %v11569_v17  ;;  %v5537_v12 = vsub.f32 %v12628_v60, %v11569_v17 }
 0x514   :  { %v5538_v62 = vsub.f32 %v12631_v21, %v11569_v17  ;;  %v5539_v9 = vsub.f32 %v12634_v39, %v11569_v17  ;;  %v5540_v13 = vsub.f32 %v12637_v29, %v11569_v17  ;;  %v5541_v50 = vsub.f32 %v12640_v57, %v11569_v17 }
 0x515   :  { %v5542_v5 = vsub.f32 %v12643_v41, %v11569_v17  ;;  %v5545_v19 = vsub.f32 %v12646_v0, %v11569_v17  ;;  %v5546_v60 = vsub.f32 %v12649_v31, %v11569_v17  ;;  %v5553_v21 = vmul.f32 %v12387_v18, %v5483_v54 }
 0x516   :  { %v12717_v20 = vmul.f32 %v12387_v18, %v5484_v33  ;;  %v5585_v39 = vmul.f32 %v12387_v18, %v5515_v55  ;;  %v5586_v29 = vmul.f32 %v12387_v18, %v5516_v49  ;;  %v5587_v57 = vmul.f32 %v12387_v18, %v5517_v16 }
 0x517   :  { %v5588_v25 = vmul.f32 %v12387_v18, %v5518_v11  ;;  %v5589_v41 = vmul.f32 %v12387_v18, %v5519_v28  ;;  %v5590_v0 = vmul.f32 %v12387_v18, %v5520_v40  ;;  %v5591_v2 = vmul.f32 %v12387_v18, %v5521_v45 }
 0x518   :  { %16096 = vst [vmem:[#allocation98_spill] sm:$0xff] %v12717_v20  ;;  %v5592_v17 = vmul.f32 %v12387_v18, %v5522_v46  ;;  %v5593_v54 = vmul.f32 %v12387_v18, %v5523_v63  ;;  %v5594_v33 = vmul.f32 %v12387_v18, %v5524_v52  ;;  %v5595_v55 = vmul.f32 %v12387_v18, %v5525_v59  ;;  %v16127_v20 = vld [vmem:[#allocation83_spill] sm:$0xff] }
 0x519   :  { %v5596_v49 = vmul.f32 %v12387_v18, %v5526_v23  ;;  %v5597_v16 = vmul.f32 %v12387_v18, %v5527_v7  ;;  %v5598_v11 = vmul.f32 %v12387_v18, %v5528_v1  ;;  %v5599_v28 = vmul.f32 %v12387_v18, %v5529_v34 }
 0x51a   :  { %v5600_v40 = vmul.f32 %v12387_v18, %v5530_v22  ;;  %v5601_v45 = vmul.f32 %v12387_v18, %v5531_v43  ;;  %v5602_v46 = vmul.f32 %v12387_v18, %v5532_v10  ;;  %v5603_v63 = vmul.f32 %v12387_v18, %v5533_v32 }
 0x51b   :  { %v5604_v52 = vmul.f32 %v12387_v18, %v5534_v24  ;;  %v5605_v59 = vmul.f32 %v12387_v18, %v5535_v36  ;;  %v5606_v23 = vmul.f32 %v12387_v18, %v5536_v35  ;;  %v5607_v7 = vmul.f32 %v12387_v18, %v5537_v12 }
 0x51c   :  { %v5608_v1 = vmul.f32 %v12387_v18, %v5538_v62  ;;  %v5609_v34 = vmul.f32 %v12387_v18, %v5539_v9  ;;  %v5610_v22 = vmul.f32 %v12387_v18, %v5540_v13  ;;  %v5611_v43 = vmul.f32 %v12387_v18, %v5541_v50 }
 0x51d   :  { %v5612_v10 = vmul.f32 %v12387_v18, %v5542_v5  ;;  %v5615_v32 = vmul.f32 %v12387_v18, %v5545_v19  ;;  %v5616_v24 = vmul.f32 %v12387_v18, %v5546_v60  ;;  %v12750_v36 = vmul.f32 %v12398_v8, %v5553_v21 }
 0x51e   :  { %v5653_v35 = vmul.f32 %v12398_v8, %v5585_v39  ;;  %v5654_v12 = vmul.f32 %v12398_v8, %v5586_v29  ;;  %v5655_v62 = vmul.f32 %v12398_v8, %v5587_v57  ;;  %v5656_v9 = vmul.f32 %v12398_v8, %v5588_v25  ;;  %v8696_v25 = vld [vmem:[%s15228_s9] sm:$0xff]  }
 0x51f   :  { %16097 = vst [vmem:[#allocation99_spill] sm:$0xff] %v12750_v36  ;;  %v5657_v13 = vmul.f32 %v12398_v8, %v5589_v41  ;;  %v5658_v50 = vmul.f32 %v12398_v8, %v5590_v0  ;;  %v5659_v5 = vmul.f32 %v12398_v8, %v5591_v2  ;;  %v5660_v19 = vmul.f32 %v12398_v8, %v5592_v17 }
 0x520   :  { %v5661_v60 = vmul.f32 %v12398_v8, %v5593_v54  ;;  %v5662_v21 = vmul.f32 %v12398_v8, %v5594_v33  ;;  %v5663_v39 = vmul.f32 %v12398_v8, %v5595_v55  ;;  %v5664_v29 = vmul.f32 %v12398_v8, %v5596_v49  ;;  %6699 = vmatpush1.bf16.msra.mxu1 %v8696_v25 }
 0x521   :  { %v5665_v57 = vmul.f32 %v12398_v8, %v5597_v16  ;;  %v5666_v41 = vmul.f32 %v12398_v8, %v5598_v11  ;;  %v5667_v2 = vmul.f32 %v12398_v8, %v5599_v28  ;;  %v5668_v0 = vmul.f32 %v12398_v8, %v5600_v40 }
 0x522   :  { %v5669_v17 = vmul.f32 %v12398_v8, %v5601_v45  ;;  %v5670_v54 = vmul.f32 %v12398_v8, %v5602_v46  ;;  %v5671_v33 = vmul.f32 %v12398_v8, %v5603_v63  ;;  %v5672_v55 = vmul.f32 %v12398_v8, %v5604_v52 }
 0x523   :  { %v5673_v49 = vmul.f32 %v12398_v8, %v5605_v59  ;;  %v5674_v18 = vmul.f32 %v12398_v8, %v5606_v23  ;;  %v5675_v16 = vmul.f32 %v12398_v8, %v5607_v7  ;;  %v5676_v11 = vmul.f32 %v12398_v8, %v5608_v1 }
 0x524   :  { %v16098_v28 = vmov 0   ;;  %v5677_v40 = vmul.f32 %v12398_v8, %v5609_v34  ;;  %v5678_v45 = vmul.f32 %v12398_v8, %v5610_v22  ;;  %v5679_v46 = vmul.f32 %v12398_v8, %v5611_v43 }
 0x525   :  { %6700 = vmatprep.subr.bf16.mxu1 %v16098_v28  ;;  %v5680_v63 = vmul.f32 %v12398_v8, %v5612_v10  ;;  %v5683_v52 = vmul.f32 %v12398_v8, %v5615_v32  ;;  %v5684_v59 = vmul.f32 %v12398_v8, %v5616_v24  ;;  %v12787_v23 = vadd.f32 %v12417_v56, %v5653_v35  ;;  %v16114_v8 = vld [vmem:[#allocation41_spill] sm:$0xff] }
 0x526   :  { %v12790_v7 = vadd.f32 %v12417_v56, %v5654_v12  ;;  %v12793_v1 = vadd.f32 %v12417_v56, %v5655_v62  ;;  %v12796_v34 = vadd.f32 %v12417_v56, %v5656_v9  ;;  %v12799_v22 = vadd.f32 %v12417_v56, %v5657_v13  ;;  %v8697_v12 = vld [vmem:[%s15228_s9 + $0x8] sm:$0xff]  }
 0x527   :  { %v12802_v43 = vadd.f32 %v12417_v56, %v5658_v50  ;;  %v12805_v10 = vadd.f32 %v12417_v56, %v5659_v5  ;;  %v12808_v32 = vadd.f32 %v12417_v56, %v5660_v19  ;;  %v12811_v24 = vadd.f32 %v12417_v56, %v5661_v60  ;;  %6701 = vmatpush1.bf16.msra.mxu1 %v8697_v12 }
 0x528   :  { %v12814_v35 = vadd.f32 %v12417_v56, %v5662_v21  ;;  %v12820_v62 = vadd.f32 %v12417_v56, %v5663_v39  ;;  %v12823_v9 = vadd.f32 %v12417_v56, %v5664_v29  ;;  %v12826_v13 = vadd.f32 %v12417_v56, %v5665_v57  ;;  %6702 = vmatprep.subr.bf16.mxu1 %v16098_v28 }
 0x529   :  { %v12829_v50 = vadd.f32 %v12417_v56, %v5666_v41  ;;  %v12832_v5 = vadd.f32 %v12417_v56, %v5667_v2  ;;  %v12835_v19 = vadd.f32 %v12417_v56, %v5668_v0  ;;  %v12838_v60 = vadd.f32 %v12417_v56, %v5669_v17 }
 0x52a   :  { %v12841_v21 = vadd.f32 %v12417_v56, %v5670_v54  ;;  %v12844_v39 = vadd.f32 %v12417_v56, %v5671_v33  ;;  %v12847_v29 = vadd.f32 %v12417_v56, %v5672_v55  ;;  %v12850_v25 = vadd.f32 %v12417_v56, %v5673_v49 }
 0x52b   :  { %v12853_v57 = vadd.f32 %v12417_v56, %v5674_v18  ;;  %v12857_v41 = vadd.f32 %v12417_v56, %v5675_v16  ;;  %v12860_v2 = vadd.f32 %v12417_v56, %v5676_v11  ;;  %v12863_v0 = vadd.f32 %v12417_v56, %v5677_v40  ;;  %v16109_v11 = vld [vmem:[#allocation49_spill] sm:$0xff] }
 0x52c   :  { %16099 = vst [vmem:[#allocation100_spill] sm:$0xff] %v12850_v25  ;;  %v12866_v17 = vadd.f32 %v12417_v56, %v5678_v45  ;;  %v12869_v54 = vadd.f32 %v12417_v56, %v5679_v46  ;;  %v12872_v18 = vadd.f32 %v12417_v56, %v5680_v63  ;;  %v12875_v33 = vadd.f32 %v12417_v56, %v5683_v52  ;;  %v16110_v45 = vld [vmem:[#allocation36_spill] sm:$0xff]  ;;  %v16111_v63 = vld [vmem:[#allocation33_spill] sm:$0xff] }
 0x52d   :  { %16100 = vst [vmem:[#allocation101_spill] sm:$0xff] %v12853_v57  ;;  %16101 = vst [vmem:[#allocation102_spill] sm:$0xff] %v12857_v41  ;;  %v12878_v55 = vadd.f32 %v12417_v56, %v5684_v59  ;;  %v5785_v49 = vadd.f32 %v12562_v47, %v12057_v26  ;;  %v5786_v16 = vadd.f32 %v12565_v61, %v12060_v38  ;;  %v16112_v52 = vld [vmem:[#allocation53_spill] sm:$0xff]  ;;  %v16113_v59 = vld [vmem:[#allocation60_spill] sm:$0xff] }
 0x52e   :  { %16102 = vst [vmem:[#allocation103_spill] sm:$0xff] %v12860_v2  ;;  %16103 = vst [vmem:[#allocation107_spill] sm:$0xff] %v12863_v0  ;;  %v5787_v40 = vadd.f32 %v12568_v53, %v16109_v11  ;;  %v5788_v46 = vadd.f32 %v12571_v6, %v16110_v45  ;;  %v5789_v12 = vadd.f32 %v12574_v44, %v16111_v63  ;;  %v16115_v47 = vld [vmem:[#allocation63_spill] sm:$0xff]  ;;  %v16116_v61 = vld [vmem:[#allocation65_spill] sm:$0xff] }
 0x52f   :  { %16104 = vst [vmem:[#allocation108_spill] sm:$0xff] %v12866_v17  ;;  %16105 = vst [vmem:[#allocation109_spill] sm:$0xff] %v12869_v54  ;;  %v5790_v36 = vadd.f32 %v12577_v27, %v16112_v52  ;;  %v5791_v56 = vadd.f32 %v12580_v48, %v16113_v59  ;;  %v5792_v26 = vadd.f32 %v12583_v42, %v16114_v8  ;;  %v16117_v11 = vld [vmem:[#allocation66_spill] sm:$0xff]  ;;  %v16118_v45 = vld [vmem:[#allocation69_spill] sm:$0xff] }
 0x530   :  { %16106 = vst [vmem:[#allocation112_spill] sm:$0xff] %v12872_v18  ;;  %16107 = vst [vmem:[#allocation113_spill] sm:$0xff] %v12875_v33  ;;  %v5793_v38 = vadd.f32 %v12586_v14, %v16115_v47  ;;  %v5794_v53 = vadd.f32 %v12589_v4, %v16116_v61  ;;  %v5795_v6 = vadd.f32 %v12592_v30, %v16117_v11  ;;  %v8698_v27 = vld [vmem:[%s15228_s9 + $0x10] sm:$0xff]   ;;  %v16120_v8 = vld [vmem:[#allocation72_spill] sm:$0xff] }
 0x531   :  { %16108 = vst [vmem:[#allocation129_spill] sm:$0xff] %v12878_v55  ;;  %v5796_v44 = vadd.f32 %v12595_v51, %v16118_v45  ;;  %v16119_v48 = vld [vmem:[#allocation54_spill] sm:$0xff]  ;;  %v5798_v42 = vadd.f32 %v12601_v37, %v16120_v8  ;;  %v16121_v14 = vld [vmem:[#allocation75_spill] sm:$0xff]  ;;  %v16122_v4 = vld [vmem:[#allocation77_spill] sm:$0xff]  ;;  %6703 = vmatpush1.bf16.msra.mxu1 %v8698_v27 }
 0x532   :  { %v5797_v63 = vadd.f32 %v12598_v3, %v16119_v48  ;;  %v5799_v52 = vadd.f32 %v12604_v58, %v16121_v14  ;;  %v5800_v59 = vadd.f32 %v12607_v15, %v16122_v4  ;;  %v16123_v30 = vld [vmem:[#allocation79_spill] sm:$0xff]  ;;  %v16124_v47 = vld [vmem:[#allocation94_spill] sm:$0xff]  ;;  %v16125_v51 = vld [vmem:[#allocation80_spill] sm:$0xff]  ;;  %6704 = vmatprep.subr.bf16.mxu1 %v16098_v28 }
 0x533   :  { %v5801_v61 = vadd.f32 %v16124_v47, %v16123_v30  ;;  %v16126_v11 = vld [vmem:[#allocation78_spill] sm:$0xff]  ;;  %v16128_v55 = vld [vmem:[#allocation97_spill] sm:$0xff]  ;;  %v16129_v18 = vld [vmem:[#allocation104_spill] sm:$0xff] }
 0x534   :  { %v5802_v45 = vadd.f32 %v16126_v11, %v16125_v51  ;;  %v5803_v33 = vadd.f32 %v16128_v55, %v16127_v20  ;;  %v16130_v3 = vld [vmem:[#allocation81_spill] sm:$0xff]  ;;  %v16132_v8 = vld [vmem:[#allocation82_spill] sm:$0xff]  ;;  %v16134_v14 = vld [vmem:[#allocation84_spill] sm:$0xff] }
 0x535   :  { %v5804_v48 = vadd.f32 %v16130_v3, %v16129_v18  ;;  %v16131_v37 = vld [vmem:[#allocation105_spill] sm:$0xff]  ;;  %v16133_v58 = vld [vmem:[#allocation106_spill] sm:$0xff]  ;;  %v16139_v51 = vld [vmem:[#allocation7_spill] sm:$0xff] }
 0x536   :  { %v5805_v54 = vadd.f32 %v16132_v8, %v16131_v37  ;;  %v5806_v17 = vadd.f32 %v16134_v14, %v16133_v58  ;;  %v16135_v15 = vld [vmem:[#allocation5_spill] sm:$0xff]  ;;  %v16136_v4 = vld [vmem:[#allocation86_spill] sm:$0xff]  ;;  %v16140_v20 = vld [vmem:[#allocation88_spill] sm:$0xff] }
 0x537   :  { %v5807_v0 = vadd.f32 %v16136_v4, %v16135_v15  ;;  %v16137_v30 = vld [vmem:[#allocation6_spill] sm:$0xff]  ;;  %v5809_v55 = vadd.f32 %v16140_v20, %v16139_v51  ;;  %v16141_v11 = vld [vmem:[#allocation8_spill] sm:$0xff]  ;;  %v16142_v18 = vld [vmem:[#allocation91_spill] sm:$0xff]  ;;  %v12948_v51 = vadd.f32 %v5786_v16, %v12790_v7  ;;  %v12951_v20 = vadd.f32 %v5787_v40, %v12793_v1 }
 0x538   :  { %v16138_v47 = vld [vmem:[#allocation90_spill] sm:$0xff]  ;;  %v5810_v27 = vadd.f32 %v16142_v18, %v16141_v11  ;;  %v16143_v3 = vld [vmem:[#allocation9_spill] sm:$0xff]  ;;  %v16146_v57 = vld [vmem:[#allocation95_spill] sm:$0xff]  ;;  %v12969_v7 = vadd.f32 %v5793_v38, %v12811_v24  ;;  %v12972_v1 = vadd.f32 %v5794_v53, %v12814_v35  ;;  %v12996_v24 = vadd.f32 %v5801_v61, %v12838_v60 }
 0x539   :  { %v5808_v2 = vadd.f32 %v16138_v47, %v16137_v30  ;;  %v16144_v41 = vld [vmem:[#allocation93_spill] sm:$0xff]  ;;  %v16145_v8 = vld [vmem:[#allocation10_spill] sm:$0xff]  ;;  %v16147_v14 = vld [vmem:[#allocation11_spill] sm:$0xff]  ;;  %v12945_v47 = vadd.f32 %v5785_v49, %v12787_v23  ;;  %v12966_v23 = vadd.f32 %v5792_v26, %v12808_v32  ;;  %v12993_v32 = vadd.f32 %v5800_v59, %v12835_v19 }
 0x53a   :  { %v5811_v37 = vadd.f32 %v16144_v41, %v16143_v3  ;;  %v5812_v58 = vadd.f32 %v16146_v57, %v16145_v8  ;;  %v16148_v25 = vld [vmem:[#allocation96_spill] sm:$0xff]  ;;  %v12954_v41 = vadd.f32 %v5788_v46, %v12796_v34  ;;  %v12957_v57 = vadd.f32 %v5789_v12, %v12799_v22  ;;  %16151 = vst [vmem:[#allocation36_spill] sm:$0xff] %v12969_v7  ;;  %v16167_v19 = vld [vmem:[#allocation102_spill] sm:$0xff]  ;;  %v16169_v60 = vld [vmem:[#allocation103_spill] sm:$0xff] }
 0x53b   :  { %v5815_v15 = vadd.f32 %v16148_v25, %v16147_v14  ;;  %v16149_v4 = vld [vmem:[#allocation12_spill] sm:$0xff]  ;;  %v12960_v25 = vadd.f32 %v5790_v36, %v12802_v43  ;;  %16150 = vst [vmem:[#allocation49_spill] sm:$0xff] %v12966_v23  ;;  %16152 = vst [vmem:[#allocation33_spill] sm:$0xff] %v12972_v1  ;;  %v12975_v34 = vadd.f32 %v5795_v6, %v12820_v62  ;;  %v8699_v43 = vld [vmem:[%s15228_s9 + $0x18] sm:$0xff]  }
 0x53c   :  { %v5816_v30 = vadd.f32 %v12649_v31, %v16149_v4  ;;  %v12963_v31 = vadd.f32 %v5791_v56, %v12805_v10  ;;  %v12978_v22 = vadd.f32 %v5796_v44, %v12823_v9  ;;  %v12981_v36 = vadd.f32 %v5797_v63, %v12826_v13  ;;  %16158 = vst [vmem:[#allocation66_spill] sm:$0xff] %v12993_v32  ;;  %v16163_v13 = vld [vmem:[#allocation100_spill] sm:$0xff]  ;;  %v16179_v26 = vld [vmem:[#allocation113_spill] sm:$0xff]  ;;  %v16183_v53 = vld [vmem:[#allocation115_spill] sm:$0xff] }
 0x53d   :  { %16153 = vst [vmem:[#allocation53_spill] sm:$0xff] %v12975_v34  ;;  %v12984_v56 = vadd.f32 %v5798_v42, %v12829_v50  ;;  %v12990_v10 = vadd.f32 %v5799_v52, %v12832_v5  ;;  %16159 = vst [vmem:[#allocation69_spill] sm:$0xff] %v12996_v24  ;;  %v12999_v35 = vadd.f32 %v5802_v45, %v12841_v21  ;;  %v16165_v5 = vld [vmem:[#allocation101_spill] sm:$0xff]  ;;  %6705 = vmatpush1.bf16.msra.mxu1 %v8699_v43  ;;  %v16171_v21 = vld [vmem:[#allocation107_spill] sm:$0xff] }
 0x53e   :  { %16154 = vst [vmem:[#allocation60_spill] sm:$0xff] %v12978_v22  ;;  %16155 = vst [vmem:[#allocation41_spill] sm:$0xff] %v12981_v36  ;;  %v13002_v62 = vadd.f32 %v5803_v33, %v12844_v39  ;;  %v13005_v9 = vadd.f32 %v5804_v48, %v12847_v29  ;;  %v13008_v50 = vadd.f32 %v5805_v54, %v16163_v13  ;;  %v16173_v39 = vld [vmem:[#allocation108_spill] sm:$0xff]  ;;  %6706 = vmatprep.subr.bf16.mxu1 %v16098_v28  ;;  %v16175_v29 = vld [vmem:[#allocation109_spill] sm:$0xff] }
 0x53f   :  { %16156 = vst [vmem:[#allocation63_spill] sm:$0xff] %v12984_v56  ;;  %16157 = vst [vmem:[#allocation65_spill] sm:$0xff] %v12990_v10  ;;  %v13011_v49 = vadd.f32 %v5806_v17, %v16165_v5  ;;  %v13014_v16 = vadd.f32 %v5807_v0, %v16167_v19  ;;  %v13017_v40 = vadd.f32 %v5808_v2, %v16169_v60  ;;  %v16177_v17 = vld [vmem:[#allocation112_spill] sm:$0xff]  ;;  %v16181_v38 = vld [vmem:[#allocation129_spill] sm:$0xff] }
 0x540   :  { %16160 = vst [vmem:[#allocation54_spill] sm:$0xff] %v12999_v35  ;;  %16161 = vst [vmem:[#allocation72_spill] sm:$0xff] %v13002_v62  ;;  %v13020_v46 = vadd.f32 %v5809_v55, %v16171_v21  ;;  %v13023_v33 = vadd.f32 %v5810_v27, %v16173_v39  ;;  %v13027_v54 = vadd.f32 %v5811_v37, %v16175_v29  ;;  %v16184_v6 = vld [vmem:[#allocation20_spill] sm:$0xff]  ;;  %v16185_v63 = vld [vmem:[#allocation26_spill] sm:$0xff] }
 0x541   :  { %16162 = vst [vmem:[#allocation75_spill] sm:$0xff] %v13005_v9  ;;  %16164 = vst [vmem:[#allocation77_spill] sm:$0xff] %v13008_v50  ;;  %v13030_v12 = vadd.f32 %v5812_v58, %v16177_v17  ;;  %v13033_v0 = vadd.f32 %v5815_v15, %v16179_v26  ;;  %v13036_v2 = vadd.f32 %v5816_v30, %v16181_v38  ;;  %v16186_v52 = vld [vmem:[#allocation29_spill] sm:$0xff]  ;;  %v16187_v61 = vld [vmem:[#allocation98_spill] sm:$0xff] }
 0x542   :  { %16166 = vst [vmem:[#allocation79_spill] sm:$0xff] %v13011_v49  ;;  %16168 = vst [vmem:[#allocation94_spill] sm:$0xff] %v13014_v16  ;;  %v13040_v44 = vmul.f32 %v16184_v6, %v16183_v53  ;;  %v13044_v42 = vmul.f32 %v16185_v63, %v16183_v53  ;;  %v13048_v59 = vmul.f32 %v16186_v52, %v16183_v53  ;;  %v16188_v45 = vld [vmem:[#allocation45_spill] sm:$0xff]  ;;  %v16190_v18 = vld [vmem:[#allocation34_spill] sm:$0xff] }
 0x543   :  { %16170 = vst [vmem:[#allocation80_spill] sm:$0xff] %v13017_v40  ;;  %16172 = vst [vmem:[#allocation78_spill] sm:$0xff] %v13020_v46  ;;  %v5622_v48 = vmul.f32 %v16188_v45, %v16187_v61  ;;  %v16189_v55 = vld [vmem:[#allocation17_spill] sm:$0xff]  ;;  %v13058_v27 = vmul.f32 %v16190_v18, %v16183_v53  ;;  %v16191_v3 = vld [vmem:[#allocation19_spill] sm:$0xff] }
 0x544   :  { %16174 = vst [vmem:[#allocation83_spill] sm:$0xff] %v13023_v33  ;;  %16176 = vst [vmem:[#allocation97_spill] sm:$0xff] %v13027_v54  ;;  %v13054_v11 = vmul.f32 %v16189_v55, %v16183_v53  ;;  %v13062_v37 = vmul.f32 %v16191_v3, %v16183_v53  ;;  %v16192_v8 = vld [vmem:[#allocation21_spill] sm:$0xff]  ;;  %v16193_v14 = vld [vmem:[#allocation23_spill] sm:$0xff] }
 0x545   :  { %16178 = vst [vmem:[#allocation104_spill] sm:$0xff] %v13030_v12  ;;  %16180 = vst [vmem:[#allocation81_spill] sm:$0xff] %v13033_v0  ;;  %v13066_v58 = vmul.f32 %v16192_v8, %v16183_v53  ;;  %v13070_v15 = vmul.f32 %v16193_v14, %v16183_v53  ;;  %v16194_v4 = vld [vmem:[#allocation24_spill] sm:$0xff]  ;;  %v16196_v5 = vld [vmem:[#allocation30_spill] sm:$0xff] }
 0x546   :  { %16182 = vst [vmem:[#allocation105_spill] sm:$0xff] %v13036_v2  ;;  %v13074_v30 = vmul.f32 %v16194_v4, %v16183_v53  ;;  %v16195_v43 = vld [vmem:[#allocation28_spill] sm:$0xff]  ;;  %v13082_v19 = vmul.f32 %v16196_v5, %v16183_v53  ;;  %v16197_v60 = vld [vmem:[#allocation31_spill] sm:$0xff]  ;;  %v16203_v52 = vld [vmem:[#allocation46_spill] sm:$0xff] }
 0x547   :  { %v13078_v13 = vmul.f32 %v16195_v43, %v16183_v53  ;;  %v13086_v21 = vmul.f32 %v16197_v60, %v16183_v53  ;;  %v16198_v39 = vld [vmem:[#allocation44_spill] sm:$0xff]  ;;  %v16200_v26 = vld [vmem:[#allocation47_spill] sm:$0xff]  ;;  %v5690_v18 = vadd.f32 %v16203_v52, %v5622_v48  ;;  %v16205_v4 = vld [vmem:[#allocation57_spill] sm:$0xff] }
 0x548   :  { %v16199_v29 = vld [vmem:[#allocation76_spill] sm:$0xff]  ;;  %v16202_v63 = vld [vmem:[#allocation99_spill] sm:$0xff]  ;;  %v16206_v5 = vld [vmem:[#allocation62_spill] sm:$0xff] }
 0x549   :  { %v5753_v17 = vadd.f32 %v16199_v29, %v16198_v39  ;;  %v16201_v38 = vld [vmem:[#allocation92_spill] sm:$0xff]  ;;  %v5689_v61 = vadd.f32 %v16203_v52, %v16202_v63  ;;  %v16209_v48 = vld [vmem:[#allocation67_spill] sm:$0xff]  ;;  %v16216_v54 = vld [vmem:[#allocation61_spill] sm:$0xff] }
 0x54a   :  { %v5754_v6 = vadd.f32 %v16201_v38, %v16200_v26  ;;  %v8700_v55 = vld [vmem:[%s15228_s9 + $0x20] sm:$0xff]   ;;  %v16217_v50 = vld [vmem:[#allocation13_spill] sm:$0xff] }
 0x54b   :  { %v13101_v3 = vld [vmem:[%s15225_s6 + $0x3] ss:$0 sm:$0xff]  ;;  %v13109_v39 = vadd.f32 %v5753_v17, %v5689_v61  ;;  %6707 = vmatpush1.bf16.msra.mxu1 %v8700_v55  ;;  %v16213_v61 = vld [vmem:[#allocation38_spill] sm:$0xff] }
 0x54c   :  { %v16204_v8 = vld [vmem:[#allocation56_spill] sm:$0xff]  ;;  %v5418_v43 = vadd.f32 %v13101_v3, %v16205_v4  ;;  %v5419_v60 = vadd.f32 %v13101_v3, %v16206_v5  ;;  %v5421_v38 = vadd.f32 %v13101_v3, %v16209_v48  ;;  %v13121_v4 = vadd.f32 %v5754_v6, %v5690_v18  ;;  %6708 = vmatprep.subr.bf16.mxu1 %v16098_v28  ;;  %v16214_v48 = vld [vmem:[#allocation55_spill] sm:$0xff] }
 0x54d   :  { %v5417_v14 = vadd.f32 %v13101_v3, %v16204_v8  ;;  %16207 = vst [vmem:[#allocation82_spill] sm:$0xff] %v13109_v39  ;;  %v16208_v29 = vld [vmem:[#allocation64_spill] sm:$0xff]  ;;  %v16211_v8 = vld [vmem:[#allocation50_spill] sm:$0xff]  ;;  %v16215_v6 = vld [vmem:[#allocation39_spill] sm:$0xff] }
 0x54e   :  { %v5420_v26 = vadd.f32 %v13101_v3, %v16208_v29  ;;  %v16210_v63 = vld [vmem:[#allocation68_spill] sm:$0xff]  ;;  %v13119_v0 = vmul.f32 %v16211_v8, %v16183_v53  ;;  %16212 = vst [vmem:[#allocation106_spill] sm:$0xff] %v13121_v4  ;;  %v5486_v17 = vsub.f32 %v5418_v43, %v13101_v3  ;;  %v13128_v29 = vmul.f32 %v16213_v61, %v16183_v53 }
 0x54f   :  { %v5422_v2 = vadd.f32 %v13101_v3, %v16210_v63  ;;  %v5485_v5 = vsub.f32 %v5417_v14, %v13101_v3  ;;  %v13132_v63 = vmul.f32 %v16214_v48, %v16183_v53  ;;  %v5487_v55 = vsub.f32 %v5419_v60, %v13101_v3 }
 0x550   :  { %v5488_v8 = vsub.f32 %v5420_v26, %v13101_v3  ;;  %v13138_v18 = vmul.f32 %v16215_v6, %v16183_v53  ;;  %v5881_v12 = vpack.c.bf16 %v13121_v4, %v13109_v39  ;;  %v5556_v61 = vmul.f32 %v16216_v54, %v5486_v17  ;;  %v16218_v39 = vld [vmem:[#allocation14_spill] sm:$0xff] }
 0x551   :  { %v5555_v33 = vmul.f32 %v16216_v54, %v5485_v5  ;;  %v5557_v46 = vmul.f32 %v16216_v54, %v5487_v55  ;;  %v5489_v40 = vsub.f32 %v5421_v38, %v13101_v3  ;;  %v5490_v16 = vsub.f32 %v5422_v2, %v13101_v3 }
 0x552   :  { %v5558_v48 = vmul.f32 %v16216_v54, %v5488_v8  ;;  %6054 = vmatmul.mubr.bf16.vlgmr.msra.gmra.mrb[192].mxu0 %v5881_v12  ;;  %v5624_v6 = vmul.f32 %v16188_v45, %v5556_v61  ;;  %v5755_v9 = vadd.f32 %v5417_v14, %v16217_v50  ;;  %v5756_v4 = vadd.f32 %v5418_v43, %v16218_v39  ;;  %v16219_v14 = vld [vmem:[#allocation70_spill] sm:$0xff]  ;;  %v16220_v39 = vld [vmem:[#allocation85_spill] sm:$0xff] }
 0x553   :  { %v5623_v49 = vmul.f32 %v16188_v45, %v5555_v33  ;;  %6063 = vmatprep.mubr.bf16.mxu0 %v16098_v28  ;;  %v5625_v5 = vmul.f32 %v16188_v45, %v5557_v46  ;;  %v5559_v55 = vmul.f32 %v16216_v54, %v5489_v40  ;;  %v5560_v8 = vmul.f32 %v16216_v54, %v5490_v16  ;;  %v8701_v33 = vld [vmem:[%s15228_s9 + $0x28] sm:$0xff]  }
 0x554   :  { %v5626_v17 = vmul.f32 %v16188_v45, %v5558_v48  ;;  %v5692_v50 = vadd.f32 %v16203_v52, %v5624_v6  ;;  %v5423_v43 = vadd.f32 %v13101_v3, %v16219_v14  ;;  %v5424_v46 = vadd.f32 %v13101_v3, %v16220_v39  ;;  %6709 = vmatpush1.bf16.msra.mxu1 %v8701_v33  ;;  %v16223_v39 = vld [vmem:[#allocation16_spill] sm:$0xff] }
 0x555   :  { %v5691_v12 = vadd.f32 %v16203_v52, %v5623_v49  ;;  %v5693_v61 = vadd.f32 %v16203_v52, %v5625_v5  ;;  %v5627_v16 = vmul.f32 %v16188_v45, %v5559_v55  ;;  %v5628_v48 = vmul.f32 %v16188_v45, %v5560_v8  ;;  %6710 = vmatprep.subr.bf16.mxu1 %v16098_v28  ;;  %v16224_v5 = vld [vmem:[#allocation110_spill] sm:$0xff] }
 0x556   :  { %v5694_v40 = vadd.f32 %v16203_v52, %v5626_v17  ;;  %v13172_v49 = vadd.f32 %v5756_v4, %v5692_v50  ;;  %v5491_v6 = vsub.f32 %v5423_v43, %v13101_v3  ;;  %v5492_v14 = vsub.f32 %v5424_v46, %v13101_v3  ;;  %v16225_v8 = vld [vmem:[#allocation58_spill] sm:$0xff] }
 0x557   :  { %v13170_v62 = vadd.f32 %v5755_v9, %v5691_v12  ;;  %v5757_v35 = vadd.f32 %v5419_v60, %v16223_v39  ;;  %v5758_v24 = vadd.f32 %v5420_v26, %v16224_v5  ;;  %v5695_v17 = vadd.f32 %v16203_v52, %v5627_v16  ;;  %v16227_v26 = vld [vmem:[#allocation111_spill] sm:$0xff]  ;;  %v16228_v16 = vld [vmem:[#allocation116_spill] sm:$0xff] }
 0x558   :  { %16222 = vst [vmem:[#allocation5_spill] sm:$0xff] %v13172_v49  ;;  %v5696_v55 = vadd.f32 %v16203_v52, %v5628_v48  ;;  %v13183_v9 = vmul.f32 %v16225_v8, %v16183_v53  ;;  %v5561_v33 = vmul.f32 %v16216_v54, %v5491_v6  ;;  %v5562_v12 = vmul.f32 %v16216_v54, %v5492_v14  ;;  %v16229_v8 = vld [vmem:[#allocation71_spill] sm:$0xff]  ;;  %v8702_v14 = vld [vmem:[%s15228_s9 + $0x30] sm:$0xff]  }
 0x559   :  { %16221 = vst [vmem:[#allocation84_spill] sm:$0xff] %v13170_v62  ;;  %v5882_v4 = vpack.c.bf16 %v13172_v49, %v13170_v62  ;;  %v13189_v50 = vadd.f32 %v5757_v35, %v5693_v61  ;;  %v13191_v60 = vadd.f32 %v5758_v24, %v5694_v40  ;;  %v5759_v39 = vadd.f32 %v5421_v38, %v16227_v26  ;;  %v16230_v62 = vld [vmem:[#allocation87_spill] sm:$0xff]  ;;  %v16232_v38 = vld [vmem:[#allocation73_spill] sm:$0xff] }
 0x55a   :  { %v5760_v5 = vadd.f32 %v5422_v2, %v16228_v16  ;;  %v5629_v48 = vmul.f32 %v16188_v45, %v5561_v33  ;;  %v5630_v53 = vmul.f32 %v16188_v45, %v5562_v12  ;;  %v5425_v49 = vadd.f32 %v13101_v3, %v16229_v8  ;;  %v16233_v61 = vld [vmem:[#allocation89_spill] sm:$0xff]  ;;  %v16235_v16 = vld [vmem:[#allocation74_spill] sm:$0xff]  ;;  %6711 = vmatpush1.bf16.msra.mxu1 %v8702_v14 }
 0x55b   :  { %16226 = vst [vmem:[#allocation86_spill] sm:$0xff] %v13191_v60  ;;  %6064 = vmatmul.mubr.bf16.gmra.mrb[196].mxu0 %v5882_v4  ;;  %v5426_v6 = vadd.f32 %v13101_v3, %v16230_v62  ;;  %v13202_v35 = vadd.f32 %v5759_v39, %v5695_v17  ;;  %v5427_v2 = vadd.f32 %v13101_v3, %v16232_v38 }
 0x55c   :  { %6073 = vmatprep.mubr.bf16.mxu0 %v16098_v28  ;;  %v13204_v24 = vadd.f32 %v5760_v5, %v5696_v55  ;;  %v5428_v40 = vadd.f32 %v13101_v3, %v16233_v61  ;;  %v5697_v4 = vadd.f32 %v16203_v52, %v5629_v48  ;;  %v5698_v62 = vadd.f32 %v16203_v52, %v5630_v53  ;;  %v16234_v55 = vld [vmem:[#allocation117_spill] sm:$0xff]  ;;  %v16236_v48 = vld [vmem:[#allocation118_spill] sm:$0xff] }
 0x55d   :  { %v5493_v33 = vsub.f32 %v5425_v49, %v13101_v3  ;;  %v5494_v17 = vsub.f32 %v5426_v6, %v13101_v3  ;;  %v5761_v12 = vadd.f32 %v5423_v43, %v16234_v55  ;;  %v5495_v26 = vsub.f32 %v5427_v2, %v13101_v3  ;;  %6712 = vmatprep.subr.bf16.mxu1 %v16098_v28  ;;  %v16237_v55 = vld [vmem:[#allocation119_spill] sm:$0xff] }
 0x55e   :  { %16231 = vst [vmem:[#allocation6_spill] sm:$0xff] %v13204_v24  ;;  %v5496_v39 = vsub.f32 %v5428_v40, %v13101_v3  ;;  %v5429_v5 = vadd.f32 %v13101_v3, %v16235_v16  ;;  %v5883_v8 = vpack.c.bf16 %v13191_v60, %v13189_v50  ;;  %v5762_v38 = vadd.f32 %v5424_v46, %v16236_v48 }
 0x55f   :  { %v5563_v53 = vmul.f32 %v16216_v54, %v5493_v33  ;;  %v5564_v61 = vmul.f32 %v16216_v54, %v5494_v17  ;;  %v5884_v43 = vpack.c.bf16 %v13204_v24, %v13202_v35  ;;  %v5763_v32 = vadd.f32 %v5425_v49, %v16237_v55  ;;  %v16238_v49 = vld [vmem:[#allocation123_spill] sm:$0xff] }
 0x560   :  { %v5565_v10 = vmul.f32 %v16216_v54, %v5495_v26  ;;  %v5566_v14 = vmul.f32 %v16216_v54, %v5496_v39  ;;  %v13233_v16 = vadd.f32 %v5761_v12, %v5697_v4  ;;  %v13235_v60 = vadd.f32 %v5762_v38, %v5698_v62  ;;  %v16239_v26 = vld [vmem:[#allocation120_spill] sm:$0xff] }
 0x561   :  { %v5631_v46 = vmul.f32 %v16188_v45, %v5563_v53  ;;  %v5430_v33 = vadd.f32 %v13101_v3, %v13040_v44  ;;  %v5632_v17 = vmul.f32 %v16188_v45, %v5564_v61  ;;  %v5497_v24 = vsub.f32 %v5429_v5, %v13101_v3  ;;  %v16240_v12 = vld [vmem:[#allocation124_spill] sm:$0xff]  ;;  %v16241_v53 = vld [vmem:[#allocation121_spill] sm:$0xff] }
 0x562   :  { %v5633_v48 = vmul.f32 %v16188_v45, %v5565_v10  ;;  %v5767_v55 = vadd.f32 %v5429_v5, %v16238_v49  ;;  %v5764_v39 = vadd.f32 %v5426_v6, %v16239_v26  ;;  %v5634_v4 = vmul.f32 %v16188_v45, %v5566_v14  ;;  %v8703_v6 = vld [vmem:[%s15228_s9 + $0x38] sm:$0xff]   ;;  %v16242_v14 = vld [vmem:[#allocation122_spill] sm:$0xff] }
 0x563   :  { %6074 = vmatmul.mubr.bf16.gmra.mrb[200].mxu0 %v5883_v8  ;;  %v5498_v62 = vsub.f32 %v5430_v33, %v13101_v3  ;;  %v5768_v38 = vadd.f32 %v5430_v33, %v16240_v12  ;;  %v5699_v44 = vadd.f32 %v16203_v52, %v5631_v46  ;;  %v5765_v61 = vadd.f32 %v5427_v2, %v16241_v53 }
 0x564   :  { %6083 = vmatprep.mubr.bf16.mxu0 %v16098_v28  ;;  %v5567_v10 = vmul.f32 %v16216_v54, %v5497_v24  ;;  %v5431_v5 = vadd.f32 %v13101_v3, %v13044_v42  ;;  %v13260_v33 = vadd.f32 %v5428_v40, %v16242_v14  ;;  %v5432_v2 = vadd.f32 %v13101_v3, %v13048_v59 }
 0x565   :  { %v5568_v49 = vmul.f32 %v16216_v54, %v5498_v62  ;;  %v5700_v24 = vadd.f32 %v16203_v52, %v5632_v17  ;;  %v5701_v46 = vadd.f32 %v16203_v52, %v5633_v48  ;;  %6713 = vmatpush1.bf16.msra.mxu1 %v8703_v6  ;;  %v13270_v12 = vadd.f32 %v16203_v52, %v5634_v4  ;;  %v16243_v62 = vld [vmem:[#allocation125_spill] sm:$0xff] }
 0x566   :  { %v5635_v42 = vmul.f32 %v16188_v45, %v5567_v10  ;;  %v5499_v26 = vsub.f32 %v5431_v5, %v13101_v3  ;;  %v5500_v53 = vsub.f32 %v5432_v2, %v13101_v3  ;;  %v5769_v14 = vadd.f32 %v5431_v5, %v16243_v62  ;;  %6714 = vmatprep.subr.bf16.mxu1 %v16098_v28  ;;  %v16244_v10 = vld [vmem:[#allocation126_spill] sm:$0xff] }
 0x567   :  { %v5636_v40 = vmul.f32 %v16188_v45, %v5568_v49  ;;  %v13276_v59 = vadd.f32 %v5763_v32, %v5699_v44  ;;  %v5770_v8 = vadd.f32 %v5432_v2, %v16244_v10  ;;  %v5433_v49 = vadd.f32 %v13101_v3, %v13054_v11 }
 0x568   :  { %v5703_v17 = vadd.f32 %v16203_v52, %v5635_v42  ;;  %v5569_v48 = vmul.f32 %v16216_v54, %v5499_v26  ;;  %v5570_v4 = vmul.f32 %v16216_v54, %v5500_v53  ;;  %v5434_v5 = vadd.f32 %v13101_v3, %v13058_v27 }
 0x569   :  { %v5704_v6 = vadd.f32 %v16203_v52, %v5636_v40  ;;  %v5435_v44 = vadd.f32 %v13101_v3, %v13062_v37  ;;  %v5436_v2 = vadd.f32 %v13101_v3, %v13066_v58  ;;  %v5501_v11 = vsub.f32 %v5433_v49, %v13101_v3  ;;  %v8704_v58 = vld [vmem:[%s15228_s9 + $0x40] sm:$0xff]  }
 0x56a   :  { %v13287_v62 = vadd.f32 %v5767_v55, %v5703_v17  ;;  %v5637_v32 = vmul.f32 %v16188_v45, %v5569_v48  ;;  %v5638_v26 = vmul.f32 %v16188_v45, %v5570_v4  ;;  %v5502_v40 = vsub.f32 %v5434_v5, %v13101_v3  ;;  %v16245_v55 = vld [vmem:[#allocation4_spill] sm:$0xff]  ;;  %v16246_v17 = vld [vmem:[#allocation127_spill] sm:$0xff]  ;;  %6715 = vmatpush1.bf16.msra.mxu1 %v8704_v58 }
 0x56b   :  { %6084 = vmatmul.mubr.bf16.gmra.mrb[204].mxu0 %v5884_v43  ;;  %v13294_v42 = vadd.f32 %v5768_v38, %v5704_v6  ;;  %v5771_v53 = vadd.f32 %v5433_v49, %v16245_v55  ;;  %v5772_v37 = vadd.f32 %v5434_v5, %v16246_v17  ;;  %v5503_v48 = vsub.f32 %v5435_v44, %v13101_v3  ;;  %v16247_v5 = vld [vmem:[#allocation128_spill] sm:$0xff] }
 0x56c   :  { %6093 = vmatprep.mubr.bf16.mxu0 %v16098_v28  ;;  %v5705_v27 = vadd.f32 %v16203_v52, %v5637_v32  ;;  %v13307_v43 = vadd.f32 %v5764_v39, %v5700_v24  ;;  %v5706_v45 = vadd.f32 %v16203_v52, %v5638_v26  ;;  %v5571_v38 = vmul.f32 %v16216_v54, %v5501_v11  ;;  %v13322_v39 = vld [vmem:[%s15225_s6 + $0x4] ss:$0 sm:$0xff]  ;;  %v13339_v58 = vld [vmem:[%s15225_s6 + $0x5] ss:$0 sm:$0xff] }
 0x56d   :  { %v5572_v10 = vmul.f32 %v16216_v54, %v5502_v40  ;;  %v5504_v4 = vsub.f32 %v5436_v2, %v13101_v3  ;;  %v5573_v49 = vmul.f32 %v16216_v54, %v5503_v48  ;;  %v5773_v32 = vadd.f32 %v5435_v44, %v16247_v5  ;;  %6716 = vmatprep.subr.bf16.mxu1 %v16098_v28  ;;  %v16249_v40 = vld [vmem:[#allocation22_spill] sm:$0xff] }
 0x56e   :  { %v13312_v6 = vadd.f32 %v5769_v14, %v5705_v27  ;;  %v13317_v55 = vadd.f32 %v5770_v8, %v5706_v45  ;;  %v5639_v52 = vmul.f32 %v13322_v39, %v5571_v38  ;;  %v16248_v14 = vld [vmem:[#allocation18_spill] sm:$0xff]  ;;  %v5245_v8 = vadd.f32 %v13101_v3, %v16249_v40  ;;  %v16250_v27 = vld [vmem:[#allocation25_spill] sm:$0xff] }
 0x56f   :  { %v5640_v24 = vmul.f32 %v13322_v39, %v5572_v10  ;;  %v5774_v26 = vadd.f32 %v5436_v2, %v16248_v14  ;;  %v5574_v11 = vmul.f32 %v16216_v54, %v5504_v4  ;;  %v5641_v44 = vmul.f32 %v13322_v39, %v5573_v49 }
 0x570   :  { %v5246_v17 = vadd.f32 %v13101_v3, %v16250_v27  ;;  %v13334_v48 = vadd.f32 %v5765_v61, %v5701_v46  ;;  %v5707_v2 = vadd.f32 %v13339_v58, %v5639_v52  ;;  %v5437_v38 = vadd.f32 %v13101_v3, %v13070_v15  ;;  %v16251_v46 = vld [vmem:[#allocation27_spill] sm:$0xff]  ;;  %v8705_v27 = vld [vmem:[%s15228_s9 + $0x48] sm:$0xff]  }
 0x571   :  { %v5708_v45 = vadd.f32 %v13339_v58, %v5640_v24  ;;  %v5642_v10 = vmul.f32 %v13322_v39, %v5574_v11  ;;  %v5709_v4 = vadd.f32 %v13339_v58, %v5641_v44  ;;  %v5438_v61 = vadd.f32 %v13101_v3, %v13074_v30  ;;  %6717 = vmatpush1.bf16.msra.mxu1 %v8705_v27 }
 0x572   :  { %v5247_v49 = vadd.f32 %v13101_v3, %v16251_v46  ;;  %v16252_v5 = vpack.c.bf16 %v13235_v60, %v13233_v16  ;;  %v13354_v52 = vadd.f32 %v5771_v53, %v5707_v2  ;;  %v5505_v15 = vsub.f32 %v5437_v38, %v13101_v3  ;;  %6718 = vmatprep.subr.bf16.mxu1 %v16098_v28 }
 0x573   :  { %v13356_v24 = vadd.f32 %v5772_v37, %v5708_v45  ;;  %v5775_v14 = vadd.f32 %v5437_v38, %v5245_v8  ;;  %v5710_v11 = vadd.f32 %v13339_v58, %v5642_v10  ;;  %v13361_v44 = vadd.f32 %v5773_v32, %v5709_v4  ;;  %v16253_v8 = vld [vmem:[#allocation32_spill] sm:$0xff] }
 0x574   :  { %6094 = vmatmul.mubr.bf16.gmra.mrb[208].mxu0 %v16252_v5  ;;  %v5506_v30 = vsub.f32 %v5438_v61, %v13101_v3  ;;  %v5776_v40 = vadd.f32 %v5438_v61, %v5246_v17  ;;  %v13369_v53 = vadd.f32 %v13260_v33, %v13270_v12  ;;  %v5575_v37 = vmul.f32 %v16216_v54, %v5505_v15  ;;  %v16254_v61 = vld [vmem:[#allocation15_spill] sm:$0xff] }
 0x575   :  { %6103 = vmatprep.mubr.bf16.mxu0 %v16098_v28  ;;  %v5248_v2 = vadd.f32 %v13101_v3, %v16253_v8  ;;  %v5439_v32 = vadd.f32 %v13101_v3, %v13078_v13  ;;  %v5886_v45 = vpack.c.bf16 %v13307_v43, %v13276_v59  ;;  %v13378_v17 = vadd.f32 %v5774_v26, %v5710_v11  ;;  %v16255_v15 = vld [vmem:[#allocation35_spill] sm:$0xff] }
 0x576   :  { %v5576_v38 = vmul.f32 %v16216_v54, %v5506_v30  ;;  %v5440_v10 = vadd.f32 %v13101_v3, %v13082_v19  ;;  %v5643_v33 = vmul.f32 %v13322_v39, %v5575_v37  ;;  %v5249_v46 = vadd.f32 %v13101_v3, %v16254_v61 }
 0x577   :  { %v5507_v12 = vsub.f32 %v5439_v32, %v13101_v3  ;;  %v5777_v4 = vadd.f32 %v5439_v32, %v5247_v49  ;;  %v5250_v11 = vadd.f32 %v13101_v3, %v16255_v15  ;;  %v5441_v49 = vadd.f32 %v13101_v3, %v13086_v21  ;;  %v16256_v32 = vld [vmem:[#allocation37_spill] sm:$0xff] }
 0x578   :  { %v5644_v13 = vmul.f32 %v13322_v39, %v5576_v38  ;;  %v5508_v26 = vsub.f32 %v5440_v10, %v13101_v3  ;;  %v5778_v5 = vadd.f32 %v5440_v10, %v5248_v2  ;;  %v5711_v19 = vadd.f32 %v13339_v58, %v5643_v33  ;;  %v16257_v38 = vld [vmem:[#allocation40_spill] sm:$0xff] }
 0x579   :  { %v5577_v30 = vmul.f32 %v16216_v54, %v5507_v12  ;;  %v5442_v27 = vadd.f32 %v13101_v3, %v13119_v0  ;;  %v5251_v2 = vadd.f32 %v13101_v3, %v16256_v32  ;;  %v5252_v10 = vadd.f32 %v13101_v3, %v16257_v38 }
 0x57a   :  { %v5712_v37 = vadd.f32 %v13339_v58, %v5644_v13  ;;  %v5578_v8 = vmul.f32 %v16216_v54, %v5508_v26  ;;  %v13404_v33 = vadd.f32 %v5775_v14, %v5711_v19  ;;  %v5509_v21 = vsub.f32 %v5441_v49, %v13101_v3 }
 0x57b   :  { %v5645_v12 = vmul.f32 %v13322_v39, %v5577_v30  ;;  %v5510_v61 = vsub.f32 %v5442_v27, %v13101_v3  ;;  %v5779_v26 = vadd.f32 %v5441_v49, %v5249_v46  ;;  %v5780_v15 = vadd.f32 %v5442_v27, %v5250_v11  ;;  %v16258_v11 = vld [vmem:[#allocation42_spill] sm:$0xff] }
 0x57c   :  { %6104 = vmatmul.mubr.bf16.gmra.mrb[212].mxu0 %v5886_v45  ;;  %v13410_v0 = vadd.f32 %v5776_v40, %v5712_v37  ;;  %v5646_v13 = vmul.f32 %v13322_v39, %v5578_v8  ;;  %v8706_v45 = vld [vmem:[%s15228_s9 + $0x50] sm:$0xff]   ;;  %v5579_v19 = vmul.f32 %v16216_v54, %v5509_v21  ;;  %v5443_v32 = vadd.f32 %v13101_v3, %v13128_v29 }
 0x57d   :  { %6113 = vmatprep.mubr.bf16.mxu0 %v16098_v28  ;;  %v5713_v14 = vadd.f32 %v13339_v58, %v5645_v12  ;;  %v5580_v30 = vmul.f32 %v16216_v54, %v5510_v61  ;;  %v5887_v40 = vpack.c.bf16 %v13369_v53, %v13334_v48  ;;  %v5444_v46 = vadd.f32 %v13101_v3, %v13132_v63 }
 0x57e   :  { %v5714_v37 = vadd.f32 %v13339_v58, %v5646_v13  ;;  %v5253_v49 = vadd.f32 %v13101_v3, %v16258_v11  ;;  %6719 = vmatpush1.bf16.msra.mxu1 %v8706_v45  ;;  %v5647_v8 = vmul.f32 %v13322_v39, %v5579_v19  ;;  %v5511_v29 = vsub.f32 %v5443_v32, %v13101_v3 }
 0x57f   :  { %v13428_v27 = vadd.f32 %v5777_v4, %v5713_v14  ;;  %v5648_v38 = vmul.f32 %v13322_v39, %v5580_v30  ;;  %6720 = vmatprep.subr.bf16.mxu1 %v16098_v28  ;;  %v5512_v21 = vsub.f32 %v5444_v46, %v13101_v3  ;;  %v5781_v61 = vadd.f32 %v5443_v32, %v5251_v2  ;;  %v16259_v14 = vld [vmem:[#allocation43_spill] sm:$0xff] }
 0x580   :  { %v13434_v12 = vadd.f32 %v5778_v5, %v5714_v37  ;;  %v5782_v63 = vadd.f32 %v5444_v46, %v5252_v10  ;;  %v5715_v13 = vadd.f32 %v13339_v58, %v5647_v8  ;;  %v5581_v4 = vmul.f32 %v16216_v54, %v5511_v29 }
 0x581   :  { %v5716_v45 = vadd.f32 %v13339_v58, %v5648_v38  ;;  %v5254_v19 = vadd.f32 %v13101_v3, %v16259_v14  ;;  %v5582_v30 = vmul.f32 %v16216_v54, %v5512_v21  ;;  %v5445_v11 = vadd.f32 %v13101_v3, %v13138_v18  ;;  %v8707_v18 = vld [vmem:[%s15228_s9 + $0x58] sm:$0xff]  }
 0x582   :  { %v5446_v5 = vadd.f32 %v13101_v3, %v13183_v9  ;;  %v13447_v2 = vadd.f32 %v5779_v26, %v5715_v13  ;;  %v5649_v32 = vmul.f32 %v13322_v39, %v5581_v4  ;;  %6721 = vmatpush1.bf16.msra.mxu1 %v8707_v18  ;;  %v5897_v18 = vpack.c.bf16 %v12948_v51, %v12945_v47 }
 0x583   :  { %v13449_v10 = vadd.f32 %v5780_v15, %v5716_v45  ;;  %v5650_v37 = vmul.f32 %v13322_v39, %v5582_v30  ;;  %v5513_v46 = vsub.f32 %v5445_v11, %v13101_v3  ;;  %v5783_v38 = vadd.f32 %v5445_v11, %v5253_v49  ;;  %6722 = vmatprep.subr.bf16.mxu1 %v16098_v28  ;;  %v8710_v30 = vld [vmem:[%s15228_s9 + $0x70] sm:$0xff]  }
 0x584   :  { %6114 = vmatmul.mubr.bf16.gmra.mrb[216].mxu0 %v5887_v40  ;;  %v5514_v8 = vsub.f32 %v5446_v5, %v13101_v3  ;;  %v5717_v9 = vadd.f32 %v13339_v58, %v5649_v32  ;;  %v5784_v26 = vadd.f32 %v5446_v5, %v5254_v19  ;;  %v5888_v45 = vpack.c.bf16 %v13294_v42, %v13287_v62  ;;  %v8711_v32 = vld [vmem:[%s15228_s9 + $0x78] sm:$0xff]  }
 0x585   :  { %6123 = vmatprep.mubr.bf16.mxu0 %v16098_v28  ;;  %v5718_v15 = vadd.f32 %v13339_v58, %v5650_v37  ;;  %v5583_v40 = vmul.f32 %v16216_v54, %v5513_v46  ;;  %v5890_v19 = vpack.c.bf16 %v13356_v24, %v13354_v52  ;;  %v5891_v11 = vpack.c.bf16 %v13378_v17, %v13361_v44 }
 0x586   :  { %v5584_v29 = vmul.f32 %v16216_v54, %v5514_v8  ;;  %v13463_v21 = vadd.f32 %v5781_v61, %v5717_v9  ;;  %v5892_v5 = vpack.c.bf16 %v13410_v0, %v13404_v33  ;;  %v5893_v37 = vpack.c.bf16 %v13434_v12, %v13428_v27 }
 0x587   :  { %v13466_v3 = vadd.f32 %v5782_v63, %v5718_v15  ;;  %v5651_v49 = vmul.f32 %v13322_v39, %v5583_v40  ;;  %v8708_v63 = vld [vmem:[%s15228_s9 + $0x60] sm:$0xff]   ;;  %v5894_v46 = vpack.c.bf16 %v13449_v10, %v13447_v2  ;;  %v5898_v9 = vpack.c.bf16 %v12954_v41, %v12951_v20 }
 0x588   :  { %v5652_v13 = vmul.f32 %v13322_v39, %v5584_v29  ;;  %6723 = vmatpush1.bf16.msra.mxu1 %v8708_v63  ;;  %v5889_v39 = vpack.c.bf16 %v13317_v55, %v13312_v6  ;;  %v5900_v15 = vpack.c.bf16 %v12966_v23, %v12963_v31  ;;  %v5901_v40 = vpack.c.bf16 %v12972_v1, %v12969_v7  ;;  %v16263_v63 = vld [vmem:[#allocation54_spill] sm:$0xff] }
 0x589   :  { %v5719_v4 = vadd.f32 %v13339_v58, %v5651_v49  ;;  %6724 = vmatprep.subr.bf16.mxu1 %v16098_v28  ;;  %v5895_v8 = vpack.c.bf16 %v13466_v3, %v13463_v21  ;;  %v5902_v29 = vpack.c.bf16 %v12978_v22, %v12975_v34  ;;  %v5903_v49 = vpack.c.bf16 %v12984_v56, %v12981_v36 }
 0x58a   :  { %v5720_v14 = vadd.f32 %v13339_v58, %v5652_v13  ;;  %v8709_v58 = vld [vmem:[%s15228_s9 + $0x68] sm:$0xff]  }
 0x58b   :  { %v13475_v54 = vadd.f32 %v5783_v38, %v5719_v4  ;;  %v16260_v13 = vld [vmem:[#allocation65_spill] sm:$0xff] }
 0x58c   :  { %6124 = vmatmul.mubr.bf16.gmra.mrb[220].mxu0 %v5888_v45  ;;  %v13477_v61 = vadd.f32 %v5784_v26, %v5720_v14  ;;  %6725 = vmatpush1.bf16.msra.mxu1 %v8709_v58  ;;  %v5899_v26 = vpack.c.bf16 %v12960_v25, %v12957_v57  ;;  %v16261_v45 = vld [vmem:[#allocation66_spill] sm:$0xff]  ;;  %v16262_v14 = vld [vmem:[#allocation69_spill] sm:$0xff]  ;;  %v16264_v58 = vld [vmem:[#allocation72_spill] sm:$0xff] }
 0x58d   :  { %6133 = vmatprep.mubr.bf16.mxu0 %v16098_v28  ;;  %6726 = vmatprep.subr.bf16.mxu1 %v16098_v28  ;;  %v5904_v4 = vpack.c.bf16 %v16261_v45, %v16260_v13 }
 0x58e   :  { %v5896_v38 = vpack.c.bf16 %v13477_v61, %v13475_v54 }
 0x590   :  { %6727 = vmatpush1.bf16.msra.mxu1 %v8710_v30 }
 0x591   :  { %6728 = vmatprep.subr.bf16.mxu1 %v16098_v28 }
 0x594   :  { %6134 = vmatmul.mubr.bf16.gmra.mrb[224].mxu0 %v5889_v39  ;;  %6729 = vmatpush1.bf16.msra.mxu1 %v8711_v32  ;;  %v5905_v39 = vpack.c.bf16 %v16263_v63, %v16262_v14  ;;  %v16273_v14 = vld [vmem:[#allocation83_spill] sm:$0xff] }
 0x595   :  { %6143 = vmatprep.mubr.bf16.mxu0 %v16098_v28 }
 0x59c   :  { %6144 = vmatmul.mubr.bf16.gmra.mrb[228].mxu0 %v5890_v19  ;;  %v16265_v19 = vld [vmem:[#allocation75_spill] sm:$0xff] }
 0x59d   :  { %6153 = vmatprep.mubr.bf16.mxu0 %v16098_v28  ;;  %v5906_v30 = vpack.c.bf16 %v16265_v19, %v16264_v58 }
 0x5a4   :  { %6154 = vmatmul.mubr.bf16.gmra.mrb[232].mxu0 %v5891_v11  ;;  %v5929_v11 = vld [vmem:[%s15229_s8] sm:$0x3] }
 0x5a5   :  { %6163 = vmatprep.mubr.bf16.mxu0 %v16098_v28 }
 0x5ac   :  { %6164 = vmatmul.mubr.bf16.gmra.mrb[236].mxu0 %v5892_v5  ;;  %v16266_v5 = vld [vmem:[#allocation52_spill] sm:$0xff] }
 0x5ad   :  { %6173 = vmatprep.mubr.bf16.mxu0 %v16098_v28  ;;  %v5937_v32 = vsub.s32 1, %v16266_v5 }
 0x5b4   :  { %6174 = vmatmul.mubr.bf16.gmra.mrb[240].mxu0 %v5893_v37  ;;  %v16267_v37 = vld [vmem:[#allocation77_spill] sm:$0xff] }
 0x5b5   :  { %6183 = vmatprep.mubr.bf16.mxu0 %v16098_v28 }
 0x5bc   :  { %6184 = vmatmul.mubr.bf16.gmra.mrb[244].mxu0 %v5894_v46  ;;  %v16268_v46 = vld [vmem:[#allocation79_spill] sm:$0xff] }
 0x5bd   :  { %6193 = vmatprep.mubr.bf16.mxu0 %v16098_v28 }
 0x5c4   :  { %6194 = vmatmul.mubr.bf16.gmra.mrb[248].mxu0 %v5895_v8  ;;  %v5907_v8 = vpack.c.bf16 %v16268_v46, %v16267_v37 }
 0x5c5   :  { %6203 = vmatprep.mubr.bf16.mxu0 %v16098_v28 }
 0x5cc   :  { %6204 = vmatmul.mubr.bf16.gmra.mrb[252].mxu0 %v5896_v38  ;;  %v16269_v38 = vld [vmem:[#allocation114_spill] sm:$0xff] }
 0x5cd   :  { %6213 = vmatprep.mubr.bf16.mxu0 %v16098_v28 }
 0x5d4   :  { %6214 = vmatmul.mubr.bf16.gmra.mrb[0].mxu0 %v5897_v18  ;;  %v13555_v18 = vrot.slane %v5929_v11, %v16269_v38 }
 0x5d5   :  { %6223 = vmatprep.mubr.bf16.mxu0 %v16098_v28 }
 0x5dc   :  { %6224 = vmatmul.mubr.bf16.gmra.mrb[4].mxu0 %v5898_v9  ;;  %v13557_v9 = vrot.slane %v5929_v11, %v5937_v32 }
 0x5dd   :  { %6233 = vmatprep.mubr.bf16.mxu0 %v16098_v28 }
 0x5e4   :  { %6234 = vmatmul.mubr.bf16.gmra.mrb[8].mxu0 %v5899_v26 }
 0x5e5   :  { %6243 = vmatprep.mubr.bf16.mxu0 %v16098_v28 }
 0x5ec   :  { %6244 = vmatmul.mubr.bf16.gmra.mrb[12].mxu0 %v5900_v15 }
 0x5ed   :  { %6253 = vmatprep.mubr.bf16.mxu0 %v16098_v28 }
 0x5f4   :  { %6254 = vmatmul.mubr.bf16.gmra.mrb[16].mxu0 %v5901_v40 }
 0x5f5   :  { %6263 = vmatprep.mubr.bf16.mxu0 %v16098_v28 }
 0x5fc   :  { %6264 = vmatmul.mubr.bf16.gmra.mrb[20].mxu0 %v5902_v29 }
 0x5fd   :  { %6273 = vmatprep.mubr.bf16.mxu0 %v16098_v28 }
 0x604   :  { %6274 = vmatmul.mubr.bf16.gmra.mrb[24].mxu0 %v5903_v49 }
 0x605   :  { %6283 = vmatprep.mubr.bf16.mxu0 %v16098_v28 }
 0x60c   :  { %6284 = vmatmul.mubr.bf16.gmra.mrb[28].mxu0 %v5904_v4  ;;  %v16270_v4 = vld [vmem:[#allocation94_spill] sm:$0xff] }
 0x60d   :  { %6293 = vmatprep.mubr.bf16.mxu0 %v16098_v28 }
 0x614   :  { %6294 = vmatmul.mubr.bf16.gmra.mrb[32].mxu0 %v5905_v39  ;;  %v16271_v39 = vld [vmem:[#allocation80_spill] sm:$0xff] }
 0x615   :  { %6303 = vmatprep.mubr.bf16.mxu0 %v16098_v28 }
 0x61c   :  { %6304 = vmatmul.mubr.bf16.gmra.mrb[36].mxu0 %v5906_v30  ;;  %v5908_v30 = vpack.c.bf16 %v16271_v39, %v16270_v4 }
 0x61d   :  { %6313 = vmatprep.mubr.bf16.mxu0 %v16098_v28 }
 0x624   :  { %6314 = vmatmul.mubr.bf16.gmra.mrb[40].mxu0 %v5907_v8 }
 0x625   :  { %6323 = vmatprep.mubr.bf16.mxu0 %v16098_v28  ;;  %v6055_v26 = vpop.f32.mrb[192].mxu0 }
 0x626   :  { %v6056_v15 = vadd.f32 %v6055_v26, %v13555_v18  ;;  %v6057_v40 = vpop.f32.mrb[193].mxu0 }
 0x627   :  { %v6058_v29 = vadd.f32 %v6057_v40, %v13557_v9  ;;  %v6059_v49 = vpop.f32.mrb[194].mxu0 }
 0x628   :  { %v6060_v5 = vadd.f32 %v6059_v49, %v13555_v18  ;;  %v6061_v46 = vpop.f32.mrb[195].mxu0  ;;  %v6374_v8 = vmax.f32 %v6056_v15, 0.0  ;;  %v16272_v49 = vld [vmem:[#allocation78_spill] sm:$0xff] }
 0x629   :  { %v6062_v38 = vadd.f32 %v6061_v46, %v13557_v9  ;;  %v6375_v32 = vmax.f32 %v6058_v29, 0.0  ;;  %v5909_v46 = vpack.c.bf16 %v16273_v14, %v16272_v49  ;;  %v16275_v49 = vld [vmem:[#allocation104_spill] sm:$0xff] }
 0x62a   :  { %v6376_v11 = vmax.f32 %v6060_v5, 0.0 }
 0x62b   :  { %v6377_v37 = vmax.f32 %v6062_v38, 0.0 }
 0x62c   :  { %6324 = vmatmul.mubr.bf16.gmra.mrb[44].mxu0 %v5908_v30  ;;  %v6502_v26 = vpack.c.bf16 %v6376_v11, %v6374_v8 }
 0x62d   :  { %6333 = vmatprep.mubr.bf16.mxu0 %v16098_v28  ;;  %v6503_v19 = vpack.c.bf16 %v6377_v37, %v6375_v32 }
 0x62e   :  { %v6065_v58 = vpop.f32.mrb[196].mxu0 }
 0x62f   :  { %v6066_v40 = vadd.f32 %v6065_v58, %v13555_v18  ;;  %v6067_v63 = vpop.f32.mrb[197].mxu0  ;;  %6730 = vmatprep.mubr.bf16.mxu1 %v6503_v19 }
 0x630   :  { %v6068_v39 = vadd.f32 %v6067_v63, %v13557_v9  ;;  %v6069_v4 = vpop.f32.mrb[198].mxu0  ;;  %6731 = vmatmul.mubr.bf16.vlgmr.msra.gmra.mrb[192].mxu1 %v6502_v26  ;;  %v16274_v26 = vld [vmem:[#allocation97_spill] sm:$0xff] }
 0x631   :  { %v6070_v15 = vadd.f32 %v6069_v4, %v13555_v18  ;;  %v6071_v30 = vpop.f32.mrb[199].mxu0  ;;  %v6378_v5 = vmax.f32 %v6066_v40, 0.0 }
 0x632   :  { %v6072_v29 = vadd.f32 %v6071_v30, %v13557_v9  ;;  %v6379_v37 = vmax.f32 %v6068_v39, 0.0  ;;  %v5910_v30 = vpack.c.bf16 %v16275_v49, %v16274_v26  ;;  %v16277_v26 = vld [vmem:[#allocation51_spill] sm:$0xff] }
 0x633   :  { %v6380_v38 = vmax.f32 %v6070_v15, 0.0 }
 0x634   :  { %6334 = vmatmul.mubr.bf16.gmra.mrb[48].mxu0 %v5909_v46  ;;  %v6381_v8 = vmax.f32 %v6072_v29, 0.0 }
 0x635   :  { %6343 = vmatprep.mubr.bf16.mxu0 %v16098_v28  ;;  %v6504_v58 = vpack.c.bf16 %v6380_v38, %v6378_v5 }
 0x636   :  { %v6505_v63 = vpack.c.bf16 %v6381_v8, %v6379_v37  ;;  %v6075_v11 = vpop.f32.mrb[200].mxu0 }
 0x637   :  { %v6076_v19 = vadd.f32 %v6075_v11, %v13555_v18  ;;  %v6077_v32 = vpop.f32.mrb[201].mxu0 }
 0x638   :  { %v6078_v14 = vadd.f32 %v6077_v32, %v13557_v9  ;;  %v6079_v4 = vpop.f32.mrb[202].mxu0  ;;  %6738 = vmatprep.mubr.bf16.mxu1 %v6505_v63 }
 0x639   :  { %v6080_v40 = vadd.f32 %v6079_v4, %v13555_v18  ;;  %v6081_v46 = vpop.f32.mrb[203].mxu0  ;;  %6739 = vmatmul.mubr.bf16.gmra.mrb[196].mxu1 %v6504_v58  ;;  %v6382_v15 = vmax.f32 %v6076_v19, 0.0  ;;  %v16276_v58 = vld [vmem:[#allocation48_spill] sm:$0xff] }
 0x63a   :  { %v6082_v39 = vadd.f32 %v6081_v46, %v13557_v9  ;;  %v6383_v5 = vmax.f32 %v6078_v14, 0.0  ;;  %v5911_v46 = vpack.c.bf16 %v16277_v26, %v16276_v58  ;;  %v16279_v58 = vld [vmem:[#allocation105_spill] sm:$0xff] }
 0x63b   :  { %v6384_v29 = vmax.f32 %v6080_v40, 0.0 }
 0x63c   :  { %6344 = vmatmul.mubr.bf16.gmra.mrb[52].mxu0 %v5910_v30  ;;  %v6385_v38 = vmax.f32 %v6082_v39, 0.0 }
 0x63d   :  { %6353 = vmatprep.mubr.bf16.mxu0 %v16098_v28  ;;  %v6506_v37 = vpack.c.bf16 %v6384_v29, %v6382_v15 }
 0x63e   :  { %v6507_v8 = vpack.c.bf16 %v6385_v38, %v6383_v5  ;;  %v6085_v11 = vpop.f32.mrb[204].mxu0 }
 0x63f   :  { %v6086_v63 = vadd.f32 %v6085_v11, %v13555_v18  ;;  %v6087_v32 = vpop.f32.mrb[205].mxu0 }
 0x640   :  { %v6088_v49 = vadd.f32 %v6087_v32, %v13557_v9  ;;  %v6089_v4 = vpop.f32.mrb[206].mxu0  ;;  %6746 = vmatprep.mubr.bf16.mxu1 %v6507_v8 }
 0x641   :  { %v6090_v19 = vadd.f32 %v6089_v4, %v13555_v18  ;;  %v6091_v30 = vpop.f32.mrb[207].mxu0  ;;  %6747 = vmatmul.mubr.bf16.gmra.mrb[200].mxu1 %v6506_v37  ;;  %v6386_v40 = vmax.f32 %v6086_v63, 0.0  ;;  %v16278_v37 = vld [vmem:[#allocation81_spill] sm:$0xff] }
 0x642   :  { %v6092_v14 = vadd.f32 %v6091_v30, %v13557_v9  ;;  %v6387_v15 = vmax.f32 %v6088_v49, 0.0  ;;  %v5912_v30 = vpack.c.bf16 %v16279_v58, %v16278_v37 }
 0x643   :  { %v6388_v39 = vmax.f32 %v6090_v19, 0.0 }
 0x644   :  { %6354 = vmatmul.mubr.bf16.gmra.mrb[56].mxu0 %v5911_v46  ;;  %v6389_v29 = vmax.f32 %v6092_v14, 0.0 }
 0x645   :  { %6363 = vmatprep.mubr.bf16.mxu0 %v16098_v28  ;;  %v6508_v5 = vpack.c.bf16 %v6388_v39, %v6386_v40 }
 0x646   :  { %v6509_v38 = vpack.c.bf16 %v6389_v29, %v6387_v15 }
 0x647   :  { %v6095_v11 = vpop.f32.mrb[208].mxu0 }
 0x648   :  { %v6096_v8 = vadd.f32 %v6095_v11, %v13555_v18  ;;  %v6097_v32 = vpop.f32.mrb[209].mxu0  ;;  %6754 = vmatprep.mubr.bf16.mxu1 %v6509_v38 }
 0x649   :  { %v6098_v26 = vadd.f32 %v6097_v32, %v13557_v9  ;;  %v6099_v4 = vpop.f32.mrb[210].mxu0  ;;  %6755 = vmatmul.mubr.bf16.gmra.mrb[204].mxu1 %v6508_v5 }
 0x64a   :  { %v6100_v63 = vadd.f32 %v6099_v4, %v13555_v18  ;;  %v6101_v46 = vpop.f32.mrb[211].mxu0  ;;  %v6390_v28 = vmax.f32 %v6096_v8, 0.0 }
 0x64b   :  { %v6102_v49 = vadd.f32 %v6101_v46, %v13557_v9  ;;  %v6391_v14 = vmax.f32 %v6098_v26, 0.0 }
 0x64c   :  { %v6392_v19 = vmax.f32 %v6100_v63, 0.0  ;;  %6364 = vmatmul.mubr.bf16.gmra.mrb[60].mxu0 %v5912_v30 }
 0x64d   :  { %v6393_v40 = vmax.f32 %v6102_v49, 0.0 }
 0x64e   :  { %v6510_v39 = vpack.c.bf16 %v6392_v19, %v6390_v28 }
 0x64f   :  { %v6511_v15 = vpack.c.bf16 %v6393_v40, %v6391_v14  ;;  %v6105_v29 = vpop.f32.mrb[212].mxu0 }
 0x650   :  { %v6106_v11 = vadd.f32 %v6105_v29, %v13555_v18  ;;  %v6107_v38 = vpop.f32.mrb[213].mxu0 }
 0x651   :  { %v6108_v32 = vadd.f32 %v6107_v38, %v13557_v9  ;;  %v6109_v58 = vpop.f32.mrb[214].mxu0  ;;  %6762 = vmatprep.mubr.bf16.mxu1 %v6511_v15 }
 0x652   :  { %v6110_v4 = vadd.f32 %v6109_v58, %v13555_v18  ;;  %v6111_v5 = vpop.f32.mrb[215].mxu0  ;;  %6763 = vmatmul.mubr.bf16.gmra.mrb[208].mxu1 %v6510_v39  ;;  %v6394_v63 = vmax.f32 %v6106_v11, 0.0 }
 0x653   :  { %v6112_v8 = vadd.f32 %v6111_v5, %v13557_v9  ;;  %v6395_v26 = vmax.f32 %v6108_v32, 0.0 }
 0x654   :  { %v6396_v30 = vmax.f32 %v6110_v4, 0.0 }
 0x655   :  { %v6397_v46 = vmax.f32 %v6112_v8, 0.0 }
 0x656   :  { %v6512_v49 = vpack.c.bf16 %v6396_v30, %v6394_v63 }
 0x657   :  { %v6513_v28 = vpack.c.bf16 %v6397_v46, %v6395_v26  ;;  %v6115_v19 = vpop.f32.mrb[216].mxu0 }
 0x658   :  { %v6116_v14 = vadd.f32 %v6115_v19, %v13555_v18  ;;  %v6117_v40 = vpop.f32.mrb[217].mxu0 }
 0x659   :  { %v6118_v29 = vadd.f32 %v6117_v40, %v13557_v9  ;;  %v6119_v38 = vpop.f32.mrb[218].mxu0  ;;  %6770 = vmatprep.mubr.bf16.mxu1 %v6513_v28 }
 0x65a   :  { %v6120_v58 = vadd.f32 %v6119_v38, %v13555_v18  ;;  %v6121_v15 = vpop.f32.mrb[219].mxu0  ;;  %6771 = vmatmul.mubr.bf16.gmra.mrb[212].mxu1 %v6512_v49  ;;  %v6398_v11 = vmax.f32 %v6116_v14, 0.0 }
 0x65b   :  { %v6122_v39 = vadd.f32 %v6121_v15, %v13557_v9  ;;  %v6399_v32 = vmax.f32 %v6118_v29, 0.0 }
 0x65c   :  { %v6400_v4 = vmax.f32 %v6120_v58, 0.0 }
 0x65d   :  { %v6401_v5 = vmax.f32 %v6122_v39, 0.0 }
 0x65e   :  { %v6514_v8 = vpack.c.bf16 %v6400_v4, %v6398_v11 }
 0x65f   :  { %v6515_v63 = vpack.c.bf16 %v6401_v5, %v6399_v32  ;;  %v6125_v30 = vpop.f32.mrb[220].mxu0 }
 0x660   :  { %v6126_v26 = vadd.f32 %v6125_v30, %v13555_v18  ;;  %v6127_v46 = vpop.f32.mrb[221].mxu0 }
 0x661   :  { %v6128_v19 = vadd.f32 %v6127_v46, %v13557_v9  ;;  %v6129_v40 = vpop.f32.mrb[222].mxu0  ;;  %6778 = vmatprep.mubr.bf16.mxu1 %v6515_v63 }
 0x662   :  { %v6130_v28 = vadd.f32 %v6129_v40, %v13555_v18  ;;  %v6131_v38 = vpop.f32.mrb[223].mxu0  ;;  %6779 = vmatmul.mubr.bf16.gmra.mrb[216].mxu1 %v6514_v8  ;;  %v6402_v14 = vmax.f32 %v6126_v26, 0.0 }
 0x663   :  { %v6132_v49 = vadd.f32 %v6131_v38, %v13557_v9  ;;  %v6403_v29 = vmax.f32 %v6128_v19, 0.0 }
 0x664   :  { %v6404_v58 = vmax.f32 %v6130_v28, 0.0 }
 0x665   :  { %v6405_v15 = vmax.f32 %v6132_v49, 0.0 }
 0x666   :  { %v6516_v39 = vpack.c.bf16 %v6404_v58, %v6402_v14 }
 0x667   :  { %v6517_v11 = vpack.c.bf16 %v6405_v15, %v6403_v29  ;;  %v6135_v4 = vpop.f32.mrb[224].mxu0 }
 0x668   :  { %v6136_v32 = vadd.f32 %v6135_v4, %v13555_v18  ;;  %v6137_v5 = vpop.f32.mrb[225].mxu0 }
 0x669   :  { %v6138_v30 = vadd.f32 %v6137_v5, %v13557_v9  ;;  %v6139_v46 = vpop.f32.mrb[226].mxu0  ;;  %6786 = vmatprep.mubr.bf16.mxu1 %v6517_v11 }
 0x66a   :  { %v6140_v63 = vadd.f32 %v6139_v46, %v13555_v18  ;;  %v6141_v40 = vpop.f32.mrb[227].mxu0  ;;  %6787 = vmatmul.mubr.bf16.gmra.mrb[220].mxu1 %v6516_v39  ;;  %v6406_v26 = vmax.f32 %v6136_v32, 0.0 }
 0x66b   :  { %v6142_v8 = vadd.f32 %v6141_v40, %v13557_v9  ;;  %v6407_v19 = vmax.f32 %v6138_v30, 0.0 }
 0x66c   :  { %v6408_v28 = vmax.f32 %v6140_v63, 0.0 }
 0x66d   :  { %v6409_v38 = vmax.f32 %v6142_v8, 0.0 }
 0x66e   :  { %v6518_v49 = vpack.c.bf16 %v6408_v28, %v6406_v26 }
 0x66f   :  { %v6519_v14 = vpack.c.bf16 %v6409_v38, %v6407_v19  ;;  %v6145_v58 = vpop.f32.mrb[228].mxu0 }
 0x670   :  { %v6146_v29 = vadd.f32 %v6145_v58, %v13555_v18  ;;  %v6147_v15 = vpop.f32.mrb[229].mxu0 }
 0x671   :  { %v6148_v4 = vadd.f32 %v6147_v15, %v13557_v9  ;;  %v6149_v5 = vpop.f32.mrb[230].mxu0  ;;  %6794 = vmatprep.mubr.bf16.mxu1 %v6519_v14 }
 0x672   :  { %v6150_v11 = vadd.f32 %v6149_v5, %v13555_v18  ;;  %v6151_v46 = vpop.f32.mrb[231].mxu0  ;;  %6795 = vmatmul.mubr.bf16.gmra.mrb[224].mxu1 %v6518_v49  ;;  %v6410_v32 = vmax.f32 %v6146_v29, 0.0 }
 0x673   :  { %v6152_v39 = vadd.f32 %v6151_v46, %v13557_v9  ;;  %v6411_v30 = vmax.f32 %v6148_v4, 0.0 }
 0x674   :  { %v6412_v63 = vmax.f32 %v6150_v11, 0.0 }
 0x675   :  { %v6413_v40 = vmax.f32 %v6152_v39, 0.0 }
 0x676   :  { %v6520_v8 = vpack.c.bf16 %v6412_v63, %v6410_v32 }
 0x677   :  { %v6521_v26 = vpack.c.bf16 %v6413_v40, %v6411_v30  ;;  %v6155_v28 = vpop.f32.mrb[232].mxu0 }
 0x678   :  { %v6156_v19 = vadd.f32 %v6155_v28, %v13555_v18  ;;  %v6157_v38 = vpop.f32.mrb[233].mxu0 }
 0x679   :  { %v6158_v58 = vadd.f32 %v6157_v38, %v13557_v9  ;;  %v6159_v15 = vpop.f32.mrb[234].mxu0  ;;  %6802 = vmatprep.mubr.bf16.mxu1 %v6521_v26 }
 0x67a   :  { %v6160_v14 = vadd.f32 %v6159_v15, %v13555_v18  ;;  %v6161_v5 = vpop.f32.mrb[235].mxu0  ;;  %6803 = vmatmul.mubr.bf16.gmra.mrb[228].mxu1 %v6520_v8  ;;  %v6414_v29 = vmax.f32 %v6156_v19, 0.0 }
 0x67b   :  { %v6162_v49 = vadd.f32 %v6161_v5, %v13557_v9  ;;  %v6415_v4 = vmax.f32 %v6158_v58, 0.0 }
 0x67c   :  { %v6416_v11 = vmax.f32 %v6160_v14, 0.0 }
 0x67d   :  { %v6417_v46 = vmax.f32 %v6162_v49, 0.0 }
 0x67e   :  { %v6522_v39 = vpack.c.bf16 %v6416_v11, %v6414_v29 }
 0x67f   :  { %v6523_v32 = vpack.c.bf16 %v6417_v46, %v6415_v4  ;;  %v6165_v63 = vpop.f32.mrb[236].mxu0 }
 0x680   :  { %v6166_v30 = vadd.f32 %v6165_v63, %v13555_v18  ;;  %v6167_v40 = vpop.f32.mrb[237].mxu0 }
 0x681   :  { %v6168_v28 = vadd.f32 %v6167_v40, %v13557_v9  ;;  %v6169_v38 = vpop.f32.mrb[238].mxu0  ;;  %6810 = vmatprep.mubr.bf16.mxu1 %v6523_v32 }
 0x682   :  { %v6170_v26 = vadd.f32 %v6169_v38, %v13555_v18  ;;  %v6171_v15 = vpop.f32.mrb[239].mxu0  ;;  %6811 = vmatmul.mubr.bf16.gmra.mrb[232].mxu1 %v6522_v39  ;;  %v6418_v19 = vmax.f32 %v6166_v30, 0.0 }
 0x683   :  { %v6172_v8 = vadd.f32 %v6171_v15, %v13557_v9  ;;  %v6419_v58 = vmax.f32 %v6168_v28, 0.0 }
 0x684   :  { %v6420_v14 = vmax.f32 %v6170_v26, 0.0 }
 0x685   :  { %v6421_v5 = vmax.f32 %v6172_v8, 0.0 }
 0x686   :  { %v6524_v49 = vpack.c.bf16 %v6420_v14, %v6418_v19 }
 0x687   :  { %v6525_v29 = vpack.c.bf16 %v6421_v5, %v6419_v58  ;;  %v6175_v11 = vpop.f32.mrb[240].mxu0 }
 0x688   :  { %v6176_v4 = vadd.f32 %v6175_v11, %v13555_v18  ;;  %v6177_v46 = vpop.f32.mrb[241].mxu0 }
 0x689   :  { %v6178_v63 = vadd.f32 %v6177_v46, %v13557_v9  ;;  %v6179_v40 = vpop.f32.mrb[242].mxu0  ;;  %6818 = vmatprep.mubr.bf16.mxu1 %v6525_v29 }
 0x68a   :  { %v6180_v32 = vadd.f32 %v6179_v40, %v13555_v18  ;;  %v6181_v38 = vpop.f32.mrb[243].mxu0  ;;  %6819 = vmatmul.mubr.bf16.gmra.mrb[236].mxu1 %v6524_v49  ;;  %v6422_v30 = vmax.f32 %v6176_v4, 0.0 }
 0x68b   :  { %v6182_v39 = vadd.f32 %v6181_v38, %v13557_v9  ;;  %v6423_v28 = vmax.f32 %v6178_v63, 0.0 }
 0x68c   :  { %v6424_v26 = vmax.f32 %v6180_v32, 0.0 }
 0x68d   :  { %v6425_v15 = vmax.f32 %v6182_v39, 0.0 }
 0x68e   :  { %v6526_v8 = vpack.c.bf16 %v6424_v26, %v6422_v30 }
 0x68f   :  { %v6527_v19 = vpack.c.bf16 %v6425_v15, %v6423_v28  ;;  %v6185_v14 = vpop.f32.mrb[244].mxu0 }
 0x690   :  { %v6186_v58 = vadd.f32 %v6185_v14, %v13555_v18  ;;  %v6187_v5 = vpop.f32.mrb[245].mxu0 }
 0x691   :  { %v6188_v11 = vadd.f32 %v6187_v5, %v13557_v9  ;;  %v6189_v46 = vpop.f32.mrb[246].mxu0  ;;  %6826 = vmatprep.mubr.bf16.mxu1 %v6527_v19 }
 0x692   :  { %v6190_v29 = vadd.f32 %v6189_v46, %v13555_v18  ;;  %v6191_v40 = vpop.f32.mrb[247].mxu0  ;;  %6827 = vmatmul.mubr.bf16.gmra.mrb[240].mxu1 %v6526_v8  ;;  %v6426_v4 = vmax.f32 %v6186_v58, 0.0 }
 0x693   :  { %v6192_v49 = vadd.f32 %v6191_v40, %v13557_v9  ;;  %v6427_v63 = vmax.f32 %v6188_v11, 0.0 }
 0x694   :  { %v6428_v32 = vmax.f32 %v6190_v29, 0.0 }
 0x695   :  { %v6429_v38 = vmax.f32 %v6192_v49, 0.0 }
 0x696   :  { %v6528_v39 = vpack.c.bf16 %v6428_v32, %v6426_v4 }
 0x697   :  { %v6529_v30 = vpack.c.bf16 %v6429_v38, %v6427_v63  ;;  %v6195_v26 = vpop.f32.mrb[248].mxu0 }
 0x698   :  { %v6196_v28 = vadd.f32 %v6195_v26, %v13555_v18  ;;  %v6197_v15 = vpop.f32.mrb[249].mxu0 }
 0x699   :  { %v6198_v14 = vadd.f32 %v6197_v15, %v13557_v9  ;;  %v6199_v5 = vpop.f32.mrb[250].mxu0  ;;  %6834 = vmatprep.mubr.bf16.mxu1 %v6529_v30 }
 0x69a   :  { %v6200_v19 = vadd.f32 %v6199_v5, %v13555_v18  ;;  %v6201_v46 = vpop.f32.mrb[251].mxu0  ;;  %6835 = vmatmul.mubr.bf16.gmra.mrb[244].mxu1 %v6528_v39  ;;  %v6430_v58 = vmax.f32 %v6196_v28, 0.0 }
 0x69b   :  { %v6202_v8 = vadd.f32 %v6201_v46, %v13557_v9  ;;  %v6431_v11 = vmax.f32 %v6198_v14, 0.0 }
 0x69c   :  { %v6432_v29 = vmax.f32 %v6200_v19, 0.0 }
 0x69d   :  { %v6433_v40 = vmax.f32 %v6202_v8, 0.0 }
 0x69e   :  { %v6530_v49 = vpack.c.bf16 %v6432_v29, %v6430_v58 }
 0x69f   :  { %v6531_v4 = vpack.c.bf16 %v6433_v40, %v6431_v11  ;;  %v6205_v32 = vpop.f32.mrb[252].mxu0 }
 0x6a0   :  { %v6206_v63 = vadd.f32 %v6205_v32, %v13555_v18  ;;  %v6207_v38 = vpop.f32.mrb[253].mxu0 }
 0x6a1   :  { %v6208_v26 = vadd.f32 %v6207_v38, %v13557_v9  ;;  %v6209_v15 = vpop.f32.mrb[254].mxu0  ;;  %6842 = vmatprep.mubr.bf16.mxu1 %v6531_v4 }
 0x6a2   :  { %v6210_v30 = vadd.f32 %v6209_v15, %v13555_v18  ;;  %v6211_v5 = vpop.f32.mrb[255].mxu0  ;;  %6843 = vmatmul.mubr.bf16.gmra.mrb[248].mxu1 %v6530_v49  ;;  %v6434_v28 = vmax.f32 %v6206_v63, 0.0 }
 0x6a3   :  { %v6212_v39 = vadd.f32 %v6211_v5, %v13557_v9  ;;  %v6435_v14 = vmax.f32 %v6208_v26, 0.0 }
 0x6a4   :  { %v6436_v19 = vmax.f32 %v6210_v30, 0.0 }
 0x6a5   :  { %v6437_v46 = vmax.f32 %v6212_v39, 0.0 }
 0x6a6   :  { %v6532_v8 = vpack.c.bf16 %v6436_v19, %v6434_v28 }
 0x6a7   :  { %v6533_v58 = vpack.c.bf16 %v6437_v46, %v6435_v14  ;;  %v6215_v29 = vpop.f32.mrb[0].mxu0 }
 0x6a8   :  { %v6216_v11 = vadd.f32 %v6215_v29, %v13555_v18  ;;  %v6217_v40 = vpop.f32.mrb[1].mxu0 }
 0x6a9   :  { %v6218_v32 = vadd.f32 %v6217_v40, %v13557_v9  ;;  %v6219_v38 = vpop.f32.mrb[2].mxu0  ;;  %6850 = vmatprep.mubr.bf16.mxu1 %v6533_v58 }
 0x6aa   :  { %v6220_v4 = vadd.f32 %v6219_v38, %v13555_v18  ;;  %v6221_v15 = vpop.f32.mrb[3].mxu0  ;;  %6851 = vmatmul.mubr.bf16.gmra.mrb[252].mxu1 %v6532_v8  ;;  %v6438_v63 = vmax.f32 %v6216_v11, 0.0 }
 0x6ab   :  { %v6222_v49 = vadd.f32 %v6221_v15, %v13557_v9  ;;  %v6439_v26 = vmax.f32 %v6218_v32, 0.0 }
 0x6ac   :  { %v6440_v30 = vmax.f32 %v6220_v4, 0.0 }
 0x6ad   :  { %v6441_v5 = vmax.f32 %v6222_v49, 0.0 }
 0x6ae   :  { %v6534_v39 = vpack.c.bf16 %v6440_v30, %v6438_v63 }
 0x6af   :  { %v6535_v28 = vpack.c.bf16 %v6441_v5, %v6439_v26  ;;  %v6225_v19 = vpop.f32.mrb[4].mxu0 }
 0x6b0   :  { %v6226_v14 = vadd.f32 %v6225_v19, %v13555_v18  ;;  %v6227_v46 = vpop.f32.mrb[5].mxu0 }
 0x6b1   :  { %v6228_v29 = vadd.f32 %v6227_v46, %v13557_v9  ;;  %v6229_v40 = vpop.f32.mrb[6].mxu0  ;;  %6858 = vmatprep.mubr.bf16.mxu1 %v6535_v28 }
 0x6b2   :  { %v6230_v58 = vadd.f32 %v6229_v40, %v13555_v18  ;;  %v6231_v38 = vpop.f32.mrb[7].mxu0  ;;  %6859 = vmatmul.mubr.bf16.gmra.mrb[0].mxu1 %v6534_v39  ;;  %v6442_v11 = vmax.f32 %v6226_v14, 0.0 }
 0x6b3   :  { %v6232_v8 = vadd.f32 %v6231_v38, %v13557_v9  ;;  %v6443_v32 = vmax.f32 %v6228_v29, 0.0 }
 0x6b4   :  { %v6444_v4 = vmax.f32 %v6230_v58, 0.0 }
 0x6b5   :  { %v6445_v15 = vmax.f32 %v6232_v8, 0.0 }
 0x6b6   :  { %v6536_v49 = vpack.c.bf16 %v6444_v4, %v6442_v11 }
 0x6b7   :  { %v6537_v63 = vpack.c.bf16 %v6445_v15, %v6443_v32  ;;  %v6235_v30 = vpop.f32.mrb[8].mxu0 }
 0x6b8   :  { %v6236_v26 = vadd.f32 %v6235_v30, %v13555_v18  ;;  %v6237_v5 = vpop.f32.mrb[9].mxu0 }
 0x6b9   :  { %v6238_v19 = vadd.f32 %v6237_v5, %v13557_v9  ;;  %v6239_v46 = vpop.f32.mrb[10].mxu0  ;;  %6866 = vmatprep.mubr.bf16.mxu1 %v6537_v63 }
 0x6ba   :  { %v6240_v28 = vadd.f32 %v6239_v46, %v13555_v18  ;;  %v6241_v40 = vpop.f32.mrb[11].mxu0  ;;  %6867 = vmatmul.mubr.bf16.gmra.mrb[4].mxu1 %v6536_v49  ;;  %v6446_v14 = vmax.f32 %v6236_v26, 0.0 }
 0x6bb   :  { %v6242_v39 = vadd.f32 %v6241_v40, %v13557_v9  ;;  %v6447_v29 = vmax.f32 %v6238_v19, 0.0 }
 0x6bc   :  { %v6448_v58 = vmax.f32 %v6240_v28, 0.0 }
 0x6bd   :  { %v6449_v38 = vmax.f32 %v6242_v39, 0.0 }
 0x6be   :  { %v6538_v8 = vpack.c.bf16 %v6448_v58, %v6446_v14 }
 0x6bf   :  { %v6539_v11 = vpack.c.bf16 %v6449_v38, %v6447_v29  ;;  %v6245_v4 = vpop.f32.mrb[12].mxu0 }
 0x6c0   :  { %v6246_v32 = vadd.f32 %v6245_v4, %v13555_v18  ;;  %v6247_v15 = vpop.f32.mrb[13].mxu0 }
 0x6c1   :  { %v6248_v30 = vadd.f32 %v6247_v15, %v13557_v9  ;;  %v6249_v5 = vpop.f32.mrb[14].mxu0  ;;  %6874 = vmatprep.mubr.bf16.mxu1 %v6539_v11 }
 0x6c2   :  { %v6250_v63 = vadd.f32 %v6249_v5, %v13555_v18  ;;  %v6251_v46 = vpop.f32.mrb[15].mxu0  ;;  %6875 = vmatmul.mubr.bf16.gmra.mrb[8].mxu1 %v6538_v8  ;;  %v6450_v26 = vmax.f32 %v6246_v32, 0.0 }
 0x6c3   :  { %v6252_v49 = vadd.f32 %v6251_v46, %v13557_v9  ;;  %v6451_v19 = vmax.f32 %v6248_v30, 0.0 }
 0x6c4   :  { %v6452_v28 = vmax.f32 %v6250_v63, 0.0 }
 0x6c5   :  { %v6453_v40 = vmax.f32 %v6252_v49, 0.0 }
 0x6c6   :  { %v6540_v39 = vpack.c.bf16 %v6452_v28, %v6450_v26 }
 0x6c7   :  { %v6541_v14 = vpack.c.bf16 %v6453_v40, %v6451_v19  ;;  %v6255_v58 = vpop.f32.mrb[16].mxu0 }
 0x6c8   :  { %v6256_v29 = vadd.f32 %v6255_v58, %v13555_v18  ;;  %v6257_v38 = vpop.f32.mrb[17].mxu0 }
 0x6c9   :  { %v6258_v4 = vadd.f32 %v6257_v38, %v13557_v9  ;;  %v6259_v15 = vpop.f32.mrb[18].mxu0  ;;  %6882 = vmatprep.mubr.bf16.mxu1 %v6541_v14 }
 0x6ca   :  { %v6260_v11 = vadd.f32 %v6259_v15, %v13555_v18  ;;  %v6261_v5 = vpop.f32.mrb[19].mxu0  ;;  %6883 = vmatmul.mubr.bf16.gmra.mrb[12].mxu1 %v6540_v39  ;;  %v6454_v32 = vmax.f32 %v6256_v29, 0.0 }
 0x6cb   :  { %v6262_v8 = vadd.f32 %v6261_v5, %v13557_v9  ;;  %v6455_v30 = vmax.f32 %v6258_v4, 0.0 }
 0x6cc   :  { %v6456_v63 = vmax.f32 %v6260_v11, 0.0 }
 0x6cd   :  { %v6457_v46 = vmax.f32 %v6262_v8, 0.0 }
 0x6ce   :  { %v6542_v49 = vpack.c.bf16 %v6456_v63, %v6454_v32 }
 0x6cf   :  { %v6543_v26 = vpack.c.bf16 %v6457_v46, %v6455_v30  ;;  %v6265_v28 = vpop.f32.mrb[20].mxu0 }
 0x6d0   :  { %v6266_v19 = vadd.f32 %v6265_v28, %v13555_v18  ;;  %v6267_v40 = vpop.f32.mrb[21].mxu0 }
 0x6d1   :  { %v6268_v58 = vadd.f32 %v6267_v40, %v13557_v9  ;;  %v6269_v38 = vpop.f32.mrb[22].mxu0  ;;  %6890 = vmatprep.mubr.bf16.mxu1 %v6543_v26 }
 0x6d2   :  { %v6270_v14 = vadd.f32 %v6269_v38, %v13555_v18  ;;  %v6271_v15 = vpop.f32.mrb[23].mxu0  ;;  %6891 = vmatmul.mubr.bf16.gmra.mrb[16].mxu1 %v6542_v49  ;;  %v6458_v29 = vmax.f32 %v6266_v19, 0.0 }
 0x6d3   :  { %v6272_v39 = vadd.f32 %v6271_v15, %v13557_v9  ;;  %v6459_v4 = vmax.f32 %v6268_v58, 0.0 }
 0x6d4   :  { %v6460_v11 = vmax.f32 %v6270_v14, 0.0 }
 0x6d5   :  { %v6461_v5 = vmax.f32 %v6272_v39, 0.0 }
 0x6d6   :  { %v6544_v8 = vpack.c.bf16 %v6460_v11, %v6458_v29 }
 0x6d7   :  { %v6545_v32 = vpack.c.bf16 %v6461_v5, %v6459_v4  ;;  %v6275_v63 = vpop.f32.mrb[24].mxu0 }
 0x6d8   :  { %v6276_v30 = vadd.f32 %v6275_v63, %v13555_v18  ;;  %v6277_v46 = vpop.f32.mrb[25].mxu0 }
 0x6d9   :  { %v6278_v28 = vadd.f32 %v6277_v46, %v13557_v9  ;;  %v6279_v40 = vpop.f32.mrb[26].mxu0  ;;  %6898 = vmatprep.mubr.bf16.mxu1 %v6545_v32 }
 0x6da   :  { %v6280_v26 = vadd.f32 %v6279_v40, %v13555_v18  ;;  %v6281_v38 = vpop.f32.mrb[27].mxu0  ;;  %6899 = vmatmul.mubr.bf16.gmra.mrb[20].mxu1 %v6544_v8  ;;  %v6462_v19 = vmax.f32 %v6276_v30, 0.0 }
 0x6db   :  { %v6282_v49 = vadd.f32 %v6281_v38, %v13557_v9  ;;  %v6463_v58 = vmax.f32 %v6278_v28, 0.0 }
 0x6dc   :  { %v6464_v14 = vmax.f32 %v6280_v26, 0.0 }
 0x6dd   :  { %v6465_v15 = vmax.f32 %v6282_v49, 0.0 }
 0x6de   :  { %v6546_v39 = vpack.c.bf16 %v6464_v14, %v6462_v19 }
 0x6df   :  { %v6547_v29 = vpack.c.bf16 %v6465_v15, %v6463_v58  ;;  %v6285_v11 = vpop.f32.mrb[28].mxu0 }
 0x6e0   :  { %v6286_v4 = vadd.f32 %v6285_v11, %v13555_v18  ;;  %v6287_v5 = vpop.f32.mrb[29].mxu0 }
 0x6e1   :  { %v6288_v63 = vadd.f32 %v6287_v5, %v13557_v9  ;;  %v6289_v46 = vpop.f32.mrb[30].mxu0  ;;  %6906 = vmatprep.mubr.bf16.mxu1 %v6547_v29 }
 0x6e2   :  { %v6290_v32 = vadd.f32 %v6289_v46, %v13555_v18  ;;  %v6291_v40 = vpop.f32.mrb[31].mxu0  ;;  %6907 = vmatmul.mubr.bf16.gmra.mrb[24].mxu1 %v6546_v39  ;;  %v6466_v30 = vmax.f32 %v6286_v4, 0.0 }
 0x6e3   :  { %v6292_v8 = vadd.f32 %v6291_v40, %v13557_v9  ;;  %v6467_v28 = vmax.f32 %v6288_v63, 0.0 }
 0x6e4   :  { %v6468_v26 = vmax.f32 %v6290_v32, 0.0 }
 0x6e5   :  { %v6469_v38 = vmax.f32 %v6292_v8, 0.0 }
 0x6e6   :  { %v6548_v49 = vpack.c.bf16 %v6468_v26, %v6466_v30 }
 0x6e7   :  { %v6549_v19 = vpack.c.bf16 %v6469_v38, %v6467_v28  ;;  %v6295_v14 = vpop.f32.mrb[32].mxu0 }
 0x6e8   :  { %v6296_v58 = vadd.f32 %v6295_v14, %v13555_v18  ;;  %v6297_v15 = vpop.f32.mrb[33].mxu0 }
 0x6e9   :  { %v6298_v11 = vadd.f32 %v6297_v15, %v13557_v9  ;;  %v6299_v5 = vpop.f32.mrb[34].mxu0  ;;  %6914 = vmatprep.mubr.bf16.mxu1 %v6549_v19 }
 0x6ea   :  { %v6300_v29 = vadd.f32 %v6299_v5, %v13555_v18  ;;  %v6301_v46 = vpop.f32.mrb[35].mxu0  ;;  %6915 = vmatmul.mubr.bf16.gmra.mrb[28].mxu1 %v6548_v49  ;;  %v6470_v4 = vmax.f32 %v6296_v58, 0.0 }
 0x6eb   :  { %v6302_v39 = vadd.f32 %v6301_v46, %v13557_v9  ;;  %v6471_v63 = vmax.f32 %v6298_v11, 0.0 }
 0x6ec   :  { %v6472_v32 = vmax.f32 %v6300_v29, 0.0 }
 0x6ed   :  { %v6473_v40 = vmax.f32 %v6302_v39, 0.0 }
 0x6ee   :  { %v6550_v8 = vpack.c.bf16 %v6472_v32, %v6470_v4 }
 0x6ef   :  { %v6551_v30 = vpack.c.bf16 %v6473_v40, %v6471_v63  ;;  %v6305_v26 = vpop.f32.mrb[36].mxu0 }
 0x6f0   :  { %v6306_v28 = vadd.f32 %v6305_v26, %v13555_v18  ;;  %v6307_v38 = vpop.f32.mrb[37].mxu0 }
 0x6f1   :  { %v6308_v14 = vadd.f32 %v6307_v38, %v13557_v9  ;;  %v6309_v15 = vpop.f32.mrb[38].mxu0  ;;  %6922 = vmatprep.mubr.bf16.mxu1 %v6551_v30 }
 0x6f2   :  { %v6310_v19 = vadd.f32 %v6309_v15, %v13555_v18  ;;  %v6311_v5 = vpop.f32.mrb[39].mxu0  ;;  %6923 = vmatmul.mubr.bf16.gmra.mrb[32].mxu1 %v6550_v8  ;;  %v6474_v58 = vmax.f32 %v6306_v28, 0.0 }
 0x6f3   :  { %v6312_v49 = vadd.f32 %v6311_v5, %v13557_v9  ;;  %v6475_v11 = vmax.f32 %v6308_v14, 0.0 }
 0x6f4   :  { %v6476_v29 = vmax.f32 %v6310_v19, 0.0 }
 0x6f5   :  { %v6477_v46 = vmax.f32 %v6312_v49, 0.0 }
 0x6f6   :  { %v6552_v39 = vpack.c.bf16 %v6476_v29, %v6474_v58 }
 0x6f7   :  { %v6553_v4 = vpack.c.bf16 %v6477_v46, %v6475_v11  ;;  %v6315_v32 = vpop.f32.mrb[40].mxu0 }
 0x6f8   :  { %v6316_v63 = vadd.f32 %v6315_v32, %v13555_v18  ;;  %v6317_v40 = vpop.f32.mrb[41].mxu0 }
 0x6f9   :  { %v6318_v26 = vadd.f32 %v6317_v40, %v13557_v9  ;;  %v6319_v38 = vpop.f32.mrb[42].mxu0  ;;  %6930 = vmatprep.mubr.bf16.mxu1 %v6553_v4 }
 0x6fa   :  { %v6320_v30 = vadd.f32 %v6319_v38, %v13555_v18  ;;  %v6321_v15 = vpop.f32.mrb[43].mxu0  ;;  %6931 = vmatmul.mubr.bf16.gmra.mrb[36].mxu1 %v6552_v39  ;;  %v6478_v28 = vmax.f32 %v6316_v63, 0.0 }
 0x6fb   :  { %v6322_v8 = vadd.f32 %v6321_v15, %v13557_v9  ;;  %v6479_v14 = vmax.f32 %v6318_v26, 0.0 }
 0x6fc   :  { %v6480_v19 = vmax.f32 %v6320_v30, 0.0 }
 0x6fd   :  { %v6481_v5 = vmax.f32 %v6322_v8, 0.0 }
 0x6fe   :  { %v6554_v49 = vpack.c.bf16 %v6480_v19, %v6478_v28 }
 0x6ff   :  { %v6555_v58 = vpack.c.bf16 %v6481_v5, %v6479_v14  ;;  %v6325_v29 = vpop.f32.mrb[44].mxu0 }
 0x700   :  { %v6326_v11 = vadd.f32 %v6325_v29, %v13555_v18  ;;  %v6327_v46 = vpop.f32.mrb[45].mxu0 }
 0x701   :  { %v6328_v32 = vadd.f32 %v6327_v46, %v13557_v9  ;;  %v6329_v40 = vpop.f32.mrb[46].mxu0  ;;  %6938 = vmatprep.mubr.bf16.mxu1 %v6555_v58 }
 0x702   :  { %v6330_v4 = vadd.f32 %v6329_v40, %v13555_v18  ;;  %v6331_v38 = vpop.f32.mrb[47].mxu0  ;;  %6939 = vmatmul.mubr.bf16.gmra.mrb[40].mxu1 %v6554_v49  ;;  %v6482_v63 = vmax.f32 %v6326_v11, 0.0 }
 0x703   :  { %v6332_v39 = vadd.f32 %v6331_v38, %v13557_v9  ;;  %v6483_v26 = vmax.f32 %v6328_v32, 0.0  ;;  %v13686_v8 = vpop.f32.mrb[192].mxu1 }
 0x704   :  { %v6484_v30 = vmax.f32 %v6330_v4, 0.0  ;;  %v6734_v19 = vpop.f32.mrb[193].mxu1 }
 0x705   :  { %v6485_v15 = vmax.f32 %v6332_v39, 0.0  ;;  %v13688_v29 = vpop.f32.mrb[194].mxu1 }
 0x706   :  { %v6556_v28 = vpack.c.bf16 %v6484_v30, %v6482_v63  ;;  %v6737_v40 = vpop.f32.mrb[195].mxu1 }
 0x707   :  { %v6557_v14 = vpack.c.bf16 %v6485_v15, %v6483_v26  ;;  %v6335_v5 = vpop.f32.mrb[48].mxu0 }
 0x708   :  { %v6336_v58 = vadd.f32 %v6335_v5, %v13555_v18  ;;  %v6337_v46 = vpop.f32.mrb[49].mxu0 }
 0x709   :  { %v6338_v49 = vadd.f32 %v6337_v46, %v13557_v9  ;;  %v6339_v37 = vpop.f32.mrb[50].mxu0  ;;  %6946 = vmatprep.mubr.bf16.mxu1 %v6557_v14 }
 0x70a   :  { %v6340_v11 = vadd.f32 %v6339_v37, %v13555_v18  ;;  %v6341_v32 = vpop.f32.mrb[51].mxu0  ;;  %6947 = vmatmul.mubr.bf16.gmra.mrb[44].mxu1 %v6556_v28  ;;  %v6486_v38 = vmax.f32 %v6336_v58, 0.0 }
 0x70b   :  { %v6342_v4 = vadd.f32 %v6341_v32, %v13557_v9  ;;  %v6487_v63 = vmax.f32 %v6338_v49, 0.0 }
 0x70c   :  { %v6488_v39 = vmax.f32 %v6340_v11, 0.0  ;;  %v13694_v26 = vpop.f32.mrb[196].mxu1 }
 0x70d   :  { %v6489_v30 = vmax.f32 %v6342_v4, 0.0  ;;  %v6742_v19 = vpop.f32.mrb[197].mxu1 }
 0x70e   :  { %v6558_v15 = vpack.c.bf16 %v6488_v39, %v6486_v38  ;;  %v13696_v45 = vpop.f32.mrb[198].mxu1 }
 0x70f   :  { %v6559_v5 = vpack.c.bf16 %v6489_v30, %v6487_v63  ;;  %v6345_v40 = vpop.f32.mrb[52].mxu0  ;;  %v6745_v37 = vpop.f32.mrb[199].mxu1 }
 0x710   :  { %v6346_v14 = vadd.f32 %v6345_v40, %v13555_v18  ;;  %v6347_v46 = vpop.f32.mrb[53].mxu0 }
 0x711   :  { %v6348_v28 = vadd.f32 %v6347_v46, %v13557_v9  ;;  %v6349_v13 = vpop.f32.mrb[54].mxu0  ;;  %6954 = vmatprep.mubr.bf16.mxu1 %v6559_v5 }
 0x712   :  { %v6350_v58 = vadd.f32 %v6349_v13, %v13555_v18  ;;  %v6351_v49 = vpop.f32.mrb[55].mxu0  ;;  %6955 = vmatmul.mubr.bf16.gmra.mrb[48].mxu1 %v6558_v15  ;;  %v6490_v32 = vmax.f32 %v6346_v14, 0.0 }
 0x713   :  { %v6352_v11 = vadd.f32 %v6351_v49, %v13557_v9  ;;  %v6491_v38 = vmax.f32 %v6348_v28, 0.0 }
 0x714   :  { %v6492_v4 = vmax.f32 %v6350_v58, 0.0  ;;  %v13702_v63 = vpop.f32.mrb[200].mxu1 }
 0x715   :  { %v6493_v39 = vmax.f32 %v6352_v11, 0.0  ;;  %v6750_v19 = vpop.f32.mrb[201].mxu1 }
 0x716   :  { %v6560_v30 = vpack.c.bf16 %v6492_v4, %v6490_v32  ;;  %v13704_v56 = vpop.f32.mrb[202].mxu1 }
 0x717   :  { %v6561_v40 = vpack.c.bf16 %v6493_v39, %v6491_v38  ;;  %v6355_v37 = vpop.f32.mrb[56].mxu0  ;;  %v6753_v13 = vpop.f32.mrb[203].mxu1 }
 0x718   :  { %v6356_v5 = vadd.f32 %v6355_v37, %v13555_v18  ;;  %v6357_v46 = vpop.f32.mrb[57].mxu0 }
 0x719   :  { %v6358_v15 = vadd.f32 %v6357_v46, %v13557_v9  ;;  %v6359_v36 = vpop.f32.mrb[58].mxu0  ;;  %6962 = vmatprep.mubr.bf16.mxu1 %v6561_v40 }
 0x71a   :  { %v6360_v14 = vadd.f32 %v6359_v36, %v13555_v18  ;;  %v6361_v28 = vpop.f32.mrb[59].mxu0  ;;  %6963 = vmatmul.mubr.bf16.gmra.mrb[52].mxu1 %v6560_v30  ;;  %v6494_v49 = vmax.f32 %v6356_v5, 0.0 }
 0x71b   :  { %v6362_v58 = vadd.f32 %v6361_v28, %v13557_v9  ;;  %v6495_v32 = vmax.f32 %v6358_v15, 0.0 }
 0x71c   :  { %v6496_v11 = vmax.f32 %v6360_v14, 0.0  ;;  %v6756_v38 = vpop.f32.mrb[204].mxu1 }
 0x71d   :  { %v6497_v4 = vmax.f32 %v6362_v58, 0.0  ;;  %v6758_v19 = vpop.f32.mrb[205].mxu1 }
 0x71e   :  { %v6562_v39 = vpack.c.bf16 %v6496_v11, %v6494_v49  ;;  %v6759_v13 = vpop.f32.mrb[206].mxu1 }
 0x71f   :  { %v6563_v37 = vpack.c.bf16 %v6497_v4, %v6495_v32  ;;  %v6365_v22 = vpop.f32.mrb[60].mxu0  ;;  %v6761_v40 = vpop.f32.mrb[207].mxu1 }
 0x720   :  { %v6366_v46 = vadd.f32 %v6365_v22, %v13555_v18  ;;  %v6367_v34 = vpop.f32.mrb[61].mxu0 }
 0x721   :  { %v6368_v36 = vadd.f32 %v6367_v34, %v13557_v9  ;;  %v6369_v1 = vpop.f32.mrb[62].mxu0  ;;  %6970 = vmatprep.mubr.bf16.mxu1 %v6563_v37 }
 0x722   :  { %v6370_v30 = vadd.f32 %v6369_v1, %v13555_v18  ;;  %v6371_v5 = vpop.f32.mrb[63].mxu0  ;;  %6971 = vmatmul.mubr.bf16.gmra.mrb[56].mxu1 %v6562_v39  ;;  %v6498_v14 = vmax.f32 %v6366_v46, 0.0 }
 0x723   :  { %v6372_v15 = vadd.f32 %v6371_v5, %v13557_v9  ;;  %v6499_v58 = vmax.f32 %v6368_v36, 0.0 }
 0x724   :  { %v6500_v28 = vmax.f32 %v6370_v30, 0.0 }
 0x725   :  { %v6501_v49 = vmax.f32 %v6372_v15, 0.0  ;;  %v6764_v11 = vpop.f32.mrb[208].mxu1  ;;  %v13719_v15 = vld [vmem:[%s15225_s6 + $0x6] ss:$0 sm:$0xff] }
 0x726   :  { %v6564_v32 = vpack.c.bf16 %v6500_v28, %v6498_v14  ;;  %v6766_v4 = vpop.f32.mrb[209].mxu1  ;;  %v6736_v14 = vadd.f32 %v13719_v15, %v13688_v29  ;;  %v6733_v28 = vadd.f32 %v13719_v15, %v13686_v8  ;;  %v6744_v29 = vadd.f32 %v13719_v15, %v13696_v45 }
 0x727   :  { %v6565_v22 = vpack.c.bf16 %v6501_v49, %v6499_v58  ;;  %v6767_v19 = vpop.f32.mrb[210].mxu1  ;;  %v6741_v58 = vadd.f32 %v13719_v15, %v13694_v26 }
 0x728   :  { %v6769_v40 = vpop.f32.mrb[211].mxu1 }
 0x729   :  { %6978 = vmatprep.mubr.bf16.mxu1 %v6565_v22 }
 0x72a   :  { %6979 = vmatmul.mubr.bf16.gmra.mrb[60].mxu1 %v6564_v32  ;;  %v16280_v32 = vld [vmem:[#allocation106_spill] sm:$0xff] }
 0x72b   :  { %v13728_v4 = vadd.f32 %v6736_v14, %v16280_v32  ;;  %v16285_v14 = vld [vmem:[#allocation5_spill] sm:$0xff] }
 0x72c   :  { %v13746_v32 = vadd.f32 %v6744_v29, %v16285_v14  ;;  %v6765_v14 = vadd.f32 %v13719_v15, %v6764_v11 }
 0x72d   :  { %v6772_v34 = vpop.f32.mrb[212].mxu1  ;;  %16281 = vst [vmem:[#allocation90_spill] sm:$0xff] %v13728_v4 }
 0x72e   :  { %v6774_v37 = vpop.f32.mrb[213].mxu1  ;;  %16286 = vst [vmem:[#allocation88_spill] sm:$0xff] %v13746_v32 }
 0x72f   :  { %v6775_v7 = vpop.f32.mrb[214].mxu1  ;;  %v16282_v37 = vld [vmem:[#allocation82_spill] sm:$0xff] }
 0x730   :  { %v6777_v1 = vpop.f32.mrb[215].mxu1 }
 0x731   :  { %v13733_v1 = vadd.f32 %v6733_v28, %v16282_v37 }
 0x733   :  { %v7115_v26 = vadd.f32 %v13728_v4, %v13733_v1 }
 0x735   :  { %v6780_v18 = vpop.f32.mrb[216].mxu1 }
 0x736   :  { %v6782_v39 = vpop.f32.mrb[217].mxu1 }
 0x737   :  { %v6783_v23 = vpop.f32.mrb[218].mxu1  ;;  %v16283_v39 = vld [vmem:[#allocation84_spill] sm:$0xff] }
 0x738   :  { %v6785_v9 = vpop.f32.mrb[219].mxu1 }
 0x739   :  { %v13736_v9 = vadd.f32 %v6741_v58, %v16283_v39  ;;  %v6752_v58 = vadd.f32 %v13719_v15, %v13704_v56 }
 0x73b   :  { %16284 = vst [vmem:[#allocation7_spill] sm:$0xff] %v13736_v9 }
 0x73d   :  { %v6788_v46 = vpop.f32.mrb[220].mxu1 }
 0x73e   :  { %v6790_v30 = vpop.f32.mrb[221].mxu1 }
 0x73f   :  { %v13714_v36 = vpop.f32.mrb[222].mxu1  ;;  %v6749_v30 = vadd.f32 %v13719_v15, %v13702_v63 }
 0x740   :  { %v6793_v5 = vpop.f32.mrb[223].mxu1 }
 0x741   :  { %v7116_v5 = vadd.f32 %v7115_v26, %v13736_v9  ;;  %v16287_v26 = vld [vmem:[#allocation86_spill] sm:$0xff] }
 0x742   :  { %v13757_v9 = vadd.f32 %v6752_v58, %v16287_v26  ;;  %v13770_v58 = vadd.f32 %v6765_v14, %v13233_v16  ;;  %v6776_v16 = vadd.f32 %v13719_v15, %v6775_v7 }
 0x743   :  { %v7117_v39 = vadd.f32 %v7116_v5, %v13746_v32 }
 0x745   :  { %v6796_v49 = vpop.f32.mrb[224].mxu1 }
 0x746   :  { %v6798_v22 = vpop.f32.mrb[225].mxu1 }
 0x747   :  { %v13730_v40 = vpop.f32.mrb[226].mxu1  ;;  %v13749_v22 = vadd.f32 %v6749_v30, %v13189_v50  ;;  %v6760_v50 = vadd.f32 %v13719_v15, %v6759_v13 }
 0x748   :  { %v6801_v8 = vpop.f32.mrb[227].mxu1 }
 0x749   :  { %v6757_v8 = vadd.f32 %v13719_v15, %v6756_v38  ;;  %v7118_v63 = vadd.f32 %v7117_v39, %v13749_v22 }
 0x74b   :  { %v13760_v29 = vadd.f32 %v6757_v8, %v13202_v35  ;;  %v7119_v56 = vadd.f32 %v7118_v63, %v13757_v9  ;;  %v6768_v35 = vadd.f32 %v13719_v15, %v6767_v19  ;;  %v6773_v8 = vadd.f32 %v13719_v15, %v6772_v34 }
 0x74d   :  { %v6804_v28 = vpop.f32.mrb[228].mxu1  ;;  %v7120_v38 = vadd.f32 %v7119_v56, %v13760_v29  ;;  %v13777_v26 = vadd.f32 %v6768_v35, %v13235_v60  ;;  %v6784_v35 = vadd.f32 %v13719_v15, %v6783_v23 }
 0x74e   :  { %v6806_v45 = vpop.f32.mrb[229].mxu1 }
 0x74f   :  { %v6807_v37 = vpop.f32.mrb[230].mxu1 }
 0x750   :  { %v6809_v4 = vpop.f32.mrb[231].mxu1 }
 0x751   :  { %v16288_v4 = vld [vmem:[#allocation6_spill] sm:$0xff] }
 0x752   :  { %v13767_v32 = vadd.f32 %v6760_v50, %v16288_v4  ;;  %v13780_v50 = vadd.f32 %v6773_v8, %v13276_v59  ;;  %v13787_v4 = vadd.f32 %v6776_v16, %v13307_v43  ;;  %v6789_v8 = vadd.f32 %v13719_v15, %v6788_v46 }
 0x754   :  { %v7121_v13 = vadd.f32 %v7120_v38, %v13767_v32  ;;  %v6781_v38 = vadd.f32 %v13719_v15, %v6780_v18  ;;  %v13800_v43 = vadd.f32 %v6789_v8, %v13287_v62  ;;  %v6800_v62 = vadd.f32 %v13719_v15, %v13730_v40 }
 0x755   :  { %v6812_v30 = vpop.f32.mrb[232].mxu1 }
 0x756   :  { %v6814_v45 = vpop.f32.mrb[233].mxu1  ;;  %v7122_v11 = vadd.f32 %v7121_v13, %v13770_v58  ;;  %v13790_v60 = vadd.f32 %v6781_v38, %v13334_v48  ;;  %v6792_v48 = vadd.f32 %v13719_v15, %v13714_v36  ;;  %v13819_v8 = vadd.f32 %v6800_v62, %v13317_v55 }
 0x757   :  { %v6815_v5 = vpop.f32.mrb[234].mxu1 }
 0x758   :  { %v6817_v39 = vpop.f32.mrb[235].mxu1  ;;  %v7123_v19 = vadd.f32 %v7122_v11, %v13777_v26 }
 0x75a   :  { %v7124_v34 = vadd.f32 %v7123_v19, %v13780_v50 }
 0x75c   :  { %v7125_v7 = vadd.f32 %v7124_v34, %v13787_v4  ;;  %v13808_v34 = vadd.f32 %v6792_v48, %v13294_v42 }
 0x75d   :  { %v6820_v63 = vpop.f32.mrb[236].mxu1 }
 0x75e   :  { %v6822_v56 = vpop.f32.mrb[237].mxu1  ;;  %v7126_v18 = vadd.f32 %v7125_v7, %v13790_v60  ;;  %v6821_v62 = vadd.f32 %v13719_v15, %v6820_v63 }
 0x75f   :  { %v6823_v45 = vpop.f32.mrb[238].mxu1  ;;  %v13797_v56 = vadd.f32 %v6784_v35, %v13369_v53 }
 0x760   :  { %v6825_v14 = vpop.f32.mrb[239].mxu1 }
 0x761   :  { %v7127_v23 = vadd.f32 %v7126_v18, %v13797_v56  ;;  %v6797_v14 = vadd.f32 %v13719_v15, %v6796_v49 }
 0x763   :  { %v7128_v46 = vadd.f32 %v7127_v23, %v13800_v43  ;;  %v13811_v35 = vadd.f32 %v6797_v14, %v13312_v6  ;;  %v6808_v6 = vadd.f32 %v13719_v15, %v6807_v37  ;;  %v6813_v23 = vadd.f32 %v13719_v15, %v6812_v30 }
 0x765   :  { %v6828_v39 = vpop.f32.mrb[240].mxu1  ;;  %v7129_v36 = vadd.f32 %v7128_v46, %v13808_v34  ;;  %v13829_v14 = vadd.f32 %v6808_v6, %v13356_v24  ;;  %v13832_v55 = vadd.f32 %v6813_v23, %v13361_v44  ;;  %v6816_v46 = vadd.f32 %v13719_v15, %v6815_v5 }
 0x766   :  { %v6830_v59 = vpop.f32.mrb[241].mxu1  ;;  %v13842_v24 = vadd.f32 %v6821_v62, %v13404_v33  ;;  %v6824_v44 = vadd.f32 %v13719_v15, %v6823_v45 }
 0x767   :  { %v6831_v13 = vpop.f32.mrb[242].mxu1  ;;  %v6805_v59 = vadd.f32 %v13719_v15, %v6804_v28  ;;  %v7130_v49 = vadd.f32 %v7129_v36, %v13811_v35 }
 0x768   :  { %v6833_v11 = vpop.f32.mrb[243].mxu1  ;;  %v6832_v33 = vadd.f32 %v13719_v15, %v6831_v13 }
 0x769   :  { %v13822_v18 = vadd.f32 %v6805_v59, %v13354_v52  ;;  %v7131_v40 = vadd.f32 %v7130_v49, %v13819_v8  ;;  %v13839_v59 = vadd.f32 %v6816_v46, %v13378_v17 }
 0x76b   :  { %v7132_v28 = vadd.f32 %v7131_v40, %v13822_v18  ;;  %v13849_v40 = vadd.f32 %v6824_v44, %v13410_v0 }
 0x76d   :  { %v6836_v16 = vpop.f32.mrb[244].mxu1  ;;  %v7133_v37 = vadd.f32 %v7132_v28, %v13829_v14 }
 0x76e   :  { %v6838_v19 = vpop.f32.mrb[245].mxu1  ;;  %v6837_v28 = vadd.f32 %v13719_v15, %v6836_v16 }
 0x76f   :  { %v6839_v38 = vpop.f32.mrb[246].mxu1  ;;  %v7134_v30 = vadd.f32 %v7133_v37, %v13832_v55 }
 0x770   :  { %v6841_v53 = vpop.f32.mrb[247].mxu1  ;;  %v13862_v0 = vadd.f32 %v6837_v28, %v13447_v2 }
 0x771   :  { %v7135_v5 = vadd.f32 %v7134_v30, %v13839_v59 }
 0x773   :  { %v7136_v63 = vadd.f32 %v7135_v5, %v13842_v24 }
 0x775   :  { %v6844_v7 = vpop.f32.mrb[248].mxu1  ;;  %v7137_v45 = vadd.f32 %v7136_v63, %v13849_v40 }
 0x776   :  { %v6846_v11 = vpop.f32.mrb[249].mxu1  ;;  %v6845_v30 = vadd.f32 %v13719_v15, %v6844_v7 }
 0x777   :  { %v6847_v42 = vpop.f32.mrb[250].mxu1  ;;  %v6829_v11 = vadd.f32 %v13719_v15, %v6828_v39 }
 0x778   :  { %v6849_v48 = vpop.f32.mrb[251].mxu1 }
 0x779   :  { %v13852_v17 = vadd.f32 %v6829_v11, %v13428_v27  ;;  %v6840_v27 = vadd.f32 %v13719_v15, %v6839_v38  ;;  %v6848_v11 = vadd.f32 %v13719_v15, %v6847_v42 }
 0x77b   :  { %v7138_v39 = vadd.f32 %v7137_v45, %v13852_v17  ;;  %v13869_v44 = vadd.f32 %v6840_v27, %v13449_v10 }
 0x77d   :  { %v6852_v19 = vpop.f32.mrb[252].mxu1 }
 0x77e   :  { %v6854_v52 = vpop.f32.mrb[253].mxu1  ;;  %v6853_v63 = vadd.f32 %v13719_v15, %v6852_v19 }
 0x77f   :  { %v6855_v53 = vpop.f32.mrb[254].mxu1  ;;  %v13859_v52 = vadd.f32 %v6832_v33, %v13434_v12  ;;  %v13872_v12 = vadd.f32 %v6845_v30, %v13463_v21  ;;  %v13879_v33 = vadd.f32 %v6848_v11, %v13466_v3 }
 0x780   :  { %v6857_v36 = vpop.f32.mrb[255].mxu1  ;;  %v13882_v10 = vadd.f32 %v6853_v63, %v13475_v54  ;;  %v6856_v21 = vadd.f32 %v13719_v15, %v6855_v53 }
 0x781   :  { %v7139_v13 = vadd.f32 %v7138_v39, %v13859_v52 }
 0x782   :  { %v13889_v27 = vadd.f32 %v6856_v21, %v13477_v61 }
 0x783   :  { %v7140_v16 = vadd.f32 %v7139_v13, %v13862_v0 }
 0x785   :  { %v6860_v49 = vpop.f32.mrb[0].mxu1  ;;  %v7141_v38 = vadd.f32 %v7140_v16, %v13869_v44 }
 0x786   :  { %v6862_v6 = vpop.f32.mrb[1].mxu1  ;;  %v6861_v28 = vadd.f32 %v13719_v15, %v6860_v49 }
 0x787   :  { %v6863_v48 = vpop.f32.mrb[2].mxu1  ;;  %v7142_v7 = vadd.f32 %v7141_v38, %v13872_v12 }
 0x788   :  { %v6865_v23 = vpop.f32.mrb[3].mxu1  ;;  %v13892_v3 = vadd.f32 %v6861_v28, %v12945_v47  ;;  %v6864_v54 = vadd.f32 %v13719_v15, %v6863_v48 }
 0x789   :  { %v7143_v42 = vadd.f32 %v7142_v7, %v13879_v33 }
 0x78a   :  { %v13899_v16 = vadd.f32 %v6864_v54, %v12948_v51  ;;  %v16291_v54 = vld [vmem:[#allocation49_spill] sm:$0xff] }
 0x78b   :  { %v7144_v19 = vadd.f32 %v7143_v42, %v13882_v10 }
 0x78d   :  { %v6868_v46 = vpop.f32.mrb[4].mxu1  ;;  %v7145_v53 = vadd.f32 %v7144_v19, %v13889_v27 }
 0x78e   :  { %v6870_v37 = vpop.f32.mrb[5].mxu1  ;;  %v6869_v13 = vadd.f32 %v13719_v15, %v6868_v46 }
 0x78f   :  { %v6871_v62 = vpop.f32.mrb[6].mxu1  ;;  %v7146_v49 = vadd.f32 %v7145_v53, %v13892_v3 }
 0x790   :  { %v6873_v36 = vpop.f32.mrb[7].mxu1  ;;  %v13902_v61 = vadd.f32 %v6869_v13, %v12951_v20  ;;  %v6872_v47 = vadd.f32 %v13719_v15, %v6871_v62  ;;  %v16293_v13 = vld [vmem:[#allocation36_spill] sm:$0xff] }
 0x791   :  { %v7147_v63 = vadd.f32 %v7146_v49, %v13899_v16 }
 0x792   :  { %v13911_v51 = vadd.f32 %v6872_v47, %v12954_v41 }
 0x793   :  { %v7148_v7 = vadd.f32 %v7147_v63, %v13902_v61 }
 0x795   :  { %v6876_v5 = vpop.f32.mrb[8].mxu1 }
 0x796   :  { %v6878_v2 = vpop.f32.mrb[9].mxu1  ;;  %v6877_v46 = vadd.f32 %v13719_v15, %v6876_v5 }
 0x797   :  { %v6879_v6 = vpop.f32.mrb[10].mxu1 }
 0x798   :  { %v6881_v23 = vpop.f32.mrb[11].mxu1  ;;  %v6880_v38 = vadd.f32 %v13719_v15, %v6879_v6  ;;  %v13917_v62 = vadd.f32 %v6877_v46, %v12957_v57 }
 0x79a   :  { %v13914_v21 = vadd.f32 %v6880_v38, %v12960_v25 }
 0x79d   :  { %v6884_v45 = vpop.f32.mrb[12].mxu1 }
 0x79e   :  { %v6886_v39 = vpop.f32.mrb[13].mxu1  ;;  %v6885_v23 = vadd.f32 %v13719_v15, %v6884_v45  ;;  %v7149_v45 = vadd.f32 %v7148_v7, %v13911_v51 }
 0x79f   :  { %v6887_v37 = vpop.f32.mrb[14].mxu1  ;;  %v16290_v39 = vld [vmem:[#allocation59_spill] sm:$0xff] }
 0x7a0   :  { %v6889_v36 = vpop.f32.mrb[15].mxu1  ;;  %v13920_v6 = vadd.f32 %v6885_v23, %v12963_v31  ;;  %v6888_v42 = vadd.f32 %v13719_v15, %v6887_v37  ;;  %v7088_v41 = vmul.f32 %v16290_v39, %v13914_v21  ;;  %v16295_v23 = vld [vmem:[#allocation33_spill] sm:$0xff] }
 0x7a1   :  { %v7150_v36 = vadd.f32 %v7149_v45, %v13917_v62  ;;  %v16297_v45 = vld [vmem:[#allocation53_spill] sm:$0xff] }
 0x7a2   :  { %16289 = vst [vmem:[#allocation8_spill] sm:$0xff] %v13920_v6  ;;  %v7089_v57 = vmul.f32 0.0, %v13920_v6  ;;  %v13930_v53 = vadd.f32 %v6888_v42, %v16291_v54  ;;  %v16299_v54 = vld [vmem:[#allocation60_spill] sm:$0xff] }
 0x7a3   :  { %v7151_v31 = vadd.f32 %v7150_v36, %v7088_v41 }
 0x7a4   :  { %16292 = vst [vmem:[#allocation91_spill] sm:$0xff] %v13930_v53  ;;  %v7090_v38 = vmul.f32 0.0, %v13930_v53 }
 0x7a5   :  { %v6892_v30 = vpop.f32.mrb[16].mxu1  ;;  %v7152_v47 = vadd.f32 %v7151_v31, %v7089_v57 }
 0x7a6   :  { %v6894_v11 = vpop.f32.mrb[17].mxu1  ;;  %v6893_v19 = vadd.f32 %v13719_v15, %v6892_v30 }
 0x7a7   :  { %v6895_v2 = vpop.f32.mrb[18].mxu1 }
 0x7a8   :  { %v6897_v48 = vpop.f32.mrb[19].mxu1  ;;  %v13933_v37 = vadd.f32 %v6893_v19, %v16293_v13  ;;  %v6896_v49 = vadd.f32 %v13719_v15, %v6895_v2 }
 0x7aa   :  { %16294 = vst [vmem:[#allocation9_spill] sm:$0xff] %v13933_v37  ;;  %v7091_v46 = vmul.f32 0.0, %v13933_v37  ;;  %v13940_v7 = vadd.f32 %v6896_v49, %v16295_v23 }
 0x7ac   :  { %16296 = vst [vmem:[#allocation93_spill] sm:$0xff] %v13940_v7 }
 0x7ad   :  { %v6900_v20 = vpop.f32.mrb[20].mxu1 }
 0x7ae   :  { %v6902_v5 = vpop.f32.mrb[21].mxu1  ;;  %v6901_v30 = vadd.f32 %v13719_v15, %v6900_v20 }
 0x7af   :  { %v6903_v28 = vpop.f32.mrb[22].mxu1  ;;  %v7153_v5 = vadd.f32 %v7152_v47, %v7090_v38  ;;  %v16301_v47 = vld [vmem:[#allocation41_spill] sm:$0xff] }
 0x7b0   :  { %v6905_v25 = vpop.f32.mrb[23].mxu1  ;;  %v13943_v41 = vadd.f32 %v6901_v30, %v16297_v45  ;;  %v6904_v2 = vadd.f32 %v13719_v15, %v6903_v28 }
 0x7b1   :  { %v7154_v19 = vadd.f32 %v7153_v5, %v7091_v46  ;;  %v7092_v25 = vmul.f32 0.0, %v13940_v7  ;;  %v16303_v5 = vld [vmem:[#allocation63_spill] sm:$0xff] }
 0x7b2   :  { %16298 = vst [vmem:[#allocation10_spill] sm:$0xff] %v13943_v41  ;;  %v7093_v57 = vmul.f32 0.0, %v13943_v41  ;;  %v13950_v31 = vadd.f32 %v6904_v2, %v16299_v54 }
 0x7b4   :  { %16300 = vst [vmem:[#allocation95_spill] sm:$0xff] %v13950_v31  ;;  %v7094_v23 = vmul.f32 0.0, %v13950_v31 }
 0x7b5   :  { %v6908_v11 = vpop.f32.mrb[24].mxu1 }
 0x7b6   :  { %v6910_v48 = vpop.f32.mrb[25].mxu1  ;;  %v6909_v36 = vadd.f32 %v13719_v15, %v6908_v11 }
 0x7b7   :  { %v6911_v63 = vpop.f32.mrb[26].mxu1  ;;  %v7155_v48 = vadd.f32 %v7154_v19, %v7092_v25 }
 0x7b8   :  { %v6913_v42 = vpop.f32.mrb[27].mxu1  ;;  %v13953_v38 = vadd.f32 %v6909_v36, %v16301_v47  ;;  %v6912_v30 = vadd.f32 %v13719_v15, %v6911_v63 }
 0x7b9   :  { %v7156_v46 = vadd.f32 %v7155_v48, %v7093_v57 }
 0x7ba   :  { %16302 = vst [vmem:[#allocation11_spill] sm:$0xff] %v13953_v38  ;;  %v7095_v42 = vmul.f32 0.0, %v13953_v38  ;;  %v13960_v45 = vadd.f32 %v6912_v30, %v16303_v5  ;;  %v16307_v38 = vld [vmem:[#allocation66_spill] sm:$0xff] }
 0x7bb   :  { %v7157_v54 = vadd.f32 %v7156_v46, %v7094_v23  ;;  %v16309_v46 = vld [vmem:[#allocation69_spill] sm:$0xff] }
 0x7bc   :  { %16304 = vst [vmem:[#allocation96_spill] sm:$0xff] %v13960_v45  ;;  %v7096_v57 = vmul.f32 0.0, %v13960_v45 }
 0x7bd   :  { %v6916_v20 = vpop.f32.mrb[28].mxu1  ;;  %v7158_v47 = vadd.f32 %v7157_v54, %v7095_v42 }
 0x7be   :  { %v6918_v13 = vpop.f32.mrb[29].mxu1  ;;  %v6917_v11 = vadd.f32 %v13719_v15, %v6916_v20 }
 0x7bf   :  { %v6919_v49 = vpop.f32.mrb[30].mxu1  ;;  %v16305_v13 = vld [vmem:[#allocation65_spill] sm:$0xff]  ;;  %v7159_v5 = vadd.f32 %v7158_v47, %v7096_v57  ;;  %v16313_v47 = vld [vmem:[#allocation72_spill] sm:$0xff] }
 0x7c0   :  { %v6921_v28 = vpop.f32.mrb[31].mxu1  ;;  %v13963_v19 = vadd.f32 %v6917_v11, %v16305_v13  ;;  %v6920_v25 = vadd.f32 %v13719_v15, %v6919_v49 }
 0x7c2   :  { %16306 = vst [vmem:[#allocation12_spill] sm:$0xff] %v13963_v19  ;;  %v7097_v28 = vmul.f32 0.0, %v13963_v19  ;;  %v13970_v30 = vadd.f32 %v6920_v25, %v16307_v38  ;;  %v16311_v19 = vld [vmem:[#allocation54_spill] sm:$0xff] }
 0x7c4   :  { %16308 = vst [vmem:[#allocation100_spill] sm:$0xff] %v13970_v30  ;;  %v7160_v13 = vadd.f32 %v7159_v5, %v7097_v28  ;;  %v7098_v42 = vmul.f32 0.0, %v13970_v30 }
 0x7c5   :  { %v6924_v2 = vpop.f32.mrb[32].mxu1 }
 0x7c6   :  { %v6926_v36 = vpop.f32.mrb[33].mxu1  ;;  %v6925_v48 = vadd.f32 %v13719_v15, %v6924_v2  ;;  %v7161_v25 = vadd.f32 %v7160_v13, %v7098_v42  ;;  %v16317_v13 = vld [vmem:[#allocation77_spill] sm:$0xff] }
 0x7c7   :  { %v6927_v63 = vpop.f32.mrb[34].mxu1 }
 0x7c8   :  { %v6929_v20 = vpop.f32.mrb[35].mxu1  ;;  %v13973_v23 = vadd.f32 %v6925_v48, %v16309_v46  ;;  %v6928_v11 = vadd.f32 %v13719_v15, %v6927_v63 }
 0x7ca   :  { %16310 = vst [vmem:[#allocation101_spill] sm:$0xff] %v13973_v23  ;;  %v7099_v20 = vmul.f32 0.0, %v13973_v23  ;;  %v13980_v45 = vadd.f32 %v6928_v11, %v16311_v19 }
 0x7cc   :  { %16312 = vst [vmem:[#allocation102_spill] sm:$0xff] %v13980_v45  ;;  %v7162_v48 = vadd.f32 %v7161_v25, %v7099_v20  ;;  %v7100_v28 = vmul.f32 0.0, %v13980_v45 }
 0x7cd   :  { %v6932_v49 = vpop.f32.mrb[36].mxu1 }
 0x7ce   :  { %v6933_v54 = vadd.f32 %v13719_v15, %v6932_v49  ;;  %v6934_v36 = vpop.f32.mrb[37].mxu1  ;;  %v16315_v49 = vld [vmem:[#allocation75_spill] sm:$0xff] }
 0x7cf   :  { %v6935_v2 = vpop.f32.mrb[38].mxu1 }
 0x7d0   :  { %v6937_v38 = vpop.f32.mrb[39].mxu1  ;;  %v13983_v57 = vadd.f32 %v6933_v54, %v16313_v47  ;;  %v6936_v63 = vadd.f32 %v13719_v15, %v6935_v2 }
 0x7d1   :  { %v7163_v38 = vadd.f32 %v7162_v48, %v7100_v28 }
 0x7d2   :  { %16314 = vst [vmem:[#allocation103_spill] sm:$0xff] %v13983_v57  ;;  %v7101_v46 = vmul.f32 0.0, %v13983_v57  ;;  %v13989_v36 = vadd.f32 %v6936_v63, %v16315_v49  ;;  %v16319_v57 = vld [vmem:[#allocation79_spill] sm:$0xff] }
 0x7d4   :  { %16316 = vst [vmem:[#allocation107_spill] sm:$0xff] %v13989_v36  ;;  %v7164_v20 = vadd.f32 %v7163_v38, %v7101_v46  ;;  %v7102_v25 = vmul.f32 0.0, %v13989_v36 }
 0x7d5   :  { %v6940_v5 = vpop.f32.mrb[40].mxu1 }
 0x7d6   :  { %v6941_v23 = vadd.f32 %v13719_v15, %v6940_v5  ;;  %v6942_v19 = vpop.f32.mrb[41].mxu1  ;;  %v7165_v49 = vadd.f32 %v7164_v20, %v7102_v25 }
 0x7d7   :  { %v6943_v11 = vpop.f32.mrb[42].mxu1 }
 0x7d8   :  { %v13993_v42 = vadd.f32 %v6941_v23, %v16317_v13  ;;  %v6944_v54 = vadd.f32 %v13719_v15, %v6943_v11  ;;  %v6945_v2 = vpop.f32.mrb[43].mxu1  ;;  %v16321_v13 = vld [vmem:[#allocation94_spill] sm:$0xff] }
 0x7da   :  { %16318 = vst [vmem:[#allocation108_spill] sm:$0xff] %v13993_v42  ;;  %v7103_v47 = vmul.f32 0.0, %v13993_v42  ;;  %v13999_v45 = vadd.f32 %v6944_v54, %v16319_v57  ;;  %v16323_v42 = vld [vmem:[#allocation80_spill] sm:$0xff] }
 0x7dc   :  { %16320 = vst [vmem:[#allocation109_spill] sm:$0xff] %v13999_v45  ;;  %v7166_v28 = vadd.f32 %v7165_v49, %v7103_v47  ;;  %v7104_v23 = vmul.f32 0.0, %v13999_v45  ;;  %v16324_v49 = vld [vmem:[#allocation78_spill] sm:$0xff] }
 0x7dd   :  { %v6948_v63 = vpop.f32.mrb[44].mxu1 }
 0x7de   :  { %v6949_v5 = vadd.f32 %v13719_v15, %v6948_v63  ;;  %v6950_v19 = vpop.f32.mrb[45].mxu1  ;;  %v7167_v54 = vadd.f32 %v7166_v28, %v7104_v23 }
 0x7df   :  { %v6951_v48 = vpop.f32.mrb[46].mxu1 }
 0x7e0   :  { %v14004_v11 = vadd.f32 %v6949_v5, %v16321_v13  ;;  %v6952_v46 = vadd.f32 %v13719_v15, %v6951_v48  ;;  %v6953_v38 = vpop.f32.mrb[47].mxu1 }
 0x7e1   :  { %v16325_v38 = vld [vmem:[#allocation83_spill] sm:$0xff] }
 0x7e2   :  { %16322 = vst [vmem:[#allocation112_spill] sm:$0xff] %v14004_v11  ;;  %v7105_v2 = vmul.f32 0.0, %v14004_v11  ;;  %v7042_v57 = vadd.f32 %v6952_v46, %v16323_v42 }
 0x7e4   :  { %v7168_v20 = vadd.f32 %v7167_v54, %v7105_v2  ;;  %v7106_v25 = vmul.f32 0.0, %v7042_v57 }
 0x7e5   :  { %v6956_v36 = vpop.f32.mrb[48].mxu1 }
 0x7e6   :  { %v6957_v63 = vadd.f32 %v13719_v15, %v6956_v36  ;;  %v6958_v19 = vpop.f32.mrb[49].mxu1  ;;  %v7169_v30 = vadd.f32 %v7168_v20, %v7106_v25  ;;  %v16326_v36 = vld [vmem:[#allocation97_spill] sm:$0xff] }
 0x7e7   :  { %v6959_v47 = vpop.f32.mrb[50].mxu1 }
 0x7e8   :  { %v7043_v45 = vadd.f32 %v6957_v63, %v16324_v49  ;;  %v6960_v5 = vadd.f32 %v13719_v15, %v6959_v47  ;;  %v6961_v13 = vpop.f32.mrb[51].mxu1  ;;  %v16327_v47 = vld [vmem:[#allocation104_spill] sm:$0xff] }
 0x7ea   :  { %v7107_v48 = vmul.f32 0.0, %v7043_v45  ;;  %v7044_v31 = vadd.f32 %v6960_v5, %v16325_v38 }
 0x7ec   :  { %v7170_v11 = vadd.f32 %v7169_v30, %v7107_v48  ;;  %v7108_v41 = vmul.f32 0.0, %v7044_v31 }
 0x7ed   :  { %v6964_v42 = vpop.f32.mrb[52].mxu1 }
 0x7ee   :  { %v7171_v28 = vadd.f32 %v7170_v11, %v7108_v41  ;;  %v6965_v23 = vadd.f32 %v13719_v15, %v6964_v42  ;;  %v6966_v46 = vpop.f32.mrb[53].mxu1  ;;  %v16328_v11 = vld [vmem:[#allocation48_spill] sm:$0xff] }
 0x7ef   :  { %v6967_v2 = vpop.f32.mrb[54].mxu1 }
 0x7f0   :  { %v7045_v54 = vadd.f32 %v6965_v23, %v16326_v36  ;;  %v6968_v19 = vadd.f32 %v13719_v15, %v6967_v2  ;;  %v6969_v63 = vpop.f32.mrb[55].mxu1  ;;  %v16329_v36 = vld [vmem:[#allocation51_spill] sm:$0xff] }
 0x7f2   :  { %v7109_v49 = vmul.f32 0.0, %v7045_v54  ;;  %v7046_v13 = vadd.f32 %v6968_v19, %v16327_v47 }
 0x7f4   :  { %v7172_v20 = vadd.f32 %v7171_v28, %v7109_v49  ;;  %v7110_v25 = vmul.f32 0.0, %v7046_v13 }
 0x7f5   :  { %v6972_v7 = vpop.f32.mrb[56].mxu1 }
 0x7f6   :  { %v7173_v5 = vadd.f32 %v7172_v20, %v7110_v25  ;;  %v6973_v30 = vadd.f32 %v13719_v15, %v6972_v7  ;;  %v6974_v48 = vpop.f32.mrb[57].mxu1  ;;  %v16330_v20 = vld [vmem:[#allocation81_spill] sm:$0xff] }
 0x7f7   :  { %v6975_v41 = vpop.f32.mrb[58].mxu1 }
 0x7f8   :  { %v7047_v38 = vadd.f32 %v6973_v30, %v16328_v11  ;;  %v6976_v42 = vadd.f32 %v13719_v15, %v6975_v41  ;;  %v6977_v46 = vpop.f32.mrb[59].mxu1  ;;  %v16331_v11 = vld [vmem:[#allocation105_spill] sm:$0xff] }
 0x7fa   :  { %v7111_v23 = vmul.f32 0.0, %v7047_v38  ;;  %v7048_v2 = vadd.f32 %v6976_v42, %v16329_v36 }
 0x7fc   :  { %v7174_v63 = vadd.f32 %v7173_v5, %v7111_v23  ;;  %v7112_v37 = vmul.f32 0.0, %v7048_v2 }
 0x7fd   :  { %v6980_v39 = vpop.f32.mrb[60].mxu1 }
 0x7fe   :  { %v7175_v19 = vadd.f32 %v7174_v63, %v7112_v37  ;;  %v6981_v28 = vadd.f32 %v13719_v15, %v6980_v39  ;;  %v6982_v49 = vpop.f32.mrb[61].mxu1 }
 0x7ff   :  { %v6983_v47 = vpop.f32.mrb[62].mxu1 }
 0x800   :  { %v7049_v7 = vadd.f32 %v6981_v28, %v16330_v20  ;;  %v6984_v25 = vadd.f32 %v13719_v15, %v6983_v47  ;;  %v6985_v48 = vpop.f32.mrb[63].mxu1 }
 0x802   :  { %v7113_v30 = vmul.f32 0.0, %v7049_v7  ;;  %v7050_v41 = vadd.f32 %v6984_v25, %v16331_v11  ;;  %v16337_v25 = vld [vmem:[#allocation88_spill] sm:$0xff] }
 0x804   :  { %v7176_v46 = vadd.f32 %v7175_v19, %v7113_v30  ;;  %v7114_v53 = vmul.f32 0.0, %v7050_v41 }
 0x806   :  { %v7177_v6 = vadd.f32 %v7176_v46, %v7114_v53 }
 0x808   :  { %v7178_v42 = vrot.slane %v7177_v6, 4 }
 0x80a   :  { %v7179_v5 = vadd.f32 %v7178_v42, %v7177_v6 }
 0x80c   :  { %v7180_v23 = vrot.slane %v7179_v5, 2 }
 0x80e   :  { %v7181_v36 = vadd.f32 %v7180_v23, %v7179_v5 }
 0x810   :  { %v7182_v37 = vrot.slane %v7181_v36, 1 }
 0x812   :  { %v7183_v63 = vadd.f32 %v7182_v37, %v7181_v36 }
 0x814   :  { %v14025_v39 = vmul.f32 0.0033333334, %v7183_v63 }
 0x816   :  { %v14028_v49 = vsub.f32 %v7042_v57, %v14025_v39  ;;  %v14031_v15 = vsub.f32 %v7043_v45, %v14025_v39  ;;  %v14034_v28 = vsub.f32 %v7044_v31, %v14025_v39  ;;  %v14037_v19 = vsub.f32 %v7045_v54, %v14025_v39  ;;  %v16335_v54 = vld [vmem:[#allocation90_spill] sm:$0xff] }
 0x817   :  { %v14040_v6 = vsub.f32 %v7046_v13, %v14025_v39  ;;  %v14043_v53 = vsub.f32 %v7047_v38, %v14025_v39  ;;  %v14046_v47 = vsub.f32 %v7048_v2, %v14025_v39  ;;  %v14049_v57 = vsub.f32 %v7049_v7, %v14025_v39  ;;  %v16336_v38 = vld [vmem:[#allocation7_spill] sm:$0xff] }
 0x818   :  { %v14052_v45 = vsub.f32 %v7050_v41, %v14025_v39  ;;  %v14056_v31 = vsub.f32 %v13733_v1, %v14025_v39  ;;  %v14060_v13 = vsub.f32 %v16335_v54, %v14025_v39  ;;  %v14064_v20 = vsub.f32 %v16336_v38, %v14025_v39 }
 0x819   :  { %16332 = vst [vmem:[#allocation113_spill] sm:$0xff] %v14040_v6  ;;  %16333 = vst [vmem:[#allocation129_spill] sm:$0xff] %v14043_v53  ;;  %v14072_v48 = vsub.f32 %v16337_v25, %v14025_v39  ;;  %v14076_v1 = vsub.f32 %v13749_v22, %v14025_v39  ;;  %v14082_v41 = vsub.f32 %v13757_v9, %v14025_v39 }
 0x81a   :  { %16334 = vst [vmem:[#allocation115_spill] sm:$0xff] %v14046_v47  ;;  %v7313_v2 = vmul.f32 %v14056_v31, %v14056_v31  ;;  %v7314_v7 = vmul.f32 %v14060_v13, %v14060_v13  ;;  %v7315_v30 = vmul.f32 %v14064_v20, %v14064_v20  ;;  %v14088_v5 = vsub.f32 %v13760_v29, %v14025_v39 }
 0x81b   :  { %v7316_v46 = vmul.f32 %v14072_v48, %v14072_v48  ;;  %v7317_v22 = vmul.f32 %v14076_v1, %v14076_v1  ;;  %v14094_v36 = vsub.f32 %v13767_v32, %v14025_v39  ;;  %v7318_v9 = vmul.f32 %v14082_v41, %v14082_v41 }
 0x81c   :  { %v7377_v11 = vadd.f32 %v7314_v7, %v7313_v2  ;;  %v14100_v63 = vsub.f32 %v13770_v58, %v14025_v39  ;;  %v7319_v29 = vmul.f32 %v14088_v5, %v14088_v5  ;;  %v14106_v38 = vsub.f32 %v13777_v26, %v14025_v39 }
 0x81d   :  { %v7320_v32 = vmul.f32 %v14094_v36, %v14094_v36  ;;  %v14112_v7 = vsub.f32 %v13780_v50, %v14025_v39 }
 0x81e   :  { %v7378_v42 = vadd.f32 %v7377_v11, %v7315_v30  ;;  %v7321_v58 = vmul.f32 %v14100_v63, %v14100_v63  ;;  %v14118_v30 = vsub.f32 %v13787_v4, %v14025_v39  ;;  %v7322_v26 = vmul.f32 %v14106_v38, %v14106_v38 }
 0x81f   :  { %v7323_v50 = vmul.f32 %v14112_v7, %v14112_v7 }
 0x820   :  { %v7379_v23 = vadd.f32 %v7378_v42, %v7316_v46  ;;  %v14124_v46 = vsub.f32 %v13790_v60, %v14025_v39  ;;  %v7324_v4 = vmul.f32 %v14118_v30, %v14118_v30 }
 0x822   :  { %v7380_v37 = vadd.f32 %v7379_v23, %v7317_v22  ;;  %v14130_v22 = vsub.f32 %v13797_v56, %v14025_v39  ;;  %v7325_v60 = vmul.f32 %v14124_v46, %v14124_v46 }
 0x824   :  { %v7381_v54 = vadd.f32 %v7380_v37, %v7318_v9  ;;  %v14136_v9 = vsub.f32 %v13800_v43, %v14025_v39  ;;  %v7326_v56 = vmul.f32 %v14130_v22, %v14130_v22 }
 0x826   :  { %v7382_v2 = vadd.f32 %v7381_v54, %v7319_v29  ;;  %v14142_v29 = vsub.f32 %v13808_v34, %v14025_v39  ;;  %v7327_v43 = vmul.f32 %v14136_v9, %v14136_v9 }
 0x828   :  { %v7383_v25 = vadd.f32 %v7382_v2, %v7320_v32  ;;  %v14148_v32 = vsub.f32 %v13811_v35, %v14025_v39  ;;  %v7328_v34 = vmul.f32 %v14142_v29, %v14142_v29 }
 0x82a   :  { %v7384_v11 = vadd.f32 %v7383_v25, %v7321_v58  ;;  %v14154_v58 = vsub.f32 %v13819_v8, %v14025_v39  ;;  %v7329_v35 = vmul.f32 %v14148_v32, %v14148_v32 }
 0x82c   :  { %v7385_v42 = vadd.f32 %v7384_v11, %v7322_v26  ;;  %v14160_v26 = vsub.f32 %v13822_v18, %v14025_v39  ;;  %v7330_v8 = vmul.f32 %v14154_v58, %v14154_v58 }
 0x82e   :  { %v7386_v23 = vadd.f32 %v7385_v42, %v7323_v50  ;;  %v14166_v50 = vsub.f32 %v13829_v14, %v14025_v39  ;;  %v7331_v18 = vmul.f32 %v14160_v26, %v14160_v26 }
 0x830   :  { %v7387_v37 = vadd.f32 %v7386_v23, %v7324_v4  ;;  %v14172_v4 = vsub.f32 %v13832_v55, %v14025_v39  ;;  %v7332_v14 = vmul.f32 %v14166_v50, %v14166_v50 }
 0x832   :  { %v7388_v54 = vadd.f32 %v7387_v37, %v7325_v60  ;;  %v14178_v60 = vsub.f32 %v13839_v59, %v14025_v39  ;;  %v7333_v55 = vmul.f32 %v14172_v4, %v14172_v4 }
 0x834   :  { %v7389_v2 = vadd.f32 %v7388_v54, %v7326_v56  ;;  %v14184_v56 = vsub.f32 %v13842_v24, %v14025_v39  ;;  %v7334_v59 = vmul.f32 %v14178_v60, %v14178_v60 }
 0x836   :  { %v7390_v25 = vadd.f32 %v7389_v2, %v7327_v43  ;;  %v14190_v43 = vsub.f32 %v13849_v40, %v14025_v39  ;;  %v7335_v24 = vmul.f32 %v14184_v56, %v14184_v56 }
 0x838   :  { %v7391_v11 = vadd.f32 %v7390_v25, %v7328_v34  ;;  %v14196_v34 = vsub.f32 %v13852_v17, %v14025_v39  ;;  %v7336_v40 = vmul.f32 %v14190_v43, %v14190_v43 }
 0x83a   :  { %v7392_v42 = vadd.f32 %v7391_v11, %v7329_v35  ;;  %v14202_v35 = vsub.f32 %v13859_v52, %v14025_v39  ;;  %v7337_v17 = vmul.f32 %v14196_v34, %v14196_v34 }
 0x83c   :  { %v7393_v23 = vadd.f32 %v7392_v42, %v7330_v8  ;;  %v14208_v8 = vsub.f32 %v13862_v0, %v14025_v39  ;;  %v7338_v52 = vmul.f32 %v14202_v35, %v14202_v35 }
 0x83e   :  { %v7394_v37 = vadd.f32 %v7393_v23, %v7331_v18  ;;  %v14214_v18 = vsub.f32 %v13869_v44, %v14025_v39  ;;  %v7339_v0 = vmul.f32 %v14208_v8, %v14208_v8 }
 0x840   :  { %v7395_v54 = vadd.f32 %v7394_v37, %v7332_v14  ;;  %v14220_v14 = vsub.f32 %v13872_v12, %v14025_v39  ;;  %v7340_v44 = vmul.f32 %v14214_v18, %v14214_v18 }
 0x842   :  { %v7396_v2 = vadd.f32 %v7395_v54, %v7333_v55  ;;  %v14226_v55 = vsub.f32 %v13879_v33, %v14025_v39  ;;  %v7341_v12 = vmul.f32 %v14220_v14, %v14220_v14 }
 0x844   :  { %v7397_v25 = vadd.f32 %v7396_v2, %v7334_v59  ;;  %v14232_v59 = vsub.f32 %v13882_v10, %v14025_v39  ;;  %v7342_v33 = vmul.f32 %v14226_v55, %v14226_v55 }
 0x846   :  { %v7398_v11 = vadd.f32 %v7397_v25, %v7335_v24  ;;  %v14238_v24 = vsub.f32 %v13889_v27, %v14025_v39  ;;  %v7343_v10 = vmul.f32 %v14232_v59, %v14232_v59 }
 0x848   :  { %v7399_v42 = vadd.f32 %v7398_v11, %v7336_v40  ;;  %v14244_v40 = vsub.f32 %v13892_v3, %v14025_v39  ;;  %v7344_v27 = vmul.f32 %v14238_v24, %v14238_v24 }
 0x84a   :  { %v7400_v23 = vadd.f32 %v7399_v42, %v7337_v17  ;;  %v14250_v17 = vsub.f32 %v13899_v16, %v14025_v39  ;;  %v7345_v3 = vmul.f32 %v14244_v40, %v14244_v40  ;;  %v14266_v16 = vsub.f32 %v13914_v21, %v14025_v39 }
 0x84c   :  { %v7401_v37 = vadd.f32 %v7400_v23, %v7338_v52  ;;  %16338 = vst [vmem:[#allocation20_spill] sm:$0xff] %v14250_v17  ;;  %v14256_v52 = vsub.f32 %v13902_v61, %v14025_v39  ;;  %16341 = vst [vmem:[#allocation98_spill] sm:$0xff] %v14266_v16  ;;  %v14272_v61 = vsub.f32 %v13917_v62, %v14025_v39 }
 0x84e   :  { %v7402_v54 = vadd.f32 %v7401_v37, %v7339_v0  ;;  %16339 = vst [vmem:[#allocation26_spill] sm:$0xff] %v14256_v52  ;;  %v14262_v0 = vsub.f32 %v13911_v51, %v14025_v39  ;;  %v7346_v37 = vmul.f32 %v14250_v17, %v14250_v17  ;;  %16342 = vst [vmem:[#allocation45_spill] sm:$0xff] %v14272_v61 }
 0x84f   :  { %v7347_v51 = vmul.f32 %v14256_v52, %v14256_v52  ;;  %v16354_v52 = vld [vmem:[#allocation95_spill] sm:$0xff] }
 0x850   :  { %v7403_v2 = vadd.f32 %v7402_v54, %v7340_v44  ;;  %16340 = vst [vmem:[#allocation29_spill] sm:$0xff] %v14262_v0  ;;  %v16343_v54 = vld [vmem:[#allocation8_spill] sm:$0xff] }
 0x852   :  { %v7404_v25 = vadd.f32 %v7403_v2, %v7341_v12  ;;  %v14276_v12 = vsub.f32 %v16343_v54, %v14025_v39 }
 0x854   :  { %v7405_v11 = vadd.f32 %v7404_v25, %v7342_v33  ;;  %16344 = vst [vmem:[#allocation17_spill] sm:$0xff] %v14276_v12  ;;  %v16345_v33 = vld [vmem:[#allocation91_spill] sm:$0xff] }
 0x855   :  { %v14282_v21 = vsub.f32 %v16345_v33, %v14025_v39  ;;  %v16347_v25 = vld [vmem:[#allocation59_spill] sm:$0xff] }
 0x856   :  { %v7406_v42 = vadd.f32 %v7405_v11, %v7343_v10  ;;  %v7286_v10 = vmul.f32 %v16347_v25, %v14266_v16  ;;  %v7348_v11 = vmul.f32 %v14262_v0, %v14262_v0 }
 0x857   :  { %16346 = vst [vmem:[#allocation34_spill] sm:$0xff] %v14282_v21  ;;  %v7288_v33 = vmul.f32 0.0, %v14282_v21  ;;  %v16356_v21 = vld [vmem:[#allocation11_spill] sm:$0xff] }
 0x858   :  { %v7407_v23 = vadd.f32 %v7406_v42, %v7344_v27  ;;  %v16348_v27 = vld [vmem:[#allocation9_spill] sm:$0xff]  ;;  %v7350_v25 = vmul.f32 %v7286_v10, %v7286_v10  ;;  %v14312_v10 = vsub.f32 %v16356_v21, %v14025_v39 }
 0x859   :  { %v14290_v42 = vsub.f32 %v16348_v27, %v14025_v39 }
 0x85a   :  { %v7408_v44 = vadd.f32 %v7407_v23, %v7345_v3  ;;  %v7287_v3 = vmul.f32 0.0, %v14276_v12  ;;  %v7349_v23 = vmul.f32 %v14272_v61, %v14272_v61  ;;  %v14307_v61 = vsub.f32 %v16354_v52, %v14025_v39  ;;  %16357 = vst [vmem:[#allocation28_spill] sm:$0xff] %v14312_v10 }
 0x85b   :  { %16349 = vst [vmem:[#allocation19_spill] sm:$0xff] %v14290_v42  ;;  %v7289_v27 = vmul.f32 0.0, %v14290_v42  ;;  %v16358_v42 = vld [vmem:[#allocation96_spill] sm:$0xff] }
 0x85c   :  { %v7409_v2 = vadd.f32 %v7408_v44, %v7346_v37  ;;  %v16350_v44 = vld [vmem:[#allocation93_spill] sm:$0xff]  ;;  %v7351_v0 = vmul.f32 %v7287_v3, %v7287_v3  ;;  %16355 = vst [vmem:[#allocation24_spill] sm:$0xff] %v14307_v61  ;;  %v14317_v3 = vsub.f32 %v16358_v42, %v14025_v39 }
 0x85d   :  { %v14297_v54 = vsub.f32 %v16350_v44, %v14025_v39 }
 0x85e   :  { %v7410_v62 = vadd.f32 %v7409_v2, %v7347_v51  ;;  %v16352_v51 = vld [vmem:[#allocation10_spill] sm:$0xff]  ;;  %16359 = vst [vmem:[#allocation30_spill] sm:$0xff] %v14317_v3 }
 0x85f   :  { %16351 = vst [vmem:[#allocation21_spill] sm:$0xff] %v14297_v54  ;;  %v14302_v2 = vsub.f32 %v16352_v51, %v14025_v39 }
 0x860   :  { %v7411_v37 = vadd.f32 %v7410_v62, %v7348_v11  ;;  %v7290_v11 = vmul.f32 0.0, %v14297_v54  ;;  %v7352_v62 = vmul.f32 %v7288_v33, %v7288_v33  ;;  %v16360_v54 = vld [vmem:[#allocation12_spill] sm:$0xff] }
 0x861   :  { %16353 = vst [vmem:[#allocation23_spill] sm:$0xff] %v14302_v2  ;;  %v14322_v33 = vsub.f32 %v16360_v54, %v14025_v39 }
 0x862   :  { %v7412_v16 = vadd.f32 %v7411_v37, %v7349_v23  ;;  %v7291_v23 = vmul.f32 0.0, %v14302_v2  ;;  %v7353_v37 = vmul.f32 %v7289_v27, %v7289_v27  ;;  %v7354_v52 = vmul.f32 %v7290_v11, %v7290_v11  ;;  %v16362_v2 = vld [vmem:[#allocation100_spill] sm:$0xff] }
 0x863   :  { %16361 = vst [vmem:[#allocation31_spill] sm:$0xff] %v14322_v33  ;;  %v14327_v27 = vsub.f32 %v16362_v2, %v14025_v39 }
 0x864   :  { %v7413_v12 = vadd.f32 %v7412_v16, %v7350_v25  ;;  %v7292_v16 = vmul.f32 0.0, %v14307_v61  ;;  %v16364_v61 = vld [vmem:[#allocation101_spill] sm:$0xff] }
 0x865   :  { %16363 = vst [vmem:[#allocation44_spill] sm:$0xff] %v14327_v27  ;;  %v14332_v11 = vsub.f32 %v16364_v61, %v14025_v39 }
 0x866   :  { %v7414_v44 = vadd.f32 %v7413_v12, %v7351_v0  ;;  %v7293_v0 = vmul.f32 0.0, %v14312_v10  ;;  %v7355_v12 = vmul.f32 %v7291_v23, %v7291_v23  ;;  %v7356_v42 = vmul.f32 %v7292_v16, %v7292_v16  ;;  %v16366_v10 = vld [vmem:[#allocation102_spill] sm:$0xff] }
 0x867   :  { %16365 = vst [vmem:[#allocation76_spill] sm:$0xff] %v14332_v11  ;;  %v14337_v23 = vsub.f32 %v16366_v10, %v14025_v39 }
 0x868   :  { %v7415_v51 = vadd.f32 %v7414_v44, %v7352_v62  ;;  %v7294_v62 = vmul.f32 0.0, %v14317_v3  ;;  %v7357_v54 = vmul.f32 %v7293_v0, %v7293_v0  ;;  %v16368_v3 = vld [vmem:[#allocation103_spill] sm:$0xff] }
 0x869   :  { %16367 = vst [vmem:[#allocation47_spill] sm:$0xff] %v14337_v23  ;;  %v14342_v16 = vsub.f32 %v16368_v3, %v14025_v39 }
 0x86a   :  { %v7416_v25 = vadd.f32 %v7415_v51, %v7353_v37  ;;  %v7295_v37 = vmul.f32 0.0, %v14322_v33  ;;  %v7358_v2 = vmul.f32 %v7294_v62, %v7294_v62  ;;  %v16370_v33 = vld [vmem:[#allocation107_spill] sm:$0xff] }
 0x86b   :  { %16369 = vst [vmem:[#allocation92_spill] sm:$0xff] %v14342_v16  ;;  %v14347_v0 = vsub.f32 %v16370_v33, %v14025_v39 }
 0x86c   :  { %v7417_v21 = vadd.f32 %v7416_v25, %v7354_v52  ;;  %v7296_v52 = vmul.f32 0.0, %v14327_v27  ;;  %v7359_v61 = vmul.f32 %v7295_v37, %v7295_v37  ;;  %v16372_v27 = vld [vmem:[#allocation108_spill] sm:$0xff] }
 0x86d   :  { %16371 = vst [vmem:[#allocation99_spill] sm:$0xff] %v14347_v0  ;;  %v14352_v62 = vsub.f32 %v16372_v27, %v14025_v39 }
 0x86e   :  { %v7418_v44 = vadd.f32 %v7417_v21, %v7355_v12  ;;  %v7297_v12 = vmul.f32 0.0, %v14332_v11  ;;  %v7360_v10 = vmul.f32 %v7296_v52, %v7296_v52  ;;  %v16374_v11 = vld [vmem:[#allocation109_spill] sm:$0xff] }
 0x86f   :  { %16373 = vst [vmem:[#allocation46_spill] sm:$0xff] %v14352_v62  ;;  %v14357_v37 = vsub.f32 %v16374_v11, %v14025_v39 }
 0x870   :  { %v7419_v51 = vadd.f32 %v7418_v44, %v7356_v42  ;;  %v7298_v42 = vmul.f32 0.0, %v14337_v23  ;;  %v7361_v3 = vmul.f32 %v7297_v12, %v7297_v12  ;;  %v16375_v23 = vld [vmem:[#allocation112_spill] sm:$0xff] }
 0x871   :  { %v14362_v52 = vsub.f32 %v16375_v23, %v14025_v39 }
 0x872   :  { %v7420_v25 = vadd.f32 %v7419_v51, %v7357_v54  ;;  %v7299_v54 = vmul.f32 0.0, %v14342_v16  ;;  %v7362_v33 = vmul.f32 %v7298_v42, %v7298_v42  ;;  %v7302_v16 = vmul.f32 0.0, %v14357_v37 }
 0x874   :  { %v7421_v21 = vadd.f32 %v7420_v25, %v7358_v2  ;;  %v7300_v2 = vmul.f32 0.0, %v14347_v0  ;;  %v7363_v27 = vmul.f32 %v7299_v54, %v7299_v54  ;;  %v7304_v0 = vmul.f32 0.0, %v14028_v49 }
 0x875   :  { %v7366_v42 = vmul.f32 %v7302_v16, %v7302_v16 }
 0x876   :  { %v7422_v44 = vadd.f32 %v7421_v21, %v7359_v61  ;;  %v7301_v61 = vmul.f32 0.0, %v14352_v62  ;;  %v7364_v12 = vmul.f32 %v7300_v2, %v7300_v2  ;;  %v7306_v62 = vmul.f32 0.0, %v14034_v28 }
 0x877   :  { %v7368_v54 = vmul.f32 %v7304_v0, %v7304_v0 }
 0x878   :  { %v7423_v51 = vadd.f32 %v7422_v44, %v7360_v10  ;;  %v7303_v44 = vmul.f32 0.0, %v14362_v52  ;;  %v7365_v11 = vmul.f32 %v7301_v61, %v7301_v61  ;;  %v7370_v61 = vmul.f32 %v7306_v62, %v7306_v62 }
 0x87a   :  { %v7424_v25 = vadd.f32 %v7423_v51, %v7361_v3  ;;  %v7305_v51 = vmul.f32 0.0, %v14031_v15  ;;  %v7367_v39 = vmul.f32 %v7303_v44, %v7303_v44 }
 0x87c   :  { %v7425_v21 = vadd.f32 %v7424_v25, %v7362_v33  ;;  %v7307_v25 = vmul.f32 0.0, %v14037_v19  ;;  %v7369_v2 = vmul.f32 %v7305_v51, %v7305_v51 }
 0x87e   :  { %v7426_v10 = vadd.f32 %v7425_v21, %v7363_v27  ;;  %v7308_v21 = vmul.f32 0.0, %v14040_v6  ;;  %v7371_v16 = vmul.f32 %v7307_v25, %v7307_v25 }
 0x880   :  { %v7427_v17 = vadd.f32 %v7426_v10, %v7364_v12  ;;  %v7309_v10 = vmul.f32 0.0, %v14043_v53  ;;  %v7372_v44 = vmul.f32 %v7308_v21, %v7308_v21 }
 0x882   :  { %v7428_v3 = vadd.f32 %v7427_v17, %v7365_v11  ;;  %v7310_v11 = vmul.f32 0.0, %v14046_v47  ;;  %v7373_v0 = vmul.f32 %v7309_v10, %v7309_v10 }
 0x884   :  { %v7429_v23 = vadd.f32 %v7428_v3, %v7366_v42  ;;  %v7311_v3 = vmul.f32 0.0, %v14049_v57  ;;  %v7374_v51 = vmul.f32 %v7310_v11, %v7310_v11 }
 0x886   :  { %v7430_v33 = vadd.f32 %v7429_v23, %v7367_v39  ;;  %v7312_v23 = vmul.f32 0.0, %v14052_v45 }
 0x888   :  { %v7431_v27 = vadd.f32 %v7430_v33, %v7368_v54  ;;  %v7375_v33 = vmul.f32 %v7311_v3, %v7311_v3  ;;  %v7376_v62 = vmul.f32 %v7312_v23, %v7312_v23  ;;  %v16377_v3 = vld [vmem:[#allocation26_spill] sm:$0xff] }
 0x889   :  { %v16380_v23 = vld [vmem:[#allocation98_spill] sm:$0xff] }
 0x88a   :  { %v7432_v12 = vadd.f32 %v7431_v27, %v7369_v2 }
 0x88c   :  { %v7433_v17 = vadd.f32 %v7432_v12, %v7370_v61 }
 0x88e   :  { %v7434_v42 = vadd.f32 %v7433_v17, %v7371_v16 }
 0x890   :  { %v7435_v39 = vadd.f32 %v7434_v42, %v7372_v44  ;;  %v16376_v42 = vld [vmem:[#allocation20_spill] sm:$0xff] }
 0x892   :  { %v7436_v54 = vadd.f32 %v7435_v39, %v7373_v0  ;;  %v16378_v0 = vld [vmem:[#allocation29_spill] sm:$0xff] }
 0x893   :  { %v16379_v39 = vld [vmem:[#allocation45_spill] sm:$0xff] }
 0x894   :  { %v7437_v6 = vadd.f32 %v7436_v54, %v7374_v51  ;;  %v16381_v51 = vld [vmem:[#allocation17_spill] sm:$0xff] }
 0x896   :  { %v7438_v2 = vadd.f32 %v7437_v6, %v7375_v33  ;;  %v16382_v33 = vld [vmem:[#allocation34_spill] sm:$0xff] }
 0x898   :  { %v7439_v27 = vadd.f32 %v7438_v2, %v7376_v62  ;;  %v16383_v2 = vld [vmem:[#allocation19_spill] sm:$0xff] }
 0x89a   :  { %v7440_v53 = vrot.slane %v7439_v27, 4 }
 0x89c   :  { %v7441_v25 = vadd.f32 %v7440_v53, %v7439_v27 }
 0x89e   :  { %v7442_v61 = vrot.slane %v7441_v25, 2 }
 0x8a0   :  { %v7443_v12 = vadd.f32 %v7442_v61, %v7441_v25  ;;  %v16384_v25 = vld [vmem:[#allocation21_spill] sm:$0xff] }
 0x8a2   :  { %v7444_v47 = vrot.slane %v7443_v12, 1 }
 0x8a4   :  { %v7445_v21 = vadd.f32 %v7444_v47, %v7443_v12  ;;  %v16385_v12 = vld [vmem:[#allocation23_spill] sm:$0xff] }
 0x8a6   :  { %v7446_v16 = vmul.f32 0.0033333334, %v7445_v21 }
 0x8a8   :  { %v7447_v17 = vadd.f32 1e-05, %v7446_v16  ;;  %v16386_v16 = vld [vmem:[#allocation24_spill] sm:$0xff] }
 0x8aa   :  { %8718 = vrsqrt.f32 %v7447_v17 }
 0x8b4   :  { %v14376_v10 = vpop.eup %8718 }
 0x8b5   :  { %v14380_v11 = vmul.f32 %v14376_v10, %v14056_v31  ;;  %v14384_v44 = vmul.f32 %v14376_v10, %v14060_v13  ;;  %v14388_v6 = vmul.f32 %v14376_v10, %v14064_v20  ;;  %v14392_v53 = vmul.f32 %v14376_v10, %v14072_v48 }
 0x8b6   :  { %v14396_v47 = vmul.f32 %v14376_v10, %v14076_v1  ;;  %v14400_v31 = vmul.f32 %v14376_v10, %v14082_v41  ;;  %v14404_v13 = vmul.f32 %v14376_v10, %v14088_v5  ;;  %v14408_v20 = vmul.f32 %v14376_v10, %v14094_v36 }
 0x8b7   :  { %v14412_v48 = vmul.f32 %v14376_v10, %v14100_v63  ;;  %v14416_v1 = vmul.f32 %v14376_v10, %v14106_v38  ;;  %v14420_v41 = vmul.f32 %v14376_v10, %v14112_v7  ;;  %v14424_v5 = vmul.f32 %v14376_v10, %v14118_v30 }
 0x8b8   :  { %v14428_v36 = vmul.f32 %v14376_v10, %v14124_v46  ;;  %v14432_v63 = vmul.f32 %v14376_v10, %v14130_v22  ;;  %v14436_v38 = vmul.f32 %v14376_v10, %v14136_v9  ;;  %v14440_v7 = vmul.f32 %v14376_v10, %v14142_v29 }
 0x8b9   :  { %v14444_v30 = vmul.f32 %v14376_v10, %v14148_v32  ;;  %v14448_v46 = vmul.f32 %v14376_v10, %v14154_v58  ;;  %v14452_v22 = vmul.f32 %v14376_v10, %v14160_v26  ;;  %v14456_v9 = vmul.f32 %v14376_v10, %v14166_v50 }
 0x8ba   :  { %v14460_v29 = vmul.f32 %v14376_v10, %v14172_v4  ;;  %v14464_v32 = vmul.f32 %v14376_v10, %v14178_v60  ;;  %v14468_v58 = vmul.f32 %v14376_v10, %v14184_v56  ;;  %v14472_v26 = vmul.f32 %v14376_v10, %v14190_v43 }
 0x8bb   :  { %v14476_v50 = vmul.f32 %v14376_v10, %v14196_v34  ;;  %v14480_v4 = vmul.f32 %v14376_v10, %v14202_v35  ;;  %v14484_v60 = vmul.f32 %v14376_v10, %v14208_v8  ;;  %v14488_v56 = vmul.f32 %v14376_v10, %v14214_v18 }
 0x8bc   :  { %v14492_v43 = vmul.f32 %v14376_v10, %v14220_v14  ;;  %v14496_v34 = vmul.f32 %v14376_v10, %v14226_v55  ;;  %v14500_v35 = vmul.f32 %v14376_v10, %v14232_v59  ;;  %v14504_v8 = vmul.f32 %v14376_v10, %v14238_v24 }
 0x8bd   :  { %v14508_v18 = vmul.f32 %v14376_v10, %v14244_v40  ;;  %v14512_v14 = vmul.f32 %v14376_v10, %v16376_v42  ;;  %v14516_v55 = vmul.f32 %v14376_v10, %v16377_v3  ;;  %v14520_v59 = vmul.f32 %v14376_v10, %v16378_v0  ;;  %v16387_v42 = vld [vmem:[#allocation28_spill] sm:$0xff]  ;;  %v16389_v0 = vld [vmem:[#allocation30_spill] sm:$0xff] }
 0x8be   :  { %v14524_v24 = vmul.f32 %v14376_v10, %v16379_v39  ;;  %v14528_v40 = vmul.f32 %v14376_v10, %v16380_v23  ;;  %v14532_v54 = vmul.f32 %v14376_v10, %v16381_v51  ;;  %v14536_v62 = vmul.f32 %v14376_v10, %v16382_v33  ;;  %v16391_v23 = vld [vmem:[#allocation31_spill] sm:$0xff]  ;;  %v16392_v33 = vld [vmem:[#allocation44_spill] sm:$0xff] }
 0x8bf   :  { %v14540_v27 = vmul.f32 %v14376_v10, %v16383_v2  ;;  %v14544_v61 = vmul.f32 %v14376_v10, %v16384_v25  ;;  %v14548_v21 = vmul.f32 %v14376_v10, %v16385_v12  ;;  %v14552_v17 = vmul.f32 %v14376_v10, %v16386_v16  ;;  %v16394_v25 = vld [vmem:[#allocation76_spill] sm:$0xff]  ;;  %v16395_v16 = vld [vmem:[#allocation47_spill] sm:$0xff] }
 0x8c0   :  { %v14556_v3 = vmul.f32 %v14376_v10, %v16387_v42  ;;  %v14560_v39 = vmul.f32 %v14376_v10, %v16389_v0  ;;  %v14564_v51 = vmul.f32 %v14376_v10, %v16391_v23  ;;  %v14568_v2 = vmul.f32 %v14376_v10, %v16392_v33  ;;  %v14589_v33 = vld [vmem:[%s15225_s6 + $0x7] ss:$0 sm:$0xff] }
 0x8c1   :  { %v14572_v12 = vmul.f32 %v14376_v10, %v16394_v25  ;;  %v14576_v42 = vmul.f32 %v14376_v10, %v16395_v16  ;;  %v14597_v16 = vmul.f32 %v14376_v10, %v14357_v37  ;;  %v14617_v37 = vmul.f32 %v14376_v10, %v14037_v19 }
 0x8c2   :  { %16388 = vst [vmem:[#allocation56_spill] sm:$0xff] %v14556_v3  ;;  %16390 = vst [vmem:[#allocation57_spill] sm:$0xff] %v14560_v39  ;;  %v16396_v3 = vld [vmem:[#allocation92_spill] sm:$0xff]  ;;  %v16397_v39 = vld [vmem:[#allocation99_spill] sm:$0xff]  ;;  %v14637_v19 = vmul.f32 %v14376_v10, %v14052_v45  ;;  %v14657_v45 = vmul.f32 %v14589_v33, %v14396_v47  ;;  %v14681_v47 = vmul.f32 %v14589_v33, %v14420_v41 }
 0x8c3   :  { %16393 = vst [vmem:[#allocation62_spill] sm:$0xff] %v14568_v2  ;;  %v14580_v0 = vmul.f32 %v14376_v10, %v16396_v3  ;;  %v14584_v23 = vmul.f32 %v14376_v10, %v16397_v39  ;;  %v16399_v2 = vld [vmem:[#allocation46_spill] sm:$0xff]  ;;  %16400 = vst [vmem:[#allocation67_spill] sm:$0xff] %v14597_v16  ;;  %v14601_v3 = vmul.f32 %v14376_v10, %v14362_v52  ;;  %v16403_v16 = vld [vmem:[#allocation113_spill] sm:$0xff] }
 0x8c4   :  { %v14593_v25 = vmul.f32 %v14376_v10, %v16399_v2  ;;  %v14605_v39 = vmul.f32 %v14376_v10, %v14028_v49  ;;  %v14613_v2 = vmul.f32 %v14376_v10, %v14034_v28  ;;  %v14621_v52 = vmul.f32 %v14376_v10, %v16403_v16 }
 0x8c5   :  { %16398 = vst [vmem:[#allocation64_spill] sm:$0xff] %v14584_v23  ;;  %16401 = vst [vmem:[#allocation68_spill] sm:$0xff] %v14601_v3  ;;  %v14609_v23 = vmul.f32 %v14376_v10, %v14031_v15  ;;  %v16404_v3 = vld [vmem:[#allocation129_spill] sm:$0xff]  ;;  %v14633_v28 = vmul.f32 %v14376_v10, %v14049_v57  ;;  %v14641_v16 = vmul.f32 %v14589_v33, %v14380_v11 }
 0x8c6   :  { %16402 = vst [vmem:[#allocation50_spill] sm:$0xff] %v14605_v39  ;;  %v14625_v49 = vmul.f32 %v14376_v10, %v16404_v3  ;;  %v16405_v39 = vld [vmem:[#allocation115_spill] sm:$0xff]  ;;  %v14645_v3 = vmul.f32 %v14589_v33, %v14384_v44  ;;  %v14653_v57 = vmul.f32 %v14589_v33, %v14392_v53  ;;  %v14665_v11 = vmul.f32 %v14589_v33, %v14404_v13 }
 0x8c7   :  { %v14629_v15 = vmul.f32 %v14376_v10, %v16405_v39  ;;  %v14649_v39 = vmul.f32 %v14589_v33, %v14388_v6  ;;  %v14661_v10 = vmul.f32 %v14589_v33, %v14400_v31  ;;  %v14669_v44 = vmul.f32 %v14589_v33, %v14408_v20 }
 0x8c8   :  { %v14673_v6 = vmul.f32 %v14589_v33, %v14412_v48  ;;  %v14677_v53 = vmul.f32 %v14589_v33, %v14416_v1  ;;  %v14685_v31 = vmul.f32 %v14589_v33, %v14424_v5  ;;  %v14689_v13 = vmul.f32 %v14589_v33, %v14428_v36 }
 0x8c9   :  { %v14693_v20 = vmul.f32 %v14589_v33, %v14432_v63  ;;  %v14697_v48 = vmul.f32 %v14589_v33, %v14436_v38  ;;  %v14701_v1 = vmul.f32 %v14589_v33, %v14440_v7  ;;  %v14705_v41 = vmul.f32 %v14589_v33, %v14444_v30 }
 0x8ca   :  { %v14709_v5 = vmul.f32 %v14589_v33, %v14448_v46  ;;  %v14713_v36 = vmul.f32 %v14589_v33, %v14452_v22  ;;  %v14717_v63 = vmul.f32 %v14589_v33, %v14456_v9  ;;  %v14721_v38 = vmul.f32 %v14589_v33, %v14460_v29 }
 0x8cb   :  { %v14725_v7 = vmul.f32 %v14589_v33, %v14464_v32  ;;  %v14729_v30 = vmul.f32 %v14589_v33, %v14468_v58  ;;  %v14733_v46 = vmul.f32 %v14589_v33, %v14472_v26  ;;  %v14737_v22 = vmul.f32 %v14589_v33, %v14476_v50 }
 0x8cc   :  { %v14741_v9 = vmul.f32 %v14589_v33, %v14480_v4  ;;  %v14745_v29 = vmul.f32 %v14589_v33, %v14484_v60  ;;  %v14749_v32 = vmul.f32 %v14589_v33, %v14488_v56  ;;  %v14753_v58 = vmul.f32 %v14589_v33, %v14492_v43 }
 0x8cd   :  { %v14757_v26 = vmul.f32 %v14589_v33, %v14496_v34  ;;  %v14761_v50 = vmul.f32 %v14589_v33, %v14500_v35  ;;  %v14765_v4 = vmul.f32 %v14589_v33, %v14504_v8  ;;  %v14769_v60 = vmul.f32 %v14589_v33, %v14508_v18 }
 0x8ce   :  { %v14773_v56 = vmul.f32 %v14589_v33, %v14512_v14  ;;  %v14777_v43 = vmul.f32 %v14589_v33, %v14516_v55  ;;  %v14781_v34 = vmul.f32 %v14589_v33, %v14520_v59  ;;  %v14785_v35 = vmul.f32 %v14589_v33, %v14524_v24 }
 0x8cf   :  { %v14789_v8 = vmul.f32 %v14589_v33, %v14528_v40  ;;  %v14793_v18 = vmul.f32 %v14589_v33, %v14532_v54  ;;  %v14797_v14 = vmul.f32 %v14589_v33, %v14536_v62  ;;  %v14801_v55 = vmul.f32 %v14589_v33, %v14540_v27  ;;  %v16408_v54 = vld [vmem:[#allocation56_spill] sm:$0xff] }
 0x8d0   :  { %v14805_v59 = vmul.f32 %v14589_v33, %v14544_v61  ;;  %v14809_v24 = vmul.f32 %v14589_v33, %v14548_v21  ;;  %v14813_v40 = vmul.f32 %v14589_v33, %v14552_v17  ;;  %v14817_v62 = vmul.f32 %v14589_v33, %v16408_v54 }
 0x8d1   :  { %16406 = vst [vmem:[#allocation38_spill] sm:$0xff] %v14797_v14  ;;  %v16409_v14 = vld [vmem:[#allocation57_spill] sm:$0xff]  ;;  %v14825_v61 = vmul.f32 %v14589_v33, %v14564_v51  ;;  %v14833_v17 = vmul.f32 %v14589_v33, %v14572_v12  ;;  %v14837_v54 = vmul.f32 %v14589_v33, %v14576_v42  ;;  %v14854_v12 = vmul.f32 %v14589_v33, %v14593_v25 }
 0x8d2   :  { %16407 = vst [vmem:[#allocation55_spill] sm:$0xff] %v14805_v59  ;;  %v14821_v27 = vmul.f32 %v14589_v33, %v16409_v14  ;;  %v16411_v59 = vld [vmem:[#allocation62_spill] sm:$0xff]  ;;  %v14841_v14 = vmul.f32 %v14589_v33, %v14580_v0  ;;  %v14874_v25 = vmul.f32 %v14589_v33, %v14613_v2  ;;  %v14894_v2 = vmul.f32 %v14589_v33, %v14633_v28 }
 0x8d3   :  { %v14829_v21 = vmul.f32 %v14589_v33, %v16411_v59  ;;  %16412 = vst [vmem:[#allocation61_spill] sm:$0xff] %v14833_v17  ;;  %16413 = vst [vmem:[#allocation13_spill] sm:$0xff] %v14837_v54  ;;  %v14850_v59 = vld [vmem:[%s15225_s6 + $0x8] ss:$0 sm:$0xff]  ;;  %v16417_v17 = vld [vmem:[#allocation67_spill] sm:$0xff] }
 0x8d4   :  { %16410 = vst [vmem:[#allocation39_spill] sm:$0xff] %v14821_v27  ;;  %16414 = vst [vmem:[#allocation14_spill] sm:$0xff] %v14841_v14  ;;  %v16415_v27 = vld [vmem:[#allocation64_spill] sm:$0xff]  ;;  %v14858_v42 = vmul.f32 %v14589_v33, %v16417_v17  ;;  %v16419_v14 = vld [vmem:[#allocation50_spill] sm:$0xff]  ;;  %v14878_v17 = vmul.f32 %v14589_v33, %v14617_v37  ;;  %v14898_v37 = vmul.f32 %v14589_v33, %v14637_v19 }
 0x8d5   :  { %v14845_v51 = vmul.f32 %v14589_v33, %v16415_v27  ;;  %v16418_v54 = vld [vmem:[#allocation68_spill] sm:$0xff]  ;;  %v14866_v27 = vmul.f32 %v14589_v33, %v16419_v14  ;;  %v14886_v14 = vmul.f32 %v14589_v33, %v14625_v49  ;;  %16421 = vst [vmem:[#allocation16_spill] sm:$0xff] %v14894_v2  ;;  %v7587_v49 = vadd.f32 %v14850_v59, %v14649_v39 }
 0x8d6   :  { %v14862_v0 = vmul.f32 %v14589_v33, %v16418_v54  ;;  %v14882_v54 = vmul.f32 %v14589_v33, %v14621_v52  ;;  %v7585_v52 = vadd.f32 %v14850_v59, %v14641_v16  ;;  %v7589_v28 = vadd.f32 %v14850_v59, %v14657_v45 }
 0x8d7   :  { %16416 = vst [vmem:[#allocation70_spill] sm:$0xff] %v14845_v51  ;;  %v14870_v51 = vmul.f32 %v14589_v33, %v14609_v23  ;;  %v14890_v23 = vmul.f32 %v14589_v33, %v14629_v15  ;;  %v7588_v15 = vadd.f32 %v14850_v59, %v14653_v57  ;;  %v7590_v2 = vadd.f32 %v14850_v59, %v14661_v10 }
 0x8d8   :  { %16420 = vst [vmem:[#allocation85_spill] sm:$0xff] %v14882_v54  ;;  %v7586_v54 = vadd.f32 %v14850_v59, %v14645_v3  ;;  %v7591_v33 = vadd.f32 %v14850_v59, %v14665_v11  ;;  %v7592_v19 = vadd.f32 %v14850_v59, %v14669_v44  ;;  %v7593_v16 = vadd.f32 %v14850_v59, %v14673_v6 }
 0x8d9   :  { %v7594_v3 = vadd.f32 %v14850_v59, %v14677_v53  ;;  %v7595_v39 = vadd.f32 %v14850_v59, %v14681_v47  ;;  %v7596_v57 = vadd.f32 %v14850_v59, %v14685_v31  ;;  %7649 = vst [vmem:[%s15230_s10] sm:$0xff] %v7585_v52  ;;  %7651 = vst [vmem:[%s15230_s10 + $0x10] sm:$0xff] %v7587_v49 }
 0x8da   :  { %7650 = vst [vmem:[%s15230_s10 + $0x8] sm:$0xff] %v7586_v54  ;;  %7652 = vst [vmem:[%s15230_s10 + $0x18] sm:$0xff] %v7588_v15  ;;  %v7597_v45 = vadd.f32 %v14850_v59, %v14689_v13  ;;  %v7598_v10 = vadd.f32 %v14850_v59, %v14693_v20  ;;  %v7599_v11 = vadd.f32 %v14850_v59, %v14697_v48 }
 0x8db   :  { %v7600_v44 = vadd.f32 %v14850_v59, %v14701_v1  ;;  %7653 = vst [vmem:[%s15230_s10 + $0x20] sm:$0xff] %v7589_v28  ;;  %7654 = vst [vmem:[%s15230_s10 + $0x28] sm:$0xff] %v7590_v2  ;;  %v7601_v6 = vadd.f32 %v14850_v59, %v14705_v41  ;;  %v7602_v53 = vadd.f32 %v14850_v59, %v14709_v5  ;;  %v16427_v52 = vld [vmem:[#allocation14_spill] sm:$0xff] }
 0x8dc   :  { %7655 = vst [vmem:[%s15230_s10 + $0x30] sm:$0xff] %v7591_v33  ;;  %7656 = vst [vmem:[%s15230_s10 + $0x38] sm:$0xff] %v7592_v19  ;;  %v7603_v47 = vadd.f32 %v14850_v59, %v14713_v36  ;;  %v7604_v31 = vadd.f32 %v14850_v59, %v14717_v63  ;;  %v7605_v13 = vadd.f32 %v14850_v59, %v14721_v38 }
 0x8dd   :  { %7657 = vst [vmem:[%s15230_s10 + $0x40] sm:$0xff] %v7593_v16  ;;  %7658 = vst [vmem:[%s15230_s10 + $0x48] sm:$0xff] %v7594_v3  ;;  %v7606_v20 = vadd.f32 %v14850_v59, %v14725_v7  ;;  %v7607_v48 = vadd.f32 %v14850_v59, %v14729_v30  ;;  %v7608_v1 = vadd.f32 %v14850_v59, %v14733_v46 }
 0x8de   :  { %7659 = vst [vmem:[%s15230_s10 + $0x50] sm:$0xff] %v7595_v39  ;;  %7660 = vst [vmem:[%s15230_s10 + $0x58] sm:$0xff] %v7596_v57  ;;  %v7609_v41 = vadd.f32 %v14850_v59, %v14737_v22  ;;  %v7610_v5 = vadd.f32 %v14850_v59, %v14741_v9  ;;  %v7611_v36 = vadd.f32 %v14850_v59, %v14745_v29  ;;  %v16428_v15 = vld [vmem:[#allocation70_spill] sm:$0xff] }
 0x8df   :  { %7661 = vst [vmem:[%s15230_s10 + $0x60] sm:$0xff] %v7597_v45  ;;  %7662 = vst [vmem:[%s15230_s10 + $0x68] sm:$0xff] %v7598_v10  ;;  %v7612_v63 = vadd.f32 %v14850_v59, %v14749_v32  ;;  %v7613_v38 = vadd.f32 %v14850_v59, %v14753_v58  ;;  %v7614_v7 = vadd.f32 %v14850_v59, %v14757_v26 }
 0x8e0   :  { %7663 = vst [vmem:[%s15230_s10 + $0x70] sm:$0xff] %v7599_v11  ;;  %7664 = vst [vmem:[%s15230_s10 + $0x78] sm:$0xff] %v7600_v44  ;;  %v7615_v30 = vadd.f32 %v14850_v59, %v14761_v50  ;;  %v7616_v46 = vadd.f32 %v14850_v59, %v14765_v4  ;;  %v7617_v22 = vadd.f32 %v14850_v59, %v14769_v60  ;;  %v16422_v4 = vld [vmem:[#allocation38_spill] sm:$0xff] }
 0x8e1   :  { %7665 = vst [vmem:[%s15230_s10 + $0x80] sm:$0xff] %v7601_v6  ;;  %7666 = vst [vmem:[%s15230_s10 + $0x88] sm:$0xff] %v7602_v53  ;;  %v7618_v9 = vadd.f32 %v14850_v59, %v14773_v56  ;;  %v7619_v29 = vadd.f32 %v14850_v59, %v14777_v43  ;;  %v7620_v32 = vadd.f32 %v14850_v59, %v14781_v34  ;;  %v16423_v43 = vld [vmem:[#allocation55_spill] sm:$0xff] }
 0x8e2   :  { %7667 = vst [vmem:[%s15230_s10 + $0x90] sm:$0xff] %v7603_v47  ;;  %7668 = vst [vmem:[%s15230_s10 + $0x98] sm:$0xff] %v7604_v31  ;;  %v7621_v58 = vadd.f32 %v14850_v59, %v14785_v35  ;;  %v7622_v26 = vadd.f32 %v14850_v59, %v14789_v8  ;;  %v7623_v50 = vadd.f32 %v14850_v59, %v14793_v18 }
 0x8e3   :  { %7669 = vst [vmem:[%s15230_s10 + $0xa0] sm:$0xff] %v7605_v13  ;;  %7670 = vst [vmem:[%s15230_s10 + $0xa8] sm:$0xff] %v7606_v20  ;;  %v7624_v60 = vadd.f32 %v14850_v59, %v16422_v4  ;;  %v7625_v56 = vadd.f32 %v14850_v59, %v14801_v55  ;;  %v7626_v34 = vadd.f32 %v14850_v59, %v16423_v43  ;;  %v16424_v55 = vld [vmem:[#allocation39_spill] sm:$0xff] }
 0x8e4   :  { %7671 = vst [vmem:[%s15230_s10 + $0xb0] sm:$0xff] %v7607_v48  ;;  %7672 = vst [vmem:[%s15230_s10 + $0xb8] sm:$0xff] %v7608_v1  ;;  %v7627_v35 = vadd.f32 %v14850_v59, %v14809_v24  ;;  %v7628_v8 = vadd.f32 %v14850_v59, %v14813_v40  ;;  %v7629_v18 = vadd.f32 %v14850_v59, %v14817_v62  ;;  %v16425_v62 = vld [vmem:[#allocation61_spill] sm:$0xff] }
 0x8e5   :  { %7673 = vst [vmem:[%s15230_s10 + $0xc0] sm:$0xff] %v7609_v41  ;;  %7674 = vst [vmem:[%s15230_s10 + $0xc8] sm:$0xff] %v7610_v5  ;;  %v7630_v24 = vadd.f32 %v14850_v59, %v16424_v55  ;;  %v7631_v40 = vadd.f32 %v14850_v59, %v14825_v61  ;;  %v7632_v54 = vadd.f32 %v14850_v59, %v14829_v21  ;;  %v16426_v21 = vld [vmem:[#allocation13_spill] sm:$0xff] }
 0x8e6   :  { %7675 = vst [vmem:[%s15230_s10 + $0xd0] sm:$0xff] %v7611_v36  ;;  %7676 = vst [vmem:[%s15230_s10 + $0xd8] sm:$0xff] %v7612_v63  ;;  %v7633_v61 = vadd.f32 %v14850_v59, %v16425_v62  ;;  %v7634_v2 = vadd.f32 %v14850_v59, %v16426_v21  ;;  %v7635_v49 = vadd.f32 %v14850_v59, %v16427_v52 }
 0x8e7   :  { %7677 = vst [vmem:[%s15230_s10 + $0xe0] sm:$0xff] %v7613_v38  ;;  %7678 = vst [vmem:[%s15230_s10 + $0xe8] sm:$0xff] %v7614_v7  ;;  %v7636_v28 = vadd.f32 %v14850_v59, %v16428_v15  ;;  %v7637_v33 = vadd.f32 %v14850_v59, %v14854_v12  ;;  %v7638_v19 = vadd.f32 %v14850_v59, %v14858_v42 }
 0x8e8   :  { %7679 = vst [vmem:[%s15230_s10 + $0xf0] sm:$0xff] %v7615_v30  ;;  %7680 = vst [vmem:[%s15230_s10 + $0xf8] sm:$0xff] %v7616_v46  ;;  %v7639_v16 = vadd.f32 %v14850_v59, %v14862_v0  ;;  %v7640_v3 = vadd.f32 %v14850_v59, %v14866_v27  ;;  %v7641_v12 = vadd.f32 %v14850_v59, %v14870_v51  ;;  %v16429_v27 = vld [vmem:[#allocation85_spill] sm:$0xff] }
 0x8e9   :  { %7681 = vst [vmem:[%s15230_s10 + $0x100] sm:$0xff] %v7617_v22  ;;  %7682 = vst [vmem:[%s15230_s10 + $0x108] sm:$0xff] %v7618_v9  ;;  %v7642_v42 = vadd.f32 %v14850_v59, %v14874_v25  ;;  %v7643_v0 = vadd.f32 %v14850_v59, %v14878_v17  ;;  %v7644_v39 = vadd.f32 %v14850_v59, %v16429_v27  ;;  %v16430_v17 = vld [vmem:[#allocation16_spill] sm:$0xff] }
 0x8ea   :  { %7683 = vst [vmem:[%s15230_s10 + $0x110] sm:$0xff] %v7619_v29  ;;  %7684 = vst [vmem:[%s15230_s10 + $0x118] sm:$0xff] %v7620_v32  ;;  %v7645_v51 = vadd.f32 %v14850_v59, %v14886_v14  ;;  %v7646_v25 = vadd.f32 %v14850_v59, %v14890_v23  ;;  %v7647_v57 = vadd.f32 %v14850_v59, %v16430_v17 }
 0x8eb   :  { %7685 = vst [vmem:[%s15230_s10 + $0x120] sm:$0xff] %v7621_v58  ;;  %7686 = vst [vmem:[%s15230_s10 + $0x128] sm:$0xff] %v7622_v26  ;;  %v7648_v45 = vadd.f32 %v14850_v59, %v14898_v37 }
 0x8ec   :  { %7687 = vst [vmem:[%s15230_s10 + $0x130] sm:$0xff] %v7623_v50  ;;  %7688 = vst [vmem:[%s15230_s10 + $0x138] sm:$0xff] %v7624_v60 }
 0x8ed   :  { %7689 = vst [vmem:[%s15230_s10 + $0x140] sm:$0xff] %v7625_v56  ;;  %7690 = vst [vmem:[%s15230_s10 + $0x148] sm:$0xff] %v7626_v34 }
 0x8ee   :  { %7691 = vst [vmem:[%s15230_s10 + $0x150] sm:$0xff] %v7627_v35  ;;  %7692 = vst [vmem:[%s15230_s10 + $0x158] sm:$0xff] %v7628_v8 }
 0x8ef   :  { %7693 = vst [vmem:[%s15230_s10 + $0x160] sm:$0xff] %v7629_v18  ;;  %7694 = vst [vmem:[%s15230_s10 + $0x168] sm:$0xff] %v7630_v24 }
 0x8f0   :  { %7695 = vst [vmem:[%s15230_s10 + $0x170] sm:$0xff] %v7631_v40  ;;  %7696 = vst [vmem:[%s15230_s10 + $0x178] sm:$0xff] %v7632_v54 }
 0x8f1   :  { %7697 = vst [vmem:[%s15230_s10 + $0x180] sm:$0xff] %v7633_v61  ;;  %7698 = vst [vmem:[%s15230_s10 + $0x188] sm:$0xff] %v7634_v2 }
 0x8f2   :  { %7699 = vst [vmem:[%s15230_s10 + $0x190] sm:$0xff] %v7635_v49  ;;  %7700 = vst [vmem:[%s15230_s10 + $0x198] sm:$0xff] %v7636_v28 }
 0x8f3   :  { %7701 = vst [vmem:[%s15230_s10 + $0x1a0] sm:$0xff] %v7637_v33  ;;  %7702 = vst [vmem:[%s15230_s10 + $0x1a8] sm:$0xff] %v7638_v19 }
 0x8f4   :  { %7703 = vst [vmem:[%s15230_s10 + $0x1b0] sm:$0xff] %v7639_v16  ;;  %7704 = vst [vmem:[%s15230_s10 + $0x1b8] sm:$0xff] %v7640_v3 }
 0x8f5   :  { %7705 = vst [vmem:[%s15230_s10 + $0x1c0] sm:$0xff] %v7641_v12  ;;  %7706 = vst [vmem:[%s15230_s10 + $0x1c8] sm:$0xff] %v7642_v42 }
 0x8f6   :  { %7707 = vst [vmem:[%s15230_s10 + $0x1d0] sm:$0xff] %v7643_v0  ;;  %7708 = vst [vmem:[%s15230_s10 + $0x1d8] sm:$0xff] %v7644_v39 }
 0x8f7   :  { %7709 = vst [vmem:[%s15230_s10 + $0x1e0] sm:$0xff] %v7645_v51  ;;  %7710 = vst [vmem:[%s15230_s10 + $0x1e8] sm:$0xff] %v7646_v25 }
 0x8f8   :  { %7711 = vst [vmem:[%s15230_s10 + $0x1f0] sm:$0xff] %v7647_v57  ;;  %7712 = vst [vmem:[%s15230_s10 + $0x1f8] sm:$0xff] %v7648_v45 }

</bundles_post_ra>
